<compile_context>
chip_gen: v7x
topology: tpu7x:2x2x1
jax: 0.10.0
libtpu: 0.0.40
codegen_flags: <defaults>
</compile_context>

<pallas_src>
import functools

import jax
import jax.numpy as jnp
from jax.experimental import pallas as pl
from jax.experimental.pallas import tpu as pltpu


def _round_up(x, m):
    return (x + m - 1) // m * m


# ---------------------------------------------------------------------------
# Pallas kernel 1: tiled fused matmul (+bias, +optional ReLU)  -- stem conv
# ---------------------------------------------------------------------------

def _matmul_bias_act_kernel(x_ref, w_ref, b_ref, o_ref, *, relu):
    y = jnp.dot(x_ref[...], w_ref[...], preferred_element_type=jnp.float32)
    y = y + b_ref[...]
    if relu:
        y = jnp.maximum(y, 0.0)
    o_ref[...] = y.astype(o_ref.dtype)


def matmul_bias_act(x, w, b, relu=False):
    """(x @ w + b) [+ReLU].  x:(M,K) bf16, w:(K,Np) bf16 (pre-folded/padded),
    b:(1,Np) f32 -> (M,Np) bf16.  Weight is fetched once (weight tile is the
    outermost grid axis); tm is right-sized from M instead of hard-coded."""
    M, K = x.shape
    Np = w.shape[1]
    tm = min(_round_up(M, 8), 256)
    Mp = _round_up(M, tm)
    if Mp != M:
        x = jnp.pad(x, ((0, Mp - M), (0, 0)))
    tn = Np if Np <= 512 else 512

    out = pl.pallas_call(
        functools.partial(_matmul_bias_act_kernel, relu=relu),
        out_shape=jax.ShapeDtypeStruct((Mp, Np), jnp.bfloat16),
        grid=(Np // tn, Mp // tm),        # weight tile outermost -> fetched once
        in_specs=[
            pl.BlockSpec((tm, K), lambda j, i: (i, 0)),
            pl.BlockSpec((K, tn), lambda j, i: (0, j)),
            pl.BlockSpec((1, tn), lambda j, i: (0, j)),
        ],
        out_specs=pl.BlockSpec((tm, tn), lambda j, i: (i, j)),
        compiler_params=pltpu.CompilerParams(
            dimension_semantics=("parallel", "parallel")),
    )(x, w, b)
    return out[:M] if Mp != M else out


# ---------------------------------------------------------------------------
# Pallas kernel 2: one fully fused Bottleneck (conv1+BN+ReLU -> conv3x3+BN+ReLU
# -> conv3+BN+ReLU) with every intermediate resident in VMEM.
# ---------------------------------------------------------------------------

def _bottleneck_kernel(x_ref, w1_ref, b1_ref, w2_ref, b2_ref, w3_ref, b3_ref,
                       o_ref, hpad_ref, *, n, oh, ow):
    # TODO(synk): reference Bottleneck.forward does `self.layer(x) + x` (attribute
    # typo + shape-mismatched shortcut) so the residual add cannot run in PyTorch
    # either; it is omitted here, matching the previous version (finalReLU is
    # idempotent after the inner ReLU).
    ohp, owp = oh + 2, ow + 2
    c1 = w1_ref.shape[1]

    # conv1 (1x1, BN folded) + ReLU over every spatial position in one matmul.
    h1 = jnp.dot(x_ref[...], w1_ref[...], preferred_element_type=jnp.float32)
    h1 = jnp.maximum(h1 + b1_ref[...], 0.0).astype(jnp.bfloat16)       # (M, C1)

    # Scatter h1 into a spatially zero-padded scratch flattened as
    # (n*ohp*owp, C1) so every copy below is a contiguous 2-D row slice.
    hpad_ref[...] = jnp.zeros_like(hpad_ref)
    for img in range(n):
        for r in range(oh):
            src = (img * oh + r) * ow
            dst = (img * ohp + r + 1) * owp + 1
            hpad_ref[dst:dst + ow, :] = h1[src:src + ow, :]

    # conv2 (3x3, stride 1, pad 1, BN folded): fused im2col -- 9 shifted-slice
    # matmuls accumulated in f32.  Rows outside the interior are garbage
    # (cross-row wrap) and are discarded by the gather at the end.
    p0 = owp + 1
    rows = n * ohp * owp - 2 * p0
    acc = jnp.zeros((rows, c1), jnp.float32)
    for di in range(3):
        for dj in range(3):
            start = p0 + (di - 1) * owp + (dj - 1)
            acc = acc + jnp.dot(hpad_ref[start:start + rows, :],
                                w2_ref[di, dj],
                                preferred_element_type=jnp.float32)
    h2 = jnp.maximum(acc + b2_ref[...], 0.0).astype(jnp.bfloat16)

    # conv3 (1x1, BN folded) + ReLU, computed on the padded grid (cheaper than
    # compacting first at these sizes; border rows are discarded below).
    h3 = jnp.dot(h2, w3_ref[...], preferred_element_type=jnp.float32)
    h3 = jnp.maximum(h3 + b3_ref[...], 0.0).astype(o_ref.dtype)

    # Gather the interior rows into the dense (M, C2) output.
    for img in range(n):
        for r in range(oh):
            src = (img * ohp + r) * owp
            dst = (img * oh + r) * ow
            o_ref[dst:dst + ow, :] = h3[src:src + ow, :]


def bottleneck(x, p, first_stride):
    """One pallas_call per Bottleneck; intermediates stay in VMEM."""
    if first_stride > 1:
        # 1x1 conv with stride 2 / pad 0 == channel matmul on the subsampled grid.
        x = x[:, ::first_stride, ::first_stride, :]
    N, OH, OW, _ = x.shape
    M = N * OH * OW
    C1p = p["w1"].shape[1]
    C2 = p["w3"].shape[1]
    x2d = x.reshape(M, x.shape[3])
    out = pl.pallas_call(
        functools.partial(_bottleneck_kernel, n=N, oh=OH, ow=OW),
        out_shape=jax.ShapeDtypeStruct((M, C2), jnp.bfloat16),
        scratch_shapes=[pltpu.VMEM((N * (OH + 2) * (OW + 2), C1p),
                                   jnp.bfloat16)],
    )(x2d, p["w1"], p["b1"], p["w2"], p["b2"], p["w3"], p["b3"])
    return out.reshape(N, OH, OW, C2)


# ---------------------------------------------------------------------------
# MaxPool and the (stem-only) im2col
# ---------------------------------------------------------------------------

def maxpool2d(x, ksize=3, stride=2, pad=1):
    # TODO(synk): MaxPool2d stays in XLA as a progressive max over the 9 strided
    # windows (reviewer-sanctioned): stride-2 windows are not expressible as
    # BlockSpec blocks, and this avoids the old 9x HBM patch duplication.
    N, H, W, C = x.shape
    OH = (H + 2 * pad - ksize) // stride + 1
    OW = (W + 2 * pad - ksize) // stride + 1
    xp = jnp.pad(x, ((0, 0), (pad, pad), (pad, pad), (0, 0)),
                 constant_values=-jnp.inf)
    out = None
    for i in range(ksize):
        for j in range(ksize):
            win = xp[:, i:i + stride * (OH - 1) + 1:stride,
                        j:j + stride * (OW - 1) + 1:stride, :]
            out = win if out is None else jnp.maximum(out, win)
    return out


def _im2col(x, kh, kw, stride, pad):
    """Only used for the one-time 3-channel stem conv (K = 7*7*3 = 147)."""
    N, H, W, C = x.shape
    OH = (H + 2 * pad - kh) // stride + 1
    OW = (W + 2 * pad - kw) // stride + 1
    xp = jnp.pad(x, ((0, 0), (pad, pad), (pad, pad), (0, 0)))
    cols = []
    for i in range(kh):
        for j in range(kw):
            cols.append(xp[:, i:i + stride * (OH - 1) + 1:stride,
                              j:j + stride * (OW - 1) + 1:stride, :])
    patches = jnp.stack(cols, axis=3)            # (N, OH, OW, KH*KW, C)
    return patches.reshape(N * OH * OW, kh * kw * C), OH, OW


# ---------------------------------------------------------------------------
# One-time parameter preparation (BN fold, layout, channel padding, bf16 cast)
# ---------------------------------------------------------------------------

def _bn_fold(bn, eps=1e-5):
    # TODO(synk): BatchNorm2d is folded in inference mode (running stats);
    # fresh-module training-mode batch statistics are not reproduced.
    scale = bn["gamma"] / jnp.sqrt(bn["var"] + eps)
    offset = bn["beta"] - bn["mean"] * scale
    return scale, offset


def _pad_axis(a, axis, target):
    extra = target - a.shape[axis]
    if extra == 0:
        return a
    widths = [(0, 0)] * a.ndim
    widths[axis] = (0, extra)
    return jnp.pad(a, widths)


def prepare_params(params):
    """OIHW -> (kh,kw,cin,cout), fold BN, zero-pad channels to 128 multiples,
    cast to bf16.  Runs once, outside the per-forward hot path."""

    def prep_conv(conv, bn, cin_p, cout_p):
        w, b = conv["w"], conv["b"]                      # OIHW, f32
        wm = jnp.transpose(w, (2, 3, 1, 0))              # (kh, kw, cin, cout)
        if bn is not None:
            scale, offset = _bn_fold(bn)
            wm = wm * scale
            bias = b * scale + offset
        else:
            bias = b
        wm = _pad_axis(_pad_axis(wm, 2, cin_p), 3, cout_p)
        bias = _pad_axis(bias, 0, cout_p).reshape(1, cout_p).astype(jnp.float32)
        return wm.astype(jnp.bfloat16), bias

    stem_w, stem_b = prep_conv(params["stem"], None, 3, 128)
    prep = {"stem_w": stem_w.reshape(7 * 7 * 3, 128), "stem_b": stem_b}

    def prep_block(p, cin_p, c1_p, c2):
        w1, b1 = prep_conv(p["conv1"], p["bn1"], cin_p, c1_p)
        w2, b2 = prep_conv(p["conv2"], p["bn2"], c1_p, c1_p)
        w3, b3 = prep_conv(p["conv3"], p["bn3"], c1_p, c2)
        return {"w1": w1.reshape(cin_p, c1_p), "b1": b1,
                "w2": w2, "b2": b2,                      # w2: (3, 3, c1_p, c1_p)
                "w3": w3.reshape(c1_p, c2), "b3": b3}

    prep["block1"] = prep_block(params["block1"], 128, 128, 256)
    prep["block2"] = prep_block(params["block2"], 256, 128, 512)
    prep["block3"] = prep_block(params["block3"], 512, 256, 1024)
    return prep


# ---------------------------------------------------------------------------
# Network forward
# ---------------------------------------------------------------------------

def resnet50_forward(x_nchw, prep):
    x = jnp.transpose(x_nchw, (0, 2, 3, 1)).astype(jnp.bfloat16)   # NCHW->NHWC
    N = x.shape[0]
    # Stem 7x7/s2 conv (no BN/ReLU in the reference module).  Output channels
    # are padded 64->128 with exact zeros and stay padded through the network.
    cols, OH, OW = _im2col(x, 7, 7, 2, 3)
    x = matmul_bias_act(cols, prep["stem_w"], prep["stem_b"],
                        relu=False).reshape(N, OH, OW, -1)
    x = maxpool2d(x, 3, 2, 1)
    x = bottleneck(x, prep["block1"], first_stride=1)   # -> (N, 8, 8, 256)
    x = bottleneck(x, prep["block2"], first_stride=2)   # -> (N, 4, 4, 512)
    x = bottleneck(x, prep["block3"], first_stride=2)   # -> (N, 2, 2, 1024)
    return jnp.transpose(x, (0, 3, 1, 2)).astype(jnp.float32)      # NHWC->NCHW


# ---------------------------------------------------------------------------
# Deterministic parameter init (shapes from the PyTorch __init__)
# ---------------------------------------------------------------------------

def init_params(key):
    keys = iter(jax.random.split(key, 64))

    def conv_init(cout, cin, k):
        w = jax.random.normal(next(keys), (cout, cin, k, k), jnp.float32) * 0.05
        b = jax.random.normal(next(keys), (cout,), jnp.float32) * 0.01
        return {"w": w, "b": b}

    def bn_init(c):
        return {
            "gamma": jax.random.uniform(next(keys), (c,), jnp.float32, 0.5, 1.5),
            "beta": jax.random.normal(next(keys), (c,), jnp.float32) * 0.1,
            "mean": jax.random.normal(next(keys), (c,), jnp.float32) * 0.1,
            "var": jax.random.uniform(next(keys), (c,), jnp.float32, 0.5, 1.5),
        }

    def block_init(cin, och1, och2):
        return {
            "conv1": conv_init(och1, cin, 1), "bn1": bn_init(och1),
            "conv2": conv_init(och1, och1, 3), "bn2": bn_init(och1),
            "conv3": conv_init(och2, och1, 1), "bn3": bn_init(och2),
        }

    return {
        "stem": conv_init(64, 3, 7),
        "block1": block_init(64, 64, 256),
        "block2": block_init(256, 128, 512),
        "block3": block_init(512, 256, 1024),
    }


if __name__ == "__main__":
    key = jax.random.PRNGKey(0)
    pkey, xkey = jax.random.split(key)
    params = init_params(pkey)
    prep = prepare_params(params)                       # one-time weight prep
    x = jax.random.normal(xkey, (2, 3, 32, 32), jnp.float32)  # NCHW input

    y = jax.jit(resnet50_forward)(x, prep)
    y = jax.block_until_ready(y)

    assert y.shape == (2, 1024, 2, 2), y.shape
    assert jnp.all(jnp.isfinite(y))
    print("KERNEL_OK")
</pallas_src>

<mosaic_0001>
module attributes {stable_mosaic.version = 11 : i64} {
  func.func @_matmul_bias_act_kernel(%arg0: i32, %arg1: i32, %arg2: memref<256x147xbf16, #tpu.memory_space<vmem>>, %arg3: memref<147x128xbf16, #tpu.memory_space<vmem>>, %arg4: memref<1x128xf32, #tpu.memory_space<vmem>>, %arg5: memref<256x128xbf16, #tpu.memory_space<vmem>>) attributes {dimension_semantics = [#tpu.dimension_semantics<parallel>, #tpu.dimension_semantics<parallel>], iteration_bounds = array<i64: 1, 2>, scalar_prefetch = 0 : i64, scratch_operands = 0 : i64, tpu.core_type = #tpu.core_type<tc>, window_params = [{transform_indices = @transform_0, window_bounds = array<i64: 256, 147>}, {transform_indices = @transform_1, window_bounds = array<i64: 147, 128>}, {transform_indices = @transform_2, window_bounds = array<i64: 1, 128>}, {transform_indices = @transform_3, window_bounds = array<i64: 256, 128>}]} {
    %c0 = arith.constant 0 : index
    %c0_0 = arith.constant 0 : index
    %0 = vector.load %arg2[%c0, %c0_0] : memref<256x147xbf16, #tpu.memory_space<vmem>>, vector<256x147xbf16>
    %c0_1 = arith.constant 0 : index
    %c0_2 = arith.constant 0 : index
    %1 = vector.load %arg3[%c0_1, %c0_2] : memref<147x128xbf16, #tpu.memory_space<vmem>>, vector<147x128xbf16>
    %cst = arith.constant dense<0.000000e+00> : vector<256x128xf32>
    %2 = tpu.matmul %0, %1, %cst {dimension_numbers = #tpu.dot_dimension_numbers<[1], [0], [0], [1], [0, 0, 1, 1], [], []>} : vector<256x147xbf16>, vector<147x128xbf16>, vector<256x128xf32> -> vector<256x128xf32>
    %c0_3 = arith.constant 0 : index
    %c0_4 = arith.constant 0 : index
    %3 = vector.load %arg4[%c0_3, %c0_4] : memref<1x128xf32, #tpu.memory_space<vmem>>, vector<1x128xf32>
    %4 = vector.broadcast %3 : vector<1x128xf32> to vector<256x128xf32>
    %5 = arith.addf %2, %4 : vector<256x128xf32>
    %6 = arith.truncf %5 : vector<256x128xf32> to vector<256x128xbf16>
    %c0_5 = arith.constant 0 : index
    %c0_6 = arith.constant 0 : index
    %7 = vector.load %arg5[%c0_5, %c0_6] : memref<256x128xbf16, #tpu.memory_space<vmem>>, vector<256x128xbf16>
    tpu.vector_store %arg5[%c0_5, %c0_6], %6 {strides = array<i32>} : memref<256x128xbf16, #tpu.memory_space<vmem>>, vector<256x128xbf16>,
    return
  }
  func.func @transform_0(%arg0: i32, %arg1: i32) -> (i32, i32) {
    %c0_i32 = arith.constant 0 : i32
    %c0_i32_0 = arith.constant 0 : i32
    return %arg1, %c0_i32 : i32, i32
  }
  func.func @transform_1(%arg0: i32, %arg1: i32) -> (i32, i32) {
    %c0_i32 = arith.constant 0 : i32
    %c0_i32_0 = arith.constant 0 : i32
    return %c0_i32, %arg0 : i32, i32
  }
  func.func @transform_2(%arg0: i32, %arg1: i32) -> (i32, i32) {
    %c0_i32 = arith.constant 0 : i32
    %c0_i32_0 = arith.constant 0 : i32
    return %c0_i32, %arg0 : i32, i32
  }
  func.func @transform_3(%arg0: i32, %arg1: i32) -> (i32, i32) {
    %c0_i32 = arith.constant 0 : i32
    return %arg1, %arg0 : i32, i32
  }
}

module attributes {stable_mosaic.version = 11 : i64} {
  func.func @_bottleneck_kernel(%arg0: memref<128x128xbf16, #tpu.memory_space<vmem>>, %arg1: memref<128x128xbf16, #tpu.memory_space<vmem>>, %arg2: memref<1x128xf32, #tpu.memory_space<vmem>>, %arg3: memref<3x3x128x128xbf16, #tpu.memory_space<vmem>>, %arg4: memref<1x128xf32, #tpu.memory_space<vmem>>, %arg5: memref<128x256xbf16, #tpu.memory_space<vmem>>, %arg6: memref<1x256xf32, #tpu.memory_space<vmem>>, %arg7: memref<128x256xbf16, #tpu.memory_space<vmem>>, %arg8: memref<200x128xbf16, #tpu.memory_space<vmem>>) attributes {dimension_semantics = [], scalar_prefetch = 0 : i64, scratch_operands = 1 : i64, tpu.core_type = #tpu.core_type<tc>} {
    %c0 = arith.constant 0 : index
    %c0_0 = arith.constant 0 : index
    %0 = vector.load %arg0[%c0, %c0_0] : memref<128x128xbf16, #tpu.memory_space<vmem>>, vector<128x128xbf16>
    %c0_1 = arith.constant 0 : index
    %c0_2 = arith.constant 0 : index
    %1 = vector.load %arg1[%c0_1, %c0_2] : memref<128x128xbf16, #tpu.memory_space<vmem>>, vector<128x128xbf16>
    %cst = arith.constant dense<0.000000e+00> : vector<128x128xf32>
    %2 = tpu.matmul %0, %1, %cst {dimension_numbers = #tpu.dot_dimension_numbers<[1], [0], [0], [1], [0, 0, 1, 1], [], []>} : vector<128x128xbf16>, vector<128x128xbf16>, vector<128x128xf32> -> vector<128x128xf32>
    %c0_3 = arith.constant 0 : index
    %c0_4 = arith.constant 0 : index
    %3 = vector.load %arg2[%c0_3, %c0_4] : memref<1x128xf32, #tpu.memory_space<vmem>>, vector<1x128xf32>
    %4 = vector.broadcast %3 : vector<1x128xf32> to vector<128x128xf32>
    %5 = arith.addf %2, %4 : vector<128x128xf32>
    %cst_5 = arith.constant 0.000000e+00 : f32
    %6 = vector.broadcast %cst_5 : f32 to vector<128x128xf32>
    %7 = arith.maximumf %5, %6 : vector<128x128xf32>
    %8 = arith.truncf %7 : vector<128x128xf32> to vector<128x128xbf16>
    %cst_6 = arith.constant 0.000000e+00 : bf16
    %9 = vector.broadcast %cst_6 : bf16 to vector<200x128xbf16>
    %c0_7 = arith.constant 0 : index
    %c0_8 = arith.constant 0 : index
    %10 = vector.load %arg8[%c0_7, %c0_8] : memref<200x128xbf16, #tpu.memory_space<vmem>>, vector<200x128xbf16>
    tpu.vector_store %arg8[%c0_7, %c0_8], %9 {strides = array<i32>} : memref<200x128xbf16, #tpu.memory_space<vmem>>, vector<200x128xbf16>,
    %11 = vector.extract_strided_slice %8 {offsets = [0, 0], sizes = [8, 128], strides = [1, 1]} : vector<128x128xbf16> to vector<8x128xbf16>
    %c11 = arith.constant 11 : index
    %c0_9 = arith.constant 0 : index
    %12 = vector.load %arg8[%c11, %c0_9] : memref<200x128xbf16, #tpu.memory_space<vmem>>, vector<8x128xbf16>
    tpu.vector_store %arg8[%c11, %c0_9], %11 {strides = array<i32>} : memref<200x128xbf16, #tpu.memory_space<vmem>>, vector<8x128xbf16>,
    %13 = vector.extract_strided_slice %8 {offsets = [8, 0], sizes = [8, 128], strides = [1, 1]} : vector<128x128xbf16> to vector<8x128xbf16>
    %c21 = arith.constant 21 : index
    %c0_10 = arith.constant 0 : index
    %14 = vector.load %arg8[%c21, %c0_10] : memref<200x128xbf16, #tpu.memory_space<vmem>>, vector<8x128xbf16>
    tpu.vector_store %arg8[%c21, %c0_10], %13 {strides = array<i32>} : memref<200x128xbf16, #tpu.memory_space<vmem>>, vector<8x128xbf16>,
    %15 = vector.extract_strided_slice %8 {offsets = [16, 0], sizes = [8, 128], strides = [1, 1]} : vector<128x128xbf16> to vector<8x128xbf16>
    %c31 = arith.constant 31 : index
    %c0_11 = arith.constant 0 : index
    %16 = vector.load %arg8[%c31, %c0_11] : memref<200x128xbf16, #tpu.memory_space<vmem>>, vector<8x128xbf16>
    tpu.vector_store %arg8[%c31, %c0_11], %15 {strides = array<i32>} : memref<200x128xbf16, #tpu.memory_space<vmem>>, vector<8x128xbf16>,
    %17 = vector.extract_strided_slice %8 {offsets = [24, 0], sizes = [8, 128], strides = [1, 1]} : vector<128x128xbf16> to vector<8x128xbf16>
    %c41 = arith.constant 41 : index
    %c0_12 = arith.constant 0 : index
    %18 = vector.load %arg8[%c41, %c0_12] : memref<200x128xbf16, #tpu.memory_space<vmem>>, vector<8x128xbf16>
    tpu.vector_store %arg8[%c41, %c0_12], %17 {strides = array<i32>} : memref<200x128xbf16, #tpu.memory_space<vmem>>, vector<8x128xbf16>,
    %19 = vector.extract_strided_slice %8 {offsets = [32, 0], sizes = [8, 128], strides = [1, 1]} : vector<128x128xbf16> to vector<8x128xbf16>
    %c51 = arith.constant 51 : index
    %c0_13 = arith.constant 0 : index
    %20 = vector.load %arg8[%c51, %c0_13] : memref<200x128xbf16, #tpu.memory_space<vmem>>, vector<8x128xbf16>
    tpu.vector_store %arg8[%c51, %c0_13], %19 {strides = array<i32>} : memref<200x128xbf16, #tpu.memory_space<vmem>>, vector<8x128xbf16>,
    %21 = vector.extract_strided_slice %8 {offsets = [40, 0], sizes = [8, 128], strides = [1, 1]} : vector<128x128xbf16> to vector<8x128xbf16>
    %c61 = arith.constant 61 : index
    %c0_14 = arith.constant 0 : index
    %22 = vector.load %arg8[%c61, %c0_14] : memref<200x128xbf16, #tpu.memory_space<vmem>>, vector<8x128xbf16>
    tpu.vector_store %arg8[%c61, %c0_14], %21 {strides = array<i32>} : memref<200x128xbf16, #tpu.memory_space<vmem>>, vector<8x128xbf16>,
    %23 = vector.extract_strided_slice %8 {offsets = [48, 0], sizes = [8, 128], strides = [1, 1]} : vector<128x128xbf16> to vector<8x128xbf16>
    %c71 = arith.constant 71 : index
    %c0_15 = arith.constant 0 : index
    %24 = vector.load %arg8[%c71, %c0_15] : memref<200x128xbf16, #tpu.memory_space<vmem>>, vector<8x128xbf16>
    tpu.vector_store %arg8[%c71, %c0_15], %23 {strides = array<i32>} : memref<200x128xbf16, #tpu.memory_space<vmem>>, vector<8x128xbf16>,
    %25 = vector.extract_strided_slice %8 {offsets = [56, 0], sizes = [8, 128], strides = [1, 1]} : vector<128x128xbf16> to vector<8x128xbf16>
    %c81 = arith.constant 81 : index
    %c0_16 = arith.constant 0 : index
    %26 = vector.load %arg8[%c81, %c0_16] : memref<200x128xbf16, #tpu.memory_space<vmem>>, vector<8x128xbf16>
    tpu.vector_store %arg8[%c81, %c0_16], %25 {strides = array<i32>} : memref<200x128xbf16, #tpu.memory_space<vmem>>, vector<8x128xbf16>,
    %27 = vector.extract_strided_slice %8 {offsets = [64, 0], sizes = [8, 128], strides = [1, 1]} : vector<128x128xbf16> to vector<8x128xbf16>
    %c111 = arith.constant 111 : index
    %c0_17 = arith.constant 0 : index
    %28 = vector.load %arg8[%c111, %c0_17] : memref<200x128xbf16, #tpu.memory_space<vmem>>, vector<8x128xbf16>
    tpu.vector_store %arg8[%c111, %c0_17], %27 {strides = array<i32>} : memref<200x128xbf16, #tpu.memory_space<vmem>>, vector<8x128xbf16>,
    %29 = vector.extract_strided_slice %8 {offsets = [72, 0], sizes = [8, 128], strides = [1, 1]} : vector<128x128xbf16> to vector<8x128xbf16>
    %c121 = arith.constant 121 : index
    %c0_18 = arith.constant 0 : index
    %30 = vector.load %arg8[%c121, %c0_18] : memref<200x128xbf16, #tpu.memory_space<vmem>>, vector<8x128xbf16>
    tpu.vector_store %arg8[%c121, %c0_18], %29 {strides = array<i32>} : memref<200x128xbf16, #tpu.memory_space<vmem>>, vector<8x128xbf16>,
    %31 = vector.extract_strided_slice %8 {offsets = [80, 0], sizes = [8, 128], strides = [1, 1]} : vector<128x128xbf16> to vector<8x128xbf16>
    %c131 = arith.constant 131 : index
    %c0_19 = arith.constant 0 : index
    %32 = vector.load %arg8[%c131, %c0_19] : memref<200x128xbf16, #tpu.memory_space<vmem>>, vector<8x128xbf16>
    tpu.vector_store %arg8[%c131, %c0_19], %31 {strides = array<i32>} : memref<200x128xbf16, #tpu.memory_space<vmem>>, vector<8x128xbf16>,
    %33 = vector.extract_strided_slice %8 {offsets = [88, 0], sizes = [8, 128], strides = [1, 1]} : vector<128x128xbf16> to vector<8x128xbf16>
    %c141 = arith.constant 141 : index
    %c0_20 = arith.constant 0 : index
    %34 = vector.load %arg8[%c141, %c0_20] : memref<200x128xbf16, #tpu.memory_space<vmem>>, vector<8x128xbf16>
    tpu.vector_store %arg8[%c141, %c0_20], %33 {strides = array<i32>} : memref<200x128xbf16, #tpu.memory_space<vmem>>, vector<8x128xbf16>,
    %35 = vector.extract_strided_slice %8 {offsets = [96, 0], sizes = [8, 128], strides = [1, 1]} : vector<128x128xbf16> to vector<8x128xbf16>
    %c151 = arith.constant 151 : index
    %c0_21 = arith.constant 0 : index
    %36 = vector.load %arg8[%c151, %c0_21] : memref<200x128xbf16, #tpu.memory_space<vmem>>, vector<8x128xbf16>
    tpu.vector_store %arg8[%c151, %c0_21], %35 {strides = array<i32>} : memref<200x128xbf16, #tpu.memory_space<vmem>>, vector<8x128xbf16>,
    %37 = vector.extract_strided_slice %8 {offsets = [104, 0], sizes = [8, 128], strides = [1, 1]} : vector<128x128xbf16> to vector<8x128xbf16>
    %c161 = arith.constant 161 : index
    %c0_22 = arith.constant 0 : index
    %38 = vector.load %arg8[%c161, %c0_22] : memref<200x128xbf16, #tpu.memory_space<vmem>>, vector<8x128xbf16>
    tpu.vector_store %arg8[%c161, %c0_22], %37 {strides = array<i32>} : memref<200x128xbf16, #tpu.memory_space<vmem>>, vector<8x128xbf16>,
    %39 = vector.extract_strided_slice %8 {offsets = [112, 0], sizes = [8, 128], strides = [1, 1]} : vector<128x128xbf16> to vector<8x128xbf16>
    %c171 = arith.constant 171 : index
    %c0_23 = arith.constant 0 : index
    %40 = vector.load %arg8[%c171, %c0_23] : memref<200x128xbf16, #tpu.memory_space<vmem>>, vector<8x128xbf16>
    tpu.vector_store %arg8[%c171, %c0_23], %39 {strides = array<i32>} : memref<200x128xbf16, #tpu.memory_space<vmem>>, vector<8x128xbf16>,
    %41 = vector.extract_strided_slice %8 {offsets = [120, 0], sizes = [8, 128], strides = [1, 1]} : vector<128x128xbf16> to vector<8x128xbf16>
    %c181 = arith.constant 181 : index
    %c0_24 = arith.constant 0 : index
    %42 = vector.load %arg8[%c181, %c0_24] : memref<200x128xbf16, #tpu.memory_space<vmem>>, vector<8x128xbf16>
    tpu.vector_store %arg8[%c181, %c0_24], %41 {strides = array<i32>} : memref<200x128xbf16, #tpu.memory_space<vmem>>, vector<8x128xbf16>,
    %cst_25 = arith.constant 0.000000e+00 : f32
    %43 = vector.broadcast %cst_25 : f32 to vector<178x128xf32>
    %c0_26 = arith.constant 0 : index
    %c0_27 = arith.constant 0 : index
    %44 = vector.load %arg8[%c0_26, %c0_27] : memref<200x128xbf16, #tpu.memory_space<vmem>>, vector<178x128xbf16>
    %c0_28 = arith.constant 0 : index
    %c0_29 = arith.constant 0 : index
    %c0_30 = arith.constant 0 : index
    %c0_31 = arith.constant 0 : index
    %45 = vector.load %arg3[%c0_28, %c0_29, %c0_30, %c0_31] : memref<3x3x128x128xbf16, #tpu.memory_space<vmem>>, vector<1x1x128x128xbf16>
    %46 = vector.shape_cast %45 : vector<1x1x128x128xbf16> to vector<128x128xbf16>
    %cst_32 = arith.constant dense<0.000000e+00> : vector<178x128xf32>
    %47 = tpu.matmul %44, %46, %cst_32 {dimension_numbers = #tpu.dot_dimension_numbers<[1], [0], [0], [1], [0, 0, 1, 1], [], []>} : vector<178x128xbf16>, vector<128x128xbf16>, vector<178x128xf32> -> vector<178x128xf32>
    %48 = arith.addf %43, %47 : vector<178x128xf32>
    %c1 = arith.constant 1 : index
    %c0_33 = arith.constant 0 : index
    %49 = vector.load %arg8[%c1, %c0_33] : memref<200x128xbf16, #tpu.memory_space<vmem>>, vector<178x128xbf16>
    %c0_34 = arith.constant 0 : index
    %c1_35 = arith.constant 1 : index
    %c0_36 = arith.constant 0 : index
    %c0_37 = arith.constant 0 : index
    %50 = vector.load %arg3[%c0_34, %c1_35, %c0_36, %c0_37] : memref<3x3x128x128xbf16, #tpu.memory_space<vmem>>, vector<1x1x128x128xbf16>
    %51 = vector.shape_cast %50 : vector<1x1x128x128xbf16> to vector<128x128xbf16>
    %cst_38 = arith.constant dense<0.000000e+00> : vector<178x128xf32>
    %52 = tpu.matmul %49, %51, %cst_38 {dimension_numbers = #tpu.dot_dimension_numbers<[1], [0], [0], [1], [0, 0, 1, 1], [], []>} : vector<178x128xbf16>, vector<128x128xbf16>, vector<178x128xf32> -> vector<178x128xf32>
    %53 = arith.addf %48, %52 : vector<178x128xf32>
    %c2 = arith.constant 2 : index
    %c0_39 = arith.constant 0 : index
    %54 = vector.load %arg8[%c2, %c0_39] : memref<200x128xbf16, #tpu.memory_space<vmem>>, vector<178x128xbf16>
    %c0_40 = arith.constant 0 : index
    %c2_41 = arith.constant 2 : index
    %c0_42 = arith.constant 0 : index
    %c0_43 = arith.constant 0 : index
    %55 = vector.load %arg3[%c0_40, %c2_41, %c0_42, %c0_43] : memref<3x3x128x128xbf16, #tpu.memory_space<vmem>>, vector<1x1x128x128xbf16>
    %56 = vector.shape_cast %55 : vector<1x1x128x128xbf16> to vector<128x128xbf16>
    %cst_44 = arith.constant dense<0.000000e+00> : vector<178x128xf32>
    %57 = tpu.matmul %54, %56, %cst_44 {dimension_numbers = #tpu.dot_dimension_numbers<[1], [0], [0], [1], [0, 0, 1, 1], [], []>} : vector<178x128xbf16>, vector<128x128xbf16>, vector<178x128xf32> -> vector<178x128xf32>
    %58 = arith.addf %53, %57 : vector<178x128xf32>
    %c10 = arith.constant 10 : index
    %c0_45 = arith.constant 0 : index
    %59 = vector.load %arg8[%c10, %c0_45] : memref<200x128xbf16, #tpu.memory_space<vmem>>, vector<178x128xbf16>
    %c1_46 = arith.constant 1 : index
    %c0_47 = arith.constant 0 : index
    %c0_48 = arith.constant 0 : index
    %c0_49 = arith.constant 0 : index
    %60 = vector.load %arg3[%c1_46, %c0_47, %c0_48, %c0_49] : memref<3x3x128x128xbf16, #tpu.memory_space<vmem>>, vector<1x1x128x128xbf16>
    %61 = vector.shape_cast %60 : vector<1x1x128x128xbf16> to vector<128x128xbf16>
    %cst_50 = arith.constant dense<0.000000e+00> : vector<178x128xf32>
    %62 = tpu.matmul %59, %61, %cst_50 {dimension_numbers = #tpu.dot_dimension_numbers<[1], [0], [0], [1], [0, 0, 1, 1], [], []>} : vector<178x128xbf16>, vector<128x128xbf16>, vector<178x128xf32> -> vector<178x128xf32>
    %63 = arith.addf %58, %62 : vector<178x128xf32>
    %c11_51 = arith.constant 11 : index
    %c0_52 = arith.constant 0 : index
    %64 = vector.load %arg8[%c11_51, %c0_52] : memref<200x128xbf16, #tpu.memory_space<vmem>>, vector<178x128xbf16>
    %c1_53 = arith.constant 1 : index
    %c1_54 = arith.constant 1 : index
    %c0_55 = arith.constant 0 : index
    %c0_56 = arith.constant 0 : index
    %65 = vector.load %arg3[%c1_53, %c1_54, %c0_55, %c0_56] : memref<3x3x128x128xbf16, #tpu.memory_space<vmem>>, vector<1x1x128x128xbf16>
    %66 = vector.shape_cast %65 : vector<1x1x128x128xbf16> to vector<128x128xbf16>
    %cst_57 = arith.constant dense<0.000000e+00> : vector<178x128xf32>
    %67 = tpu.matmul %64, %66, %cst_57 {dimension_numbers = #tpu.dot_dimension_numbers<[1], [0], [0], [1], [0, 0, 1, 1], [], []>} : vector<178x128xbf16>, vector<128x128xbf16>, vector<178x128xf32> -> vector<178x128xf32>
    %68 = arith.addf %63, %67 : vector<178x128xf32>
    %c12 = arith.constant 12 : index
    %c0_58 = arith.constant 0 : index
    %69 = vector.load %arg8[%c12, %c0_58] : memref<200x128xbf16, #tpu.memory_space<vmem>>, vector<178x128xbf16>
    %c1_59 = arith.constant 1 : index
    %c2_60 = arith.constant 2 : index
    %c0_61 = arith.constant 0 : index
    %c0_62 = arith.constant 0 : index
    %70 = vector.load %arg3[%c1_59, %c2_60, %c0_61, %c0_62] : memref<3x3x128x128xbf16, #tpu.memory_space<vmem>>, vector<1x1x128x128xbf16>
    %71 = vector.shape_cast %70 : vector<1x1x128x128xbf16> to vector<128x128xbf16>
    %cst_63 = arith.constant dense<0.000000e+00> : vector<178x128xf32>
    %72 = tpu.matmul %69, %71, %cst_63 {dimension_numbers = #tpu.dot_dimension_numbers<[1], [0], [0], [1], [0, 0, 1, 1], [], []>} : vector<178x128xbf16>, vector<128x128xbf16>, vector<178x128xf32> -> vector<178x128xf32>
    %73 = arith.addf %68, %72 : vector<178x128xf32>
    %c20 = arith.constant 20 : index
    %c0_64 = arith.constant 0 : index
    %74 = vector.load %arg8[%c20, %c0_64] : memref<200x128xbf16, #tpu.memory_space<vmem>>, vector<178x128xbf16>
    %c2_65 = arith.constant 2 : index
    %c0_66 = arith.constant 0 : index
    %c0_67 = arith.constant 0 : index
    %c0_68 = arith.constant 0 : index
    %75 = vector.load %arg3[%c2_65, %c0_66, %c0_67, %c0_68] : memref<3x3x128x128xbf16, #tpu.memory_space<vmem>>, vector<1x1x128x128xbf16>
    %76 = vector.shape_cast %75 : vector<1x1x128x128xbf16> to vector<128x128xbf16>
    %cst_69 = arith.constant dense<0.000000e+00> : vector<178x128xf32>
    %77 = tpu.matmul %74, %76, %cst_69 {dimension_numbers = #tpu.dot_dimension_numbers<[1], [0], [0], [1], [0, 0, 1, 1], [], []>} : vector<178x128xbf16>, vector<128x128xbf16>, vector<178x128xf32> -> vector<178x128xf32>
    %78 = arith.addf %73, %77 : vector<178x128xf32>
    %c21_70 = arith.constant 21 : index
    %c0_71 = arith.constant 0 : index
    %79 = vector.load %arg8[%c21_70, %c0_71] : memref<200x128xbf16, #tpu.memory_space<vmem>>, vector<178x128xbf16>
    %c2_72 = arith.constant 2 : index
    %c1_73 = arith.constant 1 : index
    %c0_74 = arith.constant 0 : index
    %c0_75 = arith.constant 0 : index
    %80 = vector.load %arg3[%c2_72, %c1_73, %c0_74, %c0_75] : memref<3x3x128x128xbf16, #tpu.memory_space<vmem>>, vector<1x1x128x128xbf16>
    %81 = vector.shape_cast %80 : vector<1x1x128x128xbf16> to vector<128x128xbf16>
    %cst_76 = arith.constant dense<0.000000e+00> : vector<178x128xf32>
    %82 = tpu.matmul %79, %81, %cst_76 {dimension_numbers = #tpu.dot_dimension_numbers<[1], [0], [0], [1], [0, 0, 1, 1], [], []>} : vector<178x128xbf16>, vector<128x128xbf16>, vector<178x128xf32> -> vector<178x128xf32>
    %83 = arith.addf %78, %82 : vector<178x128xf32>
    %c22 = arith.constant 22 : index
    %c0_77 = arith.constant 0 : index
    %84 = vector.load %arg8[%c22, %c0_77] : memref<200x128xbf16, #tpu.memory_space<vmem>>, vector<178x128xbf16>
    %c2_78 = arith.constant 2 : index
    %c2_79 = arith.constant 2 : index
    %c0_80 = arith.constant 0 : index
    %c0_81 = arith.constant 0 : index
    %85 = vector.load %arg3[%c2_78, %c2_79, %c0_80, %c0_81] : memref<3x3x128x128xbf16, #tpu.memory_space<vmem>>, vector<1x1x128x128xbf16>
    %86 = vector.shape_cast %85 : vector<1x1x128x128xbf16> to vector<128x128xbf16>
    %cst_82 = arith.constant dense<0.000000e+00> : vector<178x128xf32>
    %87 = tpu.matmul %84, %86, %cst_82 {dimension_numbers = #tpu.dot_dimension_numbers<[1], [0], [0], [1], [0, 0, 1, 1], [], []>} : vector<178x128xbf16>, vector<128x128xbf16>, vector<178x128xf32> -> vector<178x128xf32>
    %88 = arith.addf %83, %87 : vector<178x128xf32>
    %c0_83 = arith.constant 0 : index
    %c0_84 = arith.constant 0 : index
    %89 = vector.load %arg4[%c0_83, %c0_84] : memref<1x128xf32, #tpu.memory_space<vmem>>, vector<1x128xf32>
    %90 = vector.broadcast %89 : vector<1x128xf32> to vector<178x128xf32>
    %91 = arith.addf %88, %90 : vector<178x128xf32>
    %cst_85 = arith.constant 0.000000e+00 : f32
    %92 = vector.broadcast %cst_85 : f32 to vector<178x128xf32>
    %93 = arith.maximumf %91, %92 : vector<178x128xf32>
    %94 = arith.truncf %93 : vector<178x128xf32> to vector<178x128xbf16>
    %c0_86 = arith.constant 0 : index
    %c0_87 = arith.constant 0 : index
    %95 = vector.load %arg5[%c0_86, %c0_87] : memref<128x256xbf16, #tpu.memory_space<vmem>>, vector<128x256xbf16>
    %cst_88 = arith.constant dense<0.000000e+00> : vector<178x256xf32>
    %96 = tpu.matmul %94, %95, %cst_88 {dimension_numbers = #tpu.dot_dimension_numbers<[1], [0], [0], [1], [0, 0, 1, 1], [], []>} : vector<178x128xbf16>, vector<128x256xbf16>, vector<178x256xf32> -> vector<178x256xf32>
    %c0_89 = arith.constant 0 : index
    %c0_90 = arith.constant 0 : index
    %97 = vector.load %arg6[%c0_89, %c0_90] : memref<1x256xf32, #tpu.memory_space<vmem>>, vector<1x256xf32>
    %98 = vector.broadcast %97 : vector<1x256xf32> to vector<178x256xf32>
    %99 = arith.addf %96, %98 : vector<178x256xf32>
    %cst_91 = arith.constant 0.000000e+00 : f32
    %100 = vector.broadcast %cst_91 : f32 to vector<178x256xf32>
    %101 = arith.maximumf %99, %100 : vector<178x256xf32>
    %102 = arith.truncf %101 : vector<178x256xf32> to vector<178x256xbf16>
    %103 = vector.extract_strided_slice %102 {offsets = [0, 0], sizes = [8, 256], strides = [1, 1]} : vector<178x256xbf16> to vector<8x256xbf16>
    %c0_92 = arith.constant 0 : index
    %c0_93 = arith.constant 0 : index
    %104 = vector.load %arg7[%c0_92, %c0_93] : memref<128x256xbf16, #tpu.memory_space<vmem>>, vector<8x256xbf16>
    tpu.vector_store %arg7[%c0_92, %c0_93], %103 {strides = array<i32>} : memref<128x256xbf16, #tpu.memory_space<vmem>>, vector<8x256xbf16>,
    %105 = vector.extract_strided_slice %102 {offsets = [10, 0], sizes = [8, 256], strides = [1, 1]} : vector<178x256xbf16> to vector<8x256xbf16>
    %c8 = arith.constant 8 : index
    %c0_94 = arith.constant 0 : index
    %106 = vector.load %arg7[%c8, %c0_94] : memref<128x256xbf16, #tpu.memory_space<vmem>>, vector<8x256xbf16>
    tpu.vector_store %arg7[%c8, %c0_94], %105 {strides = array<i32>} : memref<128x256xbf16, #tpu.memory_space<vmem>>, vector<8x256xbf16>,
    %107 = vector.extract_strided_slice %102 {offsets = [20, 0], sizes = [8, 256], strides = [1, 1]} : vector<178x256xbf16> to vector<8x256xbf16>
    %c16 = arith.constant 16 : index
    %c0_95 = arith.constant 0 : index
    %108 = vector.load %arg7[%c16, %c0_95] : memref<128x256xbf16, #tpu.memory_space<vmem>>, vector<8x256xbf16>
    tpu.vector_store %arg7[%c16, %c0_95], %107 {strides = array<i32>} : memref<128x256xbf16, #tpu.memory_space<vmem>>, vector<8x256xbf16>,
    %109 = vector.extract_strided_slice %102 {offsets = [30, 0], sizes = [8, 256], strides = [1, 1]} : vector<178x256xbf16> to vector<8x256xbf16>
    %c24 = arith.constant 24 : index
    %c0_96 = arith.constant 0 : index
    %110 = vector.load %arg7[%c24, %c0_96] : memref<128x256xbf16, #tpu.memory_space<vmem>>, vector<8x256xbf16>
    tpu.vector_store %arg7[%c24, %c0_96], %109 {strides = array<i32>} : memref<128x256xbf16, #tpu.memory_space<vmem>>, vector<8x256xbf16>,
    %111 = vector.extract_strided_slice %102 {offsets = [40, 0], sizes = [8, 256], strides = [1, 1]} : vector<178x256xbf16> to vector<8x256xbf16>
    %c32 = arith.constant 32 : index
    %c0_97 = arith.constant 0 : index
    %112 = vector.load %arg7[%c32, %c0_97] : memref<128x256xbf16, #tpu.memory_space<vmem>>, vector<8x256xbf16>
    tpu.vector_store %arg7[%c32, %c0_97], %111 {strides = array<i32>} : memref<128x256xbf16, #tpu.memory_space<vmem>>, vector<8x256xbf16>,
    %113 = vector.extract_strided_slice %102 {offsets = [50, 0], sizes = [8, 256], strides = [1, 1]} : vector<178x256xbf16> to vector<8x256xbf16>
    %c40 = arith.constant 40 : index
    %c0_98 = arith.constant 0 : index
    %114 = vector.load %arg7[%c40, %c0_98] : memref<128x256xbf16, #tpu.memory_space<vmem>>, vector<8x256xbf16>
    tpu.vector_store %arg7[%c40, %c0_98], %113 {strides = array<i32>} : memref<128x256xbf16, #tpu.memory_space<vmem>>, vector<8x256xbf16>,
    %115 = vector.extract_strided_slice %102 {offsets = [60, 0], sizes = [8, 256], strides = [1, 1]} : vector<178x256xbf16> to vector<8x256xbf16>
    %c48 = arith.constant 48 : index
    %c0_99 = arith.constant 0 : index
    %116 = vector.load %arg7[%c48, %c0_99] : memref<128x256xbf16, #tpu.memory_space<vmem>>, vector<8x256xbf16>
    tpu.vector_store %arg7[%c48, %c0_99], %115 {strides = array<i32>} : memref<128x256xbf16, #tpu.memory_space<vmem>>, vector<8x256xbf16>,
    %117 = vector.extract_strided_slice %102 {offsets = [70, 0], sizes = [8, 256], strides = [1, 1]} : vector<178x256xbf16> to vector<8x256xbf16>
    %c56 = arith.constant 56 : index
    %c0_100 = arith.constant 0 : index
    %118 = vector.load %arg7[%c56, %c0_100] : memref<128x256xbf16, #tpu.memory_space<vmem>>, vector<8x256xbf16>
    tpu.vector_store %arg7[%c56, %c0_100], %117 {strides = array<i32>} : memref<128x256xbf16, #tpu.memory_space<vmem>>, vector<8x256xbf16>,
    %119 = vector.extract_strided_slice %102 {offsets = [100, 0], sizes = [8, 256], strides = [1, 1]} : vector<178x256xbf16> to vector<8x256xbf16>
    %c64 = arith.constant 64 : index
    %c0_101 = arith.constant 0 : index
    %120 = vector.load %arg7[%c64, %c0_101] : memref<128x256xbf16, #tpu.memory_space<vmem>>, vector<8x256xbf16>
    tpu.vector_store %arg7[%c64, %c0_101], %119 {strides = array<i32>} : memref<128x256xbf16, #tpu.memory_space<vmem>>, vector<8x256xbf16>,
    %121 = vector.extract_strided_slice %102 {offsets = [110, 0], sizes = [8, 256], strides = [1, 1]} : vector<178x256xbf16> to vector<8x256xbf16>
    %c72 = arith.constant 72 : index
    %c0_102 = arith.constant 0 : index
    %122 = vector.load %arg7[%c72, %c0_102] : memref<128x256xbf16, #tpu.memory_space<vmem>>, vector<8x256xbf16>
    tpu.vector_store %arg7[%c72, %c0_102], %121 {strides = array<i32>} : memref<128x256xbf16, #tpu.memory_space<vmem>>, vector<8x256xbf16>,
    %123 = vector.extract_strided_slice %102 {offsets = [120, 0], sizes = [8, 256], strides = [1, 1]} : vector<178x256xbf16> to vector<8x256xbf16>
    %c80 = arith.constant 80 : index
    %c0_103 = arith.constant 0 : index
    %124 = vector.load %arg7[%c80, %c0_103] : memref<128x256xbf16, #tpu.memory_space<vmem>>, vector<8x256xbf16>
    tpu.vector_store %arg7[%c80, %c0_103], %123 {strides = array<i32>} : memref<128x256xbf16, #tpu.memory_space<vmem>>, vector<8x256xbf16>,
    %125 = vector.extract_strided_slice %102 {offsets = [130, 0], sizes = [8, 256], strides = [1, 1]} : vector<178x256xbf16> to vector<8x256xbf16>
    %c88 = arith.constant 88 : index
    %c0_104 = arith.constant 0 : index
    %126 = vector.load %arg7[%c88, %c0_104] : memref<128x256xbf16, #tpu.memory_space<vmem>>, vector<8x256xbf16>
    tpu.vector_store %arg7[%c88, %c0_104], %125 {strides = array<i32>} : memref<128x256xbf16, #tpu.memory_space<vmem>>, vector<8x256xbf16>,
    %127 = vector.extract_strided_slice %102 {offsets = [140, 0], sizes = [8, 256], strides = [1, 1]} : vector<178x256xbf16> to vector<8x256xbf16>
    %c96 = arith.constant 96 : index
    %c0_105 = arith.constant 0 : index
    %128 = vector.load %arg7[%c96, %c0_105] : memref<128x256xbf16, #tpu.memory_space<vmem>>, vector<8x256xbf16>
    tpu.vector_store %arg7[%c96, %c0_105], %127 {strides = array<i32>} : memref<128x256xbf16, #tpu.memory_space<vmem>>, vector<8x256xbf16>,
    %129 = vector.extract_strided_slice %102 {offsets = [150, 0], sizes = [8, 256], strides = [1, 1]} : vector<178x256xbf16> to vector<8x256xbf16>
    %c104 = arith.constant 104 : index
    %c0_106 = arith.constant 0 : index
    %130 = vector.load %arg7[%c104, %c0_106] : memref<128x256xbf16, #tpu.memory_space<vmem>>, vector<8x256xbf16>
    tpu.vector_store %arg7[%c104, %c0_106], %129 {strides = array<i32>} : memref<128x256xbf16, #tpu.memory_space<vmem>>, vector<8x256xbf16>,
    %131 = vector.extract_strided_slice %102 {offsets = [160, 0], sizes = [8, 256], strides = [1, 1]} : vector<178x256xbf16> to vector<8x256xbf16>
    %c112 = arith.constant 112 : index
    %c0_107 = arith.constant 0 : index
    %132 = vector.load %arg7[%c112, %c0_107] : memref<128x256xbf16, #tpu.memory_space<vmem>>, vector<8x256xbf16>
    tpu.vector_store %arg7[%c112, %c0_107], %131 {strides = array<i32>} : memref<128x256xbf16, #tpu.memory_space<vmem>>, vector<8x256xbf16>,
    %133 = vector.extract_strided_slice %102 {offsets = [170, 0], sizes = [8, 256], strides = [1, 1]} : vector<178x256xbf16> to vector<8x256xbf16>
    %c120 = arith.constant 120 : index
    %c0_108 = arith.constant 0 : index
    %134 = vector.load %arg7[%c120, %c0_108] : memref<128x256xbf16, #tpu.memory_space<vmem>>, vector<8x256xbf16>
    tpu.vector_store %arg7[%c120, %c0_108], %133 {strides = array<i32>} : memref<128x256xbf16, #tpu.memory_space<vmem>>, vector<8x256xbf16>,
    return
  }
}

module attributes {stable_mosaic.version = 11 : i64} {
  func.func @_bottleneck_kernel(%arg0: memref<32x256xbf16, #tpu.memory_space<vmem>>, %arg1: memref<256x128xbf16, #tpu.memory_space<vmem>>, %arg2: memref<1x128xf32, #tpu.memory_space<vmem>>, %arg3: memref<3x3x128x128xbf16, #tpu.memory_space<vmem>>, %arg4: memref<1x128xf32, #tpu.memory_space<vmem>>, %arg5: memref<128x512xbf16, #tpu.memory_space<vmem>>, %arg6: memref<1x512xf32, #tpu.memory_space<vmem>>, %arg7: memref<32x512xbf16, #tpu.memory_space<vmem>>, %arg8: memref<72x128xbf16, #tpu.memory_space<vmem>>) attributes {dimension_semantics = [], scalar_prefetch = 0 : i64, scratch_operands = 1 : i64, tpu.core_type = #tpu.core_type<tc>} {
    %c0 = arith.constant 0 : index
    %c0_0 = arith.constant 0 : index
    %0 = vector.load %arg0[%c0, %c0_0] : memref<32x256xbf16, #tpu.memory_space<vmem>>, vector<32x256xbf16>
    %c0_1 = arith.constant 0 : index
    %c0_2 = arith.constant 0 : index
    %1 = vector.load %arg1[%c0_1, %c0_2] : memref<256x128xbf16, #tpu.memory_space<vmem>>, vector<256x128xbf16>
    %cst = arith.constant dense<0.000000e+00> : vector<32x128xf32>
    %2 = tpu.matmul %0, %1, %cst {dimension_numbers = #tpu.dot_dimension_numbers<[1], [0], [0], [1], [0, 0, 1, 1], [], []>} : vector<32x256xbf16>, vector<256x128xbf16>, vector<32x128xf32> -> vector<32x128xf32>
    %c0_3 = arith.constant 0 : index
    %c0_4 = arith.constant 0 : index
    %3 = vector.load %arg2[%c0_3, %c0_4] : memref<1x128xf32, #tpu.memory_space<vmem>>, vector<1x128xf32>
    %4 = vector.broadcast %3 : vector<1x128xf32> to vector<32x128xf32>
    %5 = arith.addf %2, %4 : vector<32x128xf32>
    %cst_5 = arith.constant 0.000000e+00 : f32
    %6 = vector.broadcast %cst_5 : f32 to vector<32x128xf32>
    %7 = arith.maximumf %5, %6 : vector<32x128xf32>
    %8 = arith.truncf %7 : vector<32x128xf32> to vector<32x128xbf16>
    %cst_6 = arith.constant 0.000000e+00 : bf16
    %9 = vector.broadcast %cst_6 : bf16 to vector<72x128xbf16>
    %c0_7 = arith.constant 0 : index
    %c0_8 = arith.constant 0 : index
    %10 = vector.load %arg8[%c0_7, %c0_8] : memref<72x128xbf16, #tpu.memory_space<vmem>>, vector<72x128xbf16>
    tpu.vector_store %arg8[%c0_7, %c0_8], %9 {strides = array<i32>} : memref<72x128xbf16, #tpu.memory_space<vmem>>, vector<72x128xbf16>,
    %11 = vector.extract_strided_slice %8 {offsets = [0, 0], sizes = [4, 128], strides = [1, 1]} : vector<32x128xbf16> to vector<4x128xbf16>
    %c7 = arith.constant 7 : index
    %c0_9 = arith.constant 0 : index
    %12 = vector.load %arg8[%c7, %c0_9] : memref<72x128xbf16, #tpu.memory_space<vmem>>, vector<4x128xbf16>
    tpu.vector_store %arg8[%c7, %c0_9], %11 {strides = array<i32>} : memref<72x128xbf16, #tpu.memory_space<vmem>>, vector<4x128xbf16>,
    %13 = vector.extract_strided_slice %8 {offsets = [4, 0], sizes = [4, 128], strides = [1, 1]} : vector<32x128xbf16> to vector<4x128xbf16>
    %c13 = arith.constant 13 : index
    %c0_10 = arith.constant 0 : index
    %14 = vector.load %arg8[%c13, %c0_10] : memref<72x128xbf16, #tpu.memory_space<vmem>>, vector<4x128xbf16>
    tpu.vector_store %arg8[%c13, %c0_10], %13 {strides = array<i32>} : memref<72x128xbf16, #tpu.memory_space<vmem>>, vector<4x128xbf16>,
    %15 = vector.extract_strided_slice %8 {offsets = [8, 0], sizes = [4, 128], strides = [1, 1]} : vector<32x128xbf16> to vector<4x128xbf16>
    %c19 = arith.constant 19 : index
    %c0_11 = arith.constant 0 : index
    %16 = vector.load %arg8[%c19, %c0_11] : memref<72x128xbf16, #tpu.memory_space<vmem>>, vector<4x128xbf16>
    tpu.vector_store %arg8[%c19, %c0_11], %15 {strides = array<i32>} : memref<72x128xbf16, #tpu.memory_space<vmem>>, vector<4x128xbf16>,
    %17 = vector.extract_strided_slice %8 {offsets = [12, 0], sizes = [4, 128], strides = [1, 1]} : vector<32x128xbf16> to vector<4x128xbf16>
    %c25 = arith.constant 25 : index
    %c0_12 = arith.constant 0 : index
    %18 = vector.load %arg8[%c25, %c0_12] : memref<72x128xbf16, #tpu.memory_space<vmem>>, vector<4x128xbf16>
    tpu.vector_store %arg8[%c25, %c0_12], %17 {strides = array<i32>} : memref<72x128xbf16, #tpu.memory_space<vmem>>, vector<4x128xbf16>,
    %19 = vector.extract_strided_slice %8 {offsets = [16, 0], sizes = [4, 128], strides = [1, 1]} : vector<32x128xbf16> to vector<4x128xbf16>
    %c43 = arith.constant 43 : index
    %c0_13 = arith.constant 0 : index
    %20 = vector.load %arg8[%c43, %c0_13] : memref<72x128xbf16, #tpu.memory_space<vmem>>, vector<4x128xbf16>
    tpu.vector_store %arg8[%c43, %c0_13], %19 {strides = array<i32>} : memref<72x128xbf16, #tpu.memory_space<vmem>>, vector<4x128xbf16>,
    %21 = vector.extract_strided_slice %8 {offsets = [20, 0], sizes = [4, 128], strides = [1, 1]} : vector<32x128xbf16> to vector<4x128xbf16>
    %c49 = arith.constant 49 : index
    %c0_14 = arith.constant 0 : index
    %22 = vector.load %arg8[%c49, %c0_14] : memref<72x128xbf16, #tpu.memory_space<vmem>>, vector<4x128xbf16>
    tpu.vector_store %arg8[%c49, %c0_14], %21 {strides = array<i32>} : memref<72x128xbf16, #tpu.memory_space<vmem>>, vector<4x128xbf16>,
    %23 = vector.extract_strided_slice %8 {offsets = [24, 0], sizes = [4, 128], strides = [1, 1]} : vector<32x128xbf16> to vector<4x128xbf16>
    %c55 = arith.constant 55 : index
    %c0_15 = arith.constant 0 : index
    %24 = vector.load %arg8[%c55, %c0_15] : memref<72x128xbf16, #tpu.memory_space<vmem>>, vector<4x128xbf16>
    tpu.vector_store %arg8[%c55, %c0_15], %23 {strides = array<i32>} : memref<72x128xbf16, #tpu.memory_space<vmem>>, vector<4x128xbf16>,
    %25 = vector.extract_strided_slice %8 {offsets = [28, 0], sizes = [4, 128], strides = [1, 1]} : vector<32x128xbf16> to vector<4x128xbf16>
    %c61 = arith.constant 61 : index
    %c0_16 = arith.constant 0 : index
    %26 = vector.load %arg8[%c61, %c0_16] : memref<72x128xbf16, #tpu.memory_space<vmem>>, vector<4x128xbf16>
    tpu.vector_store %arg8[%c61, %c0_16], %25 {strides = array<i32>} : memref<72x128xbf16, #tpu.memory_space<vmem>>, vector<4x128xbf16>,
    %cst_17 = arith.constant 0.000000e+00 : f32
    %27 = vector.broadcast %cst_17 : f32 to vector<58x128xf32>
    %c0_18 = arith.constant 0 : index
    %c0_19 = arith.constant 0 : index
    %28 = vector.load %arg8[%c0_18, %c0_19] : memref<72x128xbf16, #tpu.memory_space<vmem>>, vector<58x128xbf16>
    %c0_20 = arith.constant 0 : index
    %c0_21 = arith.constant 0 : index
    %c0_22 = arith.constant 0 : index
    %c0_23 = arith.constant 0 : index
    %29 = vector.load %arg3[%c0_20, %c0_21, %c0_22, %c0_23] : memref<3x3x128x128xbf16, #tpu.memory_space<vmem>>, vector<1x1x128x128xbf16>
    %30 = vector.shape_cast %29 : vector<1x1x128x128xbf16> to vector<128x128xbf16>
    %cst_24 = arith.constant dense<0.000000e+00> : vector<58x128xf32>
    %31 = tpu.matmul %28, %30, %cst_24 {dimension_numbers = #tpu.dot_dimension_numbers<[1], [0], [0], [1], [0, 0, 1, 1], [], []>} : vector<58x128xbf16>, vector<128x128xbf16>, vector<58x128xf32> -> vector<58x128xf32>
    %32 = arith.addf %27, %31 : vector<58x128xf32>
    %c1 = arith.constant 1 : index
    %c0_25 = arith.constant 0 : index
    %33 = vector.load %arg8[%c1, %c0_25] : memref<72x128xbf16, #tpu.memory_space<vmem>>, vector<58x128xbf16>
    %c0_26 = arith.constant 0 : index
    %c1_27 = arith.constant 1 : index
    %c0_28 = arith.constant 0 : index
    %c0_29 = arith.constant 0 : index
    %34 = vector.load %arg3[%c0_26, %c1_27, %c0_28, %c0_29] : memref<3x3x128x128xbf16, #tpu.memory_space<vmem>>, vector<1x1x128x128xbf16>
    %35 = vector.shape_cast %34 : vector<1x1x128x128xbf16> to vector<128x128xbf16>
    %cst_30 = arith.constant dense<0.000000e+00> : vector<58x128xf32>
    %36 = tpu.matmul %33, %35, %cst_30 {dimension_numbers = #tpu.dot_dimension_numbers<[1], [0], [0], [1], [0, 0, 1, 1], [], []>} : vector<58x128xbf16>, vector<128x128xbf16>, vector<58x128xf32> -> vector<58x128xf32>
    %37 = arith.addf %32, %36 : vector<58x128xf32>
    %c2 = arith.constant 2 : index
    %c0_31 = arith.constant 0 : index
    %38 = vector.load %arg8[%c2, %c0_31] : memref<72x128xbf16, #tpu.memory_space<vmem>>, vector<58x128xbf16>
    %c0_32 = arith.constant 0 : index
    %c2_33 = arith.constant 2 : index
    %c0_34 = arith.constant 0 : index
    %c0_35 = arith.constant 0 : index
    %39 = vector.load %arg3[%c0_32, %c2_33, %c0_34, %c0_35] : memref<3x3x128x128xbf16, #tpu.memory_space<vmem>>, vector<1x1x128x128xbf16>
    %40 = vector.shape_cast %39 : vector<1x1x128x128xbf16> to vector<128x128xbf16>
    %cst_36 = arith.constant dense<0.000000e+00> : vector<58x128xf32>
    %41 = tpu.matmul %38, %40, %cst_36 {dimension_numbers = #tpu.dot_dimension_numbers<[1], [0], [0], [1], [0, 0, 1, 1], [], []>} : vector<58x128xbf16>, vector<128x128xbf16>, vector<58x128xf32> -> vector<58x128xf32>
    %42 = arith.addf %37, %41 : vector<58x128xf32>
    %c6 = arith.constant 6 : index
    %c0_37 = arith.constant 0 : index
    %43 = vector.load %arg8[%c6, %c0_37] : memref<72x128xbf16, #tpu.memory_space<vmem>>, vector<58x128xbf16>
    %c1_38 = arith.constant 1 : index
    %c0_39 = arith.constant 0 : index
    %c0_40 = arith.constant 0 : index
    %c0_41 = arith.constant 0 : index
    %44 = vector.load %arg3[%c1_38, %c0_39, %c0_40, %c0_41] : memref<3x3x128x128xbf16, #tpu.memory_space<vmem>>, vector<1x1x128x128xbf16>
    %45 = vector.shape_cast %44 : vector<1x1x128x128xbf16> to vector<128x128xbf16>
    %cst_42 = arith.constant dense<0.000000e+00> : vector<58x128xf32>
    %46 = tpu.matmul %43, %45, %cst_42 {dimension_numbers = #tpu.dot_dimension_numbers<[1], [0], [0], [1], [0, 0, 1, 1], [], []>} : vector<58x128xbf16>, vector<128x128xbf16>, vector<58x128xf32> -> vector<58x128xf32>
    %47 = arith.addf %42, %46 : vector<58x128xf32>
    %c7_43 = arith.constant 7 : index
    %c0_44 = arith.constant 0 : index
    %48 = vector.load %arg8[%c7_43, %c0_44] : memref<72x128xbf16, #tpu.memory_space<vmem>>, vector<58x128xbf16>
    %c1_45 = arith.constant 1 : index
    %c1_46 = arith.constant 1 : index
    %c0_47 = arith.constant 0 : index
    %c0_48 = arith.constant 0 : index
    %49 = vector.load %arg3[%c1_45, %c1_46, %c0_47, %c0_48] : memref<3x3x128x128xbf16, #tpu.memory_space<vmem>>, vector<1x1x128x128xbf16>
    %50 = vector.shape_cast %49 : vector<1x1x128x128xbf16> to vector<128x128xbf16>
    %cst_49 = arith.constant dense<0.000000e+00> : vector<58x128xf32>
    %51 = tpu.matmul %48, %50, %cst_49 {dimension_numbers = #tpu.dot_dimension_numbers<[1], [0], [0], [1], [0, 0, 1, 1], [], []>} : vector<58x128xbf16>, vector<128x128xbf16>, vector<58x128xf32> -> vector<58x128xf32>
    %52 = arith.addf %47, %51 : vector<58x128xf32>
    %c8 = arith.constant 8 : index
    %c0_50 = arith.constant 0 : index
    %53 = vector.load %arg8[%c8, %c0_50] : memref<72x128xbf16, #tpu.memory_space<vmem>>, vector<58x128xbf16>
    %c1_51 = arith.constant 1 : index
    %c2_52 = arith.constant 2 : index
    %c0_53 = arith.constant 0 : index
    %c0_54 = arith.constant 0 : index
    %54 = vector.load %arg3[%c1_51, %c2_52, %c0_53, %c0_54] : memref<3x3x128x128xbf16, #tpu.memory_space<vmem>>, vector<1x1x128x128xbf16>
    %55 = vector.shape_cast %54 : vector<1x1x128x128xbf16> to vector<128x128xbf16>
    %cst_55 = arith.constant dense<0.000000e+00> : vector<58x128xf32>
    %56 = tpu.matmul %53, %55, %cst_55 {dimension_numbers = #tpu.dot_dimension_numbers<[1], [0], [0], [1], [0, 0, 1, 1], [], []>} : vector<58x128xbf16>, vector<128x128xbf16>, vector<58x128xf32> -> vector<58x128xf32>
    %57 = arith.addf %52, %56 : vector<58x128xf32>
    %c12 = arith.constant 12 : index
    %c0_56 = arith.constant 0 : index
    %58 = vector.load %arg8[%c12, %c0_56] : memref<72x128xbf16, #tpu.memory_space<vmem>>, vector<58x128xbf16>
    %c2_57 = arith.constant 2 : index
    %c0_58 = arith.constant 0 : index
    %c0_59 = arith.constant 0 : index
    %c0_60 = arith.constant 0 : index
    %59 = vector.load %arg3[%c2_57, %c0_58, %c0_59, %c0_60] : memref<3x3x128x128xbf16, #tpu.memory_space<vmem>>, vector<1x1x128x128xbf16>
    %60 = vector.shape_cast %59 : vector<1x1x128x128xbf16> to vector<128x128xbf16>
    %cst_61 = arith.constant dense<0.000000e+00> : vector<58x128xf32>
    %61 = tpu.matmul %58, %60, %cst_61 {dimension_numbers = #tpu.dot_dimension_numbers<[1], [0], [0], [1], [0, 0, 1, 1], [], []>} : vector<58x128xbf16>, vector<128x128xbf16>, vector<58x128xf32> -> vector<58x128xf32>
    %62 = arith.addf %57, %61 : vector<58x128xf32>
    %c13_62 = arith.constant 13 : index
    %c0_63 = arith.constant 0 : index
    %63 = vector.load %arg8[%c13_62, %c0_63] : memref<72x128xbf16, #tpu.memory_space<vmem>>, vector<58x128xbf16>
    %c2_64 = arith.constant 2 : index
    %c1_65 = arith.constant 1 : index
    %c0_66 = arith.constant 0 : index
    %c0_67 = arith.constant 0 : index
    %64 = vector.load %arg3[%c2_64, %c1_65, %c0_66, %c0_67] : memref<3x3x128x128xbf16, #tpu.memory_space<vmem>>, vector<1x1x128x128xbf16>
    %65 = vector.shape_cast %64 : vector<1x1x128x128xbf16> to vector<128x128xbf16>
    %cst_68 = arith.constant dense<0.000000e+00> : vector<58x128xf32>
    %66 = tpu.matmul %63, %65, %cst_68 {dimension_numbers = #tpu.dot_dimension_numbers<[1], [0], [0], [1], [0, 0, 1, 1], [], []>} : vector<58x128xbf16>, vector<128x128xbf16>, vector<58x128xf32> -> vector<58x128xf32>
    %67 = arith.addf %62, %66 : vector<58x128xf32>
    %c14 = arith.constant 14 : index
    %c0_69 = arith.constant 0 : index
    %68 = vector.load %arg8[%c14, %c0_69] : memref<72x128xbf16, #tpu.memory_space<vmem>>, vector<58x128xbf16>
    %c2_70 = arith.constant 2 : index
    %c2_71 = arith.constant 2 : index
    %c0_72 = arith.constant 0 : index
    %c0_73 = arith.constant 0 : index
    %69 = vector.load %arg3[%c2_70, %c2_71, %c0_72, %c0_73] : memref<3x3x128x128xbf16, #tpu.memory_space<vmem>>, vector<1x1x128x128xbf16>
    %70 = vector.shape_cast %69 : vector<1x1x128x128xbf16> to vector<128x128xbf16>
    %cst_74 = arith.constant dense<0.000000e+00> : vector<58x128xf32>
    %71 = tpu.matmul %68, %70, %cst_74 {dimension_numbers = #tpu.dot_dimension_numbers<[1], [0], [0], [1], [0, 0, 1, 1], [], []>} : vector<58x128xbf16>, vector<128x128xbf16>, vector<58x128xf32> -> vector<58x128xf32>
    %72 = arith.addf %67, %71 : vector<58x128xf32>
    %c0_75 = arith.constant 0 : index
    %c0_76 = arith.constant 0 : index
    %73 = vector.load %arg4[%c0_75, %c0_76] : memref<1x128xf32, #tpu.memory_space<vmem>>, vector<1x128xf32>
    %74 = vector.broadcast %73 : vector<1x128xf32> to vector<58x128xf32>
    %75 = arith.addf %72, %74 : vector<58x128xf32>
    %cst_77 = arith.constant 0.000000e+00 : f32
    %76 = vector.broadcast %cst_77 : f32 to vector<58x128xf32>
    %77 = arith.maximumf %75, %76 : vector<58x128xf32>
    %78 = arith.truncf %77 : vector<58x128xf32> to vector<58x128xbf16>
    %c0_78 = arith.constant 0 : index
    %c0_79 = arith.constant 0 : index
    %79 = vector.load %arg5[%c0_78, %c0_79] : memref<128x512xbf16, #tpu.memory_space<vmem>>, vector<128x512xbf16>
    %cst_80 = arith.constant dense<0.000000e+00> : vector<58x512xf32>
    %80 = tpu.matmul %78, %79, %cst_80 {dimension_numbers = #tpu.dot_dimension_numbers<[1], [0], [0], [1], [0, 0, 1, 1], [], []>} : vector<58x128xbf16>, vector<128x512xbf16>, vector<58x512xf32> -> vector<58x512xf32>
    %c0_81 = arith.constant 0 : index
    %c0_82 = arith.constant 0 : index
    %81 = vector.load %arg6[%c0_81, %c0_82] : memref<1x512xf32, #tpu.memory_space<vmem>>, vector<1x512xf32>
    %82 = vector.broadcast %81 : vector<1x512xf32> to vector<58x512xf32>
    %83 = arith.addf %80, %82 : vector<58x512xf32>
    %cst_83 = arith.constant 0.000000e+00 : f32
    %84 = vector.broadcast %cst_83 : f32 to vector<58x512xf32>
    %85 = arith.maximumf %83, %84 : vector<58x512xf32>
    %86 = arith.truncf %85 : vector<58x512xf32> to vector<58x512xbf16>
    %87 = vector.extract_strided_slice %86 {offsets = [0, 0], sizes = [4, 512], strides = [1, 1]} : vector<58x512xbf16> to vector<4x512xbf16>
    %c0_84 = arith.constant 0 : index
    %c0_85 = arith.constant 0 : index
    %88 = vector.load %arg7[%c0_84, %c0_85] : memref<32x512xbf16, #tpu.memory_space<vmem>>, vector<4x512xbf16>
    tpu.vector_store %arg7[%c0_84, %c0_85], %87 {strides = array<i32>} : memref<32x512xbf16, #tpu.memory_space<vmem>>, vector<4x512xbf16>,
    %89 = vector.extract_strided_slice %86 {offsets = [6, 0], sizes = [4, 512], strides = [1, 1]} : vector<58x512xbf16> to vector<4x512xbf16>
    %c4 = arith.constant 4 : index
    %c0_86 = arith.constant 0 : index
    %90 = vector.load %arg7[%c4, %c0_86] : memref<32x512xbf16, #tpu.memory_space<vmem>>, vector<4x512xbf16>
    tpu.vector_store %arg7[%c4, %c0_86], %89 {strides = array<i32>} : memref<32x512xbf16, #tpu.memory_space<vmem>>, vector<4x512xbf16>,
    %91 = vector.extract_strided_slice %86 {offsets = [12, 0], sizes = [4, 512], strides = [1, 1]} : vector<58x512xbf16> to vector<4x512xbf16>
    %c8_87 = arith.constant 8 : index
    %c0_88 = arith.constant 0 : index
    %92 = vector.load %arg7[%c8_87, %c0_88] : memref<32x512xbf16, #tpu.memory_space<vmem>>, vector<4x512xbf16>
    tpu.vector_store %arg7[%c8_87, %c0_88], %91 {strides = array<i32>} : memref<32x512xbf16, #tpu.memory_space<vmem>>, vector<4x512xbf16>,
    %93 = vector.extract_strided_slice %86 {offsets = [18, 0], sizes = [4, 512], strides = [1, 1]} : vector<58x512xbf16> to vector<4x512xbf16>
    %c12_89 = arith.constant 12 : index
    %c0_90 = arith.constant 0 : index
    %94 = vector.load %arg7[%c12_89, %c0_90] : memref<32x512xbf16, #tpu.memory_space<vmem>>, vector<4x512xbf16>
    tpu.vector_store %arg7[%c12_89, %c0_90], %93 {strides = array<i32>} : memref<32x512xbf16, #tpu.memory_space<vmem>>, vector<4x512xbf16>,
    %95 = vector.extract_strided_slice %86 {offsets = [36, 0], sizes = [4, 512], strides = [1, 1]} : vector<58x512xbf16> to vector<4x512xbf16>
    %c16 = arith.constant 16 : index
    %c0_91 = arith.constant 0 : index
    %96 = vector.load %arg7[%c16, %c0_91] : memref<32x512xbf16, #tpu.memory_space<vmem>>, vector<4x512xbf16>
    tpu.vector_store %arg7[%c16, %c0_91], %95 {strides = array<i32>} : memref<32x512xbf16, #tpu.memory_space<vmem>>, vector<4x512xbf16>,
    %97 = vector.extract_strided_slice %86 {offsets = [42, 0], sizes = [4, 512], strides = [1, 1]} : vector<58x512xbf16> to vector<4x512xbf16>
    %c20 = arith.constant 20 : index
    %c0_92 = arith.constant 0 : index
    %98 = vector.load %arg7[%c20, %c0_92] : memref<32x512xbf16, #tpu.memory_space<vmem>>, vector<4x512xbf16>
    tpu.vector_store %arg7[%c20, %c0_92], %97 {strides = array<i32>} : memref<32x512xbf16, #tpu.memory_space<vmem>>, vector<4x512xbf16>,
    %99 = vector.extract_strided_slice %86 {offsets = [48, 0], sizes = [4, 512], strides = [1, 1]} : vector<58x512xbf16> to vector<4x512xbf16>
    %c24 = arith.constant 24 : index
    %c0_93 = arith.constant 0 : index
    %100 = vector.load %arg7[%c24, %c0_93] : memref<32x512xbf16, #tpu.memory_space<vmem>>, vector<4x512xbf16>
    tpu.vector_store %arg7[%c24, %c0_93], %99 {strides = array<i32>} : memref<32x512xbf16, #tpu.memory_space<vmem>>, vector<4x512xbf16>,
    %101 = vector.extract_strided_slice %86 {offsets = [54, 0], sizes = [4, 512], strides = [1, 1]} : vector<58x512xbf16> to vector<4x512xbf16>
    %c28 = arith.constant 28 : index
    %c0_94 = arith.constant 0 : index
    %102 = vector.load %arg7[%c28, %c0_94] : memref<32x512xbf16, #tpu.memory_space<vmem>>, vector<4x512xbf16>
    tpu.vector_store %arg7[%c28, %c0_94], %101 {strides = array<i32>} : memref<32x512xbf16, #tpu.memory_space<vmem>>, vector<4x512xbf16>,
    return
  }
}

module attributes {stable_mosaic.version = 11 : i64} {
  func.func @_bottleneck_kernel(%arg0: memref<8x512xbf16, #tpu.memory_space<vmem>>, %arg1: memref<512x256xbf16, #tpu.memory_space<vmem>>, %arg2: memref<1x256xf32, #tpu.memory_space<vmem>>, %arg3: memref<3x3x256x256xbf16, #tpu.memory_space<vmem>>, %arg4: memref<1x256xf32, #tpu.memory_space<vmem>>, %arg5: memref<256x1024xbf16, #tpu.memory_space<vmem>>, %arg6: memref<1x1024xf32, #tpu.memory_space<vmem>>, %arg7: memref<8x1024xbf16, #tpu.memory_space<vmem>>, %arg8: memref<32x256xbf16, #tpu.memory_space<vmem>>) attributes {dimension_semantics = [], scalar_prefetch = 0 : i64, scratch_operands = 1 : i64, tpu.core_type = #tpu.core_type<tc>} {
    %c0 = arith.constant 0 : index
    %c0_0 = arith.constant 0 : index
    %0 = vector.load %arg0[%c0, %c0_0] : memref<8x512xbf16, #tpu.memory_space<vmem>>, vector<8x512xbf16>
    %c0_1 = arith.constant 0 : index
    %c0_2 = arith.constant 0 : index
    %1 = vector.load %arg1[%c0_1, %c0_2] : memref<512x256xbf16, #tpu.memory_space<vmem>>, vector<512x256xbf16>
    %cst = arith.constant dense<0.000000e+00> : vector<8x256xf32>
    %2 = tpu.matmul %0, %1, %cst {dimension_numbers = #tpu.dot_dimension_numbers<[1], [0], [0], [1], [0, 0, 1, 1], [], []>} : vector<8x512xbf16>, vector<512x256xbf16>, vector<8x256xf32> -> vector<8x256xf32>
    %c0_3 = arith.constant 0 : index
    %c0_4 = arith.constant 0 : index
    %3 = vector.load %arg2[%c0_3, %c0_4] : memref<1x256xf32, #tpu.memory_space<vmem>>, vector<1x256xf32>
    %4 = vector.broadcast %3 : vector<1x256xf32> to vector<8x256xf32>
    %5 = arith.addf %2, %4 : vector<8x256xf32>
    %cst_5 = arith.constant 0.000000e+00 : f32
    %6 = vector.broadcast %cst_5 : f32 to vector<8x256xf32>
    %7 = arith.maximumf %5, %6 : vector<8x256xf32>
    %8 = arith.truncf %7 : vector<8x256xf32> to vector<8x256xbf16>
    %cst_6 = arith.constant 0.000000e+00 : bf16
    %9 = vector.broadcast %cst_6 : bf16 to vector<32x256xbf16>
    %c0_7 = arith.constant 0 : index
    %c0_8 = arith.constant 0 : index
    %10 = vector.load %arg8[%c0_7, %c0_8] : memref<32x256xbf16, #tpu.memory_space<vmem>>, vector<32x256xbf16>
    tpu.vector_store %arg8[%c0_7, %c0_8], %9 {strides = array<i32>} : memref<32x256xbf16, #tpu.memory_space<vmem>>, vector<32x256xbf16>,
    %11 = vector.extract_strided_slice %8 {offsets = [0, 0], sizes = [2, 256], strides = [1, 1]} : vector<8x256xbf16> to vector<2x256xbf16>
    %c5 = arith.constant 5 : index
    %c0_9 = arith.constant 0 : index
    %12 = vector.load %arg8[%c5, %c0_9] : memref<32x256xbf16, #tpu.memory_space<vmem>>, vector<2x256xbf16>
    tpu.vector_store %arg8[%c5, %c0_9], %11 {strides = array<i32>} : memref<32x256xbf16, #tpu.memory_space<vmem>>, vector<2x256xbf16>,
    %13 = vector.extract_strided_slice %8 {offsets = [2, 0], sizes = [2, 256], strides = [1, 1]} : vector<8x256xbf16> to vector<2x256xbf16>
    %c9 = arith.constant 9 : index
    %c0_10 = arith.constant 0 : index
    %14 = vector.load %arg8[%c9, %c0_10] : memref<32x256xbf16, #tpu.memory_space<vmem>>, vector<2x256xbf16>
    tpu.vector_store %arg8[%c9, %c0_10], %13 {strides = array<i32>} : memref<32x256xbf16, #tpu.memory_space<vmem>>, vector<2x256xbf16>,
    %15 = vector.extract_strided_slice %8 {offsets = [4, 0], sizes = [2, 256], strides = [1, 1]} : vector<8x256xbf16> to vector<2x256xbf16>
    %c21 = arith.constant 21 : index
    %c0_11 = arith.constant 0 : index
    %16 = vector.load %arg8[%c21, %c0_11] : memref<32x256xbf16, #tpu.memory_space<vmem>>, vector<2x256xbf16>
    tpu.vector_store %arg8[%c21, %c0_11], %15 {strides = array<i32>} : memref<32x256xbf16, #tpu.memory_space<vmem>>, vector<2x256xbf16>,
    %17 = vector.extract_strided_slice %8 {offsets = [6, 0], sizes = [2, 256], strides = [1, 1]} : vector<8x256xbf16> to vector<2x256xbf16>
    %c25 = arith.constant 25 : index
    %c0_12 = arith.constant 0 : index
    %18 = vector.load %arg8[%c25, %c0_12] : memref<32x256xbf16, #tpu.memory_space<vmem>>, vector<2x256xbf16>
    tpu.vector_store %arg8[%c25, %c0_12], %17 {strides = array<i32>} : memref<32x256xbf16, #tpu.memory_space<vmem>>, vector<2x256xbf16>,
    %cst_13 = arith.constant 0.000000e+00 : f32
    %19 = vector.broadcast %cst_13 : f32 to vector<22x256xf32>
    %c0_14 = arith.constant 0 : index
    %c0_15 = arith.constant 0 : index
    %20 = vector.load %arg8[%c0_14, %c0_15] : memref<32x256xbf16, #tpu.memory_space<vmem>>, vector<22x256xbf16>
    %c0_16 = arith.constant 0 : index
    %c0_17 = arith.constant 0 : index
    %c0_18 = arith.constant 0 : index
    %c0_19 = arith.constant 0 : index
    %21 = vector.load %arg3[%c0_16, %c0_17, %c0_18, %c0_19] : memref<3x3x256x256xbf16, #tpu.memory_space<vmem>>, vector<1x1x256x256xbf16>
    %22 = vector.shape_cast %21 : vector<1x1x256x256xbf16> to vector<256x256xbf16>
    %cst_20 = arith.constant dense<0.000000e+00> : vector<22x256xf32>
    %23 = tpu.matmul %20, %22, %cst_20 {dimension_numbers = #tpu.dot_dimension_numbers<[1], [0], [0], [1], [0, 0, 1, 1], [], []>} : vector<22x256xbf16>, vector<256x256xbf16>, vector<22x256xf32> -> vector<22x256xf32>
    %24 = arith.addf %19, %23 : vector<22x256xf32>
    %c1 = arith.constant 1 : index
    %c0_21 = arith.constant 0 : index
    %25 = vector.load %arg8[%c1, %c0_21] : memref<32x256xbf16, #tpu.memory_space<vmem>>, vector<22x256xbf16>
    %c0_22 = arith.constant 0 : index
    %c1_23 = arith.constant 1 : index
    %c0_24 = arith.constant 0 : index
    %c0_25 = arith.constant 0 : index
    %26 = vector.load %arg3[%c0_22, %c1_23, %c0_24, %c0_25] : memref<3x3x256x256xbf16, #tpu.memory_space<vmem>>, vector<1x1x256x256xbf16>
    %27 = vector.shape_cast %26 : vector<1x1x256x256xbf16> to vector<256x256xbf16>
    %cst_26 = arith.constant dense<0.000000e+00> : vector<22x256xf32>
    %28 = tpu.matmul %25, %27, %cst_26 {dimension_numbers = #tpu.dot_dimension_numbers<[1], [0], [0], [1], [0, 0, 1, 1], [], []>} : vector<22x256xbf16>, vector<256x256xbf16>, vector<22x256xf32> -> vector<22x256xf32>
    %29 = arith.addf %24, %28 : vector<22x256xf32>
    %c2 = arith.constant 2 : index
    %c0_27 = arith.constant 0 : index
    %30 = vector.load %arg8[%c2, %c0_27] : memref<32x256xbf16, #tpu.memory_space<vmem>>, vector<22x256xbf16>
    %c0_28 = arith.constant 0 : index
    %c2_29 = arith.constant 2 : index
    %c0_30 = arith.constant 0 : index
    %c0_31 = arith.constant 0 : index
    %31 = vector.load %arg3[%c0_28, %c2_29, %c0_30, %c0_31] : memref<3x3x256x256xbf16, #tpu.memory_space<vmem>>, vector<1x1x256x256xbf16>
    %32 = vector.shape_cast %31 : vector<1x1x256x256xbf16> to vector<256x256xbf16>
    %cst_32 = arith.constant dense<0.000000e+00> : vector<22x256xf32>
    %33 = tpu.matmul %30, %32, %cst_32 {dimension_numbers = #tpu.dot_dimension_numbers<[1], [0], [0], [1], [0, 0, 1, 1], [], []>} : vector<22x256xbf16>, vector<256x256xbf16>, vector<22x256xf32> -> vector<22x256xf32>
    %34 = arith.addf %29, %33 : vector<22x256xf32>
    %c4 = arith.constant 4 : index
    %c0_33 = arith.constant 0 : index
    %35 = vector.load %arg8[%c4, %c0_33] : memref<32x256xbf16, #tpu.memory_space<vmem>>, vector<22x256xbf16>
    %c1_34 = arith.constant 1 : index
    %c0_35 = arith.constant 0 : index
    %c0_36 = arith.constant 0 : index
    %c0_37 = arith.constant 0 : index
    %36 = vector.load %arg3[%c1_34, %c0_35, %c0_36, %c0_37] : memref<3x3x256x256xbf16, #tpu.memory_space<vmem>>, vector<1x1x256x256xbf16>
    %37 = vector.shape_cast %36 : vector<1x1x256x256xbf16> to vector<256x256xbf16>
    %cst_38 = arith.constant dense<0.000000e+00> : vector<22x256xf32>
    %38 = tpu.matmul %35, %37, %cst_38 {dimension_numbers = #tpu.dot_dimension_numbers<[1], [0], [0], [1], [0, 0, 1, 1], [], []>} : vector<22x256xbf16>, vector<256x256xbf16>, vector<22x256xf32> -> vector<22x256xf32>
    %39 = arith.addf %34, %38 : vector<22x256xf32>
    %c5_39 = arith.constant 5 : index
    %c0_40 = arith.constant 0 : index
    %40 = vector.load %arg8[%c5_39, %c0_40] : memref<32x256xbf16, #tpu.memory_space<vmem>>, vector<22x256xbf16>
    %c1_41 = arith.constant 1 : index
    %c1_42 = arith.constant 1 : index
    %c0_43 = arith.constant 0 : index
    %c0_44 = arith.constant 0 : index
    %41 = vector.load %arg3[%c1_41, %c1_42, %c0_43, %c0_44] : memref<3x3x256x256xbf16, #tpu.memory_space<vmem>>, vector<1x1x256x256xbf16>
    %42 = vector.shape_cast %41 : vector<1x1x256x256xbf16> to vector<256x256xbf16>
    %cst_45 = arith.constant dense<0.000000e+00> : vector<22x256xf32>
    %43 = tpu.matmul %40, %42, %cst_45 {dimension_numbers = #tpu.dot_dimension_numbers<[1], [0], [0], [1], [0, 0, 1, 1], [], []>} : vector<22x256xbf16>, vector<256x256xbf16>, vector<22x256xf32> -> vector<22x256xf32>
    %44 = arith.addf %39, %43 : vector<22x256xf32>
    %c6 = arith.constant 6 : index
    %c0_46 = arith.constant 0 : index
    %45 = vector.load %arg8[%c6, %c0_46] : memref<32x256xbf16, #tpu.memory_space<vmem>>, vector<22x256xbf16>
    %c1_47 = arith.constant 1 : index
    %c2_48 = arith.constant 2 : index
    %c0_49 = arith.constant 0 : index
    %c0_50 = arith.constant 0 : index
    %46 = vector.load %arg3[%c1_47, %c2_48, %c0_49, %c0_50] : memref<3x3x256x256xbf16, #tpu.memory_space<vmem>>, vector<1x1x256x256xbf16>
    %47 = vector.shape_cast %46 : vector<1x1x256x256xbf16> to vector<256x256xbf16>
    %cst_51 = arith.constant dense<0.000000e+00> : vector<22x256xf32>
    %48 = tpu.matmul %45, %47, %cst_51 {dimension_numbers = #tpu.dot_dimension_numbers<[1], [0], [0], [1], [0, 0, 1, 1], [], []>} : vector<22x256xbf16>, vector<256x256xbf16>, vector<22x256xf32> -> vector<22x256xf32>
    %49 = arith.addf %44, %48 : vector<22x256xf32>
    %c8 = arith.constant 8 : index
    %c0_52 = arith.constant 0 : index
    %50 = vector.load %arg8[%c8, %c0_52] : memref<32x256xbf16, #tpu.memory_space<vmem>>, vector<22x256xbf16>
    %c2_53 = arith.constant 2 : index
    %c0_54 = arith.constant 0 : index
    %c0_55 = arith.constant 0 : index
    %c0_56 = arith.constant 0 : index
    %51 = vector.load %arg3[%c2_53, %c0_54, %c0_55, %c0_56] : memref<3x3x256x256xbf16, #tpu.memory_space<vmem>>, vector<1x1x256x256xbf16>
    %52 = vector.shape_cast %51 : vector<1x1x256x256xbf16> to vector<256x256xbf16>
    %cst_57 = arith.constant dense<0.000000e+00> : vector<22x256xf32>
    %53 = tpu.matmul %50, %52, %cst_57 {dimension_numbers = #tpu.dot_dimension_numbers<[1], [0], [0], [1], [0, 0, 1, 1], [], []>} : vector<22x256xbf16>, vector<256x256xbf16>, vector<22x256xf32> -> vector<22x256xf32>
    %54 = arith.addf %49, %53 : vector<22x256xf32>
    %c9_58 = arith.constant 9 : index
    %c0_59 = arith.constant 0 : index
    %55 = vector.load %arg8[%c9_58, %c0_59] : memref<32x256xbf16, #tpu.memory_space<vmem>>, vector<22x256xbf16>
    %c2_60 = arith.constant 2 : index
    %c1_61 = arith.constant 1 : index
    %c0_62 = arith.constant 0 : index
    %c0_63 = arith.constant 0 : index
    %56 = vector.load %arg3[%c2_60, %c1_61, %c0_62, %c0_63] : memref<3x3x256x256xbf16, #tpu.memory_space<vmem>>, vector<1x1x256x256xbf16>
    %57 = vector.shape_cast %56 : vector<1x1x256x256xbf16> to vector<256x256xbf16>
    %cst_64 = arith.constant dense<0.000000e+00> : vector<22x256xf32>
    %58 = tpu.matmul %55, %57, %cst_64 {dimension_numbers = #tpu.dot_dimension_numbers<[1], [0], [0], [1], [0, 0, 1, 1], [], []>} : vector<22x256xbf16>, vector<256x256xbf16>, vector<22x256xf32> -> vector<22x256xf32>
    %59 = arith.addf %54, %58 : vector<22x256xf32>
    %c10 = arith.constant 10 : index
    %c0_65 = arith.constant 0 : index
    %60 = vector.load %arg8[%c10, %c0_65] : memref<32x256xbf16, #tpu.memory_space<vmem>>, vector<22x256xbf16>
    %c2_66 = arith.constant 2 : index
    %c2_67 = arith.constant 2 : index
    %c0_68 = arith.constant 0 : index
    %c0_69 = arith.constant 0 : index
    %61 = vector.load %arg3[%c2_66, %c2_67, %c0_68, %c0_69] : memref<3x3x256x256xbf16, #tpu.memory_space<vmem>>, vector<1x1x256x256xbf16>
    %62 = vector.shape_cast %61 : vector<1x1x256x256xbf16> to vector<256x256xbf16>
    %cst_70 = arith.constant dense<0.000000e+00> : vector<22x256xf32>
    %63 = tpu.matmul %60, %62, %cst_70 {dimension_numbers = #tpu.dot_dimension_numbers<[1], [0], [0], [1], [0, 0, 1, 1], [], []>} : vector<22x256xbf16>, vector<256x256xbf16>, vector<22x256xf32> -> vector<22x256xf32>
    %64 = arith.addf %59, %63 : vector<22x256xf32>
    %c0_71 = arith.constant 0 : index
    %c0_72 = arith.constant 0 : index
    %65 = vector.load %arg4[%c0_71, %c0_72] : memref<1x256xf32, #tpu.memory_space<vmem>>, vector<1x256xf32>
    %66 = vector.broadcast %65 : vector<1x256xf32> to vector<22x256xf32>
    %67 = arith.addf %64, %66 : vector<22x256xf32>
    %cst_73 = arith.constant 0.000000e+00 : f32
    %68 = vector.broadcast %cst_73 : f32 to vector<22x256xf32>
    %69 = arith.maximumf %67, %68 : vector<22x256xf32>
    %70 = arith.truncf %69 : vector<22x256xf32> to vector<22x256xbf16>
    %c0_74 = arith.constant 0 : index
    %c0_75 = arith.constant 0 : index
    %71 = vector.load %arg5[%c0_74, %c0_75] : memref<256x1024xbf16, #tpu.memory_space<vmem>>, vector<256x1024xbf16>
    %cst_76 = arith.constant dense<0.000000e+00> : vector<22x1024xf32>
    %72 = tpu.matmul %70, %71, %cst_76 {dimension_numbers = #tpu.dot_dimension_numbers<[1], [0], [0], [1], [0, 0, 1, 1], [], []>} : vector<22x256xbf16>, vector<256x1024xbf16>, vector<22x1024xf32> -> vector<22x1024xf32>
    %c0_77 = arith.constant 0 : index
    %c0_78 = arith.constant 0 : index
    %73 = vector.load %arg6[%c0_77, %c0_78] : memref<1x1024xf32, #tpu.memory_space<vmem>>, vector<1x1024xf32>
    %74 = vector.broadcast %73 : vector<1x1024xf32> to vector<22x1024xf32>
    %75 = arith.addf %72, %74 : vector<22x1024xf32>
    %cst_79 = arith.constant 0.000000e+00 : f32
    %76 = vector.broadcast %cst_79 : f32 to vector<22x1024xf32>
    %77 = arith.maximumf %75, %76 : vector<22x1024xf32>
    %78 = arith.truncf %77 : vector<22x1024xf32> to vector<22x1024xbf16>
    %79 = vector.extract_strided_slice %78 {offsets = [0, 0], sizes = [2, 1024], strides = [1, 1]} : vector<22x1024xbf16> to vector<2x1024xbf16>
    %c0_80 = arith.constant 0 : index
    %c0_81 = arith.constant 0 : index
    %80 = vector.load %arg7[%c0_80, %c0_81] : memref<8x1024xbf16, #tpu.memory_space<vmem>>, vector<2x1024xbf16>
    tpu.vector_store %arg7[%c0_80, %c0_81], %79 {strides = array<i32>} : memref<8x1024xbf16, #tpu.memory_space<vmem>>, vector<2x1024xbf16>,
    %81 = vector.extract_strided_slice %78 {offsets = [4, 0], sizes = [2, 1024], strides = [1, 1]} : vector<22x1024xbf16> to vector<2x1024xbf16>
    %c2_82 = arith.constant 2 : index
    %c0_83 = arith.constant 0 : index
    %82 = vector.load %arg7[%c2_82, %c0_83] : memref<8x1024xbf16, #tpu.memory_space<vmem>>, vector<2x1024xbf16>
    tpu.vector_store %arg7[%c2_82, %c0_83], %81 {strides = array<i32>} : memref<8x1024xbf16, #tpu.memory_space<vmem>>, vector<2x1024xbf16>,
    %83 = vector.extract_strided_slice %78 {offsets = [16, 0], sizes = [2, 1024], strides = [1, 1]} : vector<22x1024xbf16> to vector<2x1024xbf16>
    %c4_84 = arith.constant 4 : index
    %c0_85 = arith.constant 0 : index
    %84 = vector.load %arg7[%c4_84, %c0_85] : memref<8x1024xbf16, #tpu.memory_space<vmem>>, vector<2x1024xbf16>
    tpu.vector_store %arg7[%c4_84, %c0_85], %83 {strides = array<i32>} : memref<8x1024xbf16, #tpu.memory_space<vmem>>, vector<2x1024xbf16>,
    %85 = vector.extract_strided_slice %78 {offsets = [20, 0], sizes = [2, 1024], strides = [1, 1]} : vector<22x1024xbf16> to vector<2x1024xbf16>
    %c6_86 = arith.constant 6 : index
    %c0_87 = arith.constant 0 : index
    %86 = vector.load %arg7[%c6_86, %c0_87] : memref<8x1024xbf16, #tpu.memory_space<vmem>>, vector<2x1024xbf16>
    tpu.vector_store %arg7[%c6_86, %c0_87], %85 {strides = array<i32>} : memref<8x1024xbf16, #tpu.memory_space<vmem>>, vector<2x1024xbf16>,
    return
  }
}

</mosaic_0001>

<bundles_post_ra>
// kernel: resnet50_forward.4
= control target key start
LH: loop header
LB: loop body
LE: loop exit
PB: predicated region body
PF: predicated region fallthrough
CT: control target
= control target key end

     0   :  { %s1350_s12 = smov 0   ;;  %s1352_s13 = smov 0   ;;  %s1522_s0 = inlined_call_operand.vmem [shape: bf16[512,147], index: 0, kind: input, shape index: {}]   ;;  %s1523_s1 = inlined_call_operand.vmem [shape: bf16[147,128], index: 1, kind: input, shape index: {}]   ;;  %s1524_s2 = inlined_call_operand.vmem [shape: f32[1,128], index: 2, kind: input, shape index: {}]   ;;  %s1525_s3 = inlined_call_operand.vmem [shape: bf16[512,128], index: 3, kind: output, shape index: {}]  }
   0x1   :  { %s1354_s14 = smov 0  }
   0x2 LB: > { %s22_s15 = sadd.s32 1, %s1322_s13  ;;  %p973_p0 = scmp.ge.s32.totalorder %s1326_s14, 1  ;;  %s1326_s14 = sphi %s1354_s14, %s13_s14   ;;  %s1322_s13 = sphi %s1352_s13, %s1527_s13   ;;  %s1318_s12 = sphi %s1350_s12, %s1526_s12  }
   0x3   : > { %p23_p1 = scmp.ge.s32.totalorder %s22_s15, 2  ;;  %p170_p2 = scmp.lt.s32.totalorder %s1326_s14, 3 }
   0x5   : > { %s1529_s15 = smov (%p23_p1, %s22_s15), 0  ;;  %p171_p3 = pnand %p973_p0, %p170_p2 }
   0x6   : > { %v1246_v0 = vld [vmem:[%s1523_s1] sm:$0xff] (!%p171_p3)   ;;  %v1328_v1 = vmov (!%p171_p3), 0   ;;  %v1247_v2 = vld [vmem:[%s1523_s1 + $0x8] sm:$0xff] (!%p171_p3)   ;;  %v1248_v3 = vld [vmem:[%s1523_s1 + $0x10] sm:$0xff] (!%p171_p3)   ;;  %s974_s22 = sshll.u32 (!%p171_p3), %s1318_s12, 5  ;;  %vm488_vm0 = vcmask (!%p171_p3), 154624  }
   0x7   : > { %174 = sbr.rel (%p171_p3) target bundleno = 322 (0x142), region = 32  ;;  %544 = vmatprep.subr.bf16.mxu0 (!%p171_p3), %v1328_v1  ;;  %1200 = vmatprep.subr.bf16.mxu1 (!%p171_p3), %v1328_v1  ;;  %p206_p4 = scmp.lt.s32.totalorder (!%p171_p3), %s974_s22, 63  ;;  %v1249_v4 = vld [vmem:[%s1523_s1 + $0x18] sm:$0xff] (!%p171_p3)   ;;  %v1250_v5 = vld [vmem:[%s1523_s1 + $0x20] sm:$0xff] (!%p171_p3)   ;;  %v1251_v8 = vld [vmem:[%s1523_s1 + $0x28] sm:$0xff] (!%p171_p3)   ;;  %vm537_vm1 = vcmask (!%p171_p3), 1040384  }
   0x8   : > { %545 = vmatpush1.bf16.msra.mxu0 (!%p171_p3), %v1246_v0  ;;  %1210 = vmatpush1.bf16.msra.mxu1 (!%p171_p3), %v1246_v0  ;;  %v1252_v9 = vld [vmem:[%s1523_s1 + $0x30] sm:$0xff] (!%p171_p3)   ;;  %v1253_v10 = vld [vmem:[%s1523_s1 + $0x38] sm:$0xff] (!%p171_p3)   ;;  %vm538_vm2 = vcmask (!%p171_p3), 1041408   ;;  %v1329_v11 = vmov (!%p171_p3), 65535   ;;  %v1254_v13 = vld [vmem:[%s1523_s1 + $0x40] sm:$0xff] (!%p171_p3)  }
   0x9   : > { %546 = vmatprep.subr.bf16.mxu0 (!%p171_p3), %v1328_v1  ;;  %1201 = vmatprep.subr.bf16.mxu1 (!%p171_p3), %v1328_v1  ;;  %v539_v12 = vsel (!%p171_p3), %vm537_vm1, 4294967295, %v1329_v11  ;;  %v1255_v14 = vld [vmem:[%s1523_s1 + $0x48] ss:$0 sps:$4 sm:$0x33] (!%p171_p3)   ;;  %v1457_v47 = vld [vmem:[%s1524_s2] ss:$0 sm:$0xff] (!%p171_p3) }
   0xa   : > { %v540_v15 = vsel (!%p171_p3), %vm538_vm2, %v539_v12, 0 }
   0xb   : > { %v542_v16 = vand.u32 (!%p171_p3), %v1255_v14, %v540_v15 }
   0xc   : > { %547 = vmatpush1.bf16.msra.mxu0 (!%p171_p3), %v1247_v2  ;;  %1211 = vmatpush1.bf16.msra.mxu1 (!%p171_p3), %v1247_v2 }
   0xd   : > { %548 = vmatprep.subr.bf16.mxu0 (!%p171_p3), %v1328_v1  ;;  %1202 = vmatprep.subr.bf16.mxu1 (!%p171_p3), %v1328_v1 }
   0xe   : > { %s1531_s22 = smov (!%p206_p4, %s974_s22), 63 }
   0xf   : > { %s1072_s25 = sshll.u32 %s1531_s22, 3  ;;  %s978_s19 = sshll.u32 %s1531_s22, 2 }
  0x10   : > { %549 = vmatpush1.bf16.msra.mxu0 %v1248_v3  ;;  %1212 = vmatpush1.bf16.msra.mxu1 %v1248_v3  ;;  %s1386_s28 = scalar_lea.vmem %s1522_s0, %s1072_s25  ;;  %s1467_s23 = scalar_lea.vmem %s1525_s3, %s978_s19 }
  0x11   : > { %550 = vmatprep.subr.bf16.mxu0 %v1328_v1  ;;  %1203 = vmatprep.subr.bf16.mxu1 %v1328_v1  ;;  %v1258_v6 = vld [vmem:[%s1386_s28 + $0x4] ss:$8 sps:$4 sm:$0xff]   ;;  %v1256_v17 = vld [vmem:[%s1386_s28] ss:$8 sps:$4 sm:$0xff]   ;;  %v1262_v19 = vld [vmem:[%s1386_s28 + $0x14] ss:$8 sps:$4 sm:$0xff]  }
  0x12   : > { %v1261_v7 = vld [vmem:[%s1386_s28 + $0x84] ss:$8 sps:$4 sm:$0xff]   ;;  %1022 = vmatprep.mubr.msk.bf16.mxu0 %vm488_vm0, %v1258_v6  ;;  %v1259_v18 = vld [vmem:[%s1386_s28 + $0x80] ss:$8 sps:$4 sm:$0xff]   ;;  %v1264_v20 = vld [vmem:[%s1386_s28 + $0x94] ss:$8 sps:$4 sm:$0xff]  }
  0x13   : > { %1030 = vmatprep.mubr.msk.bf16.mxu1 %vm488_vm0, %v1261_v7  ;;  %v1266_v21 = vld [vmem:[%s1386_s28 + $0x10] ss:$8 sps:$4 sm:$0xff]   ;;  %v1268_v23 = vld [vmem:[%s1386_s28 + $0x24] ss:$8 sps:$4 sm:$0xff]   ;;  %v1272_v25 = vld [vmem:[%s1386_s28 + $0x20] ss:$8 sps:$4 sm:$0xff]  }
  0x14   : > { %551 = vmatpush1.bf16.msra.mxu0 %v1249_v4  ;;  %1213 = vmatpush1.bf16.msra.mxu1 %v1249_v4  ;;  %v1267_v22 = vld [vmem:[%s1386_s28 + $0x90] ss:$8 sps:$4 sm:$0xff]   ;;  %v1270_v24 = vld [vmem:[%s1386_s28 + $0xa4] ss:$8 sps:$4 sm:$0xff]   ;;  %v1273_v26 = vld [vmem:[%s1386_s28 + $0xa0] ss:$8 sps:$4 sm:$0xff]  }
  0x15   : > { %552 = vmatprep.subr.bf16.mxu0 %v1328_v1  ;;  %1204 = vmatprep.subr.bf16.mxu1 %v1328_v1  ;;  %v1274_v27 = vld [vmem:[%s1386_s28 + $0x34] ss:$8 sps:$4 sm:$0xff]   ;;  %v1278_v29 = vld [vmem:[%s1386_s28 + $0x30] ss:$8 sps:$4 sm:$0xff]   ;;  %v1280_v31 = vld [vmem:[%s1386_s28 + $0x44] ss:$8 sps:$4 sm:$0xff]  }
  0x16   : > { %v1276_v28 = vld [vmem:[%s1386_s28 + $0xb4] ss:$8 sps:$4 sm:$0xff]   ;;  %v1279_v30 = vld [vmem:[%s1386_s28 + $0xb0] ss:$8 sps:$4 sm:$0xff]   ;;  %v1282_v32 = vld [vmem:[%s1386_s28 + $0xc4] ss:$8 sps:$4 sm:$0xff]  }
  0x17   : > { %v1284_v33 = vld [vmem:[%s1386_s28 + $0x40] ss:$8 sps:$4 sm:$0xff]   ;;  %v1286_v35 = vld [vmem:[%s1386_s28 + $0x54] ss:$8 sps:$4 sm:$0xff]   ;;  %v1290_v37 = vld [vmem:[%s1386_s28 + $0x50] ss:$8 sps:$4 sm:$0xff]  }
  0x18   : > { %553 = vmatpush1.bf16.msra.mxu0 %v1250_v5  ;;  %1214 = vmatpush1.bf16.msra.mxu1 %v1250_v5  ;;  %v1285_v34 = vld [vmem:[%s1386_s28 + $0xc0] ss:$8 sps:$4 sm:$0xff]   ;;  %v1288_v36 = vld [vmem:[%s1386_s28 + $0xd4] ss:$8 sps:$4 sm:$0xff]   ;;  %v1291_v38 = vld [vmem:[%s1386_s28 + $0xd0] ss:$8 sps:$4 sm:$0xff]  }
  0x19   : > { %554 = vmatprep.subr.bf16.mxu0 %v1328_v1  ;;  %1205 = vmatprep.subr.bf16.mxu1 %v1328_v1  ;;  %v1292_v39 = vld [vmem:[%s1386_s28 + $0x64] ss:$8 sps:$4 sm:$0xff]   ;;  %v1296_v41 = vld [vmem:[%s1386_s28 + $0x60] ss:$8 sps:$4 sm:$0xff]   ;;  %v1298_v43 = vld [vmem:[%s1386_s28 + $0x74] ss:$8 sps:$4 sm:$0xff]  }
  0x1a   : > { %v1294_v40 = vld [vmem:[%s1386_s28 + $0xe4] ss:$8 sps:$4 sm:$0xff]   ;;  %v1297_v42 = vld [vmem:[%s1386_s28 + $0xe0] ss:$8 sps:$4 sm:$0xff]   ;;  %v1300_v44 = vld [vmem:[%s1386_s28 + $0xf4] ss:$8 sps:$4 sm:$0xff]  }
  0x1b   : > { %v1302_v45 = vld [vmem:[%s1386_s28 + $0x70] ss:$8 sps:$4 sm:$0xff]  }
  0x1c   : > { %555 = vmatpush1.bf16.msra.mxu0 %v1251_v8  ;;  %1215 = vmatpush1.bf16.msra.mxu1 %v1251_v8  ;;  %v1303_v46 = vld [vmem:[%s1386_s28 + $0xf0] ss:$8 sps:$4 sm:$0xff]  }
  0x1d   : > { %556 = vmatprep.subr.bf16.mxu0 %v1328_v1  ;;  %1206 = vmatprep.subr.bf16.mxu1 %v1328_v1 }
  0x20   : > { %557 = vmatpush1.bf16.msra.mxu0 %v1252_v9  ;;  %1216 = vmatpush1.bf16.msra.mxu1 %v1252_v9 }
  0x21   : > { %558 = vmatprep.subr.bf16.mxu0 %v1328_v1  ;;  %1207 = vmatprep.subr.bf16.mxu1 %v1328_v1 }
  0x24   : > { %559 = vmatpush1.bf16.msra.mxu0 %v1253_v10  ;;  %1217 = vmatpush1.bf16.msra.mxu1 %v1253_v10 }
  0x25   : > { %560 = vmatprep.subr.bf16.mxu0 %v1328_v1  ;;  %1208 = vmatprep.subr.bf16.mxu1 %v1328_v1 }
  0x28   : > { %561 = vmatpush1.bf16.msra.mxu0 %v1254_v13  ;;  %1218 = vmatpush1.bf16.msra.mxu1 %v1254_v13 }
  0x29   : > { %562 = vmatprep.subr.bf16.mxu0 %v1328_v1  ;;  %1209 = vmatprep.subr.bf16.mxu1 %v1328_v1 }
  0x2c   : > { %563 = vmatpush1.bf16.msra.mxu0 %v542_v16  ;;  %1219 = vmatpush1.bf16.msra.mxu1 %v542_v16 }
  0x2f   : > { %577 = vmatmul.mubr.bf16.vlgmr.msra.gmra.mrb[0].mxu0 %v1256_v17  ;;  %641 = vmatmul.mubr.bf16.vlgmr.msra.gmra.mrb[0].mxu1 %v1259_v18 }
  0x30   : > { %1023 = vmatprep.mubr.msk.bf16.mxu0 %vm488_vm0, %v1262_v19  ;;  %1031 = vmatprep.mubr.msk.bf16.mxu1 %vm488_vm0, %v1264_v20 }
  0x37   : > { %585 = vmatmul.mubr.bf16.gmra.mrb[4].mxu0 %v1266_v21  ;;  %649 = vmatmul.mubr.bf16.gmra.mrb[4].mxu1 %v1267_v22 }
  0x38   : > { %1024 = vmatprep.mubr.msk.bf16.mxu0 %vm488_vm0, %v1268_v23  ;;  %1032 = vmatprep.mubr.msk.bf16.mxu1 %vm488_vm0, %v1270_v24 }
  0x3f   : > { %593 = vmatmul.mubr.bf16.gmra.mrb[8].mxu0 %v1272_v25  ;;  %657 = vmatmul.mubr.bf16.gmra.mrb[8].mxu1 %v1273_v26 }
  0x40   : > { %1025 = vmatprep.mubr.msk.bf16.mxu0 %vm488_vm0, %v1274_v27  ;;  %1033 = vmatprep.mubr.msk.bf16.mxu1 %vm488_vm0, %v1276_v28 }
  0x47   : > { %601 = vmatmul.mubr.bf16.gmra.mrb[12].mxu0 %v1278_v29  ;;  %665 = vmatmul.mubr.bf16.gmra.mrb[12].mxu1 %v1279_v30 }
  0x48   : > { %1026 = vmatprep.mubr.msk.bf16.mxu0 %vm488_vm0, %v1280_v31  ;;  %1034 = vmatprep.mubr.msk.bf16.mxu1 %vm488_vm0, %v1282_v32 }
  0x4f   : > { %609 = vmatmul.mubr.bf16.gmra.mrb[16].mxu0 %v1284_v33  ;;  %673 = vmatmul.mubr.bf16.gmra.mrb[16].mxu1 %v1285_v34 }
  0x50   : > { %1027 = vmatprep.mubr.msk.bf16.mxu0 %vm488_vm0, %v1286_v35  ;;  %1035 = vmatprep.mubr.msk.bf16.mxu1 %vm488_vm0, %v1288_v36 }
  0x57   : > { %617 = vmatmul.mubr.bf16.gmra.mrb[20].mxu0 %v1290_v37  ;;  %681 = vmatmul.mubr.bf16.gmra.mrb[20].mxu1 %v1291_v38 }
  0x58   : > { %1028 = vmatprep.mubr.msk.bf16.mxu0 %vm488_vm0, %v1292_v39  ;;  %1036 = vmatprep.mubr.msk.bf16.mxu1 %vm488_vm0, %v1294_v40 }
  0x5f   : > { %625 = vmatmul.mubr.bf16.gmra.mrb[24].mxu0 %v1296_v41  ;;  %689 = vmatmul.mubr.bf16.gmra.mrb[24].mxu1 %v1297_v42 }
  0x60   : > { %1029 = vmatprep.mubr.msk.bf16.mxu0 %vm488_vm0, %v1298_v43  ;;  %1037 = vmatprep.mubr.msk.bf16.mxu1 %vm488_vm0, %v1300_v44 }
  0x67   : > { %633 = vmatmul.mubr.bf16.gmra.mrb[28].mxu0 %v1302_v45  ;;  %697 = vmatmul.mubr.bf16.gmra.mrb[28].mxu1 %v1303_v46 }
 0x102   : > { %v578_v48 = vpop.f32.mrb[0].mxu0  ;;  %v642_v49 = vpop.f32.mrb[0].mxu1 }
 0x103   : > { %v580_v50 = vpop.f32.mrb[1].mxu0  ;;  %v644_v51 = vpop.f32.mrb[1].mxu1  ;;  %v579_v54 = vadd.f32 %v1457_v47, %v578_v48  ;;  %v643_v55 = vadd.f32 %v1457_v47, %v642_v49 }
 0x104   : > { %v581_v52 = vpop.f32.mrb[2].mxu0  ;;  %v645_v53 = vpop.f32.mrb[2].mxu1 }
 0x105   : > { %v582_v56 = vadd.f32 %v1457_v47, %v581_v52  ;;  %v646_v57 = vadd.f32 %v1457_v47, %v645_v53  ;;  %v583_v58 = vpop.f32.mrb[3].mxu0  ;;  %v647_v59 = vpop.f32.mrb[3].mxu1 }
 0x107   : > { %v1108_v60 = vpack.c.bf16 %v582_v56, %v579_v54  ;;  %v1148_v61 = vpack.c.bf16 %v646_v57, %v643_v55 }
 0x109   : > { %1109 = vst [vmem:[%s1467_s23] sm:$0xff] %v1108_v60   ;;  %1192 = vst [vmem:[%s1467_s23 + $0x40] sm:$0xff] %v1148_v61  }
 0x10a   : > { %v586_v62 = vpop.f32.mrb[4].mxu0  ;;  %v650_v63 = vpop.f32.mrb[4].mxu1 }
 0x10b   : > { %v588_v0 = vpop.f32.mrb[5].mxu0  ;;  %v652_v1 = vpop.f32.mrb[5].mxu1  ;;  %v587_v4 = vadd.f32 %v1457_v47, %v586_v62  ;;  %v651_v5 = vadd.f32 %v1457_v47, %v650_v63 }
 0x10c   : > { %v589_v2 = vpop.f32.mrb[6].mxu0  ;;  %v653_v3 = vpop.f32.mrb[6].mxu1 }
 0x10d   : > { %v590_v6 = vadd.f32 %v1457_v47, %v589_v2  ;;  %v654_v7 = vadd.f32 %v1457_v47, %v653_v3  ;;  %v591_v8 = vpop.f32.mrb[7].mxu0  ;;  %v655_v9 = vpop.f32.mrb[7].mxu1 }
 0x10f   : > { %v1113_v10 = vpack.c.bf16 %v590_v6, %v587_v4  ;;  %v1153_v11 = vpack.c.bf16 %v654_v7, %v651_v5 }
 0x111   : > { %1185 = vst [vmem:[%s1467_s23 + $0x8] sm:$0xff] %v1113_v10   ;;  %1193 = vst [vmem:[%s1467_s23 + $0x48] sm:$0xff] %v1153_v11  }
 0x112   : > { %v594_v12 = vpop.f32.mrb[8].mxu0  ;;  %v658_v13 = vpop.f32.mrb[8].mxu1 }
 0x113   : > { %v596_v14 = vpop.f32.mrb[9].mxu0  ;;  %v660_v15 = vpop.f32.mrb[9].mxu1  ;;  %v595_v18 = vadd.f32 %v1457_v47, %v594_v12  ;;  %v659_v19 = vadd.f32 %v1457_v47, %v658_v13 }
 0x114   : > { %v597_v16 = vpop.f32.mrb[10].mxu0  ;;  %v661_v17 = vpop.f32.mrb[10].mxu1 }
 0x115   : > { %v598_v20 = vadd.f32 %v1457_v47, %v597_v16  ;;  %v662_v21 = vadd.f32 %v1457_v47, %v661_v17  ;;  %v599_v22 = vpop.f32.mrb[11].mxu0  ;;  %v663_v23 = vpop.f32.mrb[11].mxu1 }
 0x117   : > { %v1118_v24 = vpack.c.bf16 %v598_v20, %v595_v18  ;;  %v1158_v25 = vpack.c.bf16 %v662_v21, %v659_v19 }
 0x119   : > { %1186 = vst [vmem:[%s1467_s23 + $0x10] sm:$0xff] %v1118_v24   ;;  %1194 = vst [vmem:[%s1467_s23 + $0x50] sm:$0xff] %v1158_v25  }
 0x11a   : > { %v602_v26 = vpop.f32.mrb[12].mxu0  ;;  %v666_v27 = vpop.f32.mrb[12].mxu1 }
 0x11b   : > { %v604_v28 = vpop.f32.mrb[13].mxu0  ;;  %v668_v29 = vpop.f32.mrb[13].mxu1  ;;  %v603_v32 = vadd.f32 %v1457_v47, %v602_v26  ;;  %v667_v33 = vadd.f32 %v1457_v47, %v666_v27 }
 0x11c   : > { %v605_v30 = vpop.f32.mrb[14].mxu0  ;;  %v669_v31 = vpop.f32.mrb[14].mxu1 }
 0x11d   : > { %v606_v34 = vadd.f32 %v1457_v47, %v605_v30  ;;  %v670_v35 = vadd.f32 %v1457_v47, %v669_v31  ;;  %v607_v36 = vpop.f32.mrb[15].mxu0  ;;  %v671_v37 = vpop.f32.mrb[15].mxu1 }
 0x11f   : > { %v1123_v38 = vpack.c.bf16 %v606_v34, %v603_v32  ;;  %v1163_v39 = vpack.c.bf16 %v670_v35, %v667_v33 }
 0x121   : > { %1187 = vst [vmem:[%s1467_s23 + $0x18] sm:$0xff] %v1123_v38   ;;  %1195 = vst [vmem:[%s1467_s23 + $0x58] sm:$0xff] %v1163_v39  }
 0x122   : > { %v610_v40 = vpop.f32.mrb[16].mxu0  ;;  %v674_v41 = vpop.f32.mrb[16].mxu1 }
 0x123   : > { %v612_v42 = vpop.f32.mrb[17].mxu0  ;;  %v676_v43 = vpop.f32.mrb[17].mxu1  ;;  %v611_v46 = vadd.f32 %v1457_v47, %v610_v40  ;;  %v675_v48 = vadd.f32 %v1457_v47, %v674_v41 }
 0x124   : > { %v613_v44 = vpop.f32.mrb[18].mxu0  ;;  %v677_v45 = vpop.f32.mrb[18].mxu1 }
 0x125   : > { %v614_v49 = vadd.f32 %v1457_v47, %v613_v44  ;;  %v678_v50 = vadd.f32 %v1457_v47, %v677_v45  ;;  %v615_v51 = vpop.f32.mrb[19].mxu0  ;;  %v679_v52 = vpop.f32.mrb[19].mxu1 }
 0x127   : > { %v1128_v53 = vpack.c.bf16 %v614_v49, %v611_v46  ;;  %v1168_v54 = vpack.c.bf16 %v678_v50, %v675_v48 }
 0x129   : > { %1188 = vst [vmem:[%s1467_s23 + $0x20] sm:$0xff] %v1128_v53   ;;  %1196 = vst [vmem:[%s1467_s23 + $0x60] sm:$0xff] %v1168_v54  }
 0x12a   : > { %v618_v55 = vpop.f32.mrb[20].mxu0  ;;  %v682_v56 = vpop.f32.mrb[20].mxu1 }
 0x12b   : > { %v620_v57 = vpop.f32.mrb[21].mxu0  ;;  %v684_v58 = vpop.f32.mrb[21].mxu1  ;;  %v619_v61 = vadd.f32 %v1457_v47, %v618_v55  ;;  %v683_v62 = vadd.f32 %v1457_v47, %v682_v56 }
 0x12c   : > { %v621_v59 = vpop.f32.mrb[22].mxu0  ;;  %v685_v60 = vpop.f32.mrb[22].mxu1 }
 0x12d   : > { %v622_v63 = vadd.f32 %v1457_v47, %v621_v59  ;;  %v686_v0 = vadd.f32 %v1457_v47, %v685_v60  ;;  %v623_v1 = vpop.f32.mrb[23].mxu0  ;;  %v687_v2 = vpop.f32.mrb[23].mxu1 }
 0x12f   : > { %v1133_v3 = vpack.c.bf16 %v622_v63, %v619_v61  ;;  %v1173_v4 = vpack.c.bf16 %v686_v0, %v683_v62 }
 0x131   : > { %1189 = vst [vmem:[%s1467_s23 + $0x28] sm:$0xff] %v1133_v3   ;;  %1197 = vst [vmem:[%s1467_s23 + $0x68] sm:$0xff] %v1173_v4  }
 0x132   : > { %v626_v5 = vpop.f32.mrb[24].mxu0  ;;  %v690_v6 = vpop.f32.mrb[24].mxu1 }
 0x133   : > { %v628_v7 = vpop.f32.mrb[25].mxu0  ;;  %v692_v8 = vpop.f32.mrb[25].mxu1  ;;  %v627_v11 = vadd.f32 %v1457_v47, %v626_v5  ;;  %v691_v12 = vadd.f32 %v1457_v47, %v690_v6 }
 0x134   : > { %v629_v9 = vpop.f32.mrb[26].mxu0  ;;  %v693_v10 = vpop.f32.mrb[26].mxu1 }
 0x135   : > { %v630_v13 = vadd.f32 %v1457_v47, %v629_v9  ;;  %v694_v14 = vadd.f32 %v1457_v47, %v693_v10  ;;  %v631_v15 = vpop.f32.mrb[27].mxu0  ;;  %v695_v16 = vpop.f32.mrb[27].mxu1 }
 0x137   : > { %v1138_v17 = vpack.c.bf16 %v630_v13, %v627_v11  ;;  %v1178_v18 = vpack.c.bf16 %v694_v14, %v691_v12 }
 0x139   : > { %1190 = vst [vmem:[%s1467_s23 + $0x30] sm:$0xff] %v1138_v17   ;;  %1198 = vst [vmem:[%s1467_s23 + $0x70] sm:$0xff] %v1178_v18  }
 0x13a   : > { %v634_v19 = vpop.f32.mrb[28].mxu0  ;;  %v698_v20 = vpop.f32.mrb[28].mxu1 }
 0x13b   : > { %v636_v21 = vpop.f32.mrb[29].mxu0  ;;  %v700_v22 = vpop.f32.mrb[29].mxu1  ;;  %v635_v25 = vadd.f32 %v1457_v47, %v634_v19  ;;  %v699_v26 = vadd.f32 %v1457_v47, %v698_v20 }
 0x13c   : > { %v637_v23 = vpop.f32.mrb[30].mxu0  ;;  %v701_v24 = vpop.f32.mrb[30].mxu1 }
 0x13d   : > { %v638_v27 = vadd.f32 %v1457_v47, %v637_v23  ;;  %v702_v28 = vadd.f32 %v1457_v47, %v701_v24  ;;  %v639_v29 = vpop.f32.mrb[31].mxu0  ;;  %v703_v30 = vpop.f32.mrb[31].mxu1 }
 0x13f   : > { %v1143_v31 = vpack.c.bf16 %v638_v27, %v635_v25  ;;  %v1183_v32 = vpack.c.bf16 %v702_v28, %v699_v26 }
 0x141   : > { %1191 = vst [vmem:[%s1467_s23 + $0x38] sm:$0xff] %v1143_v31   ;;  %1199 = vst [vmem:[%s1467_s23 + $0x78] sm:$0xff] %v1183_v32  }
 0x142 PF: > { %s13_s14 = sadd.s32 1, %s1326_s14   ;;  %s1526_s12 = smov %s1322_s13 }
 0x143   : > { %p10_p5 = scmp.ge.s32.totalorder %s13_s14, 4   ;;  %s1527_s13 = smov %s1529_s15 }
 0x145   :  { %12 = sbr.rel (!%p10_p5) target bundleno = 2 (0x2), region = 68 }

// kernel: resnet50_forward.6
= control target key start
LH: loop header
LB: loop body
LE: loop exit
PB: predicated region body
PF: predicated region fallthrough
CT: control target
= control target key end

     0   :  { %v3329_v22 = vmov 0   ;;  %vm264_vm0 = vcmask 1043459   ;;  %vm265_vm1 = vsmask.f32 7950  ;;  %vm281_vm2 = vcmask 1043458   ;;  %s4059_s1 = inlined_call_operand.vmem [shape: bf16[256,128], index: 1, kind: input, shape index: {}]   ;;  %s4060_s0 = inlined_call_operand.vmem [shape: bf16[32,256], index: 0, kind: input, shape index: {}]   ;;  %s4061_s3 = inlined_call_operand.vmem [shape: bf16[3,3,128,128], index: 3, kind: input, shape index: {}]   ;;  %s4062_s2 = inlined_call_operand.vmem [shape: f32[1,128], index: 2, kind: input, shape index: {}]   ;;  %s4063_s5 = inlined_call_operand.vmem [shape: bf16[128,512], index: 5, kind: input, shape index: {}]   ;;  %s4064_s4 = inlined_call_operand.vmem [shape: f32[1,128], index: 4, kind: input, shape index: {}]   ;;  %s4065_s6 = inlined_call_operand.vmem [shape: f32[1,512], index: 6, kind: input, shape index: {}]   ;;  %s4066_s7 = inlined_call_operand.vmem [shape: bf16[32,512], index: 7, kind: output, shape index: {}]  }
   0x1   :  { %v3166_v0 = vld [vmem:[%s4059_s1 + $0x40] sm:$0xff]   ;;  %v3168_v2 = vld [vmem:[%s4059_s1 + $0x48] sm:$0xff]   ;;  %v3170_v4 = vld [vmem:[%s4059_s1 + $0x50] sm:$0xff]   ;;  %241 = vst [vmem:[#allocation2] sm:$0xf] %v3329_v22  ;;  %vm287_vm5 = vcmask 1040384  }
   0x2   :  { %v3167_v1 = vld [vmem:[%s4059_s1] sm:$0xff]   ;;  %2749 = vmatprep.subr.bf16.mxu0 %v3166_v0  ;;  %v3169_v3 = vld [vmem:[%s4059_s1 + $0x8] sm:$0xff]   ;;  %v3171_v5 = vld [vmem:[%s4059_s1 + $0x10] sm:$0xff]   ;;  %242 = vst [vmem:[#allocation2 + $0x4] sm:$0xf] %v3329_v22  ;;  %vm270_vm8 = vcmask 1041408  }
   0x3   :  { %2750 = vmatpush3.bf16.msra.mxu0 %v3167_v1  ;;  %v3172_v6 = vld [vmem:[%s4059_s1 + $0x58] sm:$0xff]   ;;  %v3174_v8 = vld [vmem:[%s4059_s1 + $0x60] sm:$0xff]   ;;  %v3176_v10 = vld [vmem:[%s4059_s1 + $0x68] sm:$0xff]   ;;  %243 = vst [vmem:[#allocation2 + $0x8] sm:$0xf] %v3329_v22  ;;  %vm304_vm9 = vcmask 1043457  }
   0x4   :  { %2751 = vmatprep.subr.bf16.mxu0 %v3168_v2  ;;  %v3173_v7 = vld [vmem:[%s4059_s1 + $0x18] sm:$0xff]   ;;  %v3175_v9 = vld [vmem:[%s4059_s1 + $0x20] sm:$0xff]   ;;  %v3177_v12 = vld [vmem:[%s4059_s1 + $0x28] sm:$0xff]   ;;  %244 = vst [vmem:[#allocation2 + $0xc] sm:$0xf] %v3329_v22  ;;  %vm315_vm11 = vcmask 1042432  }
   0x5   :  { %v3184_v11 = vld [vmem:[%s4060_s0 + $0x4] ss:$8 sps:$4 sm:$0xff]   ;;  %v3178_v13 = vld [vmem:[%s4059_s1 + $0x70] sm:$0xff]   ;;  %v3180_v15 = vld [vmem:[%s4059_s1 + $0x78] sm:$0xff]   ;;  %245 = vst [vmem:[#allocation2 + $0x10] sm:$0xf] %v3329_v22 }
   0x6   :  { %218 = vmatprep.mubr.bf16.mxu0 %v3184_v11  ;;  %v3179_v14 = vld [vmem:[%s4059_s1 + $0x30] sm:$0xff]   ;;  %v3181_v16 = vld [vmem:[%s4059_s1 + $0x38] sm:$0xff]   ;;  %v3182_v17 = vld [vmem:[%s4060_s0] ss:$8 sps:$4 sm:$0xff]   ;;  %246 = vst [vmem:[#allocation2 + $0x14] sm:$0xf] %v3329_v22 }
   0x7   :  { %2752 = vmatpush3.bf16.msra.mxu0 %v3169_v3  ;;  %v3185_v18 = vld [vmem:[%s4060_s0 + $0x14] ss:$8 sps:$4 sm:$0xff]   ;;  %v3187_v19 = vld [vmem:[%s4060_s0 + $0x10] ss:$8 sps:$4 sm:$0xff]   ;;  %v3188_v20 = vld [vmem:[%s4061_s3 + $0xc0] sm:$0xff]  }
   0x8   :  { %2753 = vmatprep.subr.bf16.mxu0 %v3170_v4  ;;  %2957 = vmatprep.subr.bf16.mxu1 %v3188_v20  ;;  %v3189_v21 = vld [vmem:[%s4061_s3 + $0x40] sm:$0xff]   ;;  %247 = vst [vmem:[#allocation2 + $0x18] sm:$0xf] %v3329_v22  ;;  %248 = vst [vmem:[#allocation2 + $0x1c] sm:$0xf] %v3329_v22  ;;  %v3190_v23 = vld [vmem:[%s4061_s3 + $0xc8] sm:$0xff]  }
   0x9   :  { %249 = vst [vmem:[#allocation2 + $0x20] sm:$0xf] %v3329_v22  ;;  %2958 = vmatpush3.bf16.msra.mxu1 %v3188_v20  ;;  %v3191_v24 = vld [vmem:[%s4061_s3 + $0x48] sm:$0xff]   ;;  %v3192_v25 = vld [vmem:[%s4061_s3 + $0xd0] sm:$0xff]   ;;  %v3194_v27 = vld [vmem:[%s4061_s3 + $0xd8] sm:$0xff]  }
   0xa   :  { %2959 = vmatprep.subr.bf16.mxu1 %v3190_v23  ;;  %v3193_v26 = vld [vmem:[%s4061_s3 + $0x50] sm:$0xff]   ;;  %v3195_v28 = vld [vmem:[%s4061_s3 + $0x58] sm:$0xff]   ;;  %v3196_v29 = vld [vmem:[%s4061_s3 + $0xe0] sm:$0xff]   ;;  %vm282_vm3 = vsmask.f32 7946 }
   0xb   :  { %2754 = vmatpush3.bf16.msra.mxu0 %v3171_v5  ;;  %v3197_v30 = vld [vmem:[%s4061_s3 + $0x60] sm:$0xff]   ;;  %v3198_v31 = vld [vmem:[%s4061_s3 + $0xe8] sm:$0xff]   ;;  %v3200_v33 = vld [vmem:[%s4061_s3 + $0xf0] sm:$0xff]   ;;  %vm271_vm4 = vsmask.f32 1280 }
   0xc   :  { %2755 = vmatprep.subr.bf16.mxu0 %v3172_v6  ;;  %v3199_v32 = vld [vmem:[%s4061_s3 + $0x68] sm:$0xff]   ;;  %v3201_v34 = vld [vmem:[%s4061_s3 + $0x70] sm:$0xff]   ;;  %v3202_v35 = vld [vmem:[%s4061_s3 + $0xf8] sm:$0xff]   ;;  %vm288_vm6 = vsmask.f32 256 }
   0xd   :  { %2960 = vmatpush3.bf16.msra.mxu1 %v3190_v23  ;;  %v3206_v36 = vld [vmem:[%s4061_s3 + $0x78] sm:$0xff]   ;;  %v3490_v37 = vld [vmem:[%s4061_s3 + $0x100] sm:$0xff]   ;;  %vm3508_vm7 = vmand %vm264_vm0, %vm265_vm1  ;;  %vm305_vm10 = vsmask.f32 3334  ;;  %vm316_vm14 = vsmask.f32 2306 }
   0xe   :  { %2961 = vmatprep.subr.bf16.mxu1 %v3192_v25  ;;  %v3496_v38 = vld [vmem:[%s4061_s3] sm:$0xff]   ;;  %vm3514_vm12 = vmand %vm281_vm2, %vm282_vm3  ;;  %v290_v4 = vld [vmem:[#allocation2 + $0x8] sm:$0x1]  ;;  %vm884_vm2 = vcmask 1044480   ;;  %vm436_vm3 = vsmask.f32 7424 }
   0xf   :  { %2756 = vmatpush3.bf16.msra.mxu0 %v3173_v7  ;;  %v3502_v40 = vld [vmem:[%s4062_s2] ss:$0 sm:$0xff]  ;;  %v267_v55 = vld [vmem:[#allocation2] sm:$0x8]  ;;  %v284_v1 = vld [vmem:[#allocation2 + $0x4] sm:$0xc] }
  0x10   :  { %2757 = vmatprep.subr.bf16.mxu0 %v3174_v8  ;;  %vm3520_vm13 = vmand %vm287_vm5, %vm288_vm6  ;;  %v307_v23 = vld [vmem:[#allocation2 + $0x8] sm:$0xe]  ;;  %vm726_vm5 = vcmask 1046528   ;;  %vm1403_vm6 = vcmask 1045504  }
  0x11   :  { %2962 = vmatpush3.bf16.msra.mxu1 %v3192_v25  ;;  %vm3529_vm15 = vmand %vm270_vm8, %vm271_vm4  ;;  %vm1066_vm4 = vsmask.f32 4352  ;;  %vm2326_vm8 = vcmask 1046532  }
  0x12   :  { %2963 = vmatprep.subr.bf16.mxu1 %v3194_v27  ;;  %vm3539_vm0 = vmand %vm304_vm9, %vm305_vm10 }
  0x13   :  { %2758 = vmatpush3.bf16.msra.mxu0 %v3175_v9  ;;  %vm3548_vm1 = vmand %vm315_vm11, %vm316_vm14 }
  0x14   :  { %2759 = vmatprep.subr.bf16.mxu0 %v3176_v10  ;;  %vm3975_vm9 = vmor %vm315_vm11, %vm2326_vm8 }
  0x15   :  { %2964 = vmatpush3.bf16.msra.mxu1 %v3194_v27 }
  0x16   :  { %2965 = vmatprep.subr.bf16.mxu1 %v3196_v29 }
  0x17   :  { %2760 = vmatpush3.bf16.msra.mxu0 %v3177_v12 }
  0x18   :  { %2761 = vmatprep.subr.bf16.mxu0 %v3178_v13  ;;  %v273_v13 = vld [vmem:[#allocation2 + $0x4] sm:$0x3] }
  0x19   :  { %2966 = vmatpush3.bf16.msra.mxu1 %v3196_v29 }
  0x1a   :  { %2967 = vmatprep.subr.bf16.mxu1 %v3198_v31 }
  0x1b   :  { %2762 = vmatpush3.bf16.msra.mxu0 %v3179_v14 }
  0x1c   :  { %2763 = vmatprep.subr.bf16.mxu0 %v3180_v15 }
  0x1d   :  { %2968 = vmatpush3.bf16.msra.mxu1 %v3198_v31 }
  0x1e   :  { %2969 = vmatprep.subr.bf16.mxu1 %v3200_v33 }
  0x1f   :  { %2764 = vmatpush3.bf16.msra.mxu0 %v3181_v16 }
  0x20   :  { %2885 = vmatprep.subr.bf16.mxu0 %v3189_v21 }
  0x21   :  { %2970 = vmatpush3.bf16.msra.mxu1 %v3200_v33 }
  0x22   :  { %219 = vmatmul.mubr.bf16.vlgmr.msra.gmra.mrb[0].mxu0 %v3182_v17  ;;  %2971 = vmatprep.subr.bf16.mxu1 %v3202_v35 }
  0x23   :  { %226 = vmatprep.mubr.bf16.mxu0 %v3185_v18  ;;  %2886 = vmatpush3.bf16.msra.mxu0 %v3189_v21 }
  0x24   :  { %2887 = vmatprep.subr.bf16.mxu0 %v3191_v24 }
  0x25   :  { %2972 = vmatpush3.bf16.msra.mxu1 %v3202_v35 }
  0x26   :  { %2981 = vmatprep.subr.bf16.mxu1 %v3490_v37 }
  0x27   :  { %2888 = vmatpush3.bf16.msra.mxu0 %v3191_v24 }
  0x28   :  { %2889 = vmatprep.subr.bf16.mxu0 %v3193_v26 }
  0x2a   :  { %227 = vmatmul.mubr.bf16.gmra.mrb[4].mxu0 %v3187_v19 }
  0x2b   :  { %2890 = vmatpush3.bf16.msra.mxu0 %v3193_v26 }
  0x2c   :  { %2891 = vmatprep.subr.bf16.mxu0 %v3195_v28 }
  0x2f   :  { %2892 = vmatpush3.bf16.msra.mxu0 %v3195_v28 }
  0x30   :  { %2893 = vmatprep.subr.bf16.mxu0 %v3197_v30 }
  0x33   :  { %2894 = vmatpush3.bf16.msra.mxu0 %v3197_v30  ;;  %v318_v30 = vld [vmem:[#allocation2 + $0xc] sm:$0x7] }
  0x34   :  { %2895 = vmatprep.subr.bf16.mxu0 %v3199_v32 }
  0x37   :  { %2896 = vmatpush3.bf16.msra.mxu0 %v3199_v32 }
  0x38   :  { %2897 = vmatprep.subr.bf16.mxu0 %v3201_v34 }
  0x3b   :  { %2898 = vmatpush3.bf16.msra.mxu0 %v3201_v34 }
  0x3c   :  { %2899 = vmatprep.subr.bf16.mxu0 %v3206_v36 }
  0x3f   :  { %2900 = vmatpush3.bf16.msra.mxu0 %v3206_v36 }
  0x40   :  { %2909 = vmatprep.subr.bf16.mxu0 %v3496_v38 }
  0xf5   :  { %v2765_v39 = vpop.f32.mrb[0].mxu0 }
  0xf6   :  { %v2766_v41 = vpop.f32.mrb[1].mxu0 }
  0xf7   :  { %v2767_v42 = vadd.f32 %v2766_v41, %v2765_v39  ;;  %v2768_v43 = vpop.f32.mrb[2].mxu0 }
  0xf8   :  { %v2769_v44 = vpop.f32.mrb[3].mxu0 }
  0xf9   :  { %v221_v45 = vadd.f32 %v2767_v42, %v3502_v40  ;;  %v2770_v46 = vadd.f32 %v2769_v44, %v2768_v43 }
  0xfb   :  { %v235_v47 = vmax.f32 %v221_v45, 0.0  ;;  %v224_v48 = vadd.f32 %v2770_v46, %v3502_v40  ;;  %v333_v45 = vld [vmem:[#allocation2 + $0x14] sm:$0xe] }
  0xfd   :  { %v2731_v49 = vpack.c.bf16 %v235_v47, %v235_v47  ;;  %v236_v50 = vmax.f32 %v224_v48, 0.0  ;;  %v2771_v51 = vpop.f32.mrb[4].mxu0 }
  0xfe   :  { %v2772_v52 = vpop.f32.mrb[5].mxu0 }
  0xff   :  { %v254_v53 = vshll.u32 %v2731_v49, 16  ;;  %v257_v54 = vshrl.u32 %v2731_v49, 16  ;;  %v2732_v56 = vpack.c.bf16 %v236_v50, %v236_v50  ;;  %v2773_v57 = vadd.f32 %v2772_v52, %v2771_v51  ;;  %v2774_v58 = vpop.f32.mrb[6].mxu0  ;;  %v341_v50 = vld [vmem:[#allocation2 + $0x18] sm:$0x7] }
 0x100   :  { %v2775_v60 = vpop.f32.mrb[7].mxu0  ;;  %v357_v51 = vld [vmem:[#allocation2 + $0x18] sm:$0x8]  ;;  %v368_v52 = vld [vmem:[#allocation2 + $0x1c] sm:$0xc] }
 0x101   :  { %v256_v61 = vrot.slane %v254_v53, 5  ;;  %v259_v62 = vrot.slane %v257_v54, 4  ;;  %v276_v63 = vrot.slane %v257_v54, 7  ;;  %v296_v2 = vshrl.u32 %v2732_v56, 16 }
 0x102   :  { %v299_v5 = vshll.u32 %v2732_v56, 16  ;;  %v229_v6 = vadd.f32 %v2773_v57, %v3502_v40  ;;  %v2776_v7 = vadd.f32 %v2775_v60, %v2774_v58  ;;  %v371_v56 = vld [vmem:[#allocation2 + $0x20] sm:$0x1] }
 0x103   :  { %v260_v8 = vor.u32 %v259_v62, %v256_v61  ;;  %v268_v9 = vsel %vm3508_vm7, %v256_v61, %v267_v55  ;;  %v277_v10 = vor.u32 %v276_v63, %v254_v53  ;;  %v278_v11 = vrot.slane %v276_v63, 4 }
 0x104   :  { %269 = vst [vmem:[#allocation2] sm:$0x8] %v268_v9  ;;  %v298_v14 = vrot.slane %v296_v2, 6  ;;  %v301_v15 = vrot.slane %v299_v5, 7  ;;  %v310_v16 = vrot.slane %v296_v2, 5  ;;  %v311_v17 = vrot.slane %v299_v5, 6 }
 0x105   :  { %v261_v18 = vrot.slane %v260_v8, 4  ;;  %v285_v19 = vsel %vm3514_vm12, %v277_v10, %v284_v1  ;;  %v291_v20 = vsel %vm3520_vm13, %v278_v11, %v290_v4  ;;  %v237_v24 = vmax.f32 %v229_v6, 0.0  ;;  %v360_v6 = vld [vmem:[#allocation2 + $0x1c] sm:$0x3] }
 0x106   :  { %286 = vst [vmem:[#allocation2 + $0x4] sm:$0xc] %v285_v19  ;;  %292 = vst [vmem:[#allocation2 + $0x8] sm:$0x1] %v291_v20  ;;  %v302_v25 = vor.u32 %v301_v15, %v298_v14  ;;  %v312_v26 = vor.u32 %v311_v17, %v310_v16  ;;  %v232_v27 = vadd.f32 %v2776_v7, %v3502_v40 }
 0x107   :  { %v274_v28 = vsel %vm3529_vm15, %v261_v18, %v273_v13  ;;  %v2733_v31 = vpack.c.bf16 %v237_v24, %v237_v24 }
 0x108   :  { %275 = vst [vmem:[#allocation2 + $0x4] sm:$0x3] %v274_v28  ;;  %v308_v32 = vsel %vm3539_vm0, %v302_v25, %v307_v23  ;;  %v313_v33 = vrot.slane %v312_v26, 4  ;;  %v238_v34 = vmax.f32 %v232_v27, 0.0 }
 0x109   :  { %309 = vst [vmem:[#allocation2 + $0x8] sm:$0xe] %v308_v32  ;;  %v325_v35 = vshrl.u32 %v2733_v31, 16  ;;  %v328_v36 = vshll.u32 %v2733_v31, 16 }
 0x10a   :  { %v319_v39 = vsel %vm3548_vm1, %v313_v33, %v318_v30  ;;  %v2734_v40 = vpack.c.bf16 %v238_v34, %v238_v34  ;;  %v3210_v34 = vld [vmem:[%s4061_s3 + $0x108] sm:$0xff]  }
 0x10b   :  { %320 = vst [vmem:[#allocation2 + $0xc] sm:$0x7] %v319_v39  ;;  %v327_v41 = vrot.slane %v325_v35, 6  ;;  %v330_v42 = vrot.slane %v328_v36, 7  ;;  %v336_v43 = vrot.slane %v325_v35, 5  ;;  %v337_v44 = vrot.slane %v328_v36, 6 }
 0x10c   :  { %v347_v46 = vshll.u32 %v2734_v40, 16  ;;  %v350_v47 = vshrl.u32 %v2734_v40, 16  ;;  %v374_v60 = vld [vmem:[#allocation2] sm:$0xf] }
 0x10d   :  { %v331_v48 = vor.u32 %v330_v42, %v327_v41  ;;  %v338_v49 = vor.u32 %v337_v44, %v336_v43  ;;  %v859_v4 = vld [vmem:[#allocation2] sm:$0x8]  ;;  %v3212_v42 = vld [vmem:[%s4061_s3 + $0x8] sm:$0xff]  }
 0x10e   :  { %v349_v53 = vrot.slane %v347_v46, 5  ;;  %v352_v54 = vrot.slane %v350_v47, 4  ;;  %v363_v55 = vrot.slane %v350_v47, 7  ;;  %v1017_v23 = vld [vmem:[#allocation2] sm:$0x8] }
 0x10f   :  { %v334_v57 = vsel %vm3539_vm0, %v331_v48, %v333_v45  ;;  %v339_v58 = vrot.slane %v338_v49, 4  ;;  %v3558_v61 = vld [vmem:[#allocation2 + $0x4] sm:$0xf] }
 0x110   :  { %335 = vst [vmem:[#allocation2 + $0x14] sm:$0xe] %v334_v57  ;;  %v353_v62 = vor.u32 %v352_v54, %v349_v53  ;;  %v358_v63 = vsel %vm3508_vm7, %v349_v53, %v357_v51  ;;  %v364_v1 = vor.u32 %v363_v55, %v347_v46  ;;  %v365_v2 = vrot.slane %v363_v55, 4  ;;  %v3568_v9 = vld [vmem:[#allocation2 + $0x8] sm:$0xf]  ;;  %v3214_v51 = vld [vmem:[%s4061_s3 + $0x110] sm:$0xff]  }
 0x111   :  { %v342_v5 = vsel %vm3548_vm1, %v339_v58, %v341_v50  ;;  %359 = vst [vmem:[#allocation2 + $0x18] sm:$0x8] %v358_v63  ;;  %v3565_v7 = vcombine.low %v374_v60, %v3558_v61  ;;  %v2533_v8 = vcombine.low %v859_v4, %v3558_v61  ;;  %v3579_v17 = vld [vmem:[#allocation2 + $0x4] sm:$0xf]  ;;  %v3215_v60 = vld [vmem:[%s4061_s3 + $0x10] sm:$0xff]  }
 0x112   :  { %343 = vst [vmem:[#allocation2 + $0x18] sm:$0x7] %v342_v5  ;;  %v354_v10 = vrot.slane %v353_v62, 4  ;;  %v369_v59 = vsel %vm3514_vm12, %v364_v1, %v368_v52  ;;  %v372_v11 = vsel %vm3520_vm13, %v365_v2, %v371_v56  ;;  %v3574_v13 = vld [vmem:[#allocation2 + $0x8] sm:$0xff]   ;;  %v2559_v26 = vcombine.low %v1017_v23, %v3579_v17  ;;  %v1021_v2 = vld [vmem:[#allocation2 + $0x10] sm:$0xf] }
 0x113   :  { %v3576_v14 = vld [vmem:[#allocation2 + $0xc] sm:$0xf]  ;;  %370 = vst [vmem:[#allocation2 + $0x1c] sm:$0xc] %v369_v59  ;;  %373 = vst [vmem:[#allocation2 + $0x20] sm:$0x1] %v372_v11 }
 0x114   :  { %v885_v15 = vrot.slane %v2533_v8, 3  ;;  %v440_v16 = vshll.u32 %v3565_v7, 16  ;;  %v2560_v18 = vcombine.low %v3568_v9, %v3576_v14  ;;  %v361_v0 = vsel %vm3529_vm15, %v354_v10, %v360_v6  ;;  %v3218_v5 = vld [vmem:[%s4061_s3 + $0x118] sm:$0xff]   ;;  %v3220_v59 = vld [vmem:[%s4061_s3 + $0x120] sm:$0xff]  }
 0x115   :  { %v886_v3 = vrot.slane %v3574_v13, 3  ;;  %v445_v19 = vshll.u32 %v3574_v13, 16  ;;  %362 = vst [vmem:[#allocation2 + $0x1c] sm:$0x3] %v361_v0  ;;  %v438_v20 = vshrl.u32 %v3565_v7, 16  ;;  %v449_v29 = vshrl.u32 %v3574_v13, 16 }
 0x116   :  { %v442_v21 = vrot.slane %v440_v16, 1  ;;  %v1076_v12 = vshrl.u32 %v2560_v18, 16  ;;  %v1079_v33 = vshll.u32 %v2560_v18, 16  ;;  %v1068_v35 = vshrl.u32 %v2559_v26, 16  ;;  %v3219_v6 = vld [vmem:[%s4061_s3 + $0x18] sm:$0xff]   ;;  %v3221_v0 = vld [vmem:[%s4061_s3 + $0x20] sm:$0xff]  }
 0x117   :  { %v887_v24 = vsel %vm884_vm2, %v885_v15, %v886_v3  ;;  %v447_v25 = vrot.slane %v445_v19, 1  ;;  %v3590_v28 = vld [vmem:[#allocation2 + $0x10] sm:$0xff]   ;;  %v1071_v36 = vshll.u32 %v2559_v26, 16  ;;  %v3639_v16 = vcombine.low %v3576_v14, %v1021_v2  ;;  %v3222_v14 = vld [vmem:[%s4061_s3 + $0x128] sm:$0xff]  }
 0x118   :  { %2973 = vmatprep.mubr.bf16.mxu1 %v887_v24  ;;  %v443_v27 = vor.u32 %v442_v21, %v438_v20  ;;  %v888_v31 = vrot.slane %v3590_v28, 3  ;;  %v453_v32 = vshll.u32 %v3590_v28, 16  ;;  %v1078_v43 = vrot.slane %v1076_v12, 3  ;;  %v1022_v11 = vld [vmem:[#allocation2 + $0x14] sm:$0xf] }
 0x119   :  { %v451_v39 = vor.u32 %v449_v29, %v447_v25  ;;  %v3603_v44 = vld [vmem:[#allocation2 + $0x18] sm:$0xf]  ;;  %v1081_v50 = vrot.slane %v1079_v33, 4  ;;  %v1070_v52 = vrot.slane %v1068_v35, 3  ;;  %v1073_v55 = vrot.slane %v1071_v36, 4  ;;  %v3225_v35 = vld [vmem:[%s4061_s3 + $0x30] sm:$0xff]  }
 0x11a   :  { %v448_v30 = vsel %vm436_vm3, %v443_v27, %v447_v25  ;;  %v889_v40 = vsel %vm884_vm2, %v886_v3, %v888_v31  ;;  %v455_v41 = vrot.slane %v453_v32, 1  ;;  %v1023_v8 = vld [vmem:[#allocation2 + $0x18] sm:$0xf]  ;;  %v1536_v3 = vld [vmem:[#allocation2 + $0x20] sm:$0xf]  ;;  %v1740_v21 = vrot.slane %v3639_v16, 3 }
 0x11b   :  { %2901 = vmatprep.mubr.bf16.mxu0 %v448_v30  ;;  %2974 = vmatmul.mubr.bf16.vlgmr.msra.gmra.mrb[0].mxu1 %v889_v40  ;;  %v3621_v62 = vor.u32 %v1081_v50, %v1078_v43  ;;  %v1074_v1 = vor.u32 %v1073_v55, %v1070_v52  ;;  %v3642_v18 = vcombine.low %v1022_v11, %v1023_v8  ;;  %v1718_v20 = vld [vmem:[#allocation2 + $0x4] sm:$0x8]  ;;  %v3223_v25 = vld [vmem:[%s4061_s3 + $0x28] sm:$0xff]   ;;  %v3224_v30 = vld [vmem:[%s4061_s3 + $0x130] sm:$0xff]   ;;  %vm1557_vm7 = vsmask.f32 5376 }
 0x11c   :  { %v860_v45 = vld [vmem:[#allocation2 + $0x1c] sm:$0xf]  ;;  %2982 = vmatpush3.bf16.msra.mxu1 %v3490_v37  ;;  %v456_v47 = vsel %vm436_vm3, %v451_v39, %v455_v41  ;;  %v457_v37 = vshrl.u32 %v3590_v28, 16  ;;  %v2561_v23 = vcombine.low %v1021_v2, %v1022_v11  ;;  %v3231_v52 = vld [vmem:[%s4061_s3 + $0x80] sm:$0xff]   ;;  %v3245_v11 = vld [vmem:[%s4061_s3 + $0xa8] sm:$0xff]  }
 0x11d   :  { %v398_v46 = vld [vmem:[#allocation2 + $0x1c] sm:$0x3]  ;;  %v2534_v48 = vcombine.low %v3603_v44, %v860_v45  ;;  %2902 = vmatmul.mubr.bf16.vlgmr.msra.gmra.mrb[8].mxu0 %v456_v47  ;;  %2983 = vmatprep.subr.bf16.mxu1 %v3210_v34  ;;  %v1083_v10 = vsel %vm1066_vm4, %v1074_v1, %v3621_v62  ;;  %v1742_v24 = vrot.slane %v3642_v18, 3  ;;  %v3229_v47 = vld [vmem:[%s4061_s3 + $0x140] sm:$0xff]  }
 0x11e   :  { %v3609_v49 = vcombine.low %v3603_v44, %v398_v46  ;;  %2910 = vmatpush3.bf16.msra.mxu0 %v3496_v38  ;;  %v459_v57 = vor.u32 %v457_v37, %v455_v41  ;;  %v3636_v15 = vld [vmem:[#allocation2 + $0x1c] sm:$0xf]  ;;  %v1085_v33 = vshrl.u32 %v2561_v23, 16  ;;  %v3232_v37 = vld [vmem:[%s4061_s3 + $0x148] sm:$0xff]  }
 0x11f   :  { %v890_v53 = vrot.slane %v2534_v48, 3  ;;  %2911 = vmatprep.subr.bf16.mxu0 %v3212_v42  ;;  %v3648_v19 = vcombine.low %v3636_v15, %v1536_v3  ;;  %v2562_v26 = vcombine.low %v1023_v8, %v3636_v15  ;;  %v3662_v29 = vsel %vm884_vm2, %v1740_v21, %v1742_v24  ;;  %v3226_v40 = vld [vmem:[%s4061_s3 + $0x138] sm:$0xff]   ;;  %v3687_v48 = vld [vmem:[#allocation2 + $0x20] sm:$0x1]  ;;  %v3247_v3 = vld [vmem:[%s4061_s3 + $0xb0] sm:$0xff]  }
 0x120   :  { %v461_v54 = vshll.u32 %v3609_v49, 16  ;;  %2984 = vmatpush3.bf16.msra.mxu1 %v3210_v34  ;;  %v465_v38 = vshrl.u32 %v3609_v49, 16  ;;  %v1088_v34 = vshll.u32 %v2561_v23, 16  ;;  %v1087_v41 = vrot.slane %v1085_v33, 3  ;;  %v3227_v43 = vld [vmem:[%s4061_s3 + $0x38] sm:$0xff]  }
 0x121   :  { %v891_v56 = vsel %vm884_vm2, %v888_v31, %v890_v53  ;;  %2985 = vmatprep.subr.bf16.mxu1 %v3214_v51  ;;  %v1744_v12 = vrot.slane %v3648_v19, 3  ;;  %v1094_v36 = vshrl.u32 %v2562_v26, 16  ;;  %v1097_v39 = vshll.u32 %v2562_v26, 16  ;;  %v381_v1 = vld [vmem:[#allocation2 + $0x1c] sm:$0x1] }
 0x122   :  { %v463_v58 = vrot.slane %v461_v54, 1  ;;  %2977 = vmatprep.mubr.bf16.mxu1 %v891_v56  ;;  %2912 = vmatpush3.bf16.msra.mxu0 %v3212_v42  ;;  %v1090_v42 = vrot.slane %v1088_v34, 4  ;;  %v3233_v56 = vld [vmem:[%s4061_s3 + $0x88] sm:$0xff]   ;;  %v2483_v8 = vcombine.low %v3603_v44, %v381_v1  ;;  %v732_v23 = vrot.slane %v3609_v49, 1  ;;  %v1378_v26 = vld [vmem:[#allocation2 + $0x4] sm:$0xc] }
 0x123   :  { %2978 = vmatmul.mubr.bf16.gmra.mrb[4].mxu1 %v890_v53  ;;  %2913 = vmatprep.subr.bf16.mxu0 %v3215_v60  ;;  %v3673_v32 = vsel %vm884_vm2, %v1742_v24, %v1744_v12  ;;  %v1096_v45 = vrot.slane %v1094_v36, 3  ;;  %v1099_v46 = vrot.slane %v1097_v39, 4  ;;  %v2563_v53 = vcombine.low %v3687_v48, %v3687_v48  ;;  %v3244_v44 = vld [vmem:[%s4061_s3 + $0x168] sm:$0xff]  }
 0x124   :  { %v464_v63 = vsel %vm436_vm3, %v459_v57, %v463_v58  ;;  %v467_v4 = vor.u32 %v465_v38, %v463_v58  ;;  %2986 = vmatpush3.bf16.msra.mxu1 %v3214_v51  ;;  %2997 = vmatprep.mubr.bf16.mxu1 %v1083_v10  ;;  %v1091_v50 = vor.u32 %v1090_v42, %v1087_v41  ;;  %v705_v58 = vld [vmem:[#allocation2] sm:$0xe]  ;;  %v3238_v38 = vld [vmem:[%s4061_s3 + $0x90] sm:$0xff]   ;;  %v3241_v10 = vld [vmem:[%s4061_s3 + $0x98] sm:$0xff]  }
 0x125   :  { %2905 = vmatprep.mubr.bf16.mxu0 %v464_v63  ;;  %2987 = vmatprep.subr.bf16.mxu1 %v3218_v5  ;;  %v1100_v51 = vor.u32 %v1099_v46, %v1096_v45  ;;  %v1103_v57 = vshll.u32 %v2563_v53, 16  ;;  %v3253_v24 = vld [vmem:[%s4061_s3 + $0x188] sm:$0xff]   ;;  %v2616_v49 = vcombine.low %v1378_v26, %v3568_v9  ;;  %v2591_v33 = vcombine.low %v3636_v15, %v3687_v48  ;;  %v3261_v41 = vld [vmem:[%s4061_s3 + $0x1b8] sm:$0xff]   ;;  %v1379_v42 = vld [vmem:[#allocation2 + $0x20] sm:$0x7] }
 0x126   :  { %2906 = vmatmul.mubr.bf16.gmra.mrb[12].mxu0 %v467_v4  ;;  %v1092_v54 = vsel %vm1066_vm4, %v3621_v62, %v1091_v50  ;;  %v2508_v62 = vcombine.low %v705_v58, %v3558_v61  ;;  %v728_v4 = vrot.slane %v3574_v13, 1  ;;  %v3259_v39 = vld [vmem:[%s4061_s3 + $0x1a8] sm:$0xff]   ;;  %v3262_v45 = vld [vmem:[%s4061_s3 + $0x1c0] sm:$0xff]   ;;  %v1407_v46 = vrot.slane %v3642_v18, 2 }
 0x127   :  { %2914 = vmatpush3.bf16.msra.mxu0 %v3215_v60  ;;  %2925 = vmatprep.mubr.bf16.mxu0 %v3565_v7  ;;  %v2667_v7 = vcombine.low %v1718_v20, %v3568_v9  ;;  %v1101_v55 = vsel %vm1066_vm4, %v1091_v50, %v1100_v51  ;;  %v3235_v60 = vld [vmem:[%s4061_s3 + $0x150] sm:$0xff]   ;;  %v1105_v63 = vrot.slane %v1103_v57, 4  ;;  %v3248_v20 = vld [vmem:[%s4061_s3 + $0x178] sm:$0xff]   ;;  %v1404_v34 = vrot.slane %v2616_v49, 2  ;;  %v3268_v1 = vld [vmem:[%s4061_s3 + $0x1e8] sm:$0xff]  }
 0x128   :  { %2915 = vmatprep.subr.bf16.mxu0 %v3219_v6  ;;  %2988 = vmatpush3.bf16.msra.mxu1 %v3218_v5  ;;  %v727_v2 = vrot.slane %v2508_v62, 1  ;;  %v3240_v5 = vld [vmem:[%s4061_s3 + $0x158] sm:$0xff]   ;;  %v1567_v48 = vshrl.u32 %v3639_v16, 16  ;;  %v1570_v50 = vshll.u32 %v3639_v16, 16  ;;  %v3283_v26 = vld [vmem:[%s4063_s5 + $0x4] ss:$16 sps:$4 sm:$0xff]  }
 0x129   :  { %2989 = vmatprep.subr.bf16.mxu1 %v3220_v59  ;;  %v1739_v27 = vrot.slane %v2667_v7, 3  ;;  %v1106_v61 = vsel %vm1066_vm4, %v1100_v51, %v1105_v63  ;;  %v3251_v7 = vld [vmem:[%s4061_s3 + $0x180] sm:$0xff]   ;;  %v3264_v51 = vld [vmem:[%s4061_s3 + $0x1c8] sm:$0xff]   ;;  %v3266_v62 = vld [vmem:[%s4061_s3 + $0x1d8] sm:$0xff]  }
 0x12a   :  { %v3267_v63 = vld [vmem:[%s4061_s3 + $0x1e0] sm:$0xff]  }
 0x12b   :  { %2916 = vmatpush3.bf16.msra.mxu0 %v3219_v6  ;;  %v3668_v31 = vsel %vm884_vm2, %v1739_v27, %v1740_v21  ;;  %v2588_v6 = vcombine.low %v3579_v17, %v3568_v9  ;;  %v3243_v17 = vld [vmem:[%s4061_s3 + $0xa0] sm:$0xff]   ;;  %v730_v21 = vrot.slane %v3590_v28, 1 }
 0x12c   :  { %2917 = vmatprep.subr.bf16.mxu0 %v3221_v0  ;;  %2990 = vmatpush3.bf16.msra.mxu1 %v3220_v59  ;;  %v3242_v59 = vld [vmem:[%s4061_s3 + $0x160] sm:$0xff]  }
 0x12d   :  { %2991 = vmatprep.subr.bf16.mxu1 %v3222_v14  ;;  %v733_v27 = vsel %vm726_vm5, %v730_v21, %v732_v23  ;;  %v3258_v9 = vld [vmem:[%s4061_s3 + $0x1a0] sm:$0xff]  }
 0x12f   :  { %2918 = vmatpush3.bf16.msra.mxu0 %v3221_v0  ;;  %v3246_v0 = vld [vmem:[%s4061_s3 + $0x170] sm:$0xff]  }
 0x130   :  { %2919 = vmatprep.subr.bf16.mxu0 %v3223_v25  ;;  %2992 = vmatpush3.bf16.msra.mxu1 %v3222_v14  ;;  %v3249_v14 = vld [vmem:[%s4061_s3 + $0xb8] sm:$0xff]  }
 0x131   :  { %2993 = vmatprep.subr.bf16.mxu1 %v3224_v30 }
 0x133   :  { %2920 = vmatpush3.bf16.msra.mxu0 %v3223_v25  ;;  %v731_v25 = vsel %vm726_vm5, %v728_v4, %v730_v21  ;;  %v3277_v21 = vld [vmem:[%s4061_s3 + $0x220] sm:$0xff]  }
 0x134   :  { %2921 = vmatprep.subr.bf16.mxu0 %v3225_v35  ;;  %2994 = vmatpush3.bf16.msra.mxu1 %v3224_v30  ;;  %v1405_v30 = vrot.slane %v3639_v16, 2 }
 0x135   :  { %2995 = vmatprep.subr.bf16.mxu1 %v3226_v40 }
 0x136   :  { %v1406_v36 = vsel %vm1403_vm6, %v1404_v34, %v1405_v30  ;;  %v1408_v53 = vsel %vm1403_vm6, %v1405_v30, %v1407_v46  ;;  %v3290_v30 = vld [vmem:[%s4063_s5 + $0x60] ss:$16 sps:$4 sm:$0xff]  }
 0x137   :  { %2922 = vmatpush3.bf16.msra.mxu0 %v3225_v35  ;;  %v3257_v35 = vld [vmem:[%s4061_s3 + $0x198] sm:$0xff]   ;;  %v3296_v34 = vld [vmem:[%s4063_s5 + $0xa0] ss:$16 sps:$4 sm:$0xff]  }
 0x138   :  { %2923 = vmatprep.subr.bf16.mxu0 %v3227_v43  ;;  %2996 = vmatpush3.bf16.msra.mxu1 %v3226_v40  ;;  %v3260_v40 = vld [vmem:[%s4061_s3 + $0x1b0] sm:$0xff]  }
 0x139   :  { %3005 = vmatprep.subr.bf16.mxu1 %v3229_v47 }
 0x13b   :  { %2924 = vmatpush3.bf16.msra.mxu0 %v3227_v43  ;;  %2998 = vmatmul.mubr.bf16.vlgmr.msra.gmra.mrb[0].mxu1 %v1092_v54  ;;  %v2617_v43 = vcombine.low %v3636_v15, %v1379_v42  ;;  %v1559_v15 = vshrl.u32 %v2616_v49, 16  ;;  %v1569_v54 = vrot.slane %v1567_v48, 2 }
 0x13c   :  { %2933 = vmatprep.subr.bf16.mxu0 %v3231_v52  ;;  %3001 = vmatprep.mubr.bf16.mxu1 %v1101_v55  ;;  %v1572_v55 = vrot.slane %v1570_v50, 3 }
 0x13d   :  { %3006 = vmatpush3.bf16.msra.mxu1 %v3229_v47  ;;  %v1409_v47 = vrot.slane %v2617_v43, 2 }
 0x13e   :  { %2926 = vmatmul.mubr.bf16.vlgmr.msra.gmra.mrb[8].mxu0 %v3574_v13  ;;  %3007 = vmatprep.subr.bf16.mxu1 %v3232_v37  ;;  %v729_v13 = vsel %vm726_vm5, %v727_v2, %v728_v4  ;;  %v1573_v58 = vor.u32 %v1572_v55, %v1569_v54  ;;  %v3269_v2 = vld [vmem:[%s4061_s3 + $0x1f0] sm:$0xff]   ;;  %v1576_v4 = vshrl.u32 %v3642_v18, 16 }
 0x13f   :  { %2929 = vmatprep.mubr.bf16.mxu0 %v3590_v28  ;;  %2934 = vmatpush3.bf16.msra.mxu0 %v3231_v52  ;;  %v3255_v28 = vld [vmem:[%s4061_s3 + $0x190] sm:$0xff]   ;;  %v1562_v52 = vshll.u32 %v2616_v49, 16 }
 0x140   :  { %2935 = vmatprep.subr.bf16.mxu0 %v3233_v56  ;;  %v3292_v49 = vld [vmem:[%s4063_s5 + $0x64] ss:$16 sps:$4 sm:$0xff]  }
 0x141   :  { %3008 = vmatpush3.bf16.msra.mxu1 %v3232_v37  ;;  %v1410_v37 = vsel %vm1403_vm6, %v1407_v46, %v1409_v47  ;;  %v1564_v57 = vrot.slane %v1562_v52, 3 }
 0x142   :  { %3009 = vmatprep.subr.bf16.mxu1 %v3235_v60 }
 0x143   :  { %2936 = vmatpush3.bf16.msra.mxu0 %v3233_v56  ;;  %3002 = vmatmul.mubr.bf16.gmra.mrb[4].mxu1 %v1106_v61  ;;  %v1561_v56 = vrot.slane %v1559_v15, 2  ;;  %v1585_v61 = vshrl.u32 %v3648_v19, 16  ;;  %v2676_v15 = vld [vmem:[%s4064_s4] ss:$0 sm:$0xff] }
 0x144   :  { %2937 = vmatprep.subr.bf16.mxu0 %v3238_v38  ;;  %3021 = vmatprep.mubr.bf16.mxu1 %v2588_v6  ;;  %v1588_v6 = vshll.u32 %v3648_v19, 16  ;;  %v3293_v19 = vld [vmem:[%s4063_s5 + $0x80] ss:$16 sps:$4 sm:$0xff]  }
 0x145   :  { %3010 = vmatpush3.bf16.msra.mxu1 %v3235_v60  ;;  %v1565_v60 = vor.u32 %v1564_v57, %v1561_v56 }
 0x146   :  { %2930 = vmatmul.mubr.bf16.gmra.mrb[12].mxu0 %v2483_v8  ;;  %3011 = vmatprep.subr.bf16.mxu1 %v3240_v5  ;;  %v3270_v8 = vld [vmem:[%s4061_s3 + $0x1f8] sm:$0xff]  }
 0x147   :  { %2938 = vmatpush3.bf16.msra.mxu0 %v3238_v38  ;;  %2949 = vmatprep.mubr.bf16.mxu0 %v729_v13  ;;  %v1574_v38 = vsel %vm1557_vm7, %v1565_v60, %v1573_v58 }
 0x148   :  { %2939 = vmatprep.subr.bf16.mxu0 %v3241_v10 }
 0x149   :  { %3012 = vmatpush3.bf16.msra.mxu1 %v3240_v5  ;;  %v1579_v5 = vshll.u32 %v3642_v18, 16 }
 0x14a   :  { %3013 = vmatprep.subr.bf16.mxu1 %v3242_v59 }
 0x14b   :  { %2940 = vmatpush3.bf16.msra.mxu0 %v3241_v10  ;;  %v1578_v10 = vrot.slane %v1576_v4, 2  ;;  %v1581_v13 = vrot.slane %v1579_v5, 3 }
 0x14c   :  { %2941 = vmatprep.subr.bf16.mxu0 %v3243_v17 }
 0x14d   :  { %3014 = vmatpush3.bf16.msra.mxu1 %v3242_v59  ;;  %v1587_v59 = vrot.slane %v1585_v61, 2 }
 0x14e   :  { %3015 = vmatprep.subr.bf16.mxu1 %v3244_v44 }
 0x14f   :  { %2942 = vmatpush3.bf16.msra.mxu0 %v3243_v17  ;;  %v1590_v17 = vrot.slane %v1588_v6, 3  ;;  %v3305_v6 = vld [vmem:[%s4063_s5 + $0x8] ss:$16 sps:$4 sm:$0xff]  }
 0x150   :  { %2943 = vmatprep.subr.bf16.mxu0 %v3245_v11 }
 0x151   :  { %3016 = vmatpush3.bf16.msra.mxu1 %v3244_v44  ;;  %v1582_v44 = vor.u32 %v1581_v13, %v1578_v10 }
 0x152   :  { %3017 = vmatprep.subr.bf16.mxu1 %v3246_v0 }
 0x153   :  { %2944 = vmatpush3.bf16.msra.mxu0 %v3245_v11  ;;  %v1591_v11 = vor.u32 %v1590_v17, %v1587_v59  ;;  %v3310_v17 = vld [vmem:[%s4063_s5 + $0x2c] ss:$16 sps:$4 sm:$0xff]  }
 0x154   :  { %2945 = vmatprep.subr.bf16.mxu0 %v3247_v3 }
 0x155   :  { %3018 = vmatpush3.bf16.msra.mxu1 %v3246_v0  ;;  %v3273_v0 = vld [vmem:[%s4061_s3 + $0x208] sm:$0xff]  }
 0x156   :  { %3019 = vmatprep.subr.bf16.mxu1 %v3248_v20 }
 0x157   :  { %2946 = vmatpush3.bf16.msra.mxu0 %v3247_v3  ;;  %v1583_v3 = vsel %vm1557_vm7, %v1573_v58, %v1582_v44 }
 0x158   :  { %2947 = vmatprep.subr.bf16.mxu0 %v3249_v14 }
 0x159   :  { %3020 = vmatpush3.bf16.msra.mxu1 %v3248_v20  ;;  %v1592_v20 = vsel %vm1557_vm7, %v1582_v44, %v1591_v11 }
 0x15a   :  { %3029 = vmatprep.subr.bf16.mxu1 %v3251_v7 }
 0x15b   :  { %2948 = vmatpush3.bf16.msra.mxu0 %v3249_v14  ;;  %v3274_v14 = vld [vmem:[%s4061_s3 + $0x210] sm:$0xff]  }
 0x15c   :  { %3022 = vmatmul.mubr.bf16.vlgmr.msra.gmra.mrb[0].mxu1 %v3639_v16  ;;  %v3265_v16 = vld [vmem:[%s4061_s3 + $0x1d0] sm:$0xff]   ;;  %2112 = vmatprep.subr.bf16.mxu0 %v3283_v26  ;;  %v3311_v26 = vld [vmem:[%s4063_s5 + $0x48] ss:$16 sps:$4 sm:$0xff]  }
 0x15d   :  { %3025 = vmatprep.mubr.bf16.mxu1 %v3642_v18  ;;  %3030 = vmatpush3.bf16.msra.mxu1 %v3251_v7  ;;  %v3271_v18 = vld [vmem:[%s4061_s3 + $0x200] sm:$0xff]   ;;  %v3276_v7 = vld [vmem:[%s4061_s3 + $0x218] sm:$0xff]  }
 0x15e   :  { %2950 = vmatmul.mubr.bf16.vlgmr.msra.gmra.mrb[8].mxu0 %v731_v25  ;;  %3031 = vmatprep.subr.bf16.mxu1 %v3253_v24  ;;  %v3281_v25 = vld [vmem:[%s4063_s5] ss:$16 sps:$4 sm:$0xff]  }
 0x15f   :  { %2953 = vmatprep.mubr.bf16.mxu0 %v733_v27  ;;  %v3286_v27 = vld [vmem:[%s4063_s5 + $0x24] ss:$16 sps:$4 sm:$0xff]   ;;  %2113 = vmatpush1.bf16.msra.mxu0 %v3281_v25 }
 0x160   :  { %2114 = vmatprep.subr.bf16.mxu0 %v3286_v27 }
 0x161   :  { %3032 = vmatpush3.bf16.msra.mxu1 %v3253_v24  ;;  %v3279_v24 = vld [vmem:[%s4061_s3 + $0x230] sm:$0xff]  }
 0x162   :  { %3033 = vmatprep.subr.bf16.mxu1 %v3255_v28 }
 0x164   :  { %3026 = vmatmul.mubr.bf16.gmra.mrb[4].mxu1 %v2591_v33  ;;  %v3295_v33 = vld [vmem:[%s4063_s5 + $0x84] ss:$16 sps:$4 sm:$0xff]  }
 0x165   :  { %3034 = vmatpush3.bf16.msra.mxu1 %v3255_v28  ;;  %3045 = vmatprep.mubr.bf16.mxu1 %v1406_v36  ;;  %v3287_v28 = vld [vmem:[%s4063_s5 + $0x40] ss:$16 sps:$4 sm:$0xff]   ;;  %v3301_v36 = vld [vmem:[%s4063_s5 + $0xc4] ss:$16 sps:$4 sm:$0xff]  }
 0x166   :  { %2954 = vmatmul.mubr.bf16.gmra.mrb[12].mxu0 %v732_v23  ;;  %3035 = vmatprep.subr.bf16.mxu1 %v3257_v35  ;;  %v3278_v23 = vld [vmem:[%s4061_s3 + $0x228] sm:$0xff]  }
 0x167   :  { %2144 = vmatprep.mubr.bf16.mxu0 %v3329_v22 }
 0x169   :  { %3036 = vmatpush3.bf16.msra.mxu1 %v3257_v35  ;;  %v3299_v35 = vld [vmem:[%s4063_s5 + $0xc0] ss:$16 sps:$4 sm:$0xff]  }
 0x16a   :  { %3037 = vmatprep.subr.bf16.mxu1 %v3258_v9 }
 0x16d   :  { %3038 = vmatpush3.bf16.msra.mxu1 %v3258_v9  ;;  %v3304_v9 = vld [vmem:[%s4063_s5 + $0xe4] ss:$16 sps:$4 sm:$0xff]  }
 0x16e   :  { %3039 = vmatprep.subr.bf16.mxu1 %v3259_v39 }
 0x171   :  { %3040 = vmatpush3.bf16.msra.mxu1 %v3259_v39  ;;  %v3302_v39 = vld [vmem:[%s4063_s5 + $0xe0] ss:$16 sps:$4 sm:$0xff]  }
 0x172   :  { %3041 = vmatprep.subr.bf16.mxu1 %v3260_v40 }
 0x175   :  { %3042 = vmatpush3.bf16.msra.mxu1 %v3260_v40  ;;  %v3307_v40 = vld [vmem:[%s4063_s5 + $0xc] ss:$16 sps:$4 sm:$0xff]  }
 0x176   :  { %3043 = vmatprep.subr.bf16.mxu1 %v3261_v41 }
 0x179   :  { %3044 = vmatpush3.bf16.msra.mxu1 %v3261_v41 }
 0x17a   :  { %3053 = vmatprep.subr.bf16.mxu1 %v3262_v45 }
 0x17c   :  { %3046 = vmatmul.mubr.bf16.vlgmr.msra.gmra.mrb[0].mxu1 %v1408_v53 }
 0x17d   :  { %3049 = vmatprep.mubr.bf16.mxu1 %v1410_v37  ;;  %3054 = vmatpush3.bf16.msra.mxu1 %v3262_v45 }
 0x17e   :  { %3055 = vmatprep.subr.bf16.mxu1 %v3264_v51 }
 0x181   :  { %3056 = vmatpush3.bf16.msra.mxu1 %v3264_v51 }
 0x182   :  { %3057 = vmatprep.subr.bf16.mxu1 %v3265_v16 }
 0x184   :  { %3050 = vmatmul.mubr.bf16.gmra.mrb[4].mxu1 %v1409_v47 }
 0x185   :  { %3058 = vmatpush3.bf16.msra.mxu1 %v3265_v16  ;;  %3069 = vmatprep.mubr.bf16.mxu1 %v1574_v38 }
 0x186   :  { %3059 = vmatprep.subr.bf16.mxu1 %v3266_v62 }
 0x189   :  { %3060 = vmatpush3.bf16.msra.mxu1 %v3266_v62 }
 0x18a   :  { %3061 = vmatprep.subr.bf16.mxu1 %v3267_v63 }
 0x18d   :  { %3062 = vmatpush3.bf16.msra.mxu1 %v3267_v63 }
 0x18e   :  { %3063 = vmatprep.subr.bf16.mxu1 %v3268_v1 }
 0x191   :  { %3064 = vmatpush3.bf16.msra.mxu1 %v3268_v1 }
 0x192   :  { %3065 = vmatprep.subr.bf16.mxu1 %v3269_v2 }
 0x195   :  { %3066 = vmatpush3.bf16.msra.mxu1 %v3269_v2 }
 0x196   :  { %3067 = vmatprep.subr.bf16.mxu1 %v3270_v8 }
 0x199   :  { %3068 = vmatpush3.bf16.msra.mxu1 %v3270_v8 }
 0x19a   :  { %3077 = vmatprep.subr.bf16.mxu1 %v3271_v18 }
 0x19c   :  { %3070 = vmatmul.mubr.bf16.vlgmr.msra.gmra.mrb[0].mxu1 %v1583_v3 }
 0x19d   :  { %3073 = vmatprep.mubr.bf16.mxu1 %v1592_v20  ;;  %3078 = vmatpush3.bf16.msra.mxu1 %v3271_v18 }
 0x19e   :  { %3079 = vmatprep.subr.bf16.mxu1 %v3273_v0 }
 0x1a1   :  { %3080 = vmatpush3.bf16.msra.mxu1 %v3273_v0 }
 0x1a2   :  { %3081 = vmatprep.subr.bf16.mxu1 %v3274_v14 }
 0x1a4   :  { %3074 = vmatmul.mubr.bf16.gmra.mrb[4].mxu1 %v1591_v11 }
 0x1a5   :  { %3082 = vmatpush3.bf16.msra.mxu1 %v3274_v14  ;;  %3093 = vmatprep.mubr.bf16.mxu1 %v3668_v31  ;;  %v3280_v31 = vld [vmem:[%s4061_s3 + $0x238] sm:$0xff]  }
 0x1a6   :  { %3083 = vmatprep.subr.bf16.mxu1 %v3276_v7  ;;  %v3308_v14 = vld [vmem:[%s4063_s5 + $0x28] ss:$16 sps:$4 sm:$0xff]  }
 0x1a9   :  { %3084 = vmatpush3.bf16.msra.mxu1 %v3276_v7 }
 0x1aa   :  { %3085 = vmatprep.subr.bf16.mxu1 %v3277_v21 }
 0x1ad   :  { %3086 = vmatpush3.bf16.msra.mxu1 %v3277_v21  ;;  %v3313_v21 = vld [vmem:[%s4063_s5 + $0x4c] ss:$16 sps:$4 sm:$0xff]  }
 0x1ae   :  { %3087 = vmatprep.subr.bf16.mxu1 %v3278_v23 }
 0x1b1   :  { %3088 = vmatpush3.bf16.msra.mxu1 %v3278_v23 }
 0x1b2   :  { %3089 = vmatprep.subr.bf16.mxu1 %v3279_v24 }
 0x1b5   :  { %3090 = vmatpush3.bf16.msra.mxu1 %v3279_v24 }
 0x1b6   :  { %3091 = vmatprep.subr.bf16.mxu1 %v3280_v31 }
 0x1b9   :  { %3092 = vmatpush3.bf16.msra.mxu1 %v3280_v31 }
 0x1bc   :  { %3094 = vmatmul.mubr.bf16.vlgmr.msra.gmra.mrb[0].mxu1 %v3662_v29  ;;  %v3284_v29 = vld [vmem:[%s4063_s5 + $0x20] ss:$16 sps:$4 sm:$0xff]  }
 0x1bd   :  { %3097 = vmatprep.mubr.bf16.mxu1 %v3673_v32  ;;  %v3289_v32 = vld [vmem:[%s4063_s5 + $0x44] ss:$16 sps:$4 sm:$0xff]   ;;  %2115 = vmatpush1.bf16.msra.mxu0 %v3284_v29  ;;  %v3316_v29 = vld [vmem:[%s4063_s5 + $0x6c] ss:$16 sps:$4 sm:$0xff]  }
 0x1be   :  { %2116 = vmatprep.subr.bf16.mxu0 %v3289_v32 }
 0x1c1   :  { %2117 = vmatpush1.bf16.msra.mxu0 %v3287_v28  ;;  %v3314_v28 = vld [vmem:[%s4063_s5 + $0x68] ss:$16 sps:$4 sm:$0xff]  }
 0x1c2   :  { %2118 = vmatprep.subr.bf16.mxu0 %v3292_v49  ;;  %v3319_v49 = vld [vmem:[%s4063_s5 + $0x8c] ss:$16 sps:$4 sm:$0xff]  }
 0x1c4   :  { %3098 = vmatmul.mubr.bf16.gmra.mrb[4].mxu1 %v1744_v12  ;;  %v3298_v12 = vld [vmem:[%s4063_s5 + $0xa4] ss:$16 sps:$4 sm:$0xff]  }
 0x1c5   :  { %2119 = vmatpush1.bf16.msra.mxu0 %v3290_v30  ;;  %v3317_v30 = vld [vmem:[%s4063_s5 + $0x88] ss:$16 sps:$4 sm:$0xff]  }
 0x1c6   :  { %2120 = vmatprep.subr.bf16.mxu0 %v3295_v33  ;;  %v3322_v33 = vld [vmem:[%s4063_s5 + $0xac] ss:$16 sps:$4 sm:$0xff]  }
 0x1c9   :  { %2121 = vmatpush1.bf16.msra.mxu0 %v3293_v19  ;;  %v3320_v19 = vld [vmem:[%s4063_s5 + $0xa8] ss:$16 sps:$4 sm:$0xff]  }
 0x1ca   :  { %2122 = vmatprep.subr.bf16.mxu0 %v3298_v12  ;;  %v3325_v12 = vld [vmem:[%s4063_s5 + $0xcc] ss:$16 sps:$4 sm:$0xff]  }
 0x1cd   :  { %2123 = vmatpush1.bf16.msra.mxu0 %v3296_v34  ;;  %v3323_v34 = vld [vmem:[%s4063_s5 + $0xc8] ss:$16 sps:$4 sm:$0xff]  }
 0x1ce   :  { %2124 = vmatprep.subr.bf16.mxu0 %v3301_v36  ;;  %v3326_v36 = vld [vmem:[%s4063_s5 + $0xe8] ss:$16 sps:$4 sm:$0xff]  }
 0x1d1   :  { %2125 = vmatpush1.bf16.msra.mxu0 %v3299_v35  ;;  %v3328_v35 = vld [vmem:[%s4063_s5 + $0xec] ss:$16 sps:$4 sm:$0xff]  }
 0x1d2   :  { %2126 = vmatprep.subr.bf16.mxu0 %v3304_v9  ;;  %v1932_v9 = vlaneseq }
 0x1d5   :  { %2127 = vmatpush1.bf16.msra.mxu0 %v3302_v39  ;;  %v3956_v39 = vshrl.u32 %v1932_v9, 7 }
 0x1d6   :  { %2185 = vmatprep.subr.bf16.mxu0 %v3307_v40 }
 0x1d7   :  { %v1934_v40 = vsub.s32 0, %v3956_v39 }
 0x231   :  { %v2951_v41 = vpop.f32.mrb[8].mxu0 }
 0x232   :  { %v820_v42 = vpop.f32.mrb[9].mxu0 }
 0x233   :  { %v2952_v43 = vpop.f32.mrb[10].mxu0 }
 0x234   :  { %v823_v45 = vpop.f32.mrb[11].mxu0 }
 0x239   :  { %v2955_v46 = vpop.f32.mrb[12].mxu0 }
 0x23a   :  { %v836_v47 = vpop.f32.mrb[13].mxu0 }
 0x23b   :  { %v2956_v48 = vpop.f32.mrb[14].mxu0 }
 0x23c   :  { %v839_v50 = vpop.f32.mrb[15].mxu0 }
 0x28f   :  { %v3095_v51 = vpop.f32.mrb[0].mxu1 }
 0x290   :  { %v3101_v52 = vadd.f32 %v3095_v51, %v2951_v41  ;;  %v1832_v53 = vpop.f32.mrb[1].mxu1  ;;  %v3962_v41 = vld [vmem:[%s4065_s6] sm:$0xf] }
 0x291   :  { %v3102_v37 = vadd.f32 %v1832_v53, %v820_v42  ;;  %v3096_v54 = vpop.f32.mrb[2].mxu1  ;;  %v1938_v42 = vsub.s32 1, %v3956_v39 }
 0x292   :  { %v1880_v55 = vadd.f32 %v3101_v52, %v2676_v15  ;;  %v3103_v16 = vadd.f32 %v3096_v54, %v2952_v43  ;;  %v1835_v56 = vpop.f32.mrb[3].mxu1  ;;  %v1935_v43 = vrot.slane %v3962_v41, %v1934_v40 }
 0x293   :  { %v1878_v57 = vadd.f32 %v3102_v37, %v2676_v15  ;;  %v3104_v58 = vadd.f32 %v1835_v56, %v823_v45  ;;  %v3967_v45 = vrot.slane %v3962_v41, %v1938_v42 }
 0x294   :  { %v1881_v60 = vadd.f32 %v3103_v16, %v2676_v15  ;;  %v1888_v38 = vmax.f32 %v1880_v55, 0.0 }
 0x295   :  { %v1879_v62 = vadd.f32 %v3104_v58, %v2676_v15  ;;  %v1886_v1 = vmax.f32 %v1878_v57, 0.0 }
 0x296   :  { %v1889_v63 = vmax.f32 %v1881_v60, 0.0 }
 0x297   :  { %v1887_v2 = vmax.f32 %v1879_v62, 0.0  ;;  %v3099_v4 = vpop.f32.mrb[4].mxu1 }
 0x298   :  { %v3105_v5 = vadd.f32 %v3099_v4, %v2955_v46  ;;  %v1848_v61 = vpop.f32.mrb[5].mxu1  ;;  %v1895_v8 = vpack.c.bf16 %v1889_v63, %v1888_v38 }
 0x299   :  { %v1894_v10 = vpack.c.bf16 %v1887_v2, %v1886_v1  ;;  %v3106_v13 = vadd.f32 %v1848_v61, %v836_v47  ;;  %v3100_v59 = vpop.f32.mrb[6].mxu1 }
 0x29a   :  { %v1884_v18 = vadd.f32 %v3105_v5, %v2676_v15  ;;  %v3107_v44 = vadd.f32 %v3100_v59, %v2956_v48  ;;  %v1851_v11 = vpop.f32.mrb[7].mxu1 }
 0x29b   :  { %v1882_v0 = vadd.f32 %v3106_v13, %v2676_v15  ;;  %v3108_v3 = vadd.f32 %v1851_v11, %v839_v50  ;;  %2145 = vmatmul.mubr.bf16.vlgmr.msra.gmra.mrb[16].mxu0 %v1894_v10 }
 0x29c   :  { %v1885_v20 = vadd.f32 %v3107_v44, %v2676_v15  ;;  %2186 = vmatpush1.bf16.msra.mxu0 %v3305_v6  ;;  %2154 = vmatprep.mubr.bf16.mxu0 %v3329_v22  ;;  %v1892_v23 = vmax.f32 %v1884_v18, 0.0 }
 0x29d   :  { %v1883_v7 = vadd.f32 %v3108_v3, %v2676_v15  ;;  %2187 = vmatprep.subr.bf16.mxu0 %v3310_v17  ;;  %v1890_v31 = vmax.f32 %v1882_v0, 0.0 }
 0x29e   :  { %v1893_v24 = vmax.f32 %v1885_v20, 0.0 }
 0x29f   :  { %v1891_v25 = vmax.f32 %v1883_v7, 0.0 }
 0x2a0   :  { %2188 = vmatpush1.bf16.msra.mxu0 %v3308_v14  ;;  %v1897_v27 = vpack.c.bf16 %v1893_v24, %v1892_v23 }
 0x2a1   :  { %2189 = vmatprep.subr.bf16.mxu0 %v3313_v21  ;;  %v1896_v32 = vpack.c.bf16 %v1891_v25, %v1890_v31 }
 0x2a3   :  { %2155 = vmatmul.mubr.bf16.gmra.mrb[20].mxu0 %v1895_v8 }
 0x2a4   :  { %2190 = vmatpush1.bf16.msra.mxu0 %v3311_v26  ;;  %2164 = vmatprep.mubr.bf16.mxu0 %v3329_v22 }
 0x2a5   :  { %2191 = vmatprep.subr.bf16.mxu0 %v3316_v29 }
 0x2a8   :  { %2192 = vmatpush1.bf16.msra.mxu0 %v3314_v28 }
 0x2a9   :  { %2193 = vmatprep.subr.bf16.mxu0 %v3319_v49 }
 0x2ab   :  { %2165 = vmatmul.mubr.bf16.gmra.mrb[24].mxu0 %v1896_v32 }
 0x2ac   :  { %2194 = vmatpush1.bf16.msra.mxu0 %v3317_v30  ;;  %2174 = vmatprep.mubr.bf16.mxu0 %v3329_v22 }
 0x2ad   :  { %2195 = vmatprep.subr.bf16.mxu0 %v3322_v33  ;;  %v1946_v33 = vsub.s32 3, %v3956_v39 }
 0x2b0   :  { %2196 = vmatpush1.bf16.msra.mxu0 %v3320_v19 }
 0x2b1   :  { %2197 = vmatprep.subr.bf16.mxu0 %v3325_v12 }
 0x2b3   :  { %2175 = vmatmul.mubr.bf16.gmra.mrb[28].mxu0 %v1897_v27 }
 0x2b4   :  { %2198 = vmatpush1.bf16.msra.mxu0 %v3323_v34  ;;  %2217 = vmatprep.mubr.bf16.mxu0 %v3329_v22 }
 0x2b5   :  { %2199 = vmatprep.subr.bf16.mxu0 %v3328_v35 }
 0x2b8   :  { %2200 = vmatpush1.bf16.msra.mxu0 %v3326_v36 }
 0x2bb   :  { %2218 = vmatmul.mubr.bf16.vlgmr.msra.gmra.mrb[32].mxu0 %v1894_v10 }
 0x2bc   :  { %2227 = vmatprep.mubr.bf16.mxu0 %v3329_v22 }
 0x2c3   :  { %2228 = vmatmul.mubr.bf16.gmra.mrb[36].mxu0 %v1895_v8 }
 0x2c4   :  { %2237 = vmatprep.mubr.bf16.mxu0 %v3329_v22 }
 0x2cb   :  { %2238 = vmatmul.mubr.bf16.gmra.mrb[40].mxu0 %v1896_v32  ;;  %v1942_v32 = vsub.s32 2, %v3956_v39 }
 0x2cc   :  { %2247 = vmatprep.mubr.bf16.mxu0 %v3329_v22 }
 0x2cd   :  { %v4004_v40 = vrot.slane %v3962_v41, %v1942_v32 }
 0x2d3   :  { %2248 = vmatmul.mubr.bf16.gmra.mrb[44].mxu0 %v1897_v27 }
 0x36e   :  { %v2146_v46 = vpop.f32.mrb[16].mxu0 }
 0x36f   :  { %v2147_v22 = vadd.f32 %v2146_v46, %v1935_v43  ;;  %v2148_v47 = vpop.f32.mrb[17].mxu0 }
 0x370   :  { %v2149_v48 = vadd.f32 %v2148_v47, %v3967_v45  ;;  %v2150_v50 = vpop.f32.mrb[18].mxu0 }
 0x371   :  { %v2258_v51 = vmax.f32 %v2147_v22, 0.0  ;;  %v2151_v15 = vadd.f32 %v2150_v50, %v1935_v43  ;;  %v2152_v52 = vpop.f32.mrb[19].mxu0  ;;  %v4007_v22 = vrot.slane %v3962_v41, %v1946_v33 }
 0x372   :  { %v2259_v53 = vmax.f32 %v2149_v48, 0.0  ;;  %v2153_v37 = vadd.f32 %v2152_v52, %v3967_v45 }
 0x373   :  { %v2262_v54 = vmax.f32 %v2151_v15, 0.0 }
 0x374   :  { %v2735_v55 = vpack.c.bf16 %v2259_v53, %v2258_v51  ;;  %v2263_v16 = vmax.f32 %v2153_v37, 0.0 }
 0x376   :  { %2318 = vst [vmem:[%s4066_s7] sm:$0x33] %v2735_v55  ;;  %v2737_v56 = vpack.c.bf16 %v2263_v16, %v2262_v54  ;;  %v2156_v57 = vpop.f32.mrb[20].mxu0  ;;  %v2713_v38 = vrot.slane %v2735_v55, 9 }
 0x377   :  { %v2157_v60 = vadd.f32 %v2156_v57, %v1935_v43  ;;  %v2158_v62 = vpop.f32.mrb[21].mxu0 }
 0x378   :  { %v2330_v63 = vrot.slane %v2737_v56, 5  ;;  %v2715_v1 = vrot.slane %v2737_v56, 10  ;;  %v2159_v2 = vadd.f32 %v2158_v62, %v3967_v45  ;;  %v2160_v4 = vpop.f32.mrb[22].mxu0 }
 0x379   :  { %v2266_v5 = vmax.f32 %v2157_v60, 0.0  ;;  %v2162_v61 = vpop.f32.mrb[23].mxu0 }
 0x37a   :  { %v2331_v6 = vsel %vm3975_vm9, %v2713_v38, %v2330_v63  ;;  %2346 = vst [vmem:[%s4066_s7 + $0x10] sm:$0x33] %v2715_v1  ;;  %v2267_v8 = vmax.f32 %v2159_v2, 0.0 }
 0x37b   :  { %2338 = vst [vmem:[%s4066_s7] sm:$0xcc] %v2331_v6 }
 0x37c   :  { %v2739_v10 = vpack.c.bf16 %v2267_v8, %v2266_v5 }
 0x37e   :  { %v2358_v13 = vrot.slane %v2739_v10, 7  ;;  %v2166_v59 = vpop.f32.mrb[24].mxu0 }
 0x37f   :  { %v2167_v17 = vadd.f32 %v2166_v59, %v1935_v43  ;;  %v2168_v18 = vpop.f32.mrb[25].mxu0 }
 0x380   :  { %2362 = vst [vmem:[%s4066_s7 + $0x10] sm:$0xcc] %v2358_v13  ;;  %v2169_v44 = vadd.f32 %v2168_v18, %v3967_v45  ;;  %v2170_v11 = vpop.f32.mrb[26].mxu0 }
 0x381   :  { %v2274_v0 = vmax.f32 %v2167_v17, 0.0  ;;  %v2171_v3 = vadd.f32 %v2170_v11, %v1935_v43  ;;  %v2172_v20 = vpop.f32.mrb[27].mxu0 }
 0x382   :  { %v2275_v14 = vmax.f32 %v2169_v44, 0.0  ;;  %v2173_v7 = vadd.f32 %v2172_v20, %v3967_v45 }
 0x383   :  { %v2278_v21 = vmax.f32 %v2171_v3, 0.0 }
 0x384   :  { %v2741_v23 = vpack.c.bf16 %v2275_v14, %v2274_v0  ;;  %v2279_v24 = vmax.f32 %v2173_v7, 0.0 }
 0x386   :  { %v2721_v31 = vrot.slane %v2741_v23, 10  ;;  %v2743_v25 = vpack.c.bf16 %v2279_v24, %v2278_v21  ;;  %v2176_v26 = vpop.f32.mrb[28].mxu0 }
 0x387   :  { %v2177_v27 = vadd.f32 %v2176_v26, %v1935_v43  ;;  %v2178_v29 = vpop.f32.mrb[29].mxu0 }
 0x388   :  { %2380 = vst [vmem:[%s4066_s7 + $0x20] sm:$0x33] %v2721_v31  ;;  %v2388_v28 = vrot.slane %v2743_v25, 7  ;;  %v2179_v49 = vadd.f32 %v2178_v29, %v3967_v45  ;;  %v2180_v30 = vpop.f32.mrb[30].mxu0 }
 0x389   :  { %v2282_v19 = vmax.f32 %v2177_v27, 0.0  ;;  %v2181_v12 = vadd.f32 %v2180_v30, %v1935_v43  ;;  %v2182_v34 = vpop.f32.mrb[31].mxu0 }
 0x38a   :  { %2392 = vst [vmem:[%s4066_s7 + $0x20] sm:$0xcc] %v2388_v28  ;;  %v2283_v35 = vmax.f32 %v2179_v49, 0.0  ;;  %v2183_v36 = vadd.f32 %v2182_v34, %v3967_v45 }
 0x38b   :  { %v2286_v9 = vmax.f32 %v2181_v12, 0.0 }
 0x38c   :  { %v2745_v42 = vpack.c.bf16 %v2283_v35, %v2282_v19  ;;  %v2287_v46 = vmax.f32 %v2183_v36, 0.0 }
 0x38e   :  { %2406 = vst [vmem:[%s4066_s7 + $0x30] sm:$0x33] %v2745_v42  ;;  %v2747_v39 = vpack.c.bf16 %v2287_v46, %v2286_v9  ;;  %v2219_v43 = vpop.f32.mrb[32].mxu0  ;;  %v2729_v50 = vrot.slane %v2745_v42, 9 }
 0x38f   :  { %v2220_v47 = vadd.f32 %v2219_v43, %v4004_v40  ;;  %v2221_v48 = vpop.f32.mrb[33].mxu0 }
 0x390   :  { %v2416_v45 = vrot.slane %v2747_v39, 5  ;;  %v2222_v51 = vadd.f32 %v2221_v48, %v4007_v22  ;;  %v2223_v15 = vpop.f32.mrb[34].mxu0 }
 0x391   :  { %v2260_v52 = vmax.f32 %v2220_v47, 0.0  ;;  %v2224_v53 = vadd.f32 %v2223_v15, %v4004_v40  ;;  %v2225_v37 = vpop.f32.mrb[35].mxu0 }
 0x392   :  { %v2417_v41 = vsel %vm3975_vm9, %v2729_v50, %v2416_v45  ;;  %v2261_v54 = vmax.f32 %v2222_v51, 0.0  ;;  %v2226_v55 = vadd.f32 %v2225_v37, %v4007_v22 }
 0x393   :  { %2424 = vst [vmem:[%s4066_s7 + $0x30] sm:$0xcc] %v2417_v41  ;;  %v2264_v16 = vmax.f32 %v2224_v53, 0.0 }
 0x394   :  { %v2736_v56 = vpack.c.bf16 %v2261_v54, %v2260_v52  ;;  %v2265_v57 = vmax.f32 %v2226_v55, 0.0 }
 0x396   :  { %2319 = vst [vmem:[%s4066_s7 + $0x8] sm:$0x33] %v2736_v56  ;;  %v2738_v60 = vpack.c.bf16 %v2265_v57, %v2264_v16  ;;  %v2229_v62 = vpop.f32.mrb[36].mxu0  ;;  %v2714_v1 = vrot.slane %v2736_v56, 9 }
 0x397   :  { %v2230_v38 = vadd.f32 %v2229_v62, %v4004_v40  ;;  %v2231_v63 = vpop.f32.mrb[37].mxu0 }
 0x398   :  { %v2334_v2 = vrot.slane %v2738_v60, 5  ;;  %v2716_v4 = vrot.slane %v2738_v60, 10  ;;  %v2232_v5 = vadd.f32 %v2231_v63, %v4007_v22  ;;  %v2233_v61 = vpop.f32.mrb[38].mxu0 }
 0x399   :  { %v2268_v6 = vmax.f32 %v2230_v38, 0.0  ;;  %v2235_v8 = vpop.f32.mrb[39].mxu0 }
 0x39a   :  { %v2335_v10 = vsel %vm3975_vm9, %v2714_v1, %v2334_v2  ;;  %2347 = vst [vmem:[%s4066_s7 + $0x18] sm:$0x33] %v2716_v4  ;;  %v2269_v13 = vmax.f32 %v2232_v5, 0.0 }
 0x39b   :  { %2339 = vst [vmem:[%s4066_s7 + $0x8] sm:$0xcc] %v2335_v10 }
 0x39c   :  { %v2740_v59 = vpack.c.bf16 %v2269_v13, %v2268_v6 }
 0x39e   :  { %v2359_v17 = vrot.slane %v2740_v59, 7  ;;  %v2239_v18 = vpop.f32.mrb[40].mxu0 }
 0x39f   :  { %v2240_v44 = vadd.f32 %v2239_v18, %v4004_v40  ;;  %v2241_v11 = vpop.f32.mrb[41].mxu0 }
 0x3a0   :  { %2363 = vst [vmem:[%s4066_s7 + $0x18] sm:$0xcc] %v2359_v17  ;;  %v2242_v0 = vadd.f32 %v2241_v11, %v4007_v22  ;;  %v2243_v3 = vpop.f32.mrb[42].mxu0 }
 0x3a1   :  { %v2276_v20 = vmax.f32 %v2240_v44, 0.0  ;;  %v2244_v14 = vadd.f32 %v2243_v3, %v4004_v40  ;;  %v2245_v7 = vpop.f32.mrb[43].mxu0 }
 0x3a2   :  { %v2277_v21 = vmax.f32 %v2242_v0, 0.0  ;;  %v2246_v23 = vadd.f32 %v2245_v7, %v4007_v22 }
 0x3a3   :  { %v2280_v24 = vmax.f32 %v2244_v14, 0.0 }
 0x3a4   :  { %v2742_v31 = vpack.c.bf16 %v2277_v21, %v2276_v20  ;;  %v2281_v25 = vmax.f32 %v2246_v23, 0.0 }
 0x3a6   :  { %v2722_v26 = vrot.slane %v2742_v31, 10  ;;  %v2744_v27 = vpack.c.bf16 %v2281_v25, %v2280_v24  ;;  %v2249_v29 = vpop.f32.mrb[44].mxu0 }
 0x3a7   :  { %v2250_v32 = vadd.f32 %v2249_v29, %v4004_v40  ;;  %v2251_v28 = vpop.f32.mrb[45].mxu0 }
 0x3a8   :  { %2381 = vst [vmem:[%s4066_s7 + $0x28] sm:$0x33] %v2722_v26  ;;  %v2389_v49 = vrot.slane %v2744_v27, 7  ;;  %v2252_v30 = vadd.f32 %v2251_v28, %v4007_v22  ;;  %v2253_v33 = vpop.f32.mrb[46].mxu0 }
 0x3a9   :  { %v2284_v19 = vmax.f32 %v2250_v32, 0.0  ;;  %v2254_v12 = vadd.f32 %v2253_v33, %v4004_v40  ;;  %v2255_v34 = vpop.f32.mrb[47].mxu0 }
 0x3aa   :  { %2393 = vst [vmem:[%s4066_s7 + $0x28] sm:$0xcc] %v2389_v49  ;;  %v2285_v35 = vmax.f32 %v2252_v30, 0.0  ;;  %v2256_v36 = vadd.f32 %v2255_v34, %v4007_v22 }
 0x3ab   :  { %v2288_v9 = vmax.f32 %v2254_v12, 0.0 }
 0x3ac   :  { %v2746_v42 = vpack.c.bf16 %v2285_v35, %v2284_v19  ;;  %v2289_v46 = vmax.f32 %v2256_v36, 0.0 }
 0x3ae   :  { %2407 = vst [vmem:[%s4066_s7 + $0x38] sm:$0x33] %v2746_v42  ;;  %v2748_v39 = vpack.c.bf16 %v2289_v46, %v2288_v9  ;;  %v2730_v43 = vrot.slane %v2746_v42, 9 }
 0x3b0   :  { %v2420_v47 = vrot.slane %v2748_v39, 5 }
 0x3b2   :  { %v2421_v40 = vsel %vm3975_vm9, %v2730_v43, %v2420_v47 }
 0x3b3   :  { %2425 = vst [vmem:[%s4066_s7 + $0x38] sm:$0xcc] %v2421_v40 }

// kernel: resnet50_forward.5
= control target key start
LH: loop header
LB: loop body
LE: loop exit
PB: predicated region body
PF: predicated region fallthrough
CT: control target
= control target key end

     0   :  { %v6370_v18 = vmov 0   ;;  %vm373_vm0 = vcmask 1043459   ;;  %vm374_vm1 = vsmask.f32 7950  ;;  %vm379_vm2 = vcmask 1043456   ;;  %s6362_s1 = inlined_call_operand.vmem [shape: bf16[128,128], index: 1, kind: input, shape index: {}]   ;;  %s6363_s0 = inlined_call_operand.vmem [shape: bf16[128,128], index: 0, kind: input, shape index: {}]   ;;  %s6364_s3 = inlined_call_operand.vmem [shape: bf16[3,3,128,128], index: 3, kind: input, shape index: {}]   ;;  %s6365_s2 = inlined_call_operand.vmem [shape: f32[1,128], index: 2, kind: input, shape index: {}]   ;;  %s6366_s5 = inlined_call_operand.vmem [shape: bf16[128,256], index: 5, kind: input, shape index: {}]   ;;  %s6367_s4 = inlined_call_operand.vmem [shape: f32[1,128], index: 4, kind: input, shape index: {}]   ;;  %s6368_s6 = inlined_call_operand.vmem [shape: f32[1,256], index: 6, kind: input, shape index: {}]   ;;  %s6369_s7 = inlined_call_operand.vmem [shape: bf16[128,256], index: 7, kind: output, shape index: {}]  }
   0x1   :  { %v5011_v0 = vld [vmem:[%s6362_s1] sm:$0xff]   ;;  %v5012_v1 = vld [vmem:[%s6362_s1 + $0x8] sm:$0xff]   ;;  %v5013_v2 = vld [vmem:[%s6362_s1 + $0x10] sm:$0xff]   ;;  %286 = vst [vmem:[#allocation2 + $0xc] sm:$0xf] %v6370_v18  ;;  %vm322_vm3 = vcmask 1043457  }
   0x2   :  { %4458 = vmatprep.subr.bf16.mxu0 %v5011_v0  ;;  %v5014_v3 = vld [vmem:[%s6362_s1 + $0x18] sm:$0xff]   ;;  %v5019_v4 = vld [vmem:[%s6363_s0] sm:$0xff]   ;;  %v5016_v6 = vld [vmem:[%s6362_s1 + $0x28] sm:$0xff]   ;;  %287 = vst [vmem:[#allocation2 + $0x10] sm:$0xf] %v6370_v18  ;;  %vm402_vm6 = vcmask 1040384  }
   0x3   :  { %4459 = vmatpush3.bf16.msra.mxu0 %v5011_v0  ;;  %4474 = vmatprep.mubr.bf16.mxu0 %v5019_v4  ;;  %v5015_v5 = vld [vmem:[%s6362_s1 + $0x20] sm:$0xff]   ;;  %v5017_v7 = vld [vmem:[%s6362_s1 + $0x30] sm:$0xff]   ;;  %v5018_v8 = vld [vmem:[%s6362_s1 + $0x38] sm:$0xff]   ;;  %283 = vst [vmem:[#allocation2] sm:$0xf] %v6370_v18  ;;  %vm328_vm7 = vcmask 1041408  }
   0x4   :  { %4460 = vmatprep.subr.bf16.mxu0 %v5012_v1  ;;  %v5020_v9 = vld [vmem:[%s6363_s0 + $0x8] sm:$0xff]   ;;  %v5021_v10 = vld [vmem:[%s6363_s0 + $0x10] sm:$0xff]   ;;  %v5022_v11 = vld [vmem:[%s6363_s0 + $0x18] sm:$0xff]   ;;  %284 = vst [vmem:[#allocation2 + $0x4] sm:$0xf] %v6370_v18  ;;  %vm353_vm14 = vcmask 1042432  }
   0x5   :  { %v5023_v12 = vld [vmem:[%s6363_s0 + $0x20] sm:$0xff]   ;;  %v5024_v13 = vld [vmem:[%s6363_s0 + $0x28] sm:$0xff]   ;;  %v5025_v14 = vld [vmem:[%s6363_s0 + $0x30] sm:$0xff]   ;;  %285 = vst [vmem:[#allocation2 + $0x8] sm:$0xf] %v6370_v18 }
   0x6   :  { %v5026_v15 = vld [vmem:[%s6363_s0 + $0x38] sm:$0xff]   ;;  %v5027_v16 = vld [vmem:[%s6364_s3 + $0xc0] sm:$0xff]   ;;  %288 = vst [vmem:[#allocation2 + $0x14] sm:$0xf] %v6370_v18  ;;  %289 = vst [vmem:[#allocation2 + $0x18] sm:$0xf] %v6370_v18 }
   0x7   :  { %4461 = vmatpush3.bf16.msra.mxu0 %v5012_v1  ;;  %v5028_v17 = vld [vmem:[%s6364_s3 + $0x40] sm:$0xff]   ;;  %290 = vst [vmem:[#allocation2 + $0x1c] sm:$0xf] %v6370_v18  ;;  %291 = vst [vmem:[#allocation2 + $0x20] sm:$0xf] %v6370_v18  ;;  %4610 = vmatprep.subr.bf16.mxu1 %v5027_v16  ;;  %v5029_v19 = vld [vmem:[%s6364_s3 + $0xc8] sm:$0xff]  }
   0x8   :  { %4462 = vmatprep.subr.bf16.mxu0 %v5013_v2  ;;  %292 = vst [vmem:[#allocation2 + $0x24] sm:$0xf] %v6370_v18  ;;  %293 = vst [vmem:[#allocation2 + $0x28] sm:$0xf] %v6370_v18  ;;  %4611 = vmatpush3.bf16.msra.mxu1 %v5027_v16  ;;  %v5030_v20 = vld [vmem:[%s6364_s3 + $0x48] sm:$0xff]   ;;  %v5031_v21 = vld [vmem:[%s6364_s3 + $0xd0] sm:$0xff]  }
   0x9   :  { %294 = vst [vmem:[#allocation2 + $0x2c] sm:$0xf] %v6370_v18  ;;  %295 = vst [vmem:[#allocation2 + $0x30] sm:$0xf] %v6370_v18  ;;  %4612 = vmatprep.subr.bf16.mxu1 %v5029_v19  ;;  %v5032_v22 = vld [vmem:[%s6364_s3 + $0x50] sm:$0xff]   ;;  %v5033_v23 = vld [vmem:[%s6364_s3 + $0xd8] sm:$0xff]  }
   0xa   :  { %296 = vst [vmem:[#allocation2 + $0x34] sm:$0xf] %v6370_v18  ;;  %297 = vst [vmem:[#allocation2 + $0x38] sm:$0xf] %v6370_v18  ;;  %v5034_v24 = vld [vmem:[%s6364_s3 + $0x58] sm:$0xff]   ;;  %v5035_v25 = vld [vmem:[%s6364_s3 + $0xe0] sm:$0xff]  }
   0xb   :  { %4463 = vmatpush3.bf16.msra.mxu0 %v5013_v2  ;;  %298 = vst [vmem:[#allocation2 + $0x3c] sm:$0xf] %v6370_v18  ;;  %299 = vst [vmem:[#allocation2 + $0x40] sm:$0xf] %v6370_v18  ;;  %v5036_v26 = vld [vmem:[%s6364_s3 + $0x60] sm:$0xff]   ;;  %v5037_v27 = vld [vmem:[%s6364_s3 + $0xe8] sm:$0xff]  }
   0xc   :  { %4464 = vmatprep.subr.bf16.mxu0 %v5014_v3  ;;  %300 = vst [vmem:[#allocation2 + $0x44] sm:$0xf] %v6370_v18  ;;  %301 = vst [vmem:[#allocation2 + $0x48] sm:$0xf] %v6370_v18  ;;  %4613 = vmatpush3.bf16.msra.mxu1 %v5029_v19  ;;  %v5038_v28 = vld [vmem:[%s6364_s3 + $0x68] sm:$0xff]   ;;  %v5039_v29 = vld [vmem:[%s6364_s3 + $0xf0] sm:$0xff]  }
   0xd   :  { %302 = vst [vmem:[#allocation2 + $0x4c] sm:$0xf] %v6370_v18  ;;  %303 = vst [vmem:[#allocation2 + $0x50] sm:$0xf] %v6370_v18  ;;  %4614 = vmatprep.subr.bf16.mxu1 %v5031_v21  ;;  %v5040_v30 = vld [vmem:[%s6364_s3 + $0x70] sm:$0xff]   ;;  %v5041_v31 = vld [vmem:[%s6364_s3 + $0xf8] sm:$0xff]  }
   0xe   :  { %304 = vst [vmem:[#allocation2 + $0x54] sm:$0xf] %v6370_v18  ;;  %305 = vst [vmem:[#allocation2 + $0x58] sm:$0xf] %v6370_v18  ;;  %v5042_v32 = vld [vmem:[%s6364_s3 + $0x78] sm:$0xff]   ;;  %v5330_v33 = vld [vmem:[%s6364_s3 + $0x100] sm:$0xff]  }
   0xf   :  { %4465 = vmatpush3.bf16.msra.mxu0 %v5014_v3  ;;  %306 = vst [vmem:[#allocation2 + $0x5c] sm:$0xf] %v6370_v18  ;;  %307 = vst [vmem:[#allocation2 + $0x60] sm:$0xf] %v6370_v18  ;;  %v5336_v34 = vld [vmem:[%s6364_s3] sm:$0xff]  }
  0x10   :  { %4466 = vmatprep.subr.bf16.mxu0 %v5015_v5  ;;  %4615 = vmatpush3.bf16.msra.mxu1 %v5031_v21  ;;  %v5342_v35 = vld [vmem:[%s6365_s2] ss:$0 sm:$0xff]  ;;  %vm323_vm4 = vsmask.f32 7942  ;;  %vm380_vm5 = vsmask.f32 3328  ;;  %vm5350_vm13 = vmand %vm373_vm0, %vm374_vm1 }
  0x11   :  { %4616 = vmatprep.subr.bf16.mxu1 %v5033_v23  ;;  %vm329_vm8 = vsmask.f32 1280  ;;  %vm397_vm9 = vsmask.f32 7938  ;;  %vm403_vm11 = vsmask.f32 256  ;;  %vm5356_vm15 = vmand %vm322_vm3, %vm323_vm4 }
  0x12   :  { %vm348_vm12 = vsmask.f32 7946  ;;  %v376_v53 = vld [vmem:[#allocation2 + $0xc] sm:$0x8]  ;;  %vm354_vm10 = vsmask.f32 2304  ;;  %vm5362_vm0 = vmand %vm379_vm2, %vm380_vm5 }
  0x13   :  { %4467 = vmatpush3.bf16.msra.mxu0 %v5015_v5  ;;  %v382_v2 = vld [vmem:[#allocation2 + $0x10] sm:$0xf]  ;;  %vm5368_vm1 = vmand %vm328_vm7, %vm329_vm8  ;;  %v399_v19 = vld [vmem:[#allocation2 + $0x14] sm:$0xf] }
  0x14   :  { %4468 = vmatprep.subr.bf16.mxu0 %v5016_v6  ;;  %4617 = vmatpush3.bf16.msra.mxu1 %v5033_v23  ;;  %vm5376_vm3 = vmand %vm379_vm2, %vm397_vm9  ;;  %v405_v21 = vld [vmem:[#allocation2 + $0x18] sm:$0x1]  ;;  %vm6385_vm2 = vcmask 1043458   ;;  %vm1250_vm9 = vcmask 1046528  }
  0x15   :  { %4618 = vmatprep.subr.bf16.mxu1 %v5035_v25  ;;  %vm5383_vm4 = vmand %vm402_vm6, %vm403_vm11  ;;  %vm1838_vm11 = vsmask.f32 6400 }
  0x16   :  { %vm5390_vm5 = vmand %vm6385_vm2, %vm348_vm12  ;;  %vm2178_vm12 = vcmask 1045504  }
  0x17   :  { %4469 = vmatpush3.bf16.msra.mxu0 %v5016_v6  ;;  %vm5404_vm8 = vmand %vm353_vm14, %vm354_vm10  ;;  %vm754_vm10 = vsmask.f32 7424 }
  0x18   :  { %4470 = vmatprep.subr.bf16.mxu0 %v5017_v7  ;;  %4619 = vmatpush3.bf16.msra.mxu1 %v5035_v25 }
  0x19   :  { %4620 = vmatprep.subr.bf16.mxu1 %v5037_v27 }
  0x1b   :  { %4471 = vmatpush3.bf16.msra.mxu0 %v5017_v7 }
  0x1c   :  { %4472 = vmatprep.subr.bf16.mxu0 %v5018_v8  ;;  %4621 = vmatpush3.bf16.msra.mxu1 %v5037_v27 }
  0x1d   :  { %4622 = vmatprep.subr.bf16.mxu1 %v5039_v29 }
  0x1f   :  { %4473 = vmatpush3.bf16.msra.mxu0 %v5018_v8 }
  0x20   :  { %4490 = vmatprep.subr.bf16.mxu0 %v5028_v17  ;;  %4623 = vmatpush3.bf16.msra.mxu1 %v5039_v29  ;;  %v350_v29 = vld [vmem:[#allocation2 + $0x8] sm:$0xc] }
  0x21   :  { %4624 = vmatprep.subr.bf16.mxu1 %v5041_v31 }
  0x22   :  { %4475 = vmatmul.mubr.bf16.vlgmr.msra.gmra.mrb[0].mxu0 %v5020_v9 }
  0x23   :  { %4478 = vmatprep.mubr.bf16.mxu0 %v5021_v10  ;;  %4491 = vmatpush3.bf16.msra.mxu0 %v5028_v17 }
  0x24   :  { %4492 = vmatprep.subr.bf16.mxu0 %v5030_v20  ;;  %4625 = vmatpush3.bf16.msra.mxu1 %v5041_v31 }
  0x25   :  { %4650 = vmatprep.subr.bf16.mxu1 %v5330_v33 }
  0x27   :  { %4493 = vmatpush3.bf16.msra.mxu0 %v5030_v20 }
  0x28   :  { %4494 = vmatprep.subr.bf16.mxu0 %v5032_v22 }
  0x2a   :  { %4479 = vmatmul.mubr.bf16.gmra.mrb[4].mxu0 %v5022_v11  ;;  %v325_v11 = vld [vmem:[#allocation2 + $0x4] sm:$0xe] }
  0x2b   :  { %4482 = vmatprep.mubr.bf16.mxu0 %v5023_v12  ;;  %4495 = vmatpush3.bf16.msra.mxu0 %v5032_v22  ;;  %v331_v12 = vld [vmem:[#allocation2 + $0x8] sm:$0x3] }
  0x2c   :  { %4496 = vmatprep.subr.bf16.mxu0 %v5034_v24 }
  0x2f   :  { %4497 = vmatpush3.bf16.msra.mxu0 %v5034_v24 }
  0x30   :  { %4498 = vmatprep.subr.bf16.mxu0 %v5036_v26 }
  0x32   :  { %4483 = vmatmul.mubr.bf16.gmra.mrb[8].mxu0 %v5024_v13 }
  0x33   :  { %4486 = vmatprep.mubr.bf16.mxu0 %v5025_v14  ;;  %4499 = vmatpush3.bf16.msra.mxu0 %v5036_v26 }
  0x34   :  { %4500 = vmatprep.subr.bf16.mxu0 %v5038_v28 }
  0x37   :  { %4501 = vmatpush3.bf16.msra.mxu0 %v5038_v28 }
  0x38   :  { %4502 = vmatprep.subr.bf16.mxu0 %v5040_v30 }
  0x3a   :  { %4487 = vmatmul.mubr.bf16.gmra.mrb[12].mxu0 %v5026_v15 }
  0x3b   :  { %4503 = vmatpush3.bf16.msra.mxu0 %v5040_v30 }
  0x3c   :  { %4504 = vmatprep.subr.bf16.mxu0 %v5042_v32 }
  0x3f   :  { %4505 = vmatpush3.bf16.msra.mxu0 %v5042_v32 }
  0x40   :  { %4530 = vmatprep.subr.bf16.mxu0 %v5336_v34 }
  0xf5   :  { %v4476_v36 = vpop.f32.mrb[0].mxu0 }
  0xf6   :  { %v205_v37 = vadd.f32 %v4476_v36, %v5342_v35  ;;  %v196_v38 = vpop.f32.mrb[1].mxu0 }
  0xf7   :  { %v197_v39 = vadd.f32 %v5342_v35, %v196_v38  ;;  %v4477_v40 = vpop.f32.mrb[2].mxu0 }
  0xf8   :  { %v261_v41 = vmax.f32 %v205_v37, 0.0  ;;  %v208_v42 = vadd.f32 %v4477_v40, %v5342_v35  ;;  %v199_v43 = vpop.f32.mrb[3].mxu0 }
  0xf9   :  { %v259_v44 = vmax.f32 %v197_v39, 0.0  ;;  %v200_v45 = vadd.f32 %v5342_v35, %v199_v43 }
  0xfa   :  { %v4227_v46 = vpack.c.bf16 %v261_v41, %v261_v41  ;;  %v262_v47 = vmax.f32 %v208_v42, 0.0  ;;  %v356_v42 = vld [vmem:[#allocation2 + $0xc] sm:$0x7] }
  0xfb   :  { %v4225_v48 = vpack.c.bf16 %v259_v44, %v259_v44  ;;  %v260_v49 = vmax.f32 %v200_v45, 0.0 }
  0xfc   :  { %v363_v50 = vshll.u32 %v4227_v46, 16  ;;  %v366_v51 = vshrl.u32 %v4227_v46, 16  ;;  %v4228_v54 = vpack.c.bf16 %v262_v47, %v262_v47 }
  0xfd   :  { %v312_v55 = vshrl.u32 %v4225_v48, 16  ;;  %v315_v56 = vshll.u32 %v4225_v48, 16  ;;  %v4226_v58 = vpack.c.bf16 %v260_v49, %v260_v49  ;;  %v4480_v59 = vpop.f32.mrb[4].mxu0 }
  0xfe   :  { %v365_v60 = vrot.slane %v363_v50, 5  ;;  %v368_v61 = vrot.slane %v366_v51, 4  ;;  %v388_v63 = vshrl.u32 %v4228_v54, 16  ;;  %v391_v0 = vshll.u32 %v4228_v54, 16  ;;  %v212_v1 = vpop.f32.mrb[5].mxu0 }
  0xff   :  { %v314_v3 = vrot.slane %v312_v55, 6  ;;  %v317_v4 = vrot.slane %v315_v56, 7  ;;  %v337_v6 = vshrl.u32 %v4226_v58, 16  ;;  %v340_v7 = vshll.u32 %v4226_v58, 16  ;;  %v4481_v8 = vpop.f32.mrb[6].mxu0 }
 0x100   :  { %v369_v9 = vor.u32 %v368_v61, %v365_v60  ;;  %v377_v10 = vsel %vm5350_vm13, %v365_v60, %v376_v53  ;;  %v390_v13 = vrot.slane %v388_v63, 7  ;;  %v221_v15 = vadd.f32 %v4480_v59, %v5342_v35  ;;  %v215_v16 = vpop.f32.mrb[7].mxu0  ;;  %v461_v56 = vld [vmem:[#allocation2 + $0x20] sm:$0x8] }
 0x101   :  { %378 = vst [vmem:[#allocation2 + $0xc] sm:$0x8] %v377_v10  ;;  %v318_v17 = vor.u32 %v317_v4, %v314_v3  ;;  %v339_v22 = vrot.slane %v337_v6, 5  ;;  %v342_v23 = vrot.slane %v340_v7, 6  ;;  %v213_v24 = vadd.f32 %v5342_v35, %v212_v1 }
 0x102   :  { %v370_v25 = vrot.slane %v369_v9, 4  ;;  %v393_v26 = vor.u32 %v391_v0, %v390_v13  ;;  %v394_v27 = vrot.slane %v390_v13, 4  ;;  %v265_v30 = vmax.f32 %v221_v15, 0.0  ;;  %v464_v15 = vld [vmem:[#allocation2 + $0x24] sm:$0xf] }
 0x103   :  { %v319_v31 = vrot.slane %v318_v17, 4  ;;  %v326_v32 = vsel %vm5356_vm15, %v318_v17, %v325_v11  ;;  %v343_v36 = vor.u32 %v342_v23, %v339_v22  ;;  %v263_v37 = vmax.f32 %v213_v24, 0.0  ;;  %v422_v11 = vld [vmem:[#allocation2 + $0x18] sm:$0xe]  ;;  %v425_v17 = vld [vmem:[#allocation2 + $0x1c] sm:$0x3] }
 0x104   :  { %v383_v38 = vsel %vm5362_vm0, %v370_v25, %v382_v2  ;;  %327 = vst [vmem:[#allocation2 + $0x4] sm:$0xe] %v326_v32  ;;  %v400_v39 = vsel %vm5376_vm3, %v393_v26, %v399_v19  ;;  %v406_v40 = vsel %vm5383_vm4, %v394_v27, %v405_v21  ;;  %v4231_v43 = vpack.c.bf16 %v265_v30, %v265_v30  ;;  %v479_v30 = vld [vmem:[#allocation2 + $0x28] sm:$0xf] }
 0x105   :  { %384 = vst [vmem:[#allocation2 + $0x10] sm:$0xf] %v383_v38  ;;  %v332_v44 = vsel %vm5368_vm1, %v319_v31, %v331_v12  ;;  %401 = vst [vmem:[#allocation2 + $0x14] sm:$0xf] %v400_v39  ;;  %v344_v45 = vrot.slane %v343_v36, 4  ;;  %v351_v46 = vsel %vm5390_vm5, %v343_v36, %v350_v29  ;;  %v4229_v47 = vpack.c.bf16 %v263_v37, %v263_v37  ;;  %v4484_v48 = vpop.f32.mrb[8].mxu0 }
 0x106   :  { %407 = vst [vmem:[#allocation2 + $0x18] sm:$0x1] %v406_v40  ;;  %333 = vst [vmem:[#allocation2 + $0x8] sm:$0x3] %v332_v44  ;;  %v451_v49 = vshll.u32 %v4231_v43, 16  ;;  %v454_v50 = vshrl.u32 %v4231_v43, 16  ;;  %v224_v51 = vadd.f32 %v4481_v8, %v5342_v35  ;;  %v216_v53 = vadd.f32 %v5342_v35, %v215_v16 }
 0x107   :  { %352 = vst [vmem:[#allocation2 + $0x8] sm:$0xc] %v351_v46  ;;  %v228_v54 = vpop.f32.mrb[9].mxu0  ;;  %v357_v55 = vsel %vm5404_vm8, %v344_v45, %v356_v42  ;;  %v412_v58 = vshrl.u32 %v4229_v47, 16  ;;  %v415_v59 = vshll.u32 %v4229_v47, 16  ;;  %v237_v60 = vadd.f32 %v4484_v48, %v5342_v35 }
 0x108   :  { %v4485_v61 = vpop.f32.mrb[10].mxu0  ;;  %358 = vst [vmem:[#allocation2 + $0xc] sm:$0x7] %v357_v55  ;;  %v453_v63 = vrot.slane %v451_v49, 5  ;;  %v456_v0 = vrot.slane %v454_v50, 4  ;;  %v266_v1 = vmax.f32 %v224_v51, 0.0  ;;  %v229_v8 = vadd.f32 %v5342_v35, %v228_v54 }
 0x109   :  { %v264_v2 = vmax.f32 %v216_v53, 0.0  ;;  %v231_v3 = vpop.f32.mrb[11].mxu0  ;;  %v414_v4 = vrot.slane %v412_v58, 6  ;;  %v417_v6 = vrot.slane %v415_v59, 7  ;;  %v269_v7 = vmax.f32 %v237_v60, 0.0 }
 0x10a   :  { %v457_v9 = vor.u32 %v456_v0, %v453_v63  ;;  %v462_v10 = vsel %vm5350_vm13, %v453_v63, %v461_v56  ;;  %v4232_v12 = vpack.c.bf16 %v266_v1, %v266_v1  ;;  %v267_v21 = vmax.f32 %v229_v8, 0.0  ;;  %v482_v31 = vld [vmem:[#allocation2 + $0x2c] sm:$0x1]  ;;  %v441_v42 = vld [vmem:[#allocation2 + $0x1c] sm:$0xc] }
 0x10b   :  { %v4230_v13 = vpack.c.bf16 %v264_v2, %v264_v2  ;;  %463 = vst [vmem:[#allocation2 + $0x20] sm:$0x8] %v462_v10  ;;  %v418_v16 = vor.u32 %v417_v6, %v414_v4  ;;  %v4235_v19 = vpack.c.bf16 %v269_v7, %v269_v7  ;;  %v240_v22 = vadd.f32 %v4485_v61, %v5342_v35  ;;  %v444_v53 = vld [vmem:[#allocation2 + $0x20] sm:$0x7]  ;;  %v499_v4 = vld [vmem:[#allocation2 + $0x34] sm:$0x8] }
 0x10c   :  { %v458_v23 = vrot.slane %v457_v9, 4  ;;  %v470_v24 = vshrl.u32 %v4232_v12, 16  ;;  %v473_v25 = vshll.u32 %v4232_v12, 16  ;;  %v4233_v48 = vpack.c.bf16 %v267_v21, %v267_v21  ;;  %v537_v59 = vld [vmem:[#allocation2 + $0x40] sm:$0xe] }
 0x10d   :  { %v431_v26 = vshrl.u32 %v4230_v13, 16  ;;  %v419_v27 = vrot.slane %v418_v16, 4  ;;  %v423_v29 = vsel %vm5356_vm15, %v418_v16, %v422_v11  ;;  %v434_v32 = vshll.u32 %v4230_v13, 16  ;;  %v4488_v37 = vpop.f32.mrb[12].mxu0  ;;  %v540_v9 = vld [vmem:[#allocation2 + $0x44] sm:$0x3] }
 0x10e   :  { %v527_v36 = vshrl.u32 %v4235_v19, 16  ;;  %v465_v38 = vsel %vm5362_vm0, %v458_v23, %v464_v15  ;;  %424 = vst [vmem:[#allocation2 + $0x18] sm:$0xe] %v423_v29  ;;  %v472_v39 = vrot.slane %v470_v24, 7  ;;  %v530_v43 = vshll.u32 %v4235_v19, 16  ;;  %v244_v44 = vpop.f32.mrb[13].mxu0 }
 0x10f   :  { %v433_v40 = vrot.slane %v431_v26, 5  ;;  %466 = vst [vmem:[#allocation2 + $0x24] sm:$0xf] %v465_v38  ;;  %v426_v45 = vsel %vm5368_vm1, %v419_v27, %v425_v17  ;;  %v436_v46 = vrot.slane %v434_v32, 6  ;;  %v4489_v49 = vpop.f32.mrb[14].mxu0  ;;  %v270_v55 = vmax.f32 %v240_v22, 0.0 }
 0x110   :  { %v529_v47 = vrot.slane %v527_v36, 6  ;;  %427 = vst [vmem:[#allocation2 + $0x1c] sm:$0x3] %v426_v45  ;;  %v475_v50 = vor.u32 %v473_v25, %v472_v39  ;;  %v476_v51 = vrot.slane %v472_v39, 4  ;;  %v532_v54 = vrot.slane %v530_v43, 7  ;;  %v247_v56 = vpop.f32.mrb[15].mxu0 }
 0x111   :  { %v437_v58 = vor.u32 %v436_v46, %v433_v40  ;;  %v489_v60 = vshll.u32 %v4233_v48, 16  ;;  %v492_v61 = vshrl.u32 %v4233_v48, 16  ;;  %v232_v63 = vadd.f32 %v5342_v35, %v231_v3  ;;  %v502_v13 = vld [vmem:[#allocation2 + $0x38] sm:$0xf]  ;;  %v5436_v17 = vld [vmem:[#allocation2 + $0x8] sm:$0xf] }
 0x112   :  { %v480_v0 = vsel %vm5376_vm3, %v475_v50, %v479_v30  ;;  %v483_v1 = vsel %vm5383_vm4, %v476_v51, %v482_v31  ;;  %v533_v2 = vor.u32 %v532_v54, %v529_v47  ;;  %v4236_v6 = vpack.c.bf16 %v270_v55, %v270_v55  ;;  %v556_v23 = vld [vmem:[#allocation2 + $0x44] sm:$0xc]  ;;  %v559_v46 = vld [vmem:[#allocation2 + $0x48] sm:$0x7]  ;;  %v520_v51 = vld [vmem:[#allocation2 + $0x40] sm:$0x1] }
 0x113   :  { %481 = vst [vmem:[#allocation2 + $0x28] sm:$0xf] %v480_v0  ;;  %484 = vst [vmem:[#allocation2 + $0x2c] sm:$0x1] %v483_v1  ;;  %v438_v7 = vrot.slane %v437_v58, 4  ;;  %v442_v8 = vsel %vm5390_vm5, %v437_v58, %v441_v42  ;;  %v491_v10 = vrot.slane %v489_v60, 5  ;;  %v253_v30 = vadd.f32 %v4488_v37, %v5342_v35 }
 0x114   :  { %v494_v11 = vrot.slane %v492_v61, 4  ;;  %443 = vst [vmem:[#allocation2 + $0x1c] sm:$0xc] %v442_v8  ;;  %v534_v3 = vrot.slane %v533_v2, 4  ;;  %v538_v12 = vsel %vm5356_vm15, %v533_v2, %v537_v59  ;;  %v546_v15 = vshrl.u32 %v4236_v6, 16 }
 0x115   :  { %v549_v16 = vshll.u32 %v4236_v6, 16  ;;  %v445_v19 = vsel %vm5404_vm8, %v438_v7, %v444_v53  ;;  %539 = vst [vmem:[#allocation2 + $0x40] sm:$0xe] %v538_v12  ;;  %v500_v22 = vsel %vm5350_vm13, %v491_v10, %v499_v4  ;;  %v268_v24 = vmax.f32 %v232_v63, 0.0  ;;  %v1485_v25 = vld [vmem:[#allocation2 + $0x4] sm:$0xe] }
 0x116   :  { %v495_v21 = vor.u32 %v494_v11, %v491_v10  ;;  %446 = vst [vmem:[#allocation2 + $0x20] sm:$0x7] %v445_v19  ;;  %v541_v26 = vsel %vm5368_vm1, %v534_v3, %v540_v9  ;;  %501 = vst [vmem:[#allocation2 + $0x34] sm:$0x8] %v500_v22  ;;  %v548_v27 = vrot.slane %v546_v15, 5  ;;  %v245_v36 = vadd.f32 %v5342_v35, %v244_v44  ;;  %v5460_v10 = vld [vmem:[#allocation2 + $0xc] sm:$0xff]  }
 0x117   :  { %v551_v29 = vrot.slane %v549_v16, 6  ;;  %542 = vst [vmem:[#allocation2 + $0x44] sm:$0x3] %v541_v26  ;;  %v4234_v32 = vpack.c.bf16 %v268_v24, %v268_v24  ;;  %v256_v38 = vadd.f32 %v4489_v49, %v5342_v35  ;;  %v273_v40 = vmax.f32 %v253_v30, 0.0  ;;  %v517_v49 = vld [vmem:[#allocation2 + $0x3c] sm:$0xf] }
 0x118   :  { %v496_v31 = vrot.slane %v495_v21, 4  ;;  %v248_v42 = vadd.f32 %v5342_v35, %v247_v56  ;;  %v5449_v43 = vcombine.low %v1485_v25, %v5436_v17  ;;  %v271_v48 = vmax.f32 %v245_v36, 0.0  ;;  %v576_v63 = vld [vmem:[#allocation2 + $0x48] sm:$0x8]  ;;  %v639_v1 = vld [vmem:[#allocation2] sm:$0xf] }
 0x119   :  { %v552_v39 = vor.u32 %v551_v29, %v548_v27  ;;  %v508_v37 = vshrl.u32 %v4234_v32, 16  ;;  %v511_v47 = vshll.u32 %v4234_v32, 16  ;;  %v4239_v53 = vpack.c.bf16 %v273_v40, %v273_v40  ;;  %v5458_v2 = vld [vmem:[#allocation2 + $0x4] sm:$0xf]  ;;  %v614_v7 = vld [vmem:[#allocation2 + $0x54] sm:$0xe] }
 0x11a   :  { %v503_v45 = vsel %vm5362_vm0, %v496_v31, %v502_v13  ;;  %v274_v35 = vmax.f32 %v256_v38, 0.0  ;;  %v4237_v55 = vpack.c.bf16 %v271_v48, %v271_v48  ;;  %v272_v56 = vmax.f32 %v248_v42, 0.0  ;;  %v617_v19 = vld [vmem:[#allocation2 + $0x58] sm:$0x3]  ;;  %v579_v25 = vld [vmem:[#allocation2 + $0x4c] sm:$0xf] }
 0x11b   :  { %504 = vst [vmem:[#allocation2 + $0x38] sm:$0xf] %v503_v45  ;;  %v553_v50 = vrot.slane %v552_v39, 4  ;;  %v557_v44 = vsel %vm5390_vm5, %v552_v39, %v556_v23  ;;  %v510_v54 = vrot.slane %v508_v37, 7  ;;  %v1583_v58 = vrot.slane %v5449_v43, 1  ;;  %v5472_v39 = vld [vmem:[#allocation2 + $0x8] sm:$0xff]  }
 0x11c   :  { %558 = vst [vmem:[#allocation2 + $0x44] sm:$0xc] %v557_v44  ;;  %v604_v60 = vshrl.u32 %v4239_v53, 16  ;;  %v607_v61 = vshll.u32 %v4239_v53, 16  ;;  %v4240_v0 = vpack.c.bf16 %v274_v35, %v274_v35  ;;  %v566_v8 = vshll.u32 %v4237_v55, 16  ;;  %v5476_v37 = vld [vmem:[#allocation2 + $0x10] sm:$0xff]  }
 0x11d   :  { %v560_v59 = vsel %vm5404_vm8, %v553_v50, %v559_v46  ;;  %v513_v4 = vor.u32 %v511_v47, %v510_v54  ;;  %v514_v6 = vrot.slane %v510_v54, 4  ;;  %v569_v9 = vshrl.u32 %v4237_v55, 16  ;;  %v633_v23 = vld [vmem:[#allocation2 + $0x58] sm:$0xc]  ;;  %v636_v32 = vld [vmem:[#allocation2 + $0x5c] sm:$0x7] }
 0x11e   :  { %561 = vst [vmem:[#allocation2 + $0x48] sm:$0x7] %v560_v59  ;;  %v606_v11 = vrot.slane %v604_v60, 6  ;;  %v609_v3 = vrot.slane %v607_v61, 7  ;;  %v623_v12 = vshrl.u32 %v4240_v0, 16  ;;  %v626_v13 = vshll.u32 %v4240_v0, 16 }
 0x11f   :  { %v518_v15 = vsel %vm5376_vm3, %v513_v4, %v517_v49  ;;  %v521_v16 = vsel %vm5383_vm4, %v514_v6, %v520_v51  ;;  %v568_v21 = vrot.slane %v566_v8, 5  ;;  %v571_v22 = vrot.slane %v569_v9, 4  ;;  %v5478_v47 = vld [vmem:[#allocation2 + $0x14] sm:$0xff]   ;;  %v594_v50 = vld [vmem:[#allocation2 + $0x50] sm:$0xf]  ;;  %v5493_v61 = vld [vmem:[#allocation2 + $0x1c] sm:$0xff]  }
 0x120   :  { %519 = vst [vmem:[#allocation2 + $0x3c] sm:$0xf] %v518_v15  ;;  %522 = vst [vmem:[#allocation2 + $0x40] sm:$0x1] %v521_v16  ;;  %v610_v24 = vor.u32 %v609_v3, %v606_v11  ;;  %v625_v26 = vrot.slane %v623_v12, 5  ;;  %v628_v27 = vrot.slane %v626_v13, 6  ;;  %v4238_v29 = vpack.c.bf16 %v272_v56, %v272_v56 }
 0x121   :  { %v572_v30 = vor.u32 %v571_v22, %v568_v21  ;;  %v577_v31 = vsel %vm5350_vm13, %v568_v21, %v576_v63  ;;  %v1584_v36 = vrot.slane %v5460_v10, 1  ;;  %v5470_v38 = vcombine.low %v639_v1, %v5458_v2  ;;  %v597_v44 = vld [vmem:[#allocation2 + $0x54] sm:$0x1]  ;;  %v5482_v53 = vld [vmem:[#allocation2 + $0x18] sm:$0xff]   ;;  %v5498_v1 = vld [vmem:[#allocation2 + $0x20] sm:$0xff]  }
 0x122   :  { %v611_v40 = vrot.slane %v610_v24, 4  ;;  %v615_v42 = vsel %vm5356_vm15, %v610_v24, %v614_v7  ;;  %578 = vst [vmem:[#allocation2 + $0x48] sm:$0x8] %v577_v31  ;;  %v629_v45 = vor.u32 %v628_v27, %v625_v26  ;;  %v585_v46 = vshrl.u32 %v4238_v29, 16  ;;  %v5052_v3 = vld [vmem:[%s6364_s3 + $0x108] sm:$0xff]   ;;  %v5057_v31 = vld [vmem:[%s6364_s3 + $0x110] sm:$0xff]  }
 0x123   :  { %616 = vst [vmem:[#allocation2 + $0x54] sm:$0xe] %v615_v42  ;;  %v573_v52 = vrot.slane %v572_v30, 4  ;;  %v588_v48 = vshll.u32 %v4238_v29, 16  ;;  %v1585_v49 = vsel %vm1250_vm9, %v1583_v58, %v1584_v36  ;;  %v756_v51 = vshrl.u32 %v5470_v38, 16  ;;  %v5512_v14 = vld [vmem:[#allocation2 + $0x28] sm:$0xff]  }
 0x124   :  { %v618_v57 = vsel %vm5368_vm1, %v611_v40, %v617_v19  ;;  %v630_v35 = vrot.slane %v629_v45, 4  ;;  %v634_v54 = vsel %vm5390_vm5, %v629_v45, %v633_v23  ;;  %v587_v55 = vrot.slane %v585_v46, 7  ;;  %4626 = vmatprep.mubr.bf16.mxu1 %v1585_v49  ;;  %v5515_v22 = vld [vmem:[#allocation2 + $0x24] sm:$0xff]   ;;  %v5517_v23 = vld [vmem:[#allocation2 + $0x2c] sm:$0xff]  }
 0x125   :  { %619 = vst [vmem:[#allocation2 + $0x58] sm:$0x3] %v618_v57  ;;  %v580_v56 = vsel %vm5362_vm0, %v573_v52, %v579_v25  ;;  %635 = vst [vmem:[#allocation2 + $0x58] sm:$0xc] %v634_v54  ;;  %v758_v58 = vshll.u32 %v5470_v38, 16  ;;  %v763_v59 = vshll.u32 %v5472_v39, 16 }
 0x126   :  { %v767_v60 = vshrl.u32 %v5472_v39, 16  ;;  %581 = vst [vmem:[#allocation2 + $0x4c] sm:$0xf] %v580_v56  ;;  %v637_v5 = vsel %vm5404_vm8, %v630_v35, %v636_v32  ;;  %v590_v28 = vor.u32 %v588_v48, %v587_v55  ;;  %v591_v63 = vrot.slane %v587_v55, 4  ;;  %v5064_v27 = vld [vmem:[%s6364_s3 + $0x8] sm:$0xff]   ;;  %v5536_v46 = vld [vmem:[#allocation2 + $0x30] sm:$0xff]  }
 0x127   :  { %v771_v0 = vshll.u32 %v5476_v37, 16  ;;  %638 = vst [vmem:[#allocation2 + $0x5c] sm:$0x7] %v637_v5  ;;  %v760_v62 = vrot.slane %v758_v58, 1  ;;  %v765_v4 = vrot.slane %v763_v59, 1  ;;  %v1586_v6 = vrot.slane %v5478_v47, 1 }
 0x128   :  { %v775_v7 = vshrl.u32 %v5476_v37, 16  ;;  %v595_v8 = vsel %vm5376_vm3, %v590_v28, %v594_v50  ;;  %v598_v41 = vsel %vm5383_vm4, %v591_v63, %v597_v44  ;;  %v779_v11 = vshll.u32 %v5482_v53, 16  ;;  %v5063_v52 = vld [vmem:[%s6364_s3 + $0x118] sm:$0xff]   ;;  %v5067_v44 = vld [vmem:[%s6364_s3 + $0x10] sm:$0xff]   ;;  %v5065_v56 = vld [vmem:[%s6364_s3 + $0x120] sm:$0xff]  }
 0x129   :  { %v773_v9 = vrot.slane %v771_v0, 1  ;;  %596 = vst [vmem:[#allocation2 + $0x50] sm:$0xf] %v595_v8  ;;  %599 = vst [vmem:[#allocation2 + $0x54] sm:$0x1] %v598_v41  ;;  %v761_v12 = vor.u32 %v760_v62, %v756_v51  ;;  %v769_v13 = vor.u32 %v767_v60, %v765_v4  ;;  %v1587_v15 = vsel %vm1250_vm9, %v1584_v36, %v1586_v6  ;;  %v5541_v50 = vld [vmem:[#allocation2 + $0x34] sm:$0xff]  }
 0x12a   :  { %v1588_v16 = vrot.slane %v5493_v61, 1  ;;  %4627 = vmatmul.mubr.bf16.vlgmr.msra.gmra.mrb[0].mxu1 %v1587_v15  ;;  %v781_v19 = vrot.slane %v779_v11, 1  ;;  %v787_v21 = vshll.u32 %v5498_v1, 16  ;;  %v783_v32 = vshrl.u32 %v5482_v53, 16  ;;  %v5547_v51 = vld [vmem:[#allocation2 + $0x38] sm:$0xff]   ;;  %v5561_v60 = vld [vmem:[#allocation2 + $0x40] sm:$0xff]  }
 0x12b   :  { %v777_v20 = vor.u32 %v775_v7, %v773_v9  ;;  %v766_v24 = vsel %vm754_vm10, %v761_v12, %v765_v4  ;;  %v774_v25 = vsel %vm754_vm10, %v769_v13, %v773_v9  ;;  %4651 = vmatpush3.bf16.msra.mxu1 %v5330_v33  ;;  %v791_v33 = vshrl.u32 %v5498_v1, 16  ;;  %v5550_v35 = vld [vmem:[#allocation2 + $0x3c] sm:$0xff]   ;;  %v5567_v4 = vld [vmem:[#allocation2 + $0x44] sm:$0xff]  }
 0x12c   :  { %v1589_v26 = vsel %vm1250_vm9, %v1586_v6, %v1588_v16  ;;  %4506 = vmatprep.mubr.bf16.mxu0 %v766_v24  ;;  %v789_v30 = vrot.slane %v787_v21, 1  ;;  %4652 = vmatprep.subr.bf16.mxu1 %v5052_v3  ;;  %v795_v36 = vshll.u32 %v5512_v14, 16  ;;  %v1590_v40 = vrot.slane %v5515_v22, 1  ;;  %v5071_v58 = vld [vmem:[%s6364_s3 + $0x18] sm:$0xff]   ;;  %v5072_v6 = vld [vmem:[%s6364_s3 + $0x128] sm:$0xff]   ;;  %v5074_v9 = vld [vmem:[%s6364_s3 + $0x20] sm:$0xff]  }
 0x12d   :  { %v782_v29 = vsel %vm754_vm10, %v777_v20, %v781_v19  ;;  %4630 = vmatprep.mubr.bf16.mxu1 %v1589_v26  ;;  %4507 = vmatmul.mubr.bf16.vlgmr.msra.gmra.mrb[16].mxu0 %v774_v25  ;;  %v1592_v42 = vrot.slane %v5517_v23, 1  ;;  %v785_v48 = vor.u32 %v783_v32, %v781_v19  ;;  %v803_v55 = vshll.u32 %v5536_v46, 16  ;;  %v5574_v41 = vld [vmem:[#allocation2 + $0x48] sm:$0xff]   ;;  %v5587_v24 = vld [vmem:[#allocation2 + $0x58] ss:$0 sps:$4 sm:$0x33]  }
 0x12e   :  { %4510 = vmatprep.mubr.bf16.mxu0 %v782_v29  ;;  %4531 = vmatpush3.bf16.msra.mxu0 %v5336_v34  ;;  %v793_v45 = vor.u32 %v791_v33, %v789_v30  ;;  %v1591_v49 = vsel %vm1250_vm9, %v1588_v16, %v1590_v40  ;;  %v797_v34 = vrot.slane %v795_v36, 1  ;;  %v1594_v5 = vrot.slane %v5541_v50, 1  ;;  %v5079_v25 = vld [vmem:[%s6364_s3 + $0x28] sm:$0xff]  }
 0x12f   :  { %4653 = vmatpush3.bf16.msra.mxu1 %v5052_v3  ;;  %4532 = vmatprep.subr.bf16.mxu0 %v5064_v27  ;;  %v1593_v57 = vsel %vm1250_vm9, %v1590_v40, %v1592_v42  ;;  %v790_v59 = vsel %vm754_vm10, %v785_v48, %v789_v30  ;;  %v807_v28 = vshrl.u32 %v5536_v46, 16  ;;  %v811_v63 = vshll.u32 %v5547_v51, 16 }
 0x130   :  { %4654 = vmatprep.subr.bf16.mxu1 %v5057_v31  ;;  %v798_v54 = vsel %vm754_vm10, %v793_v45, %v797_v34  ;;  %v1596_v0 = vrot.slane %v5550_v35, 1  ;;  %v805_v62 = vrot.slane %v803_v55, 1  ;;  %v799_v7 = vshrl.u32 %v5512_v14, 16  ;;  %v5580_v13 = vld [vmem:[#allocation2 + $0x4c] sm:$0xff]  }
 0x131   :  { %v819_v8 = vshll.u32 %v5561_v60, 16  ;;  %v1595_v11 = vsel %vm1250_vm9, %v1592_v42, %v1594_v5  ;;  %v813_v12 = vrot.slane %v811_v63, 1  ;;  %v815_v20 = vshrl.u32 %v5547_v51, 16  ;;  %v5585_v21 = vld [vmem:[#allocation2 + $0x50] sm:$0xff]  }
 0x132   :  { %4631 = vmatmul.mubr.bf16.gmra.mrb[4].mxu1 %v1591_v49  ;;  %4533 = vmatpush3.bf16.msra.mxu0 %v5064_v27  ;;  %v809_v3 = vor.u32 %v807_v28, %v805_v62  ;;  %v801_v15 = vor.u32 %v799_v7, %v797_v34  ;;  %v1597_v16 = vsel %vm1250_vm9, %v1594_v5, %v1596_v0  ;;  %v1598_v19 = vrot.slane %v5567_v4, 1  ;;  %v5080_v42 = vld [vmem:[%s6364_s3 + $0x30] sm:$0xff]   ;;  %v5081_v34 = vld [vmem:[%s6364_s3 + $0x138] sm:$0xff]  }
 0x133   :  { %4634 = vmatprep.mubr.bf16.mxu1 %v1593_v57  ;;  %4655 = vmatpush3.bf16.msra.mxu1 %v5057_v31  ;;  %v821_v27 = vrot.slane %v819_v8, 1  ;;  %v823_v29 = vshrl.u32 %v5561_v60, 16  ;;  %v827_v30 = vshll.u32 %v5574_v41, 16  ;;  %v5078_v31 = vld [vmem:[%s6364_s3 + $0x130] sm:$0xff]   ;;  %v1600_v33 = vrot.slane %v5580_v13, 1 }
 0x134   :  { %4656 = vmatprep.subr.bf16.mxu1 %v5063_v52  ;;  %4534 = vmatprep.subr.bf16.mxu0 %v5067_v44  ;;  %v806_v26 = vsel %vm754_vm10, %v801_v15, %v805_v62  ;;  %v814_v32 = vsel %vm754_vm10, %v809_v3, %v813_v12  ;;  %v835_v36 = vshll.u32 %v5585_v21, 16  ;;  %v817_v40 = vor.u32 %v815_v20, %v813_v12  ;;  %v5606_v49 = vld [vmem:[#allocation2 + $0x54] sm:$0xff]  }
 0x135   :  { %4511 = vmatmul.mubr.bf16.gmra.mrb[20].mxu0 %v790_v59  ;;  %v1599_v45 = vsel %vm1250_vm9, %v1596_v0, %v1598_v19  ;;  %v829_v48 = vrot.slane %v827_v30, 1  ;;  %v1601_v57 = vsel %vm1250_vm9, %v1598_v19, %v1600_v33  ;;  %v839_v55 = vshrl.u32 %v5585_v21, 16  ;;  %v5082_v0 = vld [vmem:[%s6364_s3 + $0x38] sm:$0xff]  }
 0x136   :  { %4514 = vmatprep.mubr.bf16.mxu0 %v798_v54  ;;  %4535 = vmatpush3.bf16.msra.mxu0 %v5067_v44  ;;  %v831_v44 = vshrl.u32 %v5574_v41, 16  ;;  %v837_v54 = vrot.slane %v835_v36, 1  ;;  %v1840_v59 = vshrl.u32 %v5449_v43, 16  ;;  %v1843_v5 = vshll.u32 %v5449_v43, 16  ;;  %v5629_v43 = vld [vmem:[%s6364_s3 + $0x140] sm:$0xff]  }
 0x137   :  { %4657 = vmatpush3.bf16.msra.mxu1 %v5063_v52  ;;  %4536 = vmatprep.subr.bf16.mxu0 %v5071_v58  ;;  %v825_v52 = vor.u32 %v823_v29, %v821_v27  ;;  %v1848_v28 = vshrl.u32 %v5460_v10, 16  ;;  %v1851_v63 = vshll.u32 %v5460_v10, 16  ;;  %v822_v62 = vsel %vm754_vm10, %v817_v40, %v821_v27  ;;  %v5637_v27 = vld [vmem:[%s6364_s3 + $0x80] sm:$0xff]  }
 0x138   :  { %4658 = vmatprep.subr.bf16.mxu1 %v5065_v56  ;;  %v833_v7 = vor.u32 %v831_v44, %v829_v48  ;;  %v1602_v8 = vrot.slane %v5606_v49, 1  ;;  %v847_v12 = vshrl.u32 %v5587_v24, 16  ;;  %v1842_v15 = vrot.slane %v1840_v59, 1 }
 0x139   :  { %v1850_v20 = vrot.slane %v1848_v28, 1  ;;  %v1853_v19 = vrot.slane %v1851_v63, 2  ;;  %v1254_v59 = vrot.slane %v5476_v37, 1  ;;  %vm3106_vm13 = vcmask 1044480  }
 0x13a   :  { %4635 = vmatmul.mubr.bf16.gmra.mrb[8].mxu1 %v1595_v11  ;;  %4537 = vmatpush3.bf16.msra.mxu0 %v5071_v58  ;;  %v5614_v58 = vld [vmem:[#allocation2 + $0x5c] ss:$0 sps:$4 sm:$0x33]   ;;  %v838_v29 = vsel %vm754_vm10, %v833_v7, %v837_v54  ;;  %v1603_v30 = vsel %vm1250_vm9, %v1600_v33, %v1602_v8  ;;  %v1252_v33 = vrot.slane %v5472_v39, 1  ;;  %vm2766_vm15 = vsmask.f32 5376 }
 0x13b   :  { %4638 = vmatprep.mubr.bf16.mxu1 %v1597_v16  ;;  %4659 = vmatpush3.bf16.msra.mxu1 %v5065_v56  ;;  %v843_v56 = vshll.u32 %v5587_v24, 16  ;;  %v1604_v3 = vrot.slane %v5614_v58, 1  ;;  %v1845_v16 = vrot.slane %v1843_v5, 2  ;;  %v5648_v44 = vor.u32 %v1853_v19, %v1850_v20 }
 0x13c   :  { %4660 = vmatprep.subr.bf16.mxu1 %v5072_v6  ;;  %4538 = vmatprep.subr.bf16.mxu0 %v5074_v9  ;;  %v2182_v5 = vrot.slane %v5478_v47, 2  ;;  %v1262_v20 = vrot.slane %v5536_v46, 1  ;;  %vm3740_vm0 = vcmask 1046532   ;;  %vm3751_vm1 = vcmask 1045508  }
 0x13d   :  { %4515 = vmatmul.mubr.bf16.gmra.mrb[24].mxu0 %v806_v26  ;;  %v845_v11 = vrot.slane %v843_v56, 1  ;;  %v1857_v26 = vshrl.u32 %v5478_v47, 16  ;;  %v1605_v36 = vsel %vm1250_vm9, %v1602_v8, %v1604_v3  ;;  %v2180_v56 = vrot.slane %v5460_v10, 2  ;;  %vm6245_vm3 = vmor %vm353_vm14, %vm3740_vm0 }
 0x13e   :  { %4518 = vmatprep.mubr.bf16.mxu0 %v814_v32  ;;  %4539 = vmatpush3.bf16.msra.mxu0 %v5074_v9  ;;  %v841_v9 = vor.u32 %v839_v55, %v837_v54  ;;  %v1866_v32 = vshrl.u32 %v5493_v61, 16  ;;  %v5663_v10 = vsel %vm1250_vm9, %v1252_v33, %v1254_v59  ;;  %vm6250_vm4 = vmor %vm328_vm7, %vm3751_vm1  ;;  %vm3764_vm7 = vcmask 1044484  }
 0x13f   :  { %4661 = vmatpush3.bf16.msra.mxu1 %v5072_v6  ;;  %4540 = vmatprep.subr.bf16.mxu0 %v5079_v25  ;;  %v830_v6 = vsel %vm754_vm10, %v825_v52, %v829_v48  ;;  %v849_v40 = vor.u32 %v847_v12, %v845_v11  ;;  %v1846_v48 = vor.u32 %v1845_v16, %v1842_v15  ;;  %v1260_v15 = vrot.slane %v5512_v14, 1  ;;  %vm6269_vm14 = vmor %vm402_vm6, %vm3764_vm7 }
 0x140   :  { %4662 = vmatprep.subr.bf16.mxu1 %v5078_v31  ;;  %v846_v52 = vsel %vm754_vm10, %v841_v9, %v845_v11  ;;  %v1868_v58 = vrot.slane %v1866_v32, 1  ;;  %v1258_v9 = vrot.slane %v5498_v1, 1  ;;  %v2186_v11 = vrot.slane %v5515_v22, 2 }
 0x141   :  { %v2188_v16 = vrot.slane %v5517_v23, 2  ;;  %v2192_v32 = vrot.slane %v5550_v35, 2 }
 0x142   :  { %4639 = vmatmul.mubr.bf16.gmra.mrb[12].mxu1 %v1599_v45  ;;  %4541 = vmatpush3.bf16.msra.mxu0 %v5079_v25  ;;  %v1229_v25 = vld [vmem:[#allocation2] sm:$0xe] }
 0x143   :  { %4642 = vmatprep.mubr.bf16.mxu1 %v1601_v57  ;;  %4663 = vmatpush3.bf16.msra.mxu1 %v5078_v31  ;;  %v1860_v31 = vshll.u32 %v5478_v47, 16  ;;  %v3994_v45 = vcombine.low %v1229_v25, %v5458_v2  ;;  %v1859_v57 = vrot.slane %v1857_v26, 1  ;;  %v2184_v47 = vrot.slane %v5493_v61, 2 }
 0x144   :  { %4542 = vmatprep.subr.bf16.mxu0 %v5080_v42  ;;  %4664 = vmatprep.subr.bf16.mxu1 %v5081_v34  ;;  %v2190_v25 = vrot.slane %v5541_v50, 2  ;;  %v1264_v26 = vrot.slane %v5547_v51, 1 }
 0x145   :  { %4519 = vmatmul.mubr.bf16.gmra.mrb[28].mxu0 %v822_v62  ;;  %v1251_v54 = vrot.slane %v3994_v45, 1  ;;  %v1862_v2 = vrot.slane %v1860_v31, 2  ;;  %v1256_v62 = vrot.slane %v5482_v53, 1  ;;  %v5678_v12 = vsel %vm2178_vm12, %v2182_v5, %v2184_v47 }
 0x146   :  { %4522 = vmatprep.mubr.bf16.mxu0 %v830_v6  ;;  %4543 = vmatpush3.bf16.msra.mxu0 %v5080_v42  ;;  %v1869_v42 = vshll.u32 %v5493_v61, 16  ;;  %v5666_v6 = vsel %vm2178_vm12, %v2180_v56, %v2182_v5  ;;  %v5687_v19 = vsel %vm2178_vm12, %v2184_v47, %v2186_v11  ;;  %v5698_v31 = vsel %vm1250_vm9, %v1260_v15, %v1262_v20 }
 0x147   :  { %4665 = vmatpush3.bf16.msra.mxu1 %v5081_v34  ;;  %4544 = vmatprep.subr.bf16.mxu0 %v5082_v0  ;;  %v2157_v34 = vld [vmem:[#allocation2 + $0x4] sm:$0xc]  ;;  %v5657_v63 = vsel %vm1250_vm9, %v1251_v54, %v1252_v33  ;;  %v5673_v8 = vsel %vm1250_vm9, %v1254_v59, %v1256_v62  ;;  %v5684_v61 = vsel %vm1250_vm9, %v1256_v62, %v1258_v9  ;;  %v2194_v45 = vrot.slane %v5567_v4, 2 }
 0x148   :  { %4690 = vmatprep.subr.bf16.mxu1 %v5629_v43  ;;  %v4080_v55 = vcombine.low %v2157_v34, %v5436_v17  ;;  %v1871_v28 = vrot.slane %v1869_v42, 2  ;;  %v1855_v17 = vsel %vm1838_vm11, %v1846_v48, %v5648_v44  ;;  %v5703_v42 = vsel %vm2178_vm12, %v2188_v16, %v2190_v25 }
 0x149   :  { %v1878_v48 = vshll.u32 %v5515_v22, 16  ;;  %v5713_v33 = vsel %vm2178_vm12, %v2190_v25, %v2192_v32  ;;  %v2196_v34 = vrot.slane %v5580_v13, 2  ;;  %v5717_v54 = vsel %vm2178_vm12, %v2192_v32, %v2194_v45 }
 0x14a   :  { %4643 = vmatmul.mubr.bf16.gmra.mrb[16].mxu1 %v1603_v30  ;;  %4545 = vmatpush3.bf16.msra.mxu0 %v5082_v0  ;;  %v2179_v0 = vrot.slane %v4080_v55, 2  ;;  %v5695_v30 = vsel %vm2178_vm12, %v2186_v11, %v2188_v16  ;;  %v1270_v55 = vrot.slane %v5585_v21, 1  ;;  %v6372_v59 = vrot.slane %v5587_v24, 1  ;;  %v5085_v11 = vld [vmem:[%s6364_s3 + $0x150] sm:$0xff]  }
 0x14b   :  { %4646 = vmatprep.mubr.bf16.mxu1 %v1605_v36  ;;  %4570 = vmatprep.subr.bf16.mxu0 %v5637_v27  ;;  %v1875_v36 = vshrl.u32 %v5515_v22, 16  ;;  %v1884_v22 = vshrl.u32 %v5517_v23, 16  ;;  %v5726_v5 = vsel %vm2178_vm12, %v2194_v45, %v2196_v34  ;;  %v1880_v62 = vrot.slane %v1878_v48, 2  ;;  %v5089_v48 = vld [vmem:[%s6364_s3 + $0x160] sm:$0xff]  }
 0x14c   :  { %v5670_v7 = vsel %vm2178_vm12, %v2179_v0, %v2180_v56  ;;  %v2198_v56 = vrot.slane %v5606_v49, 2  ;;  %v5738_v0 = vsel %vm1250_vm9, %v1270_v55, %v6372_v59  ;;  %v1905_v25 = vshll.u32 %v5550_v35, 16 }
 0x14d   :  { %4523 = vmatmul.mubr.bf16.gmra.mrb[32].mxu0 %v838_v29  ;;  %v5692_v29 = vsel %vm1250_vm9, %v1258_v9, %v1260_v15  ;;  %v5088_v9 = vld [vmem:[%s6364_s3 + $0x88] sm:$0xff]   ;;  %v1896_v15 = vshll.u32 %v5541_v50, 16 }
 0x14e   :  { %4526 = vmatprep.mubr.bf16.mxu0 %v846_v52  ;;  %v1863_v52 = vor.u32 %v1862_v2, %v1859_v57  ;;  %v1872_v57 = vor.u32 %v1871_v28, %v1868_v58  ;;  %v1887_v2 = vshll.u32 %v5517_v23, 16  ;;  %v1877_v58 = vrot.slane %v1875_v36, 1 }
 0x14f   :  { %v1898_v36 = vrot.slane %v1896_v15, 2  ;;  %v1929_v15 = vshrl.u32 %v5606_v49, 16 }
 0x150   :  { %v1864_v23 = vsel %vm1838_vm11, %v5648_v44, %v1863_v52  ;;  %v1873_v28 = vsel %vm1838_vm11, %v1863_v52, %v1872_v57  ;;  %v1889_v47 = vrot.slane %v1887_v2, 2  ;;  %v1893_v44 = vshrl.u32 %v5541_v50, 16  ;;  %v5090_v50 = vld [vmem:[%s6364_s3 + $0x90] sm:$0xff]   ;;  %v5091_v52 = vld [vmem:[%s6364_s3 + $0x98] sm:$0xff]  }
 0x151   :  { %v1881_v16 = vor.u32 %v1880_v62, %v1877_v58  ;;  %v5780_v58 = vld [vmem:[#allocation2 + $0x5c] ss:$0 sps:$4 sm:$0x77]  }
 0x152   :  { %4647 = vmatmul.mubr.bf16.gmra.mrb[20].mxu1 %v1604_v3  ;;  %v5708_v3 = vsel %vm1250_vm9, %v1262_v20, %v1264_v26  ;;  %v1902_v20 = vshrl.u32 %v5550_v35, 16  ;;  %v1895_v32 = vrot.slane %v1893_v44, 1  ;;  %v1907_v35 = vrot.slane %v1905_v25, 2  ;;  %v5096_v25 = vld [vmem:[%s6364_s3 + $0xa8] sm:$0xff]  }
 0x153   :  { %4666 = vmatprep.mubr.bf16.mxu1 %v1855_v17  ;;  %v1886_v17 = vrot.slane %v1884_v22, 1 }
 0x154   :  { %v1904_v45 = vrot.slane %v1902_v20, 1  ;;  %v1899_v22 = vor.u32 %v1898_v36, %v1895_v32  ;;  %v1938_v20 = vshrl.u32 %v5780_v58, 16  ;;  %v5095_v32 = vld [vmem:[%s6364_s3 + $0x170] sm:$0xff]  }
 0x155   :  { %4527 = vmatmul.mubr.bf16.gmra.mrb[36].mxu0 %v849_v40  ;;  %v5731_v40 = vsel %vm2178_vm12, %v2196_v34, %v2198_v56  ;;  %v1911_v34 = vshrl.u32 %v5567_v4, 16  ;;  %v5809_v36 = vld [vmem:[#allocation2 + $0x30] sm:$0xff]  }
 0x156   :  { %4546 = vmatprep.mubr.bf16.mxu0 %v5470_v38  ;;  %v5084_v38 = vld [vmem:[%s6364_s3 + $0x148] sm:$0xff]   ;;  %v1908_v2 = vor.u32 %v1907_v35, %v1904_v45  ;;  %v1941_v45 = vshll.u32 %v5780_v58, 16  ;;  %v5814_v35 = vld [vmem:[#allocation2 + $0x38] sm:$0xff]  }
 0x15a   :  { %4667 = vmatmul.mubr.bf16.vlgmr.msra.gmra.mrb[0].mxu1 %v1864_v23  ;;  %v1923_v23 = vshll.u32 %v5580_v13, 16 }
 0x15b   :  { %4691 = vmatpush3.bf16.msra.mxu1 %v5629_v43  ;;  %4670 = vmatprep.mubr.bf16.mxu1 %v1873_v28  ;;  %v1890_v43 = vor.u32 %v1889_v47, %v1886_v17  ;;  %v1913_v28 = vrot.slane %v1911_v34, 1  ;;  %v5789_v17 = vld [vmem:[#allocation2 + $0xc] sm:$0xf]  ;;  %v5793_v47 = vld [vmem:[#allocation2 + $0x18] sm:$0xff]  }
 0x15c   :  { %4692 = vmatprep.subr.bf16.mxu1 %v5084_v38  ;;  %v1925_v44 = vrot.slane %v1923_v23, 2  ;;  %v3110_v34 = vrot.slane %v5793_v47, 3  ;;  %v5823_v23 = vld [vmem:[#allocation2 + $0x50] sm:$0xff]  }
 0x15d   :  { %4547 = vmatmul.mubr.bf16.vlgmr.msra.gmra.mrb[16].mxu0 %v5472_v39  ;;  %v5087_v39 = vld [vmem:[%s6364_s3 + $0x158] sm:$0xff]  }
 0x15e   :  { %4550 = vmatprep.mubr.bf16.mxu0 %v5476_v37  ;;  %4571 = vmatpush3.bf16.msra.mxu0 %v5637_v27  ;;  %v1882_v37 = vsel %vm1838_vm11, %v1872_v57, %v1881_v16  ;;  %v1891_v27 = vsel %vm1838_vm11, %v1881_v16, %v1890_v43  ;;  %v1914_v57 = vshll.u32 %v5567_v4, 16  ;;  %v1900_v4 = vsel %vm1838_vm11, %v1890_v43, %v1899_v22  ;;  %v5797_v16 = vld [vmem:[#allocation2 + $0x20] sm:$0xff]  }
 0x15f   :  { %4693 = vmatpush3.bf16.msra.mxu1 %v5084_v38  ;;  %4572 = vmatprep.subr.bf16.mxu0 %v5088_v9  ;;  %v1920_v38 = vshrl.u32 %v5580_v13, 16  ;;  %v5791_v13 = vld [vmem:[#allocation2 + $0x10] sm:$0xff]   ;;  %v1932_v43 = vshll.u32 %v5606_v49, 16 }
 0x160   :  { %4694 = vmatprep.subr.bf16.mxu1 %v5085_v11  ;;  %v1916_v62 = vrot.slane %v1914_v57, 2 }
 0x162   :  { %4671 = vmatmul.mubr.bf16.gmra.mrb[4].mxu1 %v1882_v37  ;;  %4573 = vmatpush3.bf16.msra.mxu0 %v5088_v9  ;;  %v1909_v9 = vsel %vm1838_vm11, %v1899_v22, %v1908_v2  ;;  %v1917_v37 = vor.u32 %v1916_v62, %v1913_v28  ;;  %v1931_v22 = vrot.slane %v1929_v15, 1  ;;  %v3112_v28 = vrot.slane %v5797_v16, 3 }
 0x163   :  { %4674 = vmatprep.mubr.bf16.mxu1 %v1891_v27  ;;  %4695 = vmatpush3.bf16.msra.mxu1 %v5085_v11  ;;  %v1922_v11 = vrot.slane %v1920_v38, 1  ;;  %v5821_v38 = vld [vmem:[#allocation2 + $0x48] sm:$0xff]   ;;  %v1934_v62 = vrot.slane %v1932_v43, 2  ;;  %v3116_v43 = vrot.slane %v5809_v36, 3 }
 0x164   :  { %4696 = vmatprep.subr.bf16.mxu1 %v5087_v39  ;;  %4574 = vmatprep.subr.bf16.mxu0 %v5090_v50  ;;  %v5843_v15 = vsel %vm3106_vm13, %v3110_v34, %v3112_v28 }
 0x165   :  { %4551 = vmatmul.mubr.bf16.gmra.mrb[20].mxu0 %v5482_v53  ;;  %v5092_v53 = vld [vmem:[%s6364_s3 + $0x168] sm:$0xff]   ;;  %v1926_v57 = vor.u32 %v1925_v44, %v1922_v11  ;;  %v5098_v11 = vld [vmem:[%s6364_s3 + $0xb0] sm:$0xff]  }
 0x166   :  { %4554 = vmatprep.mubr.bf16.mxu0 %v5498_v1  ;;  %4575 = vmatpush3.bf16.msra.mxu0 %v5090_v50  ;;  %v5093_v1 = vld [vmem:[%s6364_s3 + $0xa0] sm:$0xff]   ;;  %v3085_v50 = vld [vmem:[#allocation2 + $0x8] sm:$0x8] }
 0x167   :  { %4697 = vmatpush3.bf16.msra.mxu1 %v5087_v39  ;;  %4576 = vmatprep.subr.bf16.mxu0 %v5091_v52  ;;  %v5804_v39 = vld [vmem:[#allocation2 + $0x28] sm:$0xff]   ;;  %v4166_v27 = vcombine.low %v3085_v50, %v5789_v17  ;;  %v1927_v59 = vsel %vm1838_vm11, %v1917_v37, %v1926_v57 }
 0x168   :  { %4698 = vmatprep.subr.bf16.mxu1 %v5089_v48 }
 0x16a   :  { %4675 = vmatmul.mubr.bf16.gmra.mrb[8].mxu1 %v1900_v4  ;;  %4577 = vmatpush3.bf16.msra.mxu0 %v5091_v52  ;;  %v5816_v52 = vld [vmem:[#allocation2 + $0x40] sm:$0xff]   ;;  %v1940_v4 = vrot.slane %v1938_v20, 1  ;;  %v1943_v20 = vrot.slane %v1941_v45, 2  ;;  %v5102_v45 = vld [vmem:[%s6364_s3 + $0xb8] sm:$0xff]  }
 0x16b   :  { %4678 = vmatprep.mubr.bf16.mxu1 %v1909_v9  ;;  %4699 = vmatpush3.bf16.msra.mxu1 %v5089_v48  ;;  %v3108_v48 = vrot.slane %v5791_v13, 3  ;;  %v5826_v9 = vld [vmem:[#allocation2 + $0x58] sm:$0xff]   ;;  %v3120_v18 = vrot.slane %v5816_v52, 3 }
 0x16c   :  { %4700 = vmatprep.subr.bf16.mxu1 %v5092_v53  ;;  %4578 = vmatprep.subr.bf16.mxu0 %v5093_v1 }
 0x16d   :  { %4555 = vmatmul.mubr.bf16.gmra.mrb[24].mxu0 %v5512_v14  ;;  %v3107_v14 = vrot.slane %v4166_v27, 3  ;;  %v5829_v50 = vsel %vm3106_vm13, %v3108_v48, %v3110_v34  ;;  %v3118_v27 = vrot.slane %v5814_v35, 3  ;;  %v3122_v34 = vrot.slane %v5821_v38, 3 }
 0x16e   :  { %4558 = vmatprep.mubr.bf16.mxu0 %v5536_v46  ;;  %4579 = vmatpush3.bf16.msra.mxu0 %v5093_v1  ;;  %v3114_v46 = vrot.slane %v5804_v39, 3  ;;  %v1918_v1 = vsel %vm1838_vm11, %v1908_v2, %v1917_v37  ;;  %v5103_v37 = vld [vmem:[%s6364_s3 + $0x180] sm:$0xff]  }
 0x16f   :  { %4701 = vmatpush3.bf16.msra.mxu1 %v5092_v53  ;;  %4580 = vmatprep.subr.bf16.mxu0 %v5096_v25  ;;  %v5100_v53 = vld [vmem:[%s6364_s3 + $0x178] sm:$0xff]   ;;  %v5840_v44 = vsel %vm3106_vm13, %v3107_v14, %v3108_v48  ;;  %v3124_v14 = vrot.slane %v5823_v23, 3 }
 0x170   :  { %4702 = vmatprep.subr.bf16.mxu1 %v5095_v32  ;;  %v5847_v2 = vsel %vm3106_vm13, %v3112_v28, %v3114_v46  ;;  %v5853_v48 = vsel %vm3106_vm13, %v3114_v46, %v3116_v43  ;;  %v5861_v28 = vsel %vm3106_vm13, %v3116_v43, %v3118_v27  ;;  %v1935_v46 = vor.u32 %v1934_v62, %v1931_v22  ;;  %v5097_v22 = vld [vmem:[#allocation2 + $0x58] ss:$0 sps:$4 sm:$0x11]   ;;  %v5105_v62 = vld [vmem:[%s6364_s3 + $0x190] sm:$0xff]  }
 0x172   :  { %4679 = vmatmul.mubr.bf16.gmra.mrb[12].mxu1 %v1918_v1  ;;  %4581 = vmatpush3.bf16.msra.mxu0 %v5096_v25  ;;  %v5864_v1 = vsel %vm3106_vm13, %v3118_v27, %v3120_v18  ;;  %v3126_v25 = vrot.slane %v5826_v9, 3  ;;  %v1944_v27 = vor.u32 %v1943_v20, %v1940_v4  ;;  %v2522_v20 = vrot.slane %v5814_v35, 2 }
 0x173   :  { %4682 = vmatprep.mubr.bf16.mxu1 %v1927_v59  ;;  %4703 = vmatpush3.bf16.msra.mxu1 %v5095_v32  ;;  %v5871_v59 = vsel %vm3106_vm13, %v3120_v18, %v3122_v34  ;;  %v5874_v32 = vsel %vm3106_vm13, %v3122_v34, %v3124_v14  ;;  %v1936_v18 = vsel %vm1838_vm11, %v1926_v57, %v1935_v46  ;;  %v5104_v57 = vld [vmem:[%s6364_s3 + $0x188] sm:$0xff]  }
 0x174   :  { %4582 = vmatprep.subr.bf16.mxu0 %v5098_v11  ;;  %4704 = vmatprep.subr.bf16.mxu1 %v5100_v53  ;;  %v5880_v43 = vsel %vm3106_vm13, %v3124_v14, %v3126_v25  ;;  %v1945_v34 = vsel %vm1838_vm11, %v1935_v46, %v1944_v27  ;;  %v2524_v14 = vrot.slane %v5816_v52, 2 }
 0x175   :  { %4559 = vmatmul.mubr.bf16.gmra.mrb[28].mxu0 %v5547_v51 }
 0x176   :  { %4562 = vmatprep.mubr.bf16.mxu0 %v5561_v60  ;;  %4583 = vmatpush3.bf16.msra.mxu0 %v5098_v11  ;;  %v2525_v46 = vsel %vm2178_vm12, %v2522_v20, %v2524_v14 }
 0x177   :  { %4705 = vmatpush3.bf16.msra.mxu1 %v5100_v53  ;;  %4584 = vmatprep.subr.bf16.mxu0 %v5102_v45  ;;  %v5123_v53 = vld [vmem:[%s6364_s3 + $0x1e0] sm:$0xff]  }
 0x178   :  { %4730 = vmatprep.subr.bf16.mxu1 %v5103_v37 }
 0x17a   :  { %4683 = vmatmul.mubr.bf16.gmra.mrb[16].mxu1 %v1936_v18  ;;  %4585 = vmatpush3.bf16.msra.mxu0 %v5102_v45  ;;  %v5126_v45 = vld [vmem:[%s6364_s3 + $0x1e8] sm:$0xff]   ;;  %v2526_v18 = vrot.slane %v5821_v38, 2 }
 0x17b   :  { %4686 = vmatprep.mubr.bf16.mxu1 %v1945_v34  ;;  %v2528_v34 = vrot.slane %v5823_v23, 2 }
 0x17d   :  { %4563 = vmatmul.mubr.bf16.gmra.mrb[32].mxu0 %v5574_v41 }
 0x17e   :  { %4566 = vmatprep.mubr.bf16.mxu0 %v5585_v21  ;;  %v2516_v21 = vrot.slane %v5797_v16, 2 }
 0x182   :  { %4687 = vmatmul.mubr.bf16.gmra.mrb[24].mxu1 %v1944_v27  ;;  %v5129_v27 = vld [vmem:[%s6364_s3 + $0x1f0] sm:$0xff]  }
 0x183   :  { %4706 = vmatprep.mubr.bf16.mxu1 %v5670_v7  ;;  %v5109_v7 = vld [vmem:[%s6364_s3 + $0x1b0] sm:$0xff]  }
 0x185   :  { %4567 = vmatmul.mubr.bf16.gmra.mrb[40].mxu0 %v5097_v22  ;;  %v5130_v22 = vld [vmem:[%s6364_s3 + $0x1f8] sm:$0xff]  }
 0x186   :  { %4586 = vmatprep.mubr.bf16.mxu0 %v5657_v63  ;;  %v5106_v63 = vld [vmem:[%s6364_s3 + $0x198] sm:$0xff]  }
 0x18a   :  { %4707 = vmatmul.mubr.bf16.vlgmr.msra.gmra.mrb[0].mxu1 %v5666_v6  ;;  %v5107_v6 = vld [vmem:[%s6364_s3 + $0x1a0] sm:$0xff]  }
 0x18b   :  { %4731 = vmatpush3.bf16.msra.mxu1 %v5103_v37  ;;  %4710 = vmatprep.mubr.bf16.mxu1 %v5678_v12  ;;  %v5110_v12 = vld [vmem:[%s6364_s3 + $0x1b8] sm:$0xff]  }
 0x18c   :  { %4732 = vmatprep.subr.bf16.mxu1 %v5104_v57 }
 0x18d   :  { %4587 = vmatmul.mubr.bf16.vlgmr.msra.gmra.mrb[16].mxu0 %v5663_v10  ;;  %v5108_v10 = vld [vmem:[%s6364_s3 + $0x1a8] sm:$0xff]  }
 0x18e   :  { %4590 = vmatprep.mubr.bf16.mxu0 %v5673_v8  ;;  %v1266_v8 = vrot.slane %v5561_v60, 1  ;;  %v5113_v60 = vld [vmem:[%s6364_s3 + $0x1c0] sm:$0xff]  }
 0x18f   :  { %4733 = vmatpush3.bf16.msra.mxu1 %v5104_v57  ;;  %v2527_v57 = vsel %vm2178_vm12, %v2524_v14, %v2526_v18 }
 0x190   :  { %4734 = vmatprep.subr.bf16.mxu1 %v5105_v62 }
 0x192   :  { %4711 = vmatmul.mubr.bf16.gmra.mrb[4].mxu1 %v5687_v19  ;;  %v1267_v19 = vsel %vm1250_vm9, %v1264_v26, %v1266_v8 }
 0x193   :  { %4714 = vmatprep.mubr.bf16.mxu1 %v5695_v30  ;;  %4735 = vmatpush3.bf16.msra.mxu1 %v5105_v62  ;;  %v2413_v30 = vld [vmem:[#allocation2 + $0x8] sm:$0xc]  ;;  %v2529_v62 = vsel %vm2178_vm12, %v2526_v18, %v2528_v34  ;;  %v2830_v18 = vshrl.u32 %v5816_v52, 16 }
 0x194   :  { %4736 = vmatprep.subr.bf16.mxu1 %v5106_v63  ;;  %v5939_v26 = vcombine.low %v2413_v30, %v5789_v17  ;;  %v5122_v17 = vld [vmem:[%s6364_s3 + $0x1d8] sm:$0xff]  }
 0x195   :  { %4591 = vmatmul.mubr.bf16.gmra.mrb[20].mxu0 %v5684_v61  ;;  %v1268_v61 = vrot.slane %v5574_v41, 1  ;;  %v2200_v41 = vrot.slane %v5780_v58, 2  ;;  %v2518_v58 = vrot.slane %v5804_v39, 2 }
 0x196   :  { %4594 = vmatprep.mubr.bf16.mxu0 %v5692_v29 }
 0x197   :  { %4737 = vmatpush3.bf16.msra.mxu1 %v5106_v63  ;;  %v1269_v29 = vsel %vm1250_vm9, %v1266_v8, %v1268_v61  ;;  %v2201_v51 = vsel %vm2178_vm12, %v2198_v56, %v2200_v41  ;;  %v6391_v56 = vmov 0   ;;  %v2519_v4 = vsel %vm2178_vm12, %v2516_v21, %v2518_v58  ;;  %v5128_v63 = vld [vmem:[#allocation2 + $0x60] ss:$0 sps:$4 sm:$0x77]  }
 0x198   :  { %4738 = vmatprep.subr.bf16.mxu1 %v5107_v6  ;;  %v2768_v8 = vshrl.u32 %v5939_v26, 16 }
 0x19a   :  { %4715 = vmatmul.mubr.bf16.gmra.mrb[8].mxu1 %v5703_v42  ;;  %v2511_v42 = vrot.slane %v5939_v26, 2 }
 0x19b   :  { %4718 = vmatprep.mubr.bf16.mxu1 %v5713_v33  ;;  %4739 = vmatpush3.bf16.msra.mxu1 %v5107_v6  ;;  %v6390_v33 = vrot.slane %v5587_v24, 1  ;;  %v5119_v24 = vld [vmem:[%s6364_s3 + $0x1d0] sm:$0xff]   ;;  %v5131_v6 = vld [vmem:[%s6364_s3 + $0x200] sm:$0xff]  }
 0x19c   :  { %4740 = vmatprep.subr.bf16.mxu1 %v5108_v10 }
 0x19d   :  { %4595 = vmatmul.mubr.bf16.gmra.mrb[24].mxu0 %v5698_v31  ;;  %v1271_v31 = vsel %vm1250_vm9, %v1268_v61, %v1270_v55  ;;  %v5116_v55 = vld [vmem:[%s6364_s3 + $0x1c8] sm:$0xff]   ;;  %v2776_v61 = vshrl.u32 %v5791_v13, 16 }
 0x19e   :  { %4598 = vmatprep.mubr.bf16.mxu0 %v5708_v3  ;;  %v2512_v3 = vrot.slane %v5791_v13, 2 }
 0x19f   :  { %4741 = vmatpush3.bf16.msra.mxu1 %v5108_v10  ;;  %v2530_v10 = vrot.slane %v5826_v9, 2 }
 0x1a0   :  { %4742 = vmatprep.subr.bf16.mxu1 %v5109_v7  ;;  %v2513_v49 = vsel %vm2178_vm12, %v2511_v42, %v2512_v3  ;;  %v2785_v42 = vshrl.u32 %v5793_v47, 16 }
 0x1a2   :  { %4719 = vmatmul.mubr.bf16.gmra.mrb[12].mxu1 %v5717_v54  ;;  %v2514_v54 = vrot.slane %v5793_v47, 2 }
 0x1a3   :  { %4722 = vmatprep.mubr.bf16.mxu1 %v5726_v5  ;;  %4743 = vmatpush3.bf16.msra.mxu1 %v5109_v7  ;;  %v2532_v7 = vrot.slane %v5128_v63, 2 }
 0x1a4   :  { %4744 = vmatprep.subr.bf16.mxu1 %v5110_v12  ;;  %v2515_v5 = vsel %vm2178_vm12, %v2512_v3, %v2514_v54 }
 0x1a5   :  { %4599 = vmatmul.mubr.bf16.gmra.mrb[28].mxu0 %v1267_v19  ;;  %v2779_v19 = vshll.u32 %v5791_v13, 16  ;;  %v2797_v13 = vshll.u32 %v5797_v16, 16 }
 0x1a6   :  { %4602 = vmatprep.mubr.bf16.mxu0 %v1269_v29  ;;  %v2533_v29 = vsel %vm2178_vm12, %v2530_v10, %v2532_v7 }
 0x1a7   :  { %4745 = vmatpush3.bf16.msra.mxu1 %v5110_v12  ;;  %v2771_v12 = vshll.u32 %v5939_v26, 16  ;;  %v2788_v26 = vshll.u32 %v5793_v47, 16  ;;  %v2815_v47 = vshll.u32 %v5809_v36, 16 }
 0x1a8   :  { %4770 = vmatprep.subr.bf16.mxu1 %v5113_v60 }
 0x1a9   :  { %v2773_v30 = vrot.slane %v2771_v12, 3  ;;  %v2817_v14 = vrot.slane %v2815_v47, 3  ;;  %v2839_v12 = vshrl.u32 %v5821_v38, 16 }
 0x1aa   :  { %4723 = vmatmul.mubr.bf16.gmra.mrb[16].mxu1 %v5731_v40  ;;  %v2517_v40 = vsel %vm2178_vm12, %v2514_v54, %v2516_v21  ;;  %v2787_v54 = vrot.slane %v2785_v42, 2  ;;  %v2790_v21 = vrot.slane %v2788_v26, 3 }
 0x1ab   :  { %4726 = vmatprep.mubr.bf16.mxu1 %v2201_v51  ;;  %v2778_v51 = vrot.slane %v2776_v61, 2  ;;  %v2842_v61 = vshll.u32 %v5821_v38, 16 }
 0x1ad   :  { %4603 = vmatmul.mubr.bf16.gmra.mrb[32].mxu0 %v1271_v31  ;;  %v2781_v31 = vrot.slane %v2779_v19, 3 }
 0x1ae   :  { %4606 = vmatprep.mubr.bf16.mxu0 %v5738_v0  ;;  %v2520_v0 = vrot.slane %v5809_v36, 2 }
 0x1b0   :  { %v2521_v11 = vsel %vm2178_vm12, %v2518_v58, %v2520_v0  ;;  %v2523_v37 = vsel %vm2178_vm12, %v2520_v0, %v2522_v20  ;;  %v2812_v58 = vshrl.u32 %v5809_v36, 16  ;;  %v2821_v36 = vshrl.u32 %v5814_v35, 16 }
 0x1b2   :  { %4727 = vmatmul.mubr.bf16.gmra.mrb[28].mxu1 %v2200_v41  ;;  %v2770_v41 = vrot.slane %v2768_v8, 2  ;;  %v2814_v20 = vrot.slane %v2812_v58, 2  ;;  %v2823_v63 = vrot.slane %v2821_v36, 2 }
 0x1b3   :  { %4746 = vmatprep.mubr.bf16.mxu1 %v2513_v49  ;;  %v2794_v49 = vshrl.u32 %v5797_v16, 16  ;;  %v2806_v16 = vshll.u32 %v5804_v39, 16 }
 0x1b4   :  { %v2774_v3 = vor.u32 %v2773_v30, %v2770_v41  ;;  %v5136_v41 = vld [vmem:[%s6364_s3 + $0x228] sm:$0xff]  }
 0x1b5   :  { %4607 = vmatmul.mubr.bf16.gmra.mrb[44].mxu0 %v6390_v33  ;;  %v2782_v33 = vor.u32 %v2781_v31, %v2778_v51  ;;  %v2841_v51 = vrot.slane %v2839_v12, 2  ;;  %v2844_v31 = vrot.slane %v2842_v61, 3 }
 0x1b6   :  { %3546 = vmatprep.mubr.bf16.mxu0 %v6391_v56 }
 0x1ba   :  { %4747 = vmatmul.mubr.bf16.vlgmr.msra.gmra.mrb[0].mxu1 %v2515_v5  ;;  %v2796_v5 = vrot.slane %v2794_v49, 2  ;;  %v2845_v49 = vor.u32 %v2844_v31, %v2841_v51  ;;  %v5161_v51 = vld [vmem:[%s6366_s5 + $0x64] ss:$8 sps:$4 sm:$0xff]  }
 0x1bb   :  { %4771 = vmatpush3.bf16.msra.mxu1 %v5113_v60  ;;  %4750 = vmatprep.mubr.bf16.mxu1 %v2517_v40  ;;  %v2531_v60 = vsel %vm2178_vm12, %v2528_v34, %v2530_v10  ;;  %v2799_v40 = vrot.slane %v2797_v13, 3  ;;  %v2833_v34 = vshll.u32 %v5816_v52, 16  ;;  %v5135_v52 = vld [vmem:[%s6364_s3 + $0x220] sm:$0xff]   ;;  %v2857_v13 = vshrl.u32 %v5826_v9, 16 }
 0x1bc   :  { %4772 = vmatprep.subr.bf16.mxu1 %v5116_v55 }
 0x1bd   :  { %v2800_v0 = vor.u32 %v2799_v40, %v2796_v5  ;;  %v5139_v5 = vld [vmem:[%s6364_s3 + $0x238] sm:$0xff]  }
 0x1bf   :  { %4773 = vmatpush3.bf16.msra.mxu1 %v5116_v55  ;;  %v2783_v55 = vsel %vm2766_vm15, %v2774_v3, %v2782_v33  ;;  %v5137_v3 = vld [vmem:[#allocation2 + $0x60] ss:$0 sps:$4 sm:$0xff]  }
 0x1c0   :  { %4774 = vmatprep.subr.bf16.mxu1 %v5119_v24 }
 0x1c2   :  { %4751 = vmatmul.mubr.bf16.gmra.mrb[4].mxu1 %v2519_v4  ;;  %v5132_v4 = vld [vmem:[%s6364_s3 + $0x208] sm:$0xff]  }
 0x1c3   :  { %4754 = vmatprep.mubr.bf16.mxu1 %v2521_v11  ;;  %4775 = vmatpush3.bf16.msra.mxu1 %v5119_v24  ;;  %v2791_v24 = vor.u32 %v2790_v21, %v2787_v54  ;;  %v2866_v21 = vshrl.u32 %v5137_v3, 16 }
 0x1c4   :  { %4776 = vmatprep.subr.bf16.mxu1 %v5122_v17 }
 0x1c5   :  { %v2792_v11 = vsel %vm2766_vm15, %v2782_v33, %v2791_v24  ;;  %v2860_v33 = vshll.u32 %v5826_v9, 16  ;;  %v2868_v47 = vrot.slane %v2866_v21, 2  ;;  %v5144_v9 = vld [vmem:[%s6366_s5 + $0x10] ss:$8 sps:$4 sm:$0xff]  }
 0x1c7   :  { %4777 = vmatpush3.bf16.msra.mxu1 %v5122_v17  ;;  %v2803_v17 = vshrl.u32 %v5804_v39, 16  ;;  %v5133_v39 = vld [vmem:[%s6364_s3 + $0x210] sm:$0xff]  }
 0x1c8   :  { %4778 = vmatprep.subr.bf16.mxu1 %v5123_v53 }
 0x1ca   :  { %4755 = vmatmul.mubr.bf16.gmra.mrb[8].mxu1 %v2523_v37  ;;  %v2808_v37 = vrot.slane %v2806_v16, 3 }
 0x1cb   :  { %4758 = vmatprep.mubr.bf16.mxu1 %v2525_v46  ;;  %4779 = vmatpush3.bf16.msra.mxu1 %v5123_v53  ;;  %v2801_v53 = vsel %vm2766_vm15, %v2791_v24, %v2800_v0  ;;  %v2824_v46 = vshll.u32 %v5814_v35, 16  ;;  %v2832_v35 = vrot.slane %v2830_v18, 2  ;;  %v2859_v24 = vrot.slane %v2857_v13, 2  ;;  %v5162_v13 = vld [vmem:[%s6366_s5 + $0x70] ss:$8 sps:$4 sm:$0xff]  }
 0x1cc   :  { %4780 = vmatprep.subr.bf16.mxu1 %v5126_v45 }
 0x1cf   :  { %4781 = vmatpush3.bf16.msra.mxu1 %v5126_v45  ;;  %v2805_v45 = vrot.slane %v2803_v17, 2 }
 0x1d0   :  { %4782 = vmatprep.subr.bf16.mxu1 %v5129_v27 }
 0x1d2   :  { %4759 = vmatmul.mubr.bf16.gmra.mrb[12].mxu1 %v2527_v57  ;;  %v5134_v57 = vld [vmem:[%s6364_s3 + $0x218] sm:$0xff]  }
 0x1d3   :  { %4762 = vmatprep.mubr.bf16.mxu1 %v2529_v62  ;;  %4783 = vmatpush3.bf16.msra.mxu1 %v5129_v27  ;;  %v2818_v27 = vor.u32 %v2817_v14, %v2814_v20 }
 0x1d4   :  { %4784 = vmatprep.subr.bf16.mxu1 %v5130_v22 }
 0x1d7   :  { %4785 = vmatpush3.bf16.msra.mxu1 %v5130_v22  ;;  %v2809_v22 = vor.u32 %v2808_v37, %v2805_v45 }
 0x1d8   :  { %4810 = vmatprep.subr.bf16.mxu1 %v5131_v6 }
 0x1d9   :  { %v2810_v62 = vsel %vm2766_vm15, %v2800_v0, %v2809_v22  ;;  %v2819_v10 = vsel %vm2766_vm15, %v2809_v22, %v2818_v27  ;;  %v2862_v0 = vrot.slane %v2860_v33, 3  ;;  %v5164_v33 = vld [vmem:[%s6366_s5 + $0x74] ss:$8 sps:$4 sm:$0xff]  }
 0x1da   :  { %4763 = vmatmul.mubr.bf16.gmra.mrb[16].mxu1 %v2531_v60  ;;  %v2848_v60 = vshrl.u32 %v5823_v23, 16 }
 0x1db   :  { %4766 = vmatprep.mubr.bf16.mxu1 %v2533_v29  ;;  %v2851_v29 = vshll.u32 %v5823_v23, 16  ;;  %v5138_v23 = vld [vmem:[%s6364_s3 + $0x230] sm:$0xff]   ;;  %v2863_v16 = vor.u32 %v2862_v0, %v2859_v24 }
 0x1dc   :  { %v2850_v26 = vrot.slane %v2848_v60, 2  ;;  %v5156_v60 = vld [vmem:[%s6366_s5 + $0x50] ss:$8 sps:$4 sm:$0xff]  }
 0x1dd   :  { %v2853_v38 = vrot.slane %v2851_v29, 3  ;;  %v5158_v29 = vld [vmem:[%s6366_s5 + $0x54] ss:$8 sps:$4 sm:$0xff]  }
 0x1df   :  { %v2854_v54 = vor.u32 %v2853_v38, %v2850_v26 }
 0x1e1   :  { %v2855_v58 = vsel %vm2766_vm15, %v2845_v49, %v2854_v54 }
 0x1e2   :  { %4767 = vmatmul.mubr.bf16.gmra.mrb[32].mxu1 %v2532_v7  ;;  %v2835_v7 = vrot.slane %v2833_v34, 3 }
 0x1e3   :  { %4786 = vmatprep.mubr.bf16.mxu1 %v2783_v55  ;;  %v2869_v55 = vshll.u32 %v5137_v3, 16 }
 0x1e4   :  { %v2836_v19 = vor.u32 %v2835_v7, %v2832_v35 }
 0x1e5   :  { %v2871_v17 = vrot.slane %v2869_v55, 3 }
 0x1e6   :  { %v2846_v40 = vsel %vm2766_vm15, %v2836_v19, %v2845_v49 }
 0x1ea   :  { %4787 = vmatmul.mubr.bf16.vlgmr.msra.gmra.mrb[0].mxu1 %v2792_v11  ;;  %v2864_v11 = vsel %vm2766_vm15, %v2854_v54, %v2863_v16 }
 0x1eb   :  { %4811 = vmatpush3.bf16.msra.mxu1 %v5131_v6  ;;  %4790 = vmatprep.mubr.bf16.mxu1 %v2801_v53  ;;  %v2826_v6 = vrot.slane %v2824_v46, 3 }
 0x1ec   :  { %4812 = vmatprep.subr.bf16.mxu1 %v5132_v4 }
 0x1ed   :  { %v2827_v8 = vor.u32 %v2826_v6, %v2823_v63 }
 0x1ef   :  { %4813 = vmatpush3.bf16.msra.mxu1 %v5132_v4  ;;  %v2828_v30 = vsel %vm2766_vm15, %v2818_v27, %v2827_v8  ;;  %v2837_v42 = vsel %vm2766_vm15, %v2827_v8, %v2836_v19  ;;  %v2872_v4 = vor.u32 %v2871_v17, %v2868_v47  ;;  %v5153_v27 = vld [vmem:[%s6366_s5 + $0x40] ss:$8 sps:$4 sm:$0xff]  }
 0x1f0   :  { %4814 = vmatprep.subr.bf16.mxu1 %v5133_v39 }
 0x1f1   :  { %v2873_v53 = vsel %vm2766_vm15, %v2863_v16, %v2872_v4 }
 0x1f2   :  { %4791 = vmatmul.mubr.bf16.gmra.mrb[4].mxu1 %v2810_v62 }
 0x1f3   :  { %4794 = vmatprep.mubr.bf16.mxu1 %v2819_v10  ;;  %4815 = vmatpush3.bf16.msra.mxu1 %v5133_v39 }
 0x1f4   :  { %4816 = vmatprep.subr.bf16.mxu1 %v5134_v57 }
 0x1f7   :  { %4817 = vmatpush3.bf16.msra.mxu1 %v5134_v57 }
 0x1f8   :  { %4818 = vmatprep.subr.bf16.mxu1 %v5135_v52 }
 0x1fa   :  { %4795 = vmatmul.mubr.bf16.gmra.mrb[8].mxu1 %v2828_v30 }
 0x1fb   :  { %4798 = vmatprep.mubr.bf16.mxu1 %v2837_v42  ;;  %4819 = vmatpush3.bf16.msra.mxu1 %v5135_v52  ;;  %v5159_v42 = vld [vmem:[%s6366_s5 + $0x60] ss:$8 sps:$4 sm:$0xff]  }
 0x1fc   :  { %4820 = vmatprep.subr.bf16.mxu1 %v5136_v41 }
 0x1ff   :  { %4821 = vmatpush3.bf16.msra.mxu1 %v5136_v41 }
 0x200   :  { %4822 = vmatprep.subr.bf16.mxu1 %v5138_v23 }
 0x202   :  { %4799 = vmatmul.mubr.bf16.gmra.mrb[12].mxu1 %v2846_v40 }
 0x203   :  { %4802 = vmatprep.mubr.bf16.mxu1 %v2855_v58  ;;  %4823 = vmatpush3.bf16.msra.mxu1 %v5138_v23 }
 0x204   :  { %4824 = vmatprep.subr.bf16.mxu1 %v5139_v5 }
 0x207   :  { %4825 = vmatpush3.bf16.msra.mxu1 %v5139_v5 }
 0x20a   :  { %4803 = vmatmul.mubr.bf16.gmra.mrb[16].mxu1 %v2864_v11 }
 0x20b   :  { %4806 = vmatprep.mubr.bf16.mxu1 %v2873_v53 }
 0x212   :  { %4807 = vmatmul.mubr.bf16.gmra.mrb[36].mxu1 %v2872_v4 }
 0x213   :  { %4826 = vmatprep.mubr.bf16.mxu1 %v5840_v44 }
 0x21a   :  { %4827 = vmatmul.mubr.bf16.vlgmr.msra.gmra.mrb[0].mxu1 %v5829_v50  ;;  %v3128_v50 = vrot.slane %v5137_v3, 3 }
 0x21b   :  { %4830 = vmatprep.mubr.bf16.mxu1 %v5843_v15 }
 0x21c   :  { %v3129_v15 = vsel %vm3106_vm13, %v3126_v25, %v3128_v50  ;;  %v5147_v25 = vld [vmem:[%s6366_s5 + $0x20] ss:$8 sps:$4 sm:$0xff]  }
 0x222   :  { %4831 = vmatmul.mubr.bf16.gmra.mrb[4].mxu1 %v5847_v2  ;;  %v5141_v2 = vld [vmem:[%s6366_s5] ss:$8 sps:$4 sm:$0xff]  }
 0x223   :  { %4834 = vmatprep.mubr.bf16.mxu1 %v5853_v48  ;;  %v5143_v48 = vld [vmem:[%s6366_s5 + $0x4] ss:$8 sps:$4 sm:$0xff]  }
 0x224   :  { %3514 = vmatprep.subr.bf16.mxu0 %v5143_v48 }
 0x225   :  { %v6053_v20 = vpop.f32.mrb[20].mxu1  ;;  %3515 = vmatpush1.bf16.msra.mxu0 %v5141_v2 }
 0x226   :  { %v6055_v14 = vpop.f32.mrb[21].mxu1 }
 0x227   :  { %v4649_v45 = vpop.f32.mrb[22].mxu1 }
 0x228   :  { %v4528_v37 = vpop.f32.mrb[36].mxu0  ;;  %v6057_v39 = vpop.f32.mrb[23].mxu1 }
 0x229   :  { %v1024_v36 = vpop.f32.mrb[37].mxu0 }
 0x22a   :  { %v4529_v46 = vpop.f32.mrb[38].mxu0  ;;  %4835 = vmatmul.mubr.bf16.gmra.mrb[8].mxu1 %v5861_v28  ;;  %v5146_v28 = vld [vmem:[%s6366_s5 + $0x14] ss:$8 sps:$4 sm:$0xff]  }
 0x22b   :  { %v1027_v44 = vpop.f32.mrb[39].mxu0  ;;  %4838 = vmatprep.mubr.bf16.mxu1 %v5864_v1  ;;  %3516 = vmatprep.subr.bf16.mxu0 %v5146_v28  ;;  %v5149_v1 = vld [vmem:[%s6366_s5 + $0x24] ss:$8 sps:$4 sm:$0xff]  }
 0x22c   :  { %3517 = vmatpush1.bf16.msra.mxu0 %v5144_v9 }
 0x22d   :  { %3518 = vmatprep.subr.bf16.mxu0 %v5149_v1 }
 0x230   :  { %3519 = vmatpush1.bf16.msra.mxu0 %v5147_v25 }
 0x232   :  { %4839 = vmatmul.mubr.bf16.gmra.mrb[12].mxu1 %v5871_v59  ;;  %v5152_v59 = vld [vmem:[%s6366_s5 + $0x34] ss:$8 sps:$4 sm:$0xff]  }
 0x233   :  { %4842 = vmatprep.mubr.bf16.mxu1 %v5874_v32  ;;  %v5150_v32 = vld [vmem:[%s6366_s5 + $0x30] ss:$8 sps:$4 sm:$0xff]   ;;  %3520 = vmatprep.subr.bf16.mxu0 %v5152_v59 }
 0x234   :  { %3521 = vmatpush1.bf16.msra.mxu0 %v5150_v32 }
 0x23a   :  { %4843 = vmatmul.mubr.bf16.gmra.mrb[16].mxu1 %v5880_v43  ;;  %v5155_v43 = vld [vmem:[%s6366_s5 + $0x44] ss:$8 sps:$4 sm:$0xff]  }
 0x23b   :  { %4846 = vmatprep.mubr.bf16.mxu1 %v3129_v15  ;;  %3522 = vmatprep.subr.bf16.mxu0 %v5155_v43 }
 0x23c   :  { %3523 = vmatpush1.bf16.msra.mxu0 %v5153_v27 }
 0x23d   :  { %3524 = vmatprep.subr.bf16.mxu0 %v5158_v29 }
 0x240   :  { %3525 = vmatpush1.bf16.msra.mxu0 %v5156_v60 }
 0x241   :  { %3526 = vmatprep.subr.bf16.mxu0 %v5161_v51 }
 0x242   :  { %4847 = vmatmul.mubr.bf16.gmra.mrb[40].mxu1 %v3128_v50 }
 0x244   :  { %3527 = vmatpush1.bf16.msra.mxu0 %v5159_v42 }
 0x245   :  { %3528 = vmatprep.subr.bf16.mxu0 %v5164_v33 }
 0x248   :  { %3529 = vmatpush1.bf16.msra.mxu0 %v5162_v13 }
 0x255   :  { %v4688_v18 = vpop.f32.mrb[24].mxu1 }
 0x256   :  { %v2120_v34 = vpop.f32.mrb[25].mxu1 }
 0x257   :  { %v4689_v22 = vpop.f32.mrb[26].mxu1 }
 0x258   :  { %v4568_v57 = vpop.f32.mrb[40].mxu0  ;;  %v2123_v62 = vpop.f32.mrb[27].mxu1 }
 0x259   :  { %v1224_v63 = vadd.f32 %v4568_v57, %v4528_v37  ;;  %v1215_v6 = vpop.f32.mrb[41].mxu0 }
 0x25a   :  { %v1216_v10 = vadd.f32 %v1215_v6, %v1024_v36  ;;  %v4569_v35 = vpop.f32.mrb[42].mxu0 }
 0x25b   :  { %v1218_v7 = vpop.f32.mrb[43].mxu0 }
 0x25c   :  { %v1219_v52 = vadd.f32 %v1218_v7, %v1027_v44 }
 0x260   :  { %v6097_v8 = vpop.f32.mrb[16].mxu0 }
 0x261   :  { %v6099_v12 = vpop.f32.mrb[17].mxu0 }
 0x262   :  { %v6101_v61 = vpop.f32.mrb[18].mxu0 }
 0x263   :  { %v6103_v19 = vpop.f32.mrb[19].mxu0 }
 0x268   :  { %v6111_v41 = vpop.f32.mrb[20].mxu0 }
 0x269   :  { %v6113_v30 = vpop.f32.mrb[21].mxu0 }
 0x26a   :  { %v6118_v31 = vpop.f32.mrb[22].mxu0 }
 0x26b   :  { %v6123_v26 = vpop.f32.mrb[23].mxu0 }
 0x270   :  { %v6125_v38 = vpop.f32.mrb[24].mxu0 }
 0x271   :  { %v6127_v3 = vpop.f32.mrb[25].mxu0 }
 0x272   :  { %v6129_v23 = vpop.f32.mrb[26].mxu0 }
 0x273   :  { %v6131_v49 = vpop.f32.mrb[27].mxu0 }
 0x278   :  { %v6139_v54 = vpop.f32.mrb[28].mxu0 }
 0x279   :  { %v6141_v21 = vpop.f32.mrb[29].mxu0 }
 0x27a   :  { %v6143_v55 = vpop.f32.mrb[30].mxu0 }
 0x27b   :  { %v6145_v5 = vpop.f32.mrb[31].mxu0 }
 0x280   :  { %v6147_v40 = vpop.f32.mrb[32].mxu0 }
 0x281   :  { %v6149_v24 = vpop.f32.mrb[33].mxu0 }
 0x282   :  { %v6151_v0 = vpop.f32.mrb[34].mxu0 }
 0x283   :  { %v6153_v58 = vpop.f32.mrb[35].mxu0 }
 0x285   :  { %v4728_v47 = vpop.f32.mrb[28].mxu1 }
 0x286   :  { %v2376_v17 = vpop.f32.mrb[29].mxu1 }
 0x287   :  { %v4729_v16 = vpop.f32.mrb[30].mxu1 }
 0x288   :  { %v4608_v4 = vpop.f32.mrb[44].mxu0  ;;  %v2379_v11 = vpop.f32.mrb[31].mxu1 }
 0x289   :  { %v1484_v53 = vadd.f32 %v4608_v4, %v1224_v63  ;;  %v1448_v45 = vpop.f32.mrb[45].mxu0 }
 0x28a   :  { %v1482_v37 = vadd.f32 %v1448_v45, %v1216_v10  ;;  %v4609_v36 = vpop.f32.mrb[46].mxu0 }
 0x28b   :  { %v1816_v46 = vadd.f32 %v6053_v20, %v1484_v53  ;;  %v1451_v44 = vpop.f32.mrb[47].mxu0 }
 0x28c   :  { %v1814_v50 = vadd.f32 %v6055_v14, %v1482_v37  ;;  %v1483_v15 = vadd.f32 %v1451_v44, %v1219_v52 }
 0x28d   :  { %v2156_v2 = vadd.f32 %v4688_v18, %v1816_v46 }
 0x28e   :  { %v2154_v48 = vadd.f32 %v2120_v34, %v1814_v50  ;;  %v1815_v28 = vadd.f32 %v6057_v39, %v1483_v15 }
 0x28f   :  { %v2412_v9 = vadd.f32 %v4728_v47, %v2156_v2 }
 0x290   :  { %v2410_v1 = vadd.f32 %v2376_v17, %v2154_v48  ;;  %v2155_v25 = vadd.f32 %v2123_v62, %v1815_v28  ;;  %v6167_v62 = vld [vmem:[%s6367_s4] ss:$0 sm:$0xff] }
 0x292   :  { %v2411_v59 = vadd.f32 %v2379_v11, %v2155_v25 }
 0x2b5   :  { %v4768_v32 = vpop.f32.mrb[32].mxu1 }
 0x2b6   :  { %v2744_v43 = vadd.f32 %v4768_v32, %v2412_v9  ;;  %v2708_v27 = vpop.f32.mrb[33].mxu1 }
 0x2b7   :  { %v2742_v22 = vadd.f32 %v2708_v27, %v2410_v1  ;;  %v4769_v57 = vpop.f32.mrb[34].mxu1 }
 0x2b8   :  { %v2711_v63 = vpop.f32.mrb[35].mxu1 }
 0x2b9   :  { %v2743_v6 = vadd.f32 %v2711_v63, %v2411_v59 }
 0x2e5   :  { %v4808_v20 = vpop.f32.mrb[36].mxu1 }
 0x2e6   :  { %v6158_v10 = vadd.f32 %v4808_v20, %v2744_v43  ;;  %v3048_v14 = vpop.f32.mrb[37].mxu1 }
 0x2e7   :  { %v6160_v35 = vadd.f32 %v3048_v14, %v2742_v22  ;;  %v4809_v18 = vpop.f32.mrb[38].mxu1 }
 0x2e8   :  { %v3051_v34 = vpop.f32.mrb[39].mxu1 }
 0x2e9   :  { %v6162_v39 = vadd.f32 %v3051_v34, %v2743_v6 }
 0x2ed   :  { %v4828_v7 = vpop.f32.mrb[0].mxu1 }
 0x2ee   :  { %v4850_v52 = vadd.f32 %v4828_v7, %v6097_v8  ;;  %v3224_v60 = vpop.f32.mrb[1].mxu1 }
 0x2ef   :  { %v4851_v29 = vadd.f32 %v3224_v60, %v6099_v12  ;;  %v4829_v51 = vpop.f32.mrb[2].mxu1 }
 0x2f0   :  { %v3350_v42 = vadd.f32 %v4850_v52, %v6167_v62  ;;  %v4852_v13 = vadd.f32 %v4829_v51, %v6101_v61  ;;  %v3227_v33 = vpop.f32.mrb[3].mxu1 }
 0x2f1   :  { %v3348_v47 = vadd.f32 %v4851_v29, %v6167_v62  ;;  %v4853_v17 = vadd.f32 %v3227_v33, %v6103_v19 }
 0x2f2   :  { %v3351_v16 = vadd.f32 %v4852_v13, %v6167_v62  ;;  %v3373_v11 = vmax.f32 %v3350_v42, 0.0 }
 0x2f3   :  { %v3349_v4 = vadd.f32 %v4853_v17, %v6167_v62  ;;  %v3371_v8 = vmax.f32 %v3348_v47, 0.0 }
 0x2f4   :  { %v3374_v53 = vmax.f32 %v3351_v16, 0.0 }
 0x2f5   :  { %v3372_v45 = vmax.f32 %v3349_v4, 0.0  ;;  %v4832_v37 = vpop.f32.mrb[4].mxu1 }
 0x2f6   :  { %v4854_v12 = vadd.f32 %v4832_v37, %v6111_v41  ;;  %v3240_v36 = vpop.f32.mrb[5].mxu1  ;;  %v3395_v46 = vpack.c.bf16 %v3374_v53, %v3373_v11 }
 0x2f7   :  { %v3394_v44 = vpack.c.bf16 %v3372_v45, %v3371_v8  ;;  %v4855_v61 = vadd.f32 %v3240_v36, %v6113_v30  ;;  %v4833_v50 = vpop.f32.mrb[6].mxu1 }
 0x2f8   :  { %v3354_v15 = vadd.f32 %v4854_v12, %v6167_v62  ;;  %v4856_v19 = vadd.f32 %v4833_v50, %v6118_v31  ;;  %v3243_v2 = vpop.f32.mrb[7].mxu1 }
 0x2f9   :  { %v3352_v48 = vadd.f32 %v4855_v61, %v6167_v62  ;;  %v4857_v28 = vadd.f32 %v3243_v2, %v6123_v26  ;;  %3547 = vmatmul.mubr.bf16.vlgmr.msra.gmra.mrb[48].mxu0 %v3394_v44 }
 0x2fa   :  { %v3355_v9 = vadd.f32 %v4856_v19, %v6167_v62  ;;  %3556 = vmatprep.mubr.bf16.mxu0 %v6391_v56  ;;  %v3377_v1 = vmax.f32 %v3354_v15, 0.0 }
 0x2fb   :  { %v3353_v41 = vadd.f32 %v4857_v28, %v6167_v62  ;;  %v3375_v30 = vmax.f32 %v3352_v48, 0.0 }
 0x2fc   :  { %v3378_v25 = vmax.f32 %v3355_v9, 0.0 }
 0x2fd   :  { %v3376_v59 = vmax.f32 %v3353_v41, 0.0  ;;  %v4836_v32 = vpop.f32.mrb[8].mxu1 }
 0x2fe   :  { %v4858_v43 = vadd.f32 %v4836_v32, %v6125_v38  ;;  %v3256_v31 = vpop.f32.mrb[9].mxu1  ;;  %v3397_v27 = vpack.c.bf16 %v3378_v25, %v3377_v1 }
 0x2ff   :  { %v4859_v22 = vadd.f32 %v3256_v31, %v6127_v3  ;;  %v4837_v57 = vpop.f32.mrb[10].mxu1  ;;  %v3396_v26 = vpack.c.bf16 %v3376_v59, %v3375_v30 }
 0x300   :  { %v3358_v63 = vadd.f32 %v4858_v43, %v6167_v62  ;;  %v4860_v6 = vadd.f32 %v4837_v57, %v6129_v23  ;;  %v3259_v20 = vpop.f32.mrb[11].mxu1 }
 0x301   :  { %v3356_v14 = vadd.f32 %v4859_v22, %v6167_v62  ;;  %v4861_v18 = vadd.f32 %v3259_v20, %v6131_v49  ;;  %3557 = vmatmul.mubr.bf16.gmra.mrb[52].mxu0 %v3395_v46 }
 0x302   :  { %v3359_v34 = vadd.f32 %v4860_v6, %v6167_v62  ;;  %3566 = vmatprep.mubr.bf16.mxu0 %v6391_v56  ;;  %v3381_v7 = vmax.f32 %v3358_v63, 0.0 }
 0x303   :  { %v3357_v38 = vadd.f32 %v4861_v18, %v6167_v62  ;;  %v3379_v52 = vmax.f32 %v3356_v14, 0.0  ;;  %v3422_v18 = vld [vmem:[%s6368_s6] sm:$0x3] }
 0x304   :  { %v3382_v3 = vmax.f32 %v3359_v34, 0.0 }
 0x305   :  { %v3380_v60 = vmax.f32 %v3357_v38, 0.0  ;;  %v4840_v29 = vpop.f32.mrb[12].mxu1 }
 0x306   :  { %v4862_v51 = vadd.f32 %v4840_v29, %v6139_v54  ;;  %v3272_v23 = vpop.f32.mrb[13].mxu1  ;;  %v3399_v42 = vpack.c.bf16 %v3382_v3, %v3381_v7 }
 0x307   :  { %v4863_v13 = vadd.f32 %v3272_v23, %v6141_v21  ;;  %v4841_v33 = vpop.f32.mrb[14].mxu1  ;;  %v3398_v49 = vpack.c.bf16 %v3380_v60, %v3379_v52 }
 0x308   :  { %v3362_v47 = vadd.f32 %v4862_v51, %v6167_v62  ;;  %v4864_v17 = vadd.f32 %v4841_v33, %v6143_v55  ;;  %v3275_v16 = vpop.f32.mrb[15].mxu1 }
 0x309   :  { %v3360_v4 = vadd.f32 %v4863_v13, %v6167_v62  ;;  %v4865_v11 = vadd.f32 %v3275_v16, %v6145_v5  ;;  %3567 = vmatmul.mubr.bf16.gmra.mrb[56].mxu0 %v3396_v26 }
 0x30a   :  { %v3363_v53 = vadd.f32 %v4864_v17, %v6167_v62  ;;  %3576 = vmatprep.mubr.bf16.mxu0 %v6391_v56  ;;  %v3385_v8 = vmax.f32 %v3362_v47, 0.0 }
 0x30b   :  { %v3361_v54 = vadd.f32 %v4865_v11, %v6167_v62  ;;  %v3383_v45 = vmax.f32 %v3360_v4, 0.0 }
 0x30c   :  { %v3386_v21 = vmax.f32 %v3363_v53, 0.0 }
 0x30d   :  { %v3384_v37 = vmax.f32 %v3361_v54, 0.0  ;;  %v4844_v12 = vpop.f32.mrb[16].mxu1 }
 0x30e   :  { %v4866_v36 = vadd.f32 %v4844_v12, %v6147_v40  ;;  %v3288_v55 = vpop.f32.mrb[17].mxu1  ;;  %v3401_v46 = vpack.c.bf16 %v3386_v21, %v3385_v8 }
 0x30f   :  { %v4867_v44 = vadd.f32 %v3288_v55, %v6149_v24  ;;  %v4845_v61 = vpop.f32.mrb[18].mxu1  ;;  %v3400_v5 = vpack.c.bf16 %v3384_v37, %v3383_v45 }
 0x310   :  { %v3366_v50 = vadd.f32 %v4866_v36, %v6167_v62  ;;  %v4868_v15 = vadd.f32 %v4845_v61, %v6151_v0  ;;  %v3291_v19 = vpop.f32.mrb[19].mxu1 }
 0x311   :  { %v3364_v2 = vadd.f32 %v4867_v44, %v6167_v62  ;;  %v4869_v48 = vadd.f32 %v3291_v19, %v6153_v58  ;;  %3577 = vmatmul.mubr.bf16.gmra.mrb[60].mxu0 %v3397_v27 }
 0x312   :  { %v3367_v28 = vadd.f32 %v4868_v15, %v6167_v62  ;;  %3586 = vmatprep.mubr.bf16.mxu0 %v6391_v56  ;;  %v3389_v9 = vmax.f32 %v3366_v50, 0.0 }
 0x313   :  { %v3365_v40 = vadd.f32 %v4869_v48, %v6167_v62  ;;  %v3387_v41 = vmax.f32 %v3364_v2, 0.0 }
 0x314   :  { %v3390_v24 = vmax.f32 %v3367_v28, 0.0 }
 0x315   :  { %v3388_v1 = vmax.f32 %v3365_v40, 0.0  ;;  %v4848_v25 = vpop.f32.mrb[40].mxu1 }
 0x316   :  { %v3340_v30 = vadd.f32 %v4848_v25, %v6158_v10  ;;  %v3304_v0 = vpop.f32.mrb[41].mxu1  ;;  %v3403_v59 = vpack.c.bf16 %v3390_v24, %v3389_v9 }
 0x317   :  { %v3338_v32 = vadd.f32 %v3304_v0, %v6160_v35  ;;  %v4849_v43 = vpop.f32.mrb[42].mxu1  ;;  %v3402_v58 = vpack.c.bf16 %v3388_v1, %v3387_v41 }
 0x318   :  { %v3370_v31 = vadd.f32 %v6167_v62, %v3340_v30  ;;  %v3307_v27 = vpop.f32.mrb[43].mxu1 }
 0x319   :  { %v3368_v22 = vadd.f32 %v6167_v62, %v3338_v32  ;;  %v3339_v57 = vadd.f32 %v3307_v27, %v6162_v39  ;;  %3587 = vmatmul.mubr.bf16.gmra.mrb[64].mxu0 %v3398_v49 }
 0x31a   :  { %3596 = vmatprep.mubr.bf16.mxu0 %v6391_v56  ;;  %v3393_v35 = vmax.f32 %v3370_v31, 0.0 }
 0x31b   :  { %v3369_v26 = vadd.f32 %v6167_v62, %v3339_v57  ;;  %v3391_v63 = vmax.f32 %v3368_v22, 0.0  ;;  %v3424_v62 = vlaneseq }
 0x31c   :  { %v3405_v39 = vpack.c.bf16 %v3393_v35, %v3393_v35 }
 0x31d   :  { %v3392_v10 = vmax.f32 %v3369_v26, 0.0  ;;  %v3425_v20 = vshrl.u32 %v3424_v62, 7 }
 0x31f   :  { %v3404_v6 = vpack.c.bf16 %v3392_v10, %v3391_v63  ;;  %v3426_v14 = vsub.s32 0, %v3425_v20  ;;  %v3430_v34 = vsub.s32 1, %v3425_v20 }
 0x321   :  { %3597 = vmatmul.mubr.bf16.gmra.mrb[68].mxu0 %v3399_v42  ;;  %v6229_v38 = vrot.slane %v3422_v18, %v3426_v14  ;;  %v6231_v7 = vrot.slane %v3422_v18, %v3430_v34 }
 0x322   :  { %3602 = vmatprep.mubr.bf16.mxu0 %v6391_v56 }
 0x329   :  { %3603 = vmatmul.mubr.bf16.gmra.mrb[72].mxu0 %v3400_v5 }
 0x32a   :  { %3612 = vmatprep.mubr.bf16.mxu0 %v6391_v56 }
 0x331   :  { %3613 = vmatmul.mubr.bf16.gmra.mrb[76].mxu0 %v3401_v46 }
 0x332   :  { %3622 = vmatprep.mubr.bf16.mxu0 %v6391_v56 }
 0x339   :  { %3623 = vmatmul.mubr.bf16.gmra.mrb[80].mxu0 %v3402_v58 }
 0x33a   :  { %3632 = vmatprep.mubr.bf16.mxu0 %v6391_v56 }
 0x341   :  { %3633 = vmatmul.mubr.bf16.gmra.mrb[84].mxu0 %v3403_v59 }
 0x342   :  { %3642 = vmatprep.mubr.bf16.mxu0 %v6391_v56 }
 0x349   :  { %3643 = vmatmul.mubr.bf16.gmra.mrb[88].mxu0 %v3404_v6 }
 0x34a   :  { %3652 = vmatprep.mubr.bf16.mxu0 %v6391_v56 }
 0x351   :  { %3653 = vmatmul.mubr.bf16.gmra.mrb[92].mxu0 %v3405_v39 }
 0x3cc   :  { %v3548_v3 = vpop.f32.mrb[48].mxu0 }
 0x3cd   :  { %v3549_v52 = vadd.f32 %v3548_v3, %v6229_v38  ;;  %v3550_v60 = vpop.f32.mrb[49].mxu0 }
 0x3ce   :  { %v3551_v56 = vadd.f32 %v3550_v60, %v6231_v7  ;;  %v3552_v29 = vpop.f32.mrb[50].mxu0 }
 0x3cf   :  { %v3661_v51 = vmax.f32 %v3549_v52, 0.0  ;;  %v3553_v23 = vadd.f32 %v3552_v29, %v6229_v38  ;;  %v3554_v42 = vpop.f32.mrb[51].mxu0 }
 0x3d0   :  { %v3662_v13 = vmax.f32 %v3551_v56, 0.0  ;;  %v3555_v33 = vadd.f32 %v3554_v42, %v6231_v7 }
 0x3d1   :  { %v3663_v49 = vmax.f32 %v3553_v23, 0.0 }
 0x3d2   :  { %v4241_v47 = vpack.c.bf16 %v3662_v13, %v3661_v51  ;;  %v3664_v17 = vmax.f32 %v3555_v33, 0.0 }
 0x3d4   :  { %3731 = vst [vmem:[%s6369_s7] sm:$0xff] %v4241_v47  ;;  %v4242_v16 = vpack.c.bf16 %v3664_v17, %v3663_v49  ;;  %v3558_v4 = vpop.f32.mrb[52].mxu0 }
 0x3d5   :  { %v3559_v11 = vadd.f32 %v3558_v4, %v6229_v38  ;;  %v3560_v53 = vpop.f32.mrb[53].mxu0 }
 0x3d6   :  { %v3561_v54 = vadd.f32 %v3560_v53, %v6231_v7  ;;  %v3562_v8 = vpop.f32.mrb[54].mxu0  ;;  %v4195_v5 = vrot.slane %v4242_v16, 9 }
 0x3d7   :  { %v3665_v21 = vmax.f32 %v3559_v11, 0.0  ;;  %v3563_v45 = vadd.f32 %v3562_v8, %v6229_v38  ;;  %v3564_v37 = vpop.f32.mrb[55].mxu0 }
 0x3d8   :  { %v3666_v12 = vmax.f32 %v3561_v54, 0.0  ;;  %v3565_v36 = vadd.f32 %v3564_v37, %v6231_v7 }
 0x3d9   :  { %v3667_v55 = vmax.f32 %v3563_v45, 0.0 }
 0x3da   :  { %v4243_v46 = vpack.c.bf16 %v3666_v12, %v3665_v21  ;;  %v3668_v44 = vmax.f32 %v3565_v36, 0.0 }
 0x3dc   :  { %v3744_v50 = vrot.slane %v4243_v46, 5  ;;  %v4244_v15 = vpack.c.bf16 %v3668_v44, %v3667_v55  ;;  %v3568_v19 = vpop.f32.mrb[56].mxu0  ;;  %v4197_v9 = vrot.slane %v4243_v46, 10 }
 0x3dd   :  { %v3569_v48 = vadd.f32 %v3568_v19, %v6229_v38  ;;  %v3570_v28 = vpop.f32.mrb[57].mxu0 }
 0x3de   :  { %v3745_v40 = vsel %vm6245_vm3, %v4195_v5, %v3744_v50  ;;  %v3755_v24 = vrot.slane %v4244_v15, 6  ;;  %v3571_v41 = vadd.f32 %v3570_v28, %v6231_v7  ;;  %v3572_v1 = vpop.f32.mrb[58].mxu0  ;;  %v4199_v57 = vrot.slane %v4244_v15, 11 }
 0x3df   :  { %3747 = vst [vmem:[%s6369_s7 + $0x8] sm:$0xff] %v3745_v40  ;;  %v3669_v25 = vmax.f32 %v3569_v48, 0.0  ;;  %v3573_v30 = vadd.f32 %v3572_v1, %v6229_v38  ;;  %v3574_v0 = vpop.f32.mrb[59].mxu0 }
 0x3e0   :  { %v3756_v59 = vsel %vm6250_vm4, %v4197_v9, %v3755_v24  ;;  %v3670_v32 = vmax.f32 %v3571_v41, 0.0  ;;  %v3575_v43 = vadd.f32 %v3574_v0, %v6231_v7 }
 0x3e1   :  { %3758 = vst [vmem:[%s6369_s7 + $0x10] sm:$0xff] %v3756_v59  ;;  %v3671_v58 = vmax.f32 %v3573_v30, 0.0 }
 0x3e2   :  { %v4245_v31 = vpack.c.bf16 %v3670_v32, %v3669_v25  ;;  %v3672_v27 = vmax.f32 %v3575_v43, 0.0 }
 0x3e4   :  { %v3768_v26 = vrot.slane %v4245_v31, 7  ;;  %v4246_v63 = vpack.c.bf16 %v3672_v27, %v3671_v58  ;;  %v3578_v10 = vpop.f32.mrb[60].mxu0 }
 0x3e5   :  { %v3579_v6 = vadd.f32 %v3578_v10, %v6229_v38  ;;  %v3580_v35 = vpop.f32.mrb[61].mxu0 }
 0x3e6   :  { %v3769_v39 = vsel %vm6269_vm14, %v4199_v57, %v3768_v26  ;;  %3776 = vst [vmem:[%s6369_s7 + $0x20] sm:$0xff] %v4246_v63  ;;  %v3581_v62 = vadd.f32 %v3580_v35, %v6231_v7  ;;  %v3582_v20 = vpop.f32.mrb[62].mxu0 }
 0x3e7   :  { %3771 = vst [vmem:[%s6369_s7 + $0x18] sm:$0xff] %v3769_v39  ;;  %v3673_v14 = vmax.f32 %v3579_v6, 0.0  ;;  %v3583_v18 = vadd.f32 %v3582_v20, %v6229_v38  ;;  %v3584_v34 = vpop.f32.mrb[63].mxu0 }
 0x3e8   :  { %v3674_v3 = vmax.f32 %v3581_v62, 0.0  ;;  %v3585_v52 = vadd.f32 %v3584_v34, %v6231_v7 }
 0x3e9   :  { %v3675_v60 = vmax.f32 %v3583_v18, 0.0 }
 0x3ea   :  { %v4247_v56 = vpack.c.bf16 %v3674_v3, %v3673_v14  ;;  %v3676_v29 = vmax.f32 %v3585_v52, 0.0 }
 0x3ec   :  { %v4248_v51 = vpack.c.bf16 %v3676_v29, %v3675_v60  ;;  %v3588_v23 = vpop.f32.mrb[64].mxu0  ;;  %v4203_v33 = vrot.slane %v4247_v56, 9 }
 0x3ed   :  { %v3589_v42 = vadd.f32 %v3588_v23, %v6229_v38  ;;  %v3590_v13 = vpop.f32.mrb[65].mxu0 }
 0x3ee   :  { %v3787_v49 = vrot.slane %v4248_v51, 5  ;;  %v3591_v47 = vadd.f32 %v3590_v13, %v6231_v7  ;;  %v3592_v17 = vpop.f32.mrb[66].mxu0  ;;  %v4205_v12 = vrot.slane %v4248_v51, 10 }
 0x3ef   :  { %v3677_v16 = vmax.f32 %v3589_v42, 0.0  ;;  %v3593_v4 = vadd.f32 %v3592_v17, %v6229_v38  ;;  %v3594_v11 = vpop.f32.mrb[67].mxu0 }
 0x3f0   :  { %v3788_v53 = vsel %vm6245_vm3, %v4203_v33, %v3787_v49  ;;  %v3678_v54 = vmax.f32 %v3591_v47, 0.0  ;;  %v3595_v8 = vadd.f32 %v3594_v11, %v6231_v7 }
 0x3f1   :  { %3790 = vst [vmem:[%s6369_s7 + $0x28] sm:$0xff] %v3788_v53  ;;  %v3679_v21 = vmax.f32 %v3593_v4, 0.0 }
 0x3f2   :  { %v4249_v45 = vpack.c.bf16 %v3678_v54, %v3677_v16  ;;  %v3680_v37 = vmax.f32 %v3595_v8, 0.0 }
 0x3f4   :  { %v3798_v36 = vrot.slane %v4249_v45, 6  ;;  %v4250_v55 = vpack.c.bf16 %v3680_v37, %v3679_v21  ;;  %v3598_v46 = vpop.f32.mrb[68].mxu0  ;;  %v4207_v50 = vrot.slane %v4249_v45, 11 }
 0x3f5   :  { %v3599_v44 = vpop.f32.mrb[69].mxu0 }
 0x3f6   :  { %v3799_v5 = vsel %vm6250_vm4, %v4205_v12, %v3798_v36  ;;  %v3807_v15 = vrot.slane %v4250_v55, 7  ;;  %v3600_v19 = vpop.f32.mrb[70].mxu0 }
 0x3f7   :  { %3801 = vst [vmem:[%s6369_s7 + $0x30] sm:$0xff] %v3799_v5  ;;  %v3601_v48 = vpop.f32.mrb[71].mxu0 }
 0x3f8   :  { %v3808_v28 = vsel %vm6269_vm14, %v4207_v50, %v3807_v15 }
 0x3f9   :  { %3810 = vst [vmem:[%s6369_s7 + $0x38] sm:$0xff] %v3808_v28 }
 0x3fc   :  { %v3604_v40 = vpop.f32.mrb[72].mxu0 }
 0x3fd   :  { %v3605_v9 = vadd.f32 %v3604_v40, %v6229_v38  ;;  %v3606_v24 = vpop.f32.mrb[73].mxu0 }
 0x3fe   :  { %v3607_v41 = vadd.f32 %v3606_v24, %v6231_v7  ;;  %v3608_v1 = vpop.f32.mrb[74].mxu0 }
 0x3ff   :  { %v3681_v25 = vmax.f32 %v3605_v9, 0.0  ;;  %v3609_v30 = vadd.f32 %v3608_v1, %v6229_v38  ;;  %v3610_v0 = vpop.f32.mrb[75].mxu0 }
 0x400   :  { %v3682_v59 = vmax.f32 %v3607_v41, 0.0  ;;  %v3611_v32 = vadd.f32 %v3610_v0, %v6231_v7 }
 0x401   :  { %v3683_v43 = vmax.f32 %v3609_v30, 0.0 }
 0x402   :  { %v4251_v58 = vpack.c.bf16 %v3682_v59, %v3681_v25  ;;  %v3684_v31 = vmax.f32 %v3611_v32, 0.0 }
 0x404   :  { %v4252_v27 = vpack.c.bf16 %v3684_v31, %v3683_v43  ;;  %v3614_v57 = vpop.f32.mrb[76].mxu0  ;;  %v4210_v10 = vrot.slane %v4251_v58, 10 }
 0x405   :  { %v3615_v26 = vadd.f32 %v3614_v57, %v6229_v38  ;;  %v3616_v63 = vpop.f32.mrb[77].mxu0 }
 0x406   :  { %v3821_v6 = vrot.slane %v4252_v27, 6  ;;  %v3617_v35 = vadd.f32 %v3616_v63, %v6231_v7  ;;  %v3618_v39 = vpop.f32.mrb[78].mxu0  ;;  %v4212_v29 = vrot.slane %v4252_v27, 11 }
 0x407   :  { %v3685_v62 = vmax.f32 %v3615_v26, 0.0  ;;  %v3619_v20 = vadd.f32 %v3618_v39, %v6229_v38  ;;  %v3620_v14 = vpop.f32.mrb[79].mxu0 }
 0x408   :  { %v3822_v18 = vsel %vm6250_vm4, %v4210_v10, %v3821_v6  ;;  %v3686_v34 = vmax.f32 %v3617_v35, 0.0  ;;  %v3621_v3 = vadd.f32 %v3620_v14, %v6231_v7 }
 0x409   :  { %3824 = vst [vmem:[%s6369_s7 + $0x40] sm:$0xff] %v3822_v18  ;;  %v3687_v52 = vmax.f32 %v3619_v20, 0.0 }
 0x40a   :  { %v4253_v60 = vpack.c.bf16 %v3686_v34, %v3685_v62  ;;  %v3688_v56 = vmax.f32 %v3621_v3, 0.0 }
 0x40c   :  { %v3832_v51 = vrot.slane %v4253_v60, 7  ;;  %v4254_v23 = vpack.c.bf16 %v3688_v56, %v3687_v52  ;;  %v3624_v42 = vpop.f32.mrb[80].mxu0 }
 0x40d   :  { %v3625_v13 = vadd.f32 %v3624_v42, %v6229_v38  ;;  %v3626_v33 = vpop.f32.mrb[81].mxu0 }
 0x40e   :  { %v3833_v49 = vsel %vm6269_vm14, %v4212_v29, %v3832_v51  ;;  %3840 = vst [vmem:[%s6369_s7 + $0x50] sm:$0xff] %v4254_v23  ;;  %v3627_v47 = vadd.f32 %v3626_v33, %v6231_v7  ;;  %v3628_v17 = vpop.f32.mrb[82].mxu0 }
 0x40f   :  { %3835 = vst [vmem:[%s6369_s7 + $0x48] sm:$0xff] %v3833_v49  ;;  %v3689_v16 = vmax.f32 %v3625_v13, 0.0  ;;  %v3629_v4 = vadd.f32 %v3628_v17, %v6229_v38  ;;  %v3630_v11 = vpop.f32.mrb[83].mxu0 }
 0x410   :  { %v3690_v53 = vmax.f32 %v3627_v47, 0.0  ;;  %v3631_v54 = vadd.f32 %v3630_v11, %v6231_v7 }
 0x411   :  { %v3691_v8 = vmax.f32 %v3629_v4, 0.0 }
 0x412   :  { %v4255_v21 = vpack.c.bf16 %v3690_v53, %v3689_v16  ;;  %v3692_v45 = vmax.f32 %v3631_v54, 0.0 }
 0x414   :  { %v4256_v37 = vpack.c.bf16 %v3692_v45, %v3691_v8  ;;  %v3634_v12 = vpop.f32.mrb[84].mxu0  ;;  %v4216_v46 = vrot.slane %v4255_v21, 9 }
 0x415   :  { %v3635_v36 = vadd.f32 %v3634_v12, %v6229_v38  ;;  %v3636_v55 = vpop.f32.mrb[85].mxu0 }
 0x416   :  { %v3851_v44 = vrot.slane %v4256_v37, 5  ;;  %v3637_v5 = vadd.f32 %v3636_v55, %v6231_v7  ;;  %v3638_v50 = vpop.f32.mrb[86].mxu0  ;;  %v4218_v25 = vrot.slane %v4256_v37, 10 }
 0x417   :  { %v3693_v15 = vmax.f32 %v3635_v36, 0.0  ;;  %v3639_v19 = vadd.f32 %v3638_v50, %v6229_v38  ;;  %v3640_v48 = vpop.f32.mrb[87].mxu0 }
 0x418   :  { %v3852_v28 = vsel %vm6245_vm3, %v4216_v46, %v3851_v44  ;;  %v3694_v40 = vmax.f32 %v3637_v5, 0.0  ;;  %v3641_v9 = vadd.f32 %v3640_v48, %v6231_v7 }
 0x419   :  { %3854 = vst [vmem:[%s6369_s7 + $0x58] sm:$0xff] %v3852_v28  ;;  %v3695_v24 = vmax.f32 %v3639_v19, 0.0 }
 0x41a   :  { %v4257_v41 = vpack.c.bf16 %v3694_v40, %v3693_v15  ;;  %v3696_v1 = vmax.f32 %v3641_v9, 0.0 }
 0x41c   :  { %v3862_v30 = vrot.slane %v4257_v41, 6  ;;  %v4258_v0 = vpack.c.bf16 %v3696_v1, %v3695_v24  ;;  %v3644_v59 = vpop.f32.mrb[88].mxu0  ;;  %v4220_v31 = vrot.slane %v4257_v41, 11 }
 0x41d   :  { %v3645_v32 = vadd.f32 %v3644_v59, %v6229_v38  ;;  %v3646_v43 = vpop.f32.mrb[89].mxu0 }
 0x41e   :  { %v3863_v58 = vsel %vm6250_vm4, %v4218_v25, %v3862_v30  ;;  %v3871_v27 = vrot.slane %v4258_v0, 7  ;;  %v3647_v57 = vadd.f32 %v3646_v43, %v6231_v7  ;;  %v3648_v26 = vpop.f32.mrb[90].mxu0 }
 0x41f   :  { %3865 = vst [vmem:[%s6369_s7 + $0x60] sm:$0xff] %v3863_v58  ;;  %v3697_v63 = vmax.f32 %v3645_v32, 0.0  ;;  %v3649_v10 = vadd.f32 %v3648_v26, %v6229_v38  ;;  %v3650_v6 = vpop.f32.mrb[91].mxu0 }
 0x420   :  { %v3872_v35 = vsel %vm6269_vm14, %v4220_v31, %v3871_v27  ;;  %v3698_v39 = vmax.f32 %v3647_v57, 0.0  ;;  %v3651_v2 = vadd.f32 %v3650_v6, %v6231_v7 }
 0x421   :  { %3874 = vst [vmem:[%s6369_s7 + $0x68] sm:$0xff] %v3872_v35  ;;  %v3699_v62 = vmax.f32 %v3649_v10, 0.0 }
 0x422   :  { %v4259_v20 = vpack.c.bf16 %v3698_v39, %v3697_v63  ;;  %v3700_v14 = vmax.f32 %v3651_v2, 0.0 }
 0x424   :  { %3881 = vst [vmem:[%s6369_s7 + $0x70] sm:$0xff] %v4259_v20  ;;  %v4260_v18 = vpack.c.bf16 %v3700_v14, %v3699_v62  ;;  %v3654_v34 = vpop.f32.mrb[92].mxu0 }
 0x425   :  { %v3655_v3 = vadd.f32 %v3654_v34, %v6229_v38  ;;  %v3656_v22 = vpop.f32.mrb[93].mxu0 }
 0x426   :  { %v3657_v52 = vadd.f32 %v3656_v22, %v6231_v7  ;;  %v3658_v60 = vpop.f32.mrb[94].mxu0  ;;  %v4224_v42 = vrot.slane %v4260_v18, 9 }
 0x427   :  { %v3701_v56 = vmax.f32 %v3655_v3, 0.0  ;;  %v3659_v29 = vpop.f32.mrb[95].mxu0 }
 0x428   :  { %v3702_v51 = vmax.f32 %v3657_v52, 0.0 }
 0x42a   :  { %v4261_v23 = vpack.c.bf16 %v3702_v51, %v3701_v56 }
 0x42c   :  { %v3892_v13 = vrot.slane %v4261_v23, 5 }
 0x42e   :  { %v3893_v33 = vsel %vm6245_vm3, %v4224_v42, %v3892_v13 }
 0x42f   :  { %3895 = vst [vmem:[%s6369_s7 + $0x78] sm:$0xff] %v3893_v33 }

// kernel: resnet50_forward.7
= control target key start
LH: loop header
LB: loop body
LE: loop exit
PB: predicated region body
PF: predicated region fallthrough
CT: control target
= control target key end

     0   :  { %vm547_vm0 = vcmask 1043458   ;;  %vm548_vm1 = vsmask.f32 3338  ;;  %vm564_vm2 = vcmask 1045508   ;;  %vm565_vm3 = vsmask.f32 5394  ;;  %s7321_s1 = inlined_call_operand.vmem [shape: bf16[512,256], index: 1, kind: input, shape index: {}]   ;;  %s7322_s0 = inlined_call_operand.vmem [shape: bf16[8,512], index: 0, kind: input, shape index: {}]   ;;  %s7323_s3 = inlined_call_operand.vmem [shape: bf16[3,3,256,256], index: 3, kind: input, shape index: {}]   ;;  %s7324_s2 = inlined_call_operand.vmem [shape: f32[1,256], index: 2, kind: input, shape index: {}]   ;;  %s7325_s5 = inlined_call_operand.vmem [shape: bf16[256,1024], index: 5, kind: input, shape index: {}]   ;;  %s7326_s4 = inlined_call_operand.vmem [shape: f32[1,256], index: 4, kind: input, shape index: {}]   ;;  %s7327_s6 = inlined_call_operand.vmem [shape: f32[1,1024], index: 6, kind: input, shape index: {}]   ;;  %s7328_s7 = inlined_call_operand.vmem [shape: bf16[8,1024], index: 7, kind: output, shape index: {}]  }
   0x1   :  { %v5021_v0 = vld [vmem:[%s7321_s1 + $0x4] ss:$8 sps:$4 sm:$0xff]   ;;  %v5023_v1 = vld [vmem:[%s7321_s1] ss:$8 sps:$4 sm:$0xff]   ;;  %v5024_v2 = vld [vmem:[%s7321_s1 + $0x14] ss:$8 sps:$4 sm:$0xff]  }
   0x2   :  { %439 = vmatprep.subr.bf16.mxu0 %v5021_v0  ;;  %v5026_v3 = vld [vmem:[%s7321_s1 + $0x10] ss:$8 sps:$4 sm:$0xff]   ;;  %v5027_v4 = vld [vmem:[%s7321_s1 + $0x24] ss:$8 sps:$4 sm:$0xff]   ;;  %v5029_v5 = vld [vmem:[%s7321_s1 + $0x20] ss:$8 sps:$4 sm:$0xff]  }
   0x3   :  { %440 = vmatpush1.bf16.msra.mxu0 %v5023_v1  ;;  %v5030_v6 = vld [vmem:[%s7321_s1 + $0x34] ss:$8 sps:$4 sm:$0xff]   ;;  %v5032_v7 = vld [vmem:[%s7321_s1 + $0x30] ss:$8 sps:$4 sm:$0xff]   ;;  %v5033_v8 = vld [vmem:[%s7321_s1 + $0x44] ss:$8 sps:$4 sm:$0xff]  }
   0x4   :  { %441 = vmatprep.subr.bf16.mxu0 %v5024_v2  ;;  %v5035_v9 = vld [vmem:[%s7321_s1 + $0x40] ss:$8 sps:$4 sm:$0xff]   ;;  %v5036_v10 = vld [vmem:[%s7321_s1 + $0x54] ss:$8 sps:$4 sm:$0xff]   ;;  %v5038_v11 = vld [vmem:[%s7321_s1 + $0x50] ss:$8 sps:$4 sm:$0xff]  }
   0x5   :  { %v5039_v12 = vld [vmem:[%s7321_s1 + $0x64] ss:$8 sps:$4 sm:$0xff]   ;;  %v5041_v15 = vld [vmem:[%s7321_s1 + $0x60] ss:$8 sps:$4 sm:$0xff]   ;;  %v5042_v16 = vld [vmem:[%s7321_s1 + $0x74] ss:$8 sps:$4 sm:$0xff]  }
   0x6   :  { %v5636_v13 = vld [vmem:[%s7322_s0] sm:$0xff]  ;;  %v5044_v17 = vld [vmem:[%s7321_s1 + $0x70] ss:$8 sps:$4 sm:$0xff]   ;;  %v5048_v20 = vld [vmem:[%s7321_s1 + $0x94] ss:$8 sps:$4 sm:$0xff]   ;;  %vm1166_vm7 = vcmask 1046528  }
   0x7   :  { %442 = vmatpush1.bf16.msra.mxu0 %v5026_v3  ;;  %v4223_v14 = vcombine.high %v5636_v13, %v5636_v13  ;;  %v5045_v18 = vld [vmem:[%s7321_s1 + $0x84] ss:$8 sps:$4 sm:$0xff]   ;;  %v5047_v19 = vld [vmem:[%s7321_s1 + $0x80] ss:$8 sps:$4 sm:$0xff]   ;;  %v5050_v21 = vld [vmem:[%s7321_s1 + $0x90] ss:$8 sps:$4 sm:$0xff]   ;;  %v4222_v47 = vcombine.low %v5636_v13, %v5636_v13 }
   0x8   :  { %443 = vmatprep.subr.bf16.mxu0 %v5027_v4  ;;  %v5051_v22 = vld [vmem:[%s7321_s1 + $0xa4] ss:$8 sps:$4 sm:$0xff]   ;;  %v5053_v23 = vld [vmem:[%s7321_s1 + $0xa0] ss:$8 sps:$4 sm:$0xff]   ;;  %v5054_v24 = vld [vmem:[%s7321_s1 + $0xb4] ss:$8 sps:$4 sm:$0xff]  }
   0x9   :  { %471 = vmatprep.mubr.bf16.mxu0 %v4223_v14  ;;  %v5056_v25 = vld [vmem:[%s7321_s1 + $0xb0] ss:$8 sps:$4 sm:$0xff]   ;;  %v5057_v26 = vld [vmem:[%s7321_s1 + $0xc4] ss:$8 sps:$4 sm:$0xff]   ;;  %v5123_v28 = vld [vmem:[%s7323_s3] ss:$8 sps:$4 sm:$0xff]  }
   0xa   :  { %v5121_v27 = vld [vmem:[%s7323_s3 + $0x4] ss:$8 sps:$4 sm:$0xff]   ;;  %v5124_v29 = vld [vmem:[%s7323_s3 + $0x14] ss:$8 sps:$4 sm:$0xff]   ;;  %v5059_v30 = vld [vmem:[%s7321_s1 + $0xc0] ss:$8 sps:$4 sm:$0xff]  }
   0xb   :  { %444 = vmatpush1.bf16.msra.mxu0 %v5029_v5  ;;  %1076 = vmatprep.subr.bf16.mxu1 %v5121_v27  ;;  %v5126_v31 = vld [vmem:[%s7323_s3 + $0x10] ss:$8 sps:$4 sm:$0xff]   ;;  %v5060_v32 = vld [vmem:[%s7321_s1 + $0xd4] ss:$8 sps:$4 sm:$0xff]   ;;  %v5130_v33 = vld [vmem:[%s7323_s3 + $0x24] ss:$8 sps:$4 sm:$0xff]  }
   0xc   :  { %445 = vmatprep.subr.bf16.mxu0 %v5030_v6  ;;  %1077 = vmatpush1.bf16.msra.mxu1 %v5123_v28  ;;  %v5062_v34 = vld [vmem:[%s7321_s1 + $0xd0] ss:$8 sps:$4 sm:$0xff]   ;;  %v5132_v35 = vld [vmem:[%s7323_s3 + $0x20] ss:$8 sps:$4 sm:$0xff]   ;;  %v5063_v36 = vld [vmem:[%s7321_s1 + $0xe4] ss:$8 sps:$4 sm:$0xff]  }
   0xd   :  { %1078 = vmatprep.subr.bf16.mxu1 %v5124_v29  ;;  %v5136_v37 = vld [vmem:[%s7323_s3 + $0x34] ss:$8 sps:$4 sm:$0xff]   ;;  %v5065_v38 = vld [vmem:[%s7321_s1 + $0xe0] ss:$8 sps:$4 sm:$0xff]   ;;  %v5138_v39 = vld [vmem:[%s7323_s3 + $0x30] ss:$8 sps:$4 sm:$0xff]  }
   0xe   :  { %v5066_v40 = vld [vmem:[%s7321_s1 + $0xf4] ss:$8 sps:$4 sm:$0xff]   ;;  %v5142_v41 = vld [vmem:[%s7323_s3 + $0x44] ss:$8 sps:$4 sm:$0xff]   ;;  %v5068_v42 = vld [vmem:[%s7321_s1 + $0xf0] ss:$8 sps:$4 sm:$0xff]  }
   0xf   :  { %446 = vmatpush1.bf16.msra.mxu0 %v5032_v7  ;;  %v5727_v43 = vld [vmem:[%s7322_s0 + $0x8] sm:$0xff]  ;;  %v5148_v46 = vld [vmem:[%s7323_s3 + $0x54] ss:$8 sps:$4 sm:$0xff]   ;;  %v5150_v51 = vld [vmem:[%s7323_s3 + $0x50] ss:$8 sps:$4 sm:$0xff]   ;;  %vm1435_vm8 = vcmask 1045504  }
  0x10   :  { %447 = vmatprep.subr.bf16.mxu0 %v5033_v8  ;;  %1079 = vmatpush1.bf16.msra.mxu1 %v5126_v31  ;;  %v5144_v44 = vld [vmem:[%s7323_s3 + $0x40] ss:$8 sps:$4 sm:$0xff]   ;;  %v5074_v45 = vld [vmem:[%s7321_s1 + $0x104] ss:$8 sps:$4 sm:$0xff]   ;;  %v4225_v49 = vcombine.high %v5727_v43, %v5727_v43  ;;  %v5077_v50 = vld [vmem:[%s7321_s1 + $0x114] ss:$8 sps:$4 sm:$0xff]   ;;  %v4224_v28 = vcombine.low %v5727_v43, %v5727_v43 }
  0x11   :  { %1080 = vmatprep.subr.bf16.mxu1 %v5130_v33  ;;  %v5072_v48 = vld [vmem:[%s7321_s1 + $0x100] ss:$8 sps:$4 sm:$0xff]   ;;  %v5154_v52 = vld [vmem:[%s7323_s3 + $0x64] ss:$8 sps:$4 sm:$0xff]   ;;  %v5075_v53 = vld [vmem:[%s7321_s1 + $0x110] ss:$8 sps:$4 sm:$0xff]  }
  0x12   :  { %v5080_v54 = vld [vmem:[%s7321_s1 + $0x124] ss:$8 sps:$4 sm:$0xff]   ;;  %v5156_v55 = vld [vmem:[%s7323_s3 + $0x60] ss:$8 sps:$4 sm:$0xff]   ;;  %v5160_v57 = vld [vmem:[%s7323_s3 + $0x74] ss:$8 sps:$4 sm:$0xff]  }
  0x13   :  { %448 = vmatpush1.bf16.msra.mxu0 %v5035_v9  ;;  %v5078_v56 = vld [vmem:[%s7321_s1 + $0x120] ss:$8 sps:$4 sm:$0xff]   ;;  %v5083_v58 = vld [vmem:[%s7321_s1 + $0x134] ss:$8 sps:$4 sm:$0xff]   ;;  %v5162_v59 = vld [vmem:[%s7323_s3 + $0x70] ss:$8 sps:$4 sm:$0xff]  }
  0x14   :  { %449 = vmatprep.subr.bf16.mxu0 %v5036_v10  ;;  %1081 = vmatpush1.bf16.msra.mxu1 %v5132_v35  ;;  %v5166_v60 = vld [vmem:[%s7323_s3 + $0x84] ss:$8 sps:$4 sm:$0xff]   ;;  %v5081_v61 = vld [vmem:[%s7321_s1 + $0x130] ss:$8 sps:$4 sm:$0xff]   ;;  %v5168_v63 = vld [vmem:[%s7323_s3 + $0x80] ss:$8 sps:$4 sm:$0xff]  }
  0x15   :  { %1082 = vmatprep.subr.bf16.mxu1 %v5136_v37  ;;  %v5086_v62 = vld [vmem:[%s7321_s1 + $0x144] ss:$8 sps:$4 sm:$0xff]   ;;  %v5172_v0 = vld [vmem:[%s7323_s3 + $0x94] ss:$8 sps:$4 sm:$0xff]   ;;  %v5084_v1 = vld [vmem:[%s7321_s1 + $0x140] ss:$8 sps:$4 sm:$0xff]  }
  0x16   :  { %v5089_v2 = vld [vmem:[%s7321_s1 + $0x154] ss:$8 sps:$4 sm:$0xff]   ;;  %v5174_v3 = vld [vmem:[%s7323_s3 + $0x90] ss:$8 sps:$4 sm:$0xff]   ;;  %v5178_v4 = vld [vmem:[%s7323_s3 + $0xa4] ss:$8 sps:$4 sm:$0xff]  }
  0x17   :  { %450 = vmatpush1.bf16.msra.mxu0 %v5038_v11  ;;  %v5087_v5 = vld [vmem:[%s7321_s1 + $0x150] ss:$8 sps:$4 sm:$0xff]   ;;  %v5092_v6 = vld [vmem:[%s7321_s1 + $0x164] ss:$8 sps:$4 sm:$0xff]   ;;  %v5090_v7 = vld [vmem:[%s7321_s1 + $0x160] ss:$8 sps:$4 sm:$0xff]  }
  0x18   :  { %451 = vmatprep.subr.bf16.mxu0 %v5039_v12  ;;  %1083 = vmatpush1.bf16.msra.mxu1 %v5138_v39  ;;  %v5095_v8 = vld [vmem:[%s7321_s1 + $0x174] ss:$8 sps:$4 sm:$0xff]   ;;  %v5093_v9 = vld [vmem:[%s7321_s1 + $0x170] ss:$8 sps:$4 sm:$0xff]   ;;  %v5098_v10 = vld [vmem:[%s7321_s1 + $0x184] ss:$8 sps:$4 sm:$0xff]  }
  0x19   :  { %1084 = vmatprep.subr.bf16.mxu1 %v5142_v41  ;;  %v5096_v11 = vld [vmem:[%s7321_s1 + $0x180] ss:$8 sps:$4 sm:$0xff]   ;;  %v5101_v12 = vld [vmem:[%s7321_s1 + $0x194] ss:$8 sps:$4 sm:$0xff]   ;;  %v5099_v13 = vld [vmem:[%s7321_s1 + $0x190] ss:$8 sps:$4 sm:$0xff]  }
  0x1a   :  { %v5104_v14 = vld [vmem:[%s7321_s1 + $0x1a4] ss:$8 sps:$4 sm:$0xff]   ;;  %v5127_v27 = vld [vmem:[%s7323_s3 + $0x100] ss:$8 sps:$4 sm:$0xff]   ;;  %v5135_v29 = vld [vmem:[%s7323_s3 + $0x114] ss:$8 sps:$4 sm:$0xff]  }
  0x1b   :  { %452 = vmatpush1.bf16.msra.mxu0 %v5041_v15  ;;  %v5102_v15 = vld [vmem:[%s7321_s1 + $0x1a0] ss:$8 sps:$4 sm:$0xff]   ;;  %v5141_v31 = vld [vmem:[%s7323_s3 + $0x124] ss:$8 sps:$4 sm:$0xff]   ;;  %v5147_v33 = vld [vmem:[%s7323_s3 + $0x134] ss:$8 sps:$4 sm:$0xff]  }
  0x1c   :  { %453 = vmatprep.subr.bf16.mxu0 %v5042_v16  ;;  %1085 = vmatpush1.bf16.msra.mxu1 %v5144_v44  ;;  %v5107_v16 = vld [vmem:[%s7321_s1 + $0x1b4] ss:$8 sps:$4 sm:$0xff]   ;;  %v5153_v35 = vld [vmem:[%s7323_s3 + $0x144] ss:$8 sps:$4 sm:$0xff]   ;;  %v5175_v44 = vld [vmem:[%s7323_s3 + $0x180] ss:$8 sps:$4 sm:$0xff]  }
  0x1d   :  { %1086 = vmatprep.subr.bf16.mxu1 %v5148_v46  ;;  %v5159_v37 = vld [vmem:[%s7323_s3 + $0x154] ss:$8 sps:$4 sm:$0xff]   ;;  %v5165_v39 = vld [vmem:[%s7323_s3 + $0x164] ss:$8 sps:$4 sm:$0xff]   ;;  %v5553_v46 = vmov 0   ;;  %vm6012_vm4 = vmand %vm547_vm0, %vm548_vm1  ;;  %vm1993_vm10 = vcmask 1044480  }
  0x1e   :  { %v5171_v41 = vld [vmem:[%s7323_s3 + $0x174] ss:$8 sps:$4 sm:$0xff]   ;;  %v5177_v43 = vld [vmem:[%s7323_s3 + $0x184] ss:$8 sps:$4 sm:$0xff]   ;;  %525 = vst [vmem:[#allocation2] sm:$0xff] %v5553_v46  ;;  %527 = vst [vmem:[#allocation2 + $0x10] sm:$0xff] %v5553_v46 }
  0x1f   :  { %454 = vmatpush1.bf16.msra.mxu0 %v5044_v17  ;;  %v5105_v17 = vld [vmem:[%s7321_s1 + $0x1b0] ss:$8 sps:$4 sm:$0xff]   ;;  %526 = vst [vmem:[#allocation2 + $0x8] sm:$0xff] %v5553_v46  ;;  %528 = vst [vmem:[#allocation2 + $0x18] sm:$0xff] %v5553_v46  ;;  %vm670_vm6 = vsmask.f32 7424 }
  0x20   :  { %455 = vmatprep.subr.bf16.mxu0 %v5045_v18  ;;  %1087 = vmatpush1.bf16.msra.mxu1 %v5150_v51  ;;  %v5110_v18 = vld [vmem:[%s7321_s1 + $0x1c4] ss:$8 sps:$4 sm:$0xff]   ;;  %vm6016_vm5 = vmand %vm564_vm2, %vm565_vm3  ;;  %vm1698_vm9 = vsmask.f32 5376  ;;  %vm2262_vm11 = vcmask 1043456   ;;  %vm2820_vm13 = vcmask 1042432  }
  0x21   :  { %1088 = vmatprep.subr.bf16.mxu1 %v5154_v52  ;;  %v5189_v51 = vld [vmem:[%s7323_s3 + $0x1a4] ss:$8 sps:$4 sm:$0xff]   ;;  %vm2525_vm12 = vsmask.f32 3328 }
  0x22   :  { %v5190_v52 = vld [vmem:[%s7323_s3 + $0xc4] ss:$8 sps:$4 sm:$0xff]  }
  0x23   :  { %456 = vmatpush1.bf16.msra.mxu0 %v5047_v19  ;;  %v5108_v19 = vld [vmem:[%s7321_s1 + $0x1c0] ss:$8 sps:$4 sm:$0xff]  }
  0x24   :  { %457 = vmatprep.subr.bf16.mxu0 %v5048_v20  ;;  %1089 = vmatpush1.bf16.msra.mxu1 %v5156_v55  ;;  %v5113_v20 = vld [vmem:[%s7321_s1 + $0x1d4] ss:$8 sps:$4 sm:$0xff]   ;;  %v5193_v55 = vld [vmem:[%s7323_s3 + $0x1b0] ss:$8 sps:$4 sm:$0xff]  }
  0x25   :  { %1090 = vmatprep.subr.bf16.mxu1 %v5160_v57  ;;  %v5196_v57 = vld [vmem:[%s7323_s3 + $0xd4] ss:$8 sps:$4 sm:$0xff]  }
  0x27   :  { %458 = vmatpush1.bf16.msra.mxu0 %v5050_v21  ;;  %v5111_v21 = vld [vmem:[%s7321_s1 + $0x1d0] ss:$8 sps:$4 sm:$0xff]  }
  0x28   :  { %459 = vmatprep.subr.bf16.mxu0 %v5051_v22  ;;  %1091 = vmatpush1.bf16.msra.mxu1 %v5162_v59  ;;  %v5116_v22 = vld [vmem:[%s7321_s1 + $0x1e4] ss:$8 sps:$4 sm:$0xff]  }
  0x29   :  { %1092 = vmatprep.subr.bf16.mxu1 %v5166_v60  ;;  %v5201_v59 = vld [vmem:[%s7323_s3 + $0x1c4] ss:$8 sps:$4 sm:$0xff]  }
  0x2a   :  { %v5202_v60 = vld [vmem:[%s7323_s3 + $0xe4] ss:$8 sps:$4 sm:$0xff]  }
  0x2b   :  { %460 = vmatpush1.bf16.msra.mxu0 %v5053_v23  ;;  %v5114_v23 = vld [vmem:[%s7321_s1 + $0x1e0] ss:$8 sps:$4 sm:$0xff]  }
  0x2c   :  { %461 = vmatprep.subr.bf16.mxu0 %v5054_v24  ;;  %1093 = vmatpush1.bf16.msra.mxu1 %v5168_v63  ;;  %v5119_v24 = vld [vmem:[%s7321_s1 + $0x1f4] ss:$8 sps:$4 sm:$0xff]  }
  0x2d   :  { %1094 = vmatprep.subr.bf16.mxu1 %v5172_v0  ;;  %v5207_v63 = vld [vmem:[%s7323_s3 + $0x1d4] ss:$8 sps:$4 sm:$0xff]  }
  0x2e   :  { %v5208_v0 = vld [vmem:[%s7323_s3 + $0xf4] ss:$8 sps:$4 sm:$0xff]  }
  0x2f   :  { %462 = vmatpush1.bf16.msra.mxu0 %v5056_v25  ;;  %v5117_v25 = vld [vmem:[%s7321_s1 + $0x1f0] ss:$8 sps:$4 sm:$0xff]  }
  0x30   :  { %463 = vmatprep.subr.bf16.mxu0 %v5057_v26  ;;  %1095 = vmatpush1.bf16.msra.mxu1 %v5174_v3  ;;  %v5129_v26 = vld [vmem:[%s7323_s3 + $0x104] ss:$8 sps:$4 sm:$0xff]  }
  0x31   :  { %1096 = vmatprep.subr.bf16.mxu1 %v5178_v4  ;;  %v5213_v3 = vld [vmem:[%s7323_s3 + $0x1e4] ss:$8 sps:$4 sm:$0xff]  }
  0x32   :  { %v5216_v4 = vld [vmem:[%s7323_s3 + $0x204] ss:$8 sps:$4 sm:$0xff]  }
  0x33   :  { %464 = vmatpush1.bf16.msra.mxu0 %v5059_v30  ;;  %v5133_v30 = vld [vmem:[%s7323_s3 + $0x110] ss:$8 sps:$4 sm:$0xff]  }
  0x34   :  { %465 = vmatprep.subr.bf16.mxu0 %v5060_v32  ;;  %v5139_v32 = vld [vmem:[%s7323_s3 + $0x120] ss:$8 sps:$4 sm:$0xff]  }
  0x37   :  { %466 = vmatpush1.bf16.msra.mxu0 %v5062_v34  ;;  %v5145_v34 = vld [vmem:[%s7323_s3 + $0x130] ss:$8 sps:$4 sm:$0xff]  }
  0x38   :  { %467 = vmatprep.subr.bf16.mxu0 %v5063_v36  ;;  %v5151_v36 = vld [vmem:[%s7323_s3 + $0x140] ss:$8 sps:$4 sm:$0xff]  }
  0x3b   :  { %468 = vmatpush1.bf16.msra.mxu0 %v5065_v38  ;;  %v5157_v38 = vld [vmem:[%s7323_s3 + $0x150] ss:$8 sps:$4 sm:$0xff]  }
  0x3c   :  { %469 = vmatprep.subr.bf16.mxu0 %v5066_v40  ;;  %v5163_v40 = vld [vmem:[%s7323_s3 + $0x160] ss:$8 sps:$4 sm:$0xff]  }
  0x3f   :  { %470 = vmatpush1.bf16.msra.mxu0 %v5068_v42  ;;  %v5169_v42 = vld [vmem:[%s7323_s3 + $0x170] ss:$8 sps:$4 sm:$0xff]  }
  0x40   :  { %480 = vmatprep.subr.bf16.mxu0 %v5074_v45  ;;  %v5180_v45 = vld [vmem:[%s7323_s3 + $0xa0] ss:$8 sps:$4 sm:$0xff]  }
  0x41   :  { %1097 = vmatpush1.bf16.msra.mxu1 %v5180_v45 }
  0x42   :  { %472 = vmatmul.mubr.bf16.vlgmr.msra.gmra.mrb[0].mxu0 %v4222_v47  ;;  %v5183_v47 = vld [vmem:[%s7323_s3 + $0x194] ss:$8 sps:$4 sm:$0xff]  }
  0x43   :  { %481 = vmatpush1.bf16.msra.mxu0 %v5072_v48  ;;  %512 = vmatprep.mubr.bf16.mxu0 %v4225_v49  ;;  %v5184_v48 = vld [vmem:[%s7323_s3 + $0xb4] ss:$8 sps:$4 sm:$0xff]   ;;  %v5181_v49 = vld [vmem:[%s7323_s3 + $0x190] ss:$8 sps:$4 sm:$0xff]  }
  0x44   :  { %482 = vmatprep.subr.bf16.mxu0 %v5077_v50  ;;  %v5186_v50 = vld [vmem:[%s7323_s3 + $0xb0] ss:$8 sps:$4 sm:$0xff]   ;;  %1098 = vmatprep.subr.bf16.mxu1 %v5184_v48 }
  0x45   :  { %1099 = vmatpush1.bf16.msra.mxu1 %v5186_v50 }
  0x46   :  { %1100 = vmatprep.subr.bf16.mxu1 %v5190_v52 }
  0x47   :  { %483 = vmatpush1.bf16.msra.mxu0 %v5075_v53  ;;  %v5187_v53 = vld [vmem:[%s7323_s3 + $0x1a0] ss:$8 sps:$4 sm:$0xff]  }
  0x48   :  { %484 = vmatprep.subr.bf16.mxu0 %v5080_v54  ;;  %v5192_v54 = vld [vmem:[%s7323_s3 + $0xc0] ss:$8 sps:$4 sm:$0xff]  }
  0x49   :  { %1101 = vmatpush1.bf16.msra.mxu1 %v5192_v54 }
  0x4a   :  { %1102 = vmatprep.subr.bf16.mxu1 %v5196_v57 }
  0x4b   :  { %485 = vmatpush1.bf16.msra.mxu0 %v5078_v56  ;;  %v5195_v56 = vld [vmem:[%s7323_s3 + $0x1b4] ss:$8 sps:$4 sm:$0xff]  }
  0x4c   :  { %486 = vmatprep.subr.bf16.mxu0 %v5083_v58  ;;  %v5198_v58 = vld [vmem:[%s7323_s3 + $0xd0] ss:$8 sps:$4 sm:$0xff]  }
  0x4d   :  { %1103 = vmatpush1.bf16.msra.mxu1 %v5198_v58 }
  0x4e   :  { %1104 = vmatprep.subr.bf16.mxu1 %v5202_v60 }
  0x4f   :  { %487 = vmatpush1.bf16.msra.mxu0 %v5081_v61  ;;  %v5199_v61 = vld [vmem:[%s7323_s3 + $0x1c0] ss:$8 sps:$4 sm:$0xff]  }
  0x50   :  { %488 = vmatprep.subr.bf16.mxu0 %v5086_v62  ;;  %v5204_v62 = vld [vmem:[%s7323_s3 + $0xe0] ss:$8 sps:$4 sm:$0xff]  }
  0x51   :  { %1105 = vmatpush1.bf16.msra.mxu1 %v5204_v62 }
  0x52   :  { %1106 = vmatprep.subr.bf16.mxu1 %v5208_v0 }
  0x53   :  { %489 = vmatpush1.bf16.msra.mxu0 %v5084_v1  ;;  %v5205_v1 = vld [vmem:[%s7323_s3 + $0x1d0] ss:$8 sps:$4 sm:$0xff]  }
  0x54   :  { %490 = vmatprep.subr.bf16.mxu0 %v5089_v2  ;;  %v5210_v2 = vld [vmem:[%s7323_s3 + $0xf0] ss:$8 sps:$4 sm:$0xff]  }
  0x55   :  { %1107 = vmatpush1.bf16.msra.mxu1 %v5210_v2  ;;  %v596_v2 = vld [vmem:[#allocation2 + $0x18] sm:$0x30] }
  0x56   :  { %1337 = vmatprep.subr.bf16.mxu1 %v5216_v4 }
  0x57   :  { %491 = vmatpush1.bf16.msra.mxu0 %v5087_v5  ;;  %v5211_v5 = vld [vmem:[%s7323_s3 + $0x1e0] ss:$8 sps:$4 sm:$0xff]  }
  0x58   :  { %492 = vmatprep.subr.bf16.mxu0 %v5092_v6  ;;  %v5219_v6 = vld [vmem:[%s7323_s3 + $0x1f4] ss:$8 sps:$4 sm:$0xff]  }
  0x5b   :  { %493 = vmatpush1.bf16.msra.mxu0 %v5090_v7  ;;  %v5217_v7 = vld [vmem:[%s7323_s3 + $0x1f0] ss:$8 sps:$4 sm:$0xff]  }
  0x5c   :  { %494 = vmatprep.subr.bf16.mxu0 %v5095_v8  ;;  %v95_v8 = vlaneseq }
  0x5f   :  { %495 = vmatpush1.bf16.msra.mxu0 %v5093_v9  ;;  %v5999_v9 = vshrl.u32 %v95_v8, 7 }
  0x60   :  { %496 = vmatprep.subr.bf16.mxu0 %v5098_v10 }
  0x61   :  { %v6002_v10 = vsub.s32 0, %v5999_v9 }
  0x63   :  { %497 = vmatpush1.bf16.msra.mxu0 %v5096_v11  ;;  %v93_v11 = vld [vmem:[%s7324_s2] sm:$0x3] }
  0x64   :  { %498 = vmatprep.subr.bf16.mxu0 %v5101_v12  ;;  %v6008_v12 = vsub.s32 1, %v5999_v9 }
  0x67   :  { %499 = vmatpush1.bf16.msra.mxu0 %v5099_v13  ;;  %v98_v13 = vrot.slane %v93_v11, %v6002_v10 }
  0x68   :  { %500 = vmatprep.subr.bf16.mxu0 %v5104_v14  ;;  %v102_v14 = vrot.slane %v93_v11, %v6008_v12 }
  0x6b   :  { %501 = vmatpush1.bf16.msra.mxu0 %v5102_v15 }
  0x6c   :  { %502 = vmatprep.subr.bf16.mxu0 %v5107_v16 }
  0x6f   :  { %503 = vmatpush1.bf16.msra.mxu0 %v5105_v17 }
  0x70   :  { %504 = vmatprep.subr.bf16.mxu0 %v5110_v18 }
  0x73   :  { %505 = vmatpush1.bf16.msra.mxu0 %v5108_v19 }
  0x74   :  { %506 = vmatprep.subr.bf16.mxu0 %v5113_v20 }
  0x77   :  { %507 = vmatpush1.bf16.msra.mxu0 %v5111_v21 }
  0x78   :  { %508 = vmatprep.subr.bf16.mxu0 %v5116_v22 }
  0x7b   :  { %509 = vmatpush1.bf16.msra.mxu0 %v5114_v23 }
  0x7c   :  { %510 = vmatprep.subr.bf16.mxu0 %v5119_v24 }
  0x7f   :  { %511 = vmatpush1.bf16.msra.mxu0 %v5117_v25 }
  0x80   :  { %865 = vmatprep.subr.bf16.mxu0 %v5129_v26 }
  0x82   :  { %513 = vmatmul.mubr.bf16.vlgmr.msra.gmra.mrb[0].mxu0 %v4224_v28 }
  0x83   :  { %866 = vmatpush1.bf16.msra.mxu0 %v5127_v27 }
  0x84   :  { %867 = vmatprep.subr.bf16.mxu0 %v5135_v29 }
  0x87   :  { %868 = vmatpush1.bf16.msra.mxu0 %v5133_v30 }
  0x88   :  { %869 = vmatprep.subr.bf16.mxu0 %v5141_v31 }
  0x8b   :  { %870 = vmatpush1.bf16.msra.mxu0 %v5139_v32  ;;  %v550_v32 = vld [vmem:[#allocation2] sm:$0xc] }
  0x8c   :  { %871 = vmatprep.subr.bf16.mxu0 %v5147_v33 }
  0x8f   :  { %872 = vmatpush1.bf16.msra.mxu0 %v5145_v34 }
  0x90   :  { %873 = vmatprep.subr.bf16.mxu0 %v5153_v35 }
  0x93   :  { %874 = vmatpush1.bf16.msra.mxu0 %v5151_v36  ;;  %v567_v36 = vld [vmem:[#allocation2] sm:$0x30] }
  0x94   :  { %875 = vmatprep.subr.bf16.mxu0 %v5159_v37 }
  0x97   :  { %876 = vmatpush1.bf16.msra.mxu0 %v5157_v38 }
  0x98   :  { %877 = vmatprep.subr.bf16.mxu0 %v5165_v39 }
  0x9b   :  { %878 = vmatpush1.bf16.msra.mxu0 %v5163_v40 }
  0x9c   :  { %879 = vmatprep.subr.bf16.mxu0 %v5171_v41 }
  0x9f   :  { %880 = vmatpush1.bf16.msra.mxu0 %v5169_v42 }
  0xa0   :  { %881 = vmatprep.subr.bf16.mxu0 %v5177_v43  ;;  %v579_v43 = vld [vmem:[#allocation2 + $0x10] sm:$0xc] }
  0xa3   :  { %882 = vmatpush1.bf16.msra.mxu0 %v5175_v44  ;;  %v593_v44 = vld [vmem:[#allocation2 + $0x10] sm:$0x30] }
  0xa4   :  { %883 = vmatprep.subr.bf16.mxu0 %v5183_v47 }
  0xa7   :  { %884 = vmatpush1.bf16.msra.mxu0 %v5181_v49  ;;  %v553_v49 = vld [vmem:[#allocation2 + $0x8] sm:$0xc] }
  0xa8   :  { %885 = vmatprep.subr.bf16.mxu0 %v5189_v51 }
  0xab   :  { %886 = vmatpush1.bf16.msra.mxu0 %v5187_v53 }
  0xac   :  { %887 = vmatprep.subr.bf16.mxu0 %v5195_v56  ;;  %v582_v56 = vld [vmem:[#allocation2 + $0x18] sm:$0xc] }
  0xaf   :  { %888 = vmatpush1.bf16.msra.mxu0 %v5193_v55  ;;  %v570_v55 = vld [vmem:[#allocation2 + $0x8] sm:$0x30] }
  0xb0   :  { %889 = vmatprep.subr.bf16.mxu0 %v5201_v59 }
  0xb3   :  { %890 = vmatpush1.bf16.msra.mxu0 %v5199_v61 }
  0xb4   :  { %891 = vmatprep.subr.bf16.mxu0 %v5207_v63 }
  0xb7   :  { %892 = vmatpush1.bf16.msra.mxu0 %v5205_v1 }
  0xb8   :  { %893 = vmatprep.subr.bf16.mxu0 %v5213_v3 }
  0xbb   :  { %894 = vmatpush1.bf16.msra.mxu0 %v5211_v5 }
  0xbc   :  { %895 = vmatprep.subr.bf16.mxu0 %v5219_v6 }
  0xbf   :  { %896 = vmatpush1.bf16.msra.mxu0 %v5217_v7  ;;  %v5214_v7 = vld [vmem:[%s7323_s3 + $0x200] ss:$8 sps:$4 sm:$0xff]  }
 0x155   :  { %v514_v15 = vpop.f32.mrb[0].mxu0 }
 0x156   :  { %v4982_v16 = vadd.f32 %v514_v15, %v98_v13  ;;  %v516_v17 = vpop.f32.mrb[1].mxu0 }
 0x157   :  { %v4983_v18 = vadd.f32 %v516_v17, %v102_v14  ;;  %v518_v19 = vpop.f32.mrb[2].mxu0  ;;  %v5222_v14 = vld [vmem:[%s7323_s3 + $0x214] ss:$8 sps:$4 sm:$0xff]  }
 0x158   :  { %v521_v20 = vmax.f32 %v4982_v16, 0.0  ;;  %v519_v21 = vpop.f32.mrb[3].mxu0 }
 0x159   :  { %v522_v22 = vmax.f32 %v4983_v18, 0.0 }
 0x15a   :  { %v523_v23 = vpack.c.bf16 %v521_v20, %v521_v20 }
 0x15b   :  { %v524_v24 = vpack.c.bf16 %v522_v22, %v522_v22 }
 0x15c   :  { %v530_v25 = vshrl.u32 %v523_v23, 16  ;;  %v533_v26 = vshll.u32 %v523_v23, 16  ;;  %v5220_v23 = vld [vmem:[%s7323_s3 + $0x210] ss:$8 sps:$4 sm:$0xff]  }
 0x15d   :  { %v538_v27 = vshrl.u32 %v524_v24, 16  ;;  %v541_v28 = vshll.u32 %v524_v24, 16 }
 0x15e   :  { %v532_v29 = vrot.slane %v530_v25, 5  ;;  %v535_v30 = vrot.slane %v533_v26, 6  ;;  %v556_v33 = vrot.slane %v530_v25, 4  ;;  %v557_v34 = vrot.slane %v533_v26, 5 }
 0x15f   :  { %v573_v37 = vrot.slane %v530_v25, 7  ;;  %v585_v38 = vrot.slane %v530_v25, 6  ;;  %v586_v39 = vrot.slane %v533_v26, 7  ;;  %v540_v40 = vrot.slane %v538_v27, 5 }
 0x160   :  { %v536_v41 = vor.u32 %v535_v30, %v532_v29  ;;  %v558_v42 = vor.u32 %v557_v34, %v556_v33  ;;  %v543_v45 = vrot.slane %v541_v28, 6  ;;  %v559_v46 = vrot.slane %v538_v27, 4  ;;  %v5223_v34 = vld [vmem:[%s7323_s3 + $0x220] ss:$8 sps:$4 sm:$0xff]  }
 0x161   :  { %v574_v47 = vor.u32 %v573_v37, %v533_v26  ;;  %v587_v48 = vor.u32 %v586_v39, %v585_v38  ;;  %v560_v50 = vrot.slane %v541_v28, 5  ;;  %v575_v51 = vrot.slane %v538_v27, 7  ;;  %v5228_v37 = vld [vmem:[%s7323_s3 + $0x234] ss:$8 sps:$4 sm:$0xff]  }
 0x162   :  { %v551_v52 = vsel %vm6012_vm4, %v536_v41, %v550_v32  ;;  %v568_v53 = vsel %vm6016_vm5, %v558_v42, %v567_v36  ;;  %v544_v54 = vor.u32 %v543_v45, %v540_v40  ;;  %v588_v57 = vrot.slane %v538_v27, 6  ;;  %v5225_v27 = vld [vmem:[%s7323_s3 + $0x224] ss:$8 sps:$4 sm:$0xff]   ;;  %v5226_v40 = vld [vmem:[%s7323_s3 + $0x230] ss:$8 sps:$4 sm:$0xff]  }
 0x163   :  { %552 = vst [vmem:[#allocation2] sm:$0xc] %v551_v52  ;;  %569 = vst [vmem:[#allocation2] sm:$0x30] %v568_v53  ;;  %v580_v58 = vsel %vm6012_vm4, %v574_v47, %v579_v43  ;;  %v594_v59 = vsel %vm6016_vm5, %v587_v48, %v593_v44  ;;  %v561_v60 = vor.u32 %v560_v50, %v559_v46  ;;  %v589_v63 = vrot.slane %v541_v28, 7 }
 0x164   :  { %v576_v61 = vor.u32 %v575_v51, %v541_v28  ;;  %581 = vst [vmem:[#allocation2 + $0x10] sm:$0xc] %v580_v58  ;;  %595 = vst [vmem:[#allocation2 + $0x10] sm:$0x30] %v594_v59  ;;  %v554_v62 = vsel %vm6012_vm4, %v544_v54, %v553_v49  ;;  %v5231_v41 = vld [vmem:[%s7323_s3 + $0x244] ss:$8 sps:$4 sm:$0xff]  }
 0x165   :  { %555 = vst [vmem:[#allocation2 + $0x8] sm:$0xc] %v554_v62  ;;  %v571_v0 = vsel %vm6016_vm5, %v561_v60, %v570_v55  ;;  %v590_v3 = vor.u32 %v589_v63, %v588_v57  ;;  %v5229_v44 = vld [vmem:[%s7323_s3 + $0x240] ss:$8 sps:$4 sm:$0xff]   ;;  %v5234_v45 = vld [vmem:[%s7323_s3 + $0x254] ss:$8 sps:$4 sm:$0xff]  }
 0x166   :  { %v583_v1 = vsel %vm6012_vm4, %v576_v61, %v582_v56  ;;  %572 = vst [vmem:[#allocation2 + $0x8] sm:$0x30] %v571_v0  ;;  %v5232_v46 = vld [vmem:[%s7323_s3 + $0x250] ss:$8 sps:$4 sm:$0xff]   ;;  %v5237_v47 = vld [vmem:[%s7323_s3 + $0x264] ss:$8 sps:$4 sm:$0xff]  }
 0x167   :  { %584 = vst [vmem:[#allocation2 + $0x18] sm:$0xc] %v583_v1  ;;  %v597_v4 = vsel %vm6016_vm5, %v590_v3, %v596_v2  ;;  %v5235_v48 = vld [vmem:[%s7323_s3 + $0x260] ss:$8 sps:$4 sm:$0xff]   ;;  %v5240_v49 = vld [vmem:[%s7323_s3 + $0x274] ss:$8 sps:$4 sm:$0xff]  }
 0x168   :  { %598 = vst [vmem:[#allocation2 + $0x18] sm:$0x30] %v597_v4  ;;  %v5238_v50 = vld [vmem:[%s7323_s3 + $0x270] ss:$8 sps:$4 sm:$0xff]   ;;  %v5243_v51 = vld [vmem:[%s7323_s3 + $0x284] ss:$8 sps:$4 sm:$0xff]  }
 0x169   :  { %v5241_v52 = vld [vmem:[%s7323_s3 + $0x280] ss:$8 sps:$4 sm:$0xff]   ;;  %v5246_v53 = vld [vmem:[%s7323_s3 + $0x294] ss:$8 sps:$4 sm:$0xff]   ;;  %v5244_v54 = vld [vmem:[%s7323_s3 + $0x290] ss:$8 sps:$4 sm:$0xff]  }
 0x16a   :  { %v599_v5 = vld [vmem:[#allocation2] sm:$0xff]  ;;  %v5252_v57 = vld [vmem:[%s7323_s3 + $0x2b4] ss:$8 sps:$4 sm:$0xff]   ;;  %v5250_v58 = vld [vmem:[%s7323_s3 + $0x2b0] ss:$8 sps:$4 sm:$0xff]  }
 0x16b   :  { %v674_v6 = vshll.u32 %v599_v5, 16  ;;  %v6039_v8 = vld [vmem:[#allocation2 + $0x10] sm:$0xf]  ;;  %v672_v18 = vshrl.u32 %v599_v5, 16  ;;  %v5249_v55 = vld [vmem:[%s7323_s3 + $0x2a4] ss:$8 sps:$4 sm:$0xff]  }
 0x16c   :  { %v679_v20 = vshll.u32 %v6039_v8, 16  ;;  %v601_v38 = vld [vmem:[#allocation2 + $0x10] sm:$0x7]  ;;  %v695_v42 = vshrl.u32 %v6039_v8, 16  ;;  %v5247_v56 = vld [vmem:[%s7323_s3 + $0x2a0] ss:$8 sps:$4 sm:$0xff]  }
 0x16d   :  { %v600_v11 = vld [vmem:[#allocation2 + $0x8] sm:$0xff]  ;;  %v676_v13 = vrot.slane %v674_v6, 1  ;;  %v5258_v61 = vld [vmem:[%s7323_s3 + $0x2d4] ss:$8 sps:$4 sm:$0xff]   ;;  %v5256_v62 = vld [vmem:[%s7323_s3 + $0x2d0] ss:$8 sps:$4 sm:$0xff]  }
 0x16e   :  { %v6044_v15 = vld [vmem:[#allocation2 + $0x18] sm:$0xf]  ;;  %v686_v16 = vshll.u32 %v600_v11, 16  ;;  %1108 = vmatprep.mubr.bf16.mxu1 %v600_v11  ;;  %v684_v21 = vshrl.u32 %v600_v11, 16  ;;  %v1128_v24 = vld [vmem:[#allocation2 + $0x8] sm:$0xfe] }
 0x16f   :  { %v691_v17 = vshll.u32 %v6044_v15, 16  ;;  %1109 = vmatmul.mubr.bf16.vlgmr.msra.gmra.mrb[0].mxu1 %v599_v5  ;;  %v602_v19 = vld [vmem:[#allocation2 + $0x18] sm:$0x7]  ;;  %v677_v25 = vor.u32 %v676_v13, %v672_v18  ;;  %v681_v29 = vrot.slane %v679_v20, 1  ;;  %v698_v30 = vshrl.u32 %v6044_v15, 16 }
 0x170   :  { %v688_v22 = vrot.slane %v686_v16, 1  ;;  %1338 = vmatpush1.bf16.msra.mxu1 %v5214_v7  ;;  %1118 = vmatprep.mubr.bf16.mxu1 %v602_v19  ;;  %v1170_v31 = vrot.slane %v1128_v24, 1  ;;  %v1171_v32 = vrot.slane %v6044_v15, 1  ;;  %v5255_v59 = vld [vmem:[%s7323_s3 + $0x2c4] ss:$8 sps:$4 sm:$0xff]   ;;  %v1168_v6 = vrot.slane %v6039_v8, 1 }
 0x171   :  { %1339 = vmatprep.subr.bf16.mxu1 %v5222_v14  ;;  %v693_v26 = vrot.slane %v691_v17, 1  ;;  %v682_v35 = vsel %vm670_vm6, %v677_v25, %v681_v29  ;;  %v697_v43 = vor.u32 %v695_v42, %v681_v29  ;;  %v5253_v60 = vld [vmem:[%s7323_s3 + $0x2c0] ss:$8 sps:$4 sm:$0xff]   ;;  %v5261_v63 = vld [vmem:[%s7323_s3 + $0x2e4] ss:$8 sps:$4 sm:$0xff]  }
 0x172   :  { %v689_v28 = vor.u32 %v688_v22, %v684_v21  ;;  %v1172_v39 = vsel %vm1166_vm7, %v1170_v31, %v1171_v32  ;;  %v5259_v0 = vld [vmem:[%s7323_s3 + $0x2e0] ss:$8 sps:$4 sm:$0xff]   ;;  %v5264_v1 = vld [vmem:[%s7323_s3 + $0x2f4] ss:$8 sps:$4 sm:$0xff]   ;;  %v5262_v3 = vld [vmem:[%s7323_s3 + $0x2f0] ss:$8 sps:$4 sm:$0xff]  }
 0x173   :  { %v700_v36 = vor.u32 %v698_v30, %v693_v26  ;;  %v1127_v2 = vld [vmem:[#allocation2] sm:$0xfe]  ;;  %v5270_v11 = vld [vmem:[%s7323_s3 + $0x314] ss:$8 sps:$4 sm:$0xff]   ;;  %v5268_v8 = vld [vmem:[%s7323_s3 + $0x310] ss:$8 sps:$4 sm:$0xff]  }
 0x174   :  { %1340 = vmatpush1.bf16.msra.mxu1 %v5220_v23  ;;  %v694_v33 = vsel %vm670_vm6, %v689_v28, %v693_v26  ;;  %v5267_v4 = vld [vmem:[%s7323_s3 + $0x304] ss:$8 sps:$4 sm:$0xff]   ;;  %v1167_v5 = vrot.slane %v1127_v2, 1  ;;  %v5265_v7 = vld [vmem:[%s7323_s3 + $0x300] ss:$8 sps:$4 sm:$0xff]  }
 0x175   :  { %897 = vmatprep.mubr.bf16.mxu0 %v694_v33  ;;  %1341 = vmatprep.subr.bf16.mxu1 %v5225_v27  ;;  %v6157_v14 = vld [vmem:[#allocation2 + $0x8] sm:$0xfc]  ;;  %v6159_v16 = vld [vmem:[#allocation2 + $0x18] sm:$0x1f] }
 0x176   :  { %898 = vmatmul.mubr.bf16.vlgmr.msra.gmra.mrb[4].mxu0 %v682_v35  ;;  %v1169_v13 = vsel %vm1166_vm7, %v1167_v5, %v1168_v6  ;;  %v5273_v17 = vld [vmem:[%s7323_s3 + $0x324] ss:$8 sps:$4 sm:$0xff]   ;;  %v1439_v18 = vrot.slane %v6157_v14, 2  ;;  %v1440_v19 = vrot.slane %v6159_v16, 2  ;;  %v5271_v15 = vld [vmem:[%s7323_s3 + $0x320] ss:$8 sps:$4 sm:$0xff]  }
 0x177   :  { %907 = vmatprep.mubr.bf16.mxu0 %v700_v36  ;;  %1119 = vmatmul.mubr.bf16.gmra.mrb[4].mxu1 %v601_v38  ;;  %v5276_v20 = vld [vmem:[%s7323_s3 + $0x334] ss:$8 sps:$4 sm:$0xff]   ;;  %v5274_v22 = vld [vmem:[%s7323_s3 + $0x330] ss:$8 sps:$4 sm:$0xff]   ;;  %v5279_v23 = vld [vmem:[%s7323_s3 + $0x344] ss:$8 sps:$4 sm:$0xff]  }
 0x178   :  { %1342 = vmatpush1.bf16.msra.mxu1 %v5223_v34  ;;  %1369 = vmatprep.mubr.bf16.mxu1 %v1172_v39  ;;  %v1441_v21 = vsel %vm1435_vm8, %v1439_v18, %v1440_v19  ;;  %v5277_v24 = vld [vmem:[%s7323_s3 + $0x340] ss:$8 sps:$4 sm:$0xff]   ;;  %v5282_v25 = vld [vmem:[%s7323_s3 + $0x354] ss:$8 sps:$4 sm:$0xff]   ;;  %v5280_v26 = vld [vmem:[%s7323_s3 + $0x350] ss:$8 sps:$4 sm:$0xff]  }
 0x179   :  { %1343 = vmatprep.subr.bf16.mxu1 %v5228_v37  ;;  %v5285_v27 = vld [vmem:[%s7323_s3 + $0x364] ss:$8 sps:$4 sm:$0xff]   ;;  %v5283_v28 = vld [vmem:[%s7323_s3 + $0x360] ss:$8 sps:$4 sm:$0xff]   ;;  %v5288_v29 = vld [vmem:[%s7323_s3 + $0x374] ss:$8 sps:$4 sm:$0xff]  }
 0x17a   :  { %v5286_v30 = vld [vmem:[%s7323_s3 + $0x370] ss:$8 sps:$4 sm:$0xff]   ;;  %v5291_v31 = vld [vmem:[%s7323_s3 + $0x384] ss:$8 sps:$4 sm:$0xff]   ;;  %v5294_v33 = vld [vmem:[%s7323_s3 + $0x394] ss:$8 sps:$4 sm:$0xff]  }
 0x17b   :  { %v5292_v34 = vld [vmem:[%s7323_s3 + $0x390] ss:$8 sps:$4 sm:$0xff]   ;;  %v5297_v35 = vld [vmem:[%s7323_s3 + $0x3a4] ss:$8 sps:$4 sm:$0xff]   ;;  %v5295_v36 = vld [vmem:[%s7323_s3 + $0x3a0] ss:$8 sps:$4 sm:$0xff]  }
 0x17c   :  { %1344 = vmatpush1.bf16.msra.mxu1 %v5226_v40  ;;  %v5300_v37 = vld [vmem:[%s7323_s3 + $0x3b4] ss:$8 sps:$4 sm:$0xff]   ;;  %v5298_v38 = vld [vmem:[%s7323_s3 + $0x3b0] ss:$8 sps:$4 sm:$0xff]   ;;  %v5303_v39 = vld [vmem:[%s7323_s3 + $0x3c4] ss:$8 sps:$4 sm:$0xff]  }
 0x17d   :  { %1345 = vmatprep.subr.bf16.mxu1 %v5231_v41  ;;  %v5301_v40 = vld [vmem:[%s7323_s3 + $0x3c0] ss:$8 sps:$4 sm:$0xff]   ;;  %v5306_v41 = vld [vmem:[%s7323_s3 + $0x3d4] ss:$8 sps:$4 sm:$0xff]   ;;  %v5304_v42 = vld [vmem:[%s7323_s3 + $0x3d0] ss:$8 sps:$4 sm:$0xff]  }
 0x17e   :  { %908 = vmatmul.mubr.bf16.gmra.mrb[8].mxu0 %v697_v43  ;;  %v5309_v43 = vld [vmem:[%s7323_s3 + $0x3e4] ss:$8 sps:$4 sm:$0xff]   ;;  %v5324_v5 = vld [vmem:[%s7323_s3 + $0x434] ss:$8 sps:$4 sm:$0xff]  }
 0x17f   :  { %v5333_v16 = vld [vmem:[%s7323_s3 + $0x464] ss:$8 sps:$4 sm:$0xff]   ;;  %v5336_v18 = vld [vmem:[%s7323_s3 + $0x474] ss:$8 sps:$4 sm:$0xff]  }
 0x180   :  { %1346 = vmatpush1.bf16.msra.mxu1 %v5229_v44  ;;  %v5307_v44 = vld [vmem:[%s7323_s3 + $0x3e0] ss:$8 sps:$4 sm:$0xff]  }
 0x181   :  { %1347 = vmatprep.subr.bf16.mxu1 %v5234_v45  ;;  %v5312_v45 = vld [vmem:[%s7323_s3 + $0x3f4] ss:$8 sps:$4 sm:$0xff]  }
 0x184   :  { %1348 = vmatpush1.bf16.msra.mxu1 %v5232_v46  ;;  %v6247_v46 = vld [vmem:[#allocation2] sm:$0xfc] }
 0x185   :  { %1349 = vmatprep.subr.bf16.mxu1 %v5237_v47  ;;  %v1396_v47 = vld [vmem:[#allocation2 + $0x10] sm:$0x1f] }
 0x188   :  { %1350 = vmatpush1.bf16.msra.mxu1 %v5235_v48  ;;  %v5310_v48 = vld [vmem:[%s7323_s3 + $0x3f0] ss:$8 sps:$4 sm:$0xff]  }
 0x189   :  { %1351 = vmatprep.subr.bf16.mxu1 %v5240_v49  ;;  %v6252_v49 = vld [vmem:[#allocation2 + $0x18] sm:$0x3f] }
 0x18c   :  { %1352 = vmatpush1.bf16.msra.mxu1 %v5238_v50  ;;  %v5315_v50 = vld [vmem:[%s7323_s3 + $0x404] ss:$8 sps:$4 sm:$0xff]  }
 0x18d   :  { %1353 = vmatprep.subr.bf16.mxu1 %v5243_v51  ;;  %v1436_v51 = vrot.slane %v6247_v46, 2 }
 0x190   :  { %1354 = vmatpush1.bf16.msra.mxu1 %v5241_v52  ;;  %v1437_v52 = vrot.slane %v1396_v47, 2  ;;  %v5361_v47 = vld [vmem:[%s7323_s3 + $0x500] ss:$8 sps:$4 sm:$0xff]  }
 0x191   :  { %1355 = vmatprep.subr.bf16.mxu1 %v5246_v53  ;;  %v1717_v53 = vshrl.u32 %v6157_v14, 16 }
 0x194   :  { %1356 = vmatpush1.bf16.msra.mxu1 %v5244_v54  ;;  %v1720_v54 = vshll.u32 %v6157_v14, 16  ;;  %v5328_v14 = vld [vmem:[%s7323_s3 + $0x450] ss:$8 sps:$4 sm:$0xff]  }
 0x195   :  { %1357 = vmatprep.subr.bf16.mxu1 %v5249_v55  ;;  %v1725_v55 = vshrl.u32 %v6252_v49, 16 }
 0x198   :  { %1358 = vmatpush1.bf16.msra.mxu1 %v5247_v56  ;;  %v1728_v56 = vshll.u32 %v6252_v49, 16 }
 0x199   :  { %1359 = vmatprep.subr.bf16.mxu1 %v5252_v57  ;;  %v5313_v57 = vld [vmem:[%s7323_s3 + $0x400] ss:$8 sps:$4 sm:$0xff]  }
 0x19c   :  { %1360 = vmatpush1.bf16.msra.mxu1 %v5250_v58  ;;  %v5318_v58 = vld [vmem:[%s7323_s3 + $0x414] ss:$8 sps:$4 sm:$0xff]  }
 0x19d   :  { %1361 = vmatprep.subr.bf16.mxu1 %v5255_v59  ;;  %v1438_v59 = vsel %vm1435_vm8, %v1436_v51, %v1437_v52  ;;  %v5364_v51 = vld [vmem:[%s7323_s3 + $0x510] ss:$8 sps:$4 sm:$0xff]  }
 0x1a0   :  { %1362 = vmatpush1.bf16.msra.mxu1 %v5253_v60  ;;  %v1719_v60 = vrot.slane %v1717_v53, 2  ;;  %v5369_v53 = vld [vmem:[%s7323_s3 + $0x524] ss:$8 sps:$4 sm:$0xff]  }
 0x1a1   :  { %1363 = vmatprep.subr.bf16.mxu1 %v5258_v61  ;;  %v1722_v61 = vrot.slane %v1720_v54, 3 }
 0x1a3   :  { %v1723_v2 = vor.u32 %v1722_v61, %v1719_v60  ;;  %v5375_v60 = vld [vmem:[%s7323_s3 + $0x544] ss:$8 sps:$4 sm:$0xff]   ;;  %v5373_v61 = vld [vmem:[%s7323_s3 + $0x540] ss:$8 sps:$4 sm:$0xff]  }
 0x1a4   :  { %1364 = vmatpush1.bf16.msra.mxu1 %v5256_v62  ;;  %v1727_v62 = vrot.slane %v1725_v55, 2  ;;  %v1998_v55 = vrot.slane %v6252_v49, 3  ;;  %v5415_v49 = vld [vmem:[%s7323_s3 + $0x620] ss:$8 sps:$4 sm:$0xff]  }
 0x1a5   :  { %1365 = vmatprep.subr.bf16.mxu1 %v5261_v63  ;;  %v1730_v63 = vrot.slane %v1728_v56, 3  ;;  %v5367_v56 = vld [vmem:[%s7323_s3 + $0x520] ss:$8 sps:$4 sm:$0xff]  }
 0x1a8   :  { %1366 = vmatpush1.bf16.msra.mxu1 %v5259_v0  ;;  %v5316_v0 = vld [vmem:[%s7323_s3 + $0x410] ss:$8 sps:$4 sm:$0xff]  }
 0x1a9   :  { %1367 = vmatprep.subr.bf16.mxu1 %v5264_v1  ;;  %v5321_v1 = vld [vmem:[%s7323_s3 + $0x424] ss:$8 sps:$4 sm:$0xff]  }
 0x1ac   :  { %1368 = vmatpush1.bf16.msra.mxu1 %v5262_v3  ;;  %v6277_v3 = vor.u32 %v1730_v63, %v1727_v62  ;;  %v5378_v62 = vld [vmem:[%s7323_s3 + $0x554] ss:$8 sps:$4 sm:$0xff]   ;;  %v5376_v63 = vld [vmem:[%s7323_s3 + $0x550] ss:$8 sps:$4 sm:$0xff]  }
 0x1ad   :  { %1606 = vmatprep.subr.bf16.mxu1 %v5267_v4  ;;  %v5319_v4 = vld [vmem:[%s7323_s3 + $0x420] ss:$8 sps:$4 sm:$0xff]  }
 0x1af   :  { %1370 = vmatmul.mubr.bf16.vlgmr.msra.gmra.mrb[0].mxu1 %v1169_v13  ;;  %v5325_v13 = vld [vmem:[%s7323_s3 + $0x440] ss:$8 sps:$4 sm:$0xff]  }
 0x1b0   :  { %1379 = vmatprep.mubr.bf16.mxu1 %v1171_v32  ;;  %1607 = vmatpush1.bf16.msra.mxu1 %v5265_v7  ;;  %v5289_v32 = vld [vmem:[%s7323_s3 + $0x380] ss:$8 sps:$4 sm:$0xff]   ;;  %v5322_v7 = vld [vmem:[%s7323_s3 + $0x430] ss:$8 sps:$4 sm:$0xff]  }
 0x1b1   :  { %1608 = vmatprep.subr.bf16.mxu1 %v5270_v11  ;;  %v5327_v11 = vld [vmem:[%s7323_s3 + $0x444] ss:$8 sps:$4 sm:$0xff]  }
 0x1b4   :  { %1609 = vmatpush1.bf16.msra.mxu1 %v5268_v8  ;;  %v5330_v8 = vld [vmem:[%s7323_s3 + $0x454] ss:$8 sps:$4 sm:$0xff]  }
 0x1b5   :  { %1610 = vmatprep.subr.bf16.mxu1 %v5273_v17  ;;  %v5331_v17 = vld [vmem:[%s7323_s3 + $0x460] ss:$8 sps:$4 sm:$0xff]  }
 0x1b7   :  { %1380 = vmatmul.mubr.bf16.gmra.mrb[8].mxu1 %v1168_v6  ;;  %v1732_v6 = vsel %vm1698_vm9, %v1723_v2, %v6277_v3  ;;  %v5384_v2 = vld [vmem:[%s7323_s3 + $0x574] ss:$8 sps:$4 sm:$0xff]  }
 0x1b8   :  { %1611 = vmatpush1.bf16.msra.mxu1 %v5271_v15  ;;  %1638 = vmatprep.mubr.bf16.mxu1 %v1441_v21  ;;  %v5339_v15 = vld [vmem:[%s7323_s3 + $0x484] ss:$8 sps:$4 sm:$0xff]   ;;  %v5342_v21 = vld [vmem:[%s7323_s3 + $0x494] ss:$8 sps:$4 sm:$0xff]  }
 0x1b9   :  { %1612 = vmatprep.subr.bf16.mxu1 %v5276_v20  ;;  %v5337_v20 = vld [vmem:[%s7323_s3 + $0x480] ss:$8 sps:$4 sm:$0xff]  }
 0x1bc   :  { %1613 = vmatpush1.bf16.msra.mxu1 %v5274_v22  ;;  %v5340_v22 = vld [vmem:[%s7323_s3 + $0x490] ss:$8 sps:$4 sm:$0xff]  }
 0x1bd   :  { %1614 = vmatprep.subr.bf16.mxu1 %v5279_v23  ;;  %v5345_v23 = vld [vmem:[%s7323_s3 + $0x4a4] ss:$8 sps:$4 sm:$0xff]  }
 0x1c0   :  { %1615 = vmatpush1.bf16.msra.mxu1 %v5277_v24  ;;  %v5343_v24 = vld [vmem:[%s7323_s3 + $0x4a0] ss:$8 sps:$4 sm:$0xff]  }
 0x1c1   :  { %1616 = vmatprep.subr.bf16.mxu1 %v5282_v25  ;;  %v5348_v25 = vld [vmem:[%s7323_s3 + $0x4b4] ss:$8 sps:$4 sm:$0xff]  }
 0x1c4   :  { %1617 = vmatpush1.bf16.msra.mxu1 %v5280_v26  ;;  %v5346_v26 = vld [vmem:[%s7323_s3 + $0x4b0] ss:$8 sps:$4 sm:$0xff]  }
 0x1c5   :  { %1618 = vmatprep.subr.bf16.mxu1 %v5285_v27  ;;  %v5351_v27 = vld [vmem:[%s7323_s3 + $0x4c4] ss:$8 sps:$4 sm:$0xff]  }
 0x1c8   :  { %1619 = vmatpush1.bf16.msra.mxu1 %v5283_v28  ;;  %v5349_v28 = vld [vmem:[%s7323_s3 + $0x4c0] ss:$8 sps:$4 sm:$0xff]  }
 0x1c9   :  { %1620 = vmatprep.subr.bf16.mxu1 %v5288_v29  ;;  %v5354_v29 = vld [vmem:[%s7323_s3 + $0x4d4] ss:$8 sps:$4 sm:$0xff]  }
 0x1cc   :  { %1621 = vmatpush1.bf16.msra.mxu1 %v5286_v30  ;;  %v6347_v30 = vld [vmem:[#allocation2 + $0x10] sm:$0x3f] }
 0x1cd   :  { %1622 = vmatprep.subr.bf16.mxu1 %v5291_v31  ;;  %v5352_v31 = vld [vmem:[%s7323_s3 + $0x4d0] ss:$8 sps:$4 sm:$0xff]  }
 0x1d0   :  { %1623 = vmatpush1.bf16.msra.mxu1 %v5289_v32  ;;  %v5357_v32 = vld [vmem:[%s7323_s3 + $0x4e4] ss:$8 sps:$4 sm:$0xff]  }
 0x1d1   :  { %1624 = vmatprep.subr.bf16.mxu1 %v5294_v33  ;;  %v1700_v33 = vshrl.u32 %v6247_v46, 16 }
 0x1d4   :  { %1625 = vmatpush1.bf16.msra.mxu1 %v5292_v34  ;;  %v1703_v34 = vshll.u32 %v6247_v46, 16 }
 0x1d5   :  { %1626 = vmatprep.subr.bf16.mxu1 %v5297_v35  ;;  %v1708_v35 = vshrl.u32 %v6347_v30, 16 }
 0x1d8   :  { %1627 = vmatpush1.bf16.msra.mxu1 %v5295_v36  ;;  %v1711_v36 = vshll.u32 %v6347_v30, 16 }
 0x1d9   :  { %1628 = vmatprep.subr.bf16.mxu1 %v5300_v37  ;;  %v5355_v37 = vld [vmem:[%s7323_s3 + $0x4e0] ss:$8 sps:$4 sm:$0xff]  }
 0x1dc   :  { %1629 = vmatpush1.bf16.msra.mxu1 %v5298_v38  ;;  %v5360_v38 = vld [vmem:[%s7323_s3 + $0x4f4] ss:$8 sps:$4 sm:$0xff]  }
 0x1dd   :  { %1630 = vmatprep.subr.bf16.mxu1 %v5303_v39  ;;  %v1702_v39 = vrot.slane %v1700_v33, 2  ;;  %v5400_v33 = vld [vmem:[%s7323_s3 + $0x5d0] ss:$8 sps:$4 sm:$0xff]  }
 0x1e0   :  { %1631 = vmatpush1.bf16.msra.mxu1 %v5301_v40  ;;  %v1705_v40 = vrot.slane %v1703_v34, 3  ;;  %v5405_v34 = vld [vmem:[%s7323_s3 + $0x5e4] ss:$8 sps:$4 sm:$0xff]  }
 0x1e1   :  { %1632 = vmatprep.subr.bf16.mxu1 %v5306_v41  ;;  %v1710_v41 = vrot.slane %v1708_v35, 2  ;;  %v5403_v35 = vld [vmem:[%s7323_s3 + $0x5e0] ss:$8 sps:$4 sm:$0xff]  }
 0x1e4   :  { %1633 = vmatpush1.bf16.msra.mxu1 %v5304_v42  ;;  %v1713_v42 = vrot.slane %v1711_v36, 3  ;;  %v5408_v36 = vld [vmem:[%s7323_s3 + $0x5f4] ss:$8 sps:$4 sm:$0xff]  }
 0x1e5   :  { %1634 = vmatprep.subr.bf16.mxu1 %v5309_v43  ;;  %v5358_v43 = vld [vmem:[%s7323_s3 + $0x4f0] ss:$8 sps:$4 sm:$0xff]  }
 0x1e6   :  { %v1714_v46 = vor.u32 %v1713_v42, %v1710_v41  ;;  %v1995_v41 = vrot.slane %v6347_v30, 3  ;;  %v5409_v42 = vld [vmem:[%s7323_s3 + $0x600] ss:$8 sps:$4 sm:$0xff]   ;;  %v5412_v30 = vld [vmem:[%s7323_s3 + $0x610] ss:$8 sps:$4 sm:$0xff]  }
 0x1e8   :  { %1635 = vmatpush1.bf16.msra.mxu1 %v5307_v44  ;;  %v5363_v44 = vld [vmem:[%s7323_s3 + $0x504] ss:$8 sps:$4 sm:$0xff]  }
 0x1e9   :  { %1636 = vmatprep.subr.bf16.mxu1 %v5312_v45  ;;  %v1706_v45 = vor.u32 %v1705_v40, %v1702_v39  ;;  %v5411_v39 = vld [vmem:[%s7323_s3 + $0x604] ss:$8 sps:$4 sm:$0xff]  }
 0x1ec   :  { %1637 = vmatpush1.bf16.msra.mxu1 %v5310_v48  ;;  %v5366_v48 = vld [vmem:[%s7323_s3 + $0x514] ss:$8 sps:$4 sm:$0xff]  }
 0x1ed   :  { %1897 = vmatprep.subr.bf16.mxu1 %v5315_v50  ;;  %v1715_v50 = vsel %vm1698_vm9, %v1706_v45, %v1714_v46  ;;  %v6498_v45 = vld [vmem:[#allocation2 + $0x8] sm:$0xf0] }
 0x1ef   :  { %1639 = vmatmul.mubr.bf16.vlgmr.msra.gmra.mrb[0].mxu1 %v1438_v59  ;;  %v5370_v59 = vld [vmem:[%s7323_s3 + $0x530] ss:$8 sps:$4 sm:$0xff]  }
 0x1f0   :  { %1648 = vmatprep.mubr.bf16.mxu1 %v1440_v19  ;;  %1898 = vmatpush1.bf16.msra.mxu1 %v5313_v57  ;;  %v5334_v19 = vld [vmem:[%s7323_s3 + $0x470] ss:$8 sps:$4 sm:$0xff]   ;;  %v5372_v57 = vld [vmem:[%s7323_s3 + $0x534] ss:$8 sps:$4 sm:$0xff]  }
 0x1f1   :  { %1899 = vmatprep.subr.bf16.mxu1 %v5318_v58 }
 0x1f4   :  { %1900 = vmatpush1.bf16.msra.mxu1 %v5316_v0  ;;  %v5381_v0 = vld [vmem:[%s7323_s3 + $0x564] ss:$8 sps:$4 sm:$0xff]  }
 0x1f5   :  { %1901 = vmatprep.subr.bf16.mxu1 %v5321_v1  ;;  %v5379_v1 = vld [vmem:[%s7323_s3 + $0x560] ss:$8 sps:$4 sm:$0xff]  }
 0x1f7   :  { %1649 = vmatmul.mubr.bf16.gmra.mrb[12].mxu1 %v1437_v52  ;;  %v1955_v52 = vld [vmem:[#allocation2 + $0x8] sm:$0xf8] }
 0x1f8   :  { %1902 = vmatpush1.bf16.msra.mxu1 %v5319_v4  ;;  %1929 = vmatprep.mubr.bf16.mxu1 %v1732_v6  ;;  %v1997_v54 = vrot.slane %v1955_v52, 3 }
 0x1f9   :  { %1903 = vmatprep.subr.bf16.mxu1 %v5324_v5  ;;  %v5387_v5 = vld [vmem:[%s7323_s3 + $0x584] ss:$8 sps:$4 sm:$0xff]  }
 0x1fa   :  { %v1999_v58 = vsel %vm1993_vm10, %v1997_v54, %v1998_v55  ;;  %v5423_v54 = vld [vmem:[%s7323_s3 + $0x644] ss:$8 sps:$4 sm:$0xff]  }
 0x1fc   :  { %1904 = vmatpush1.bf16.msra.mxu1 %v5322_v7 }
 0x1fd   :  { %1905 = vmatprep.subr.bf16.mxu1 %v5327_v11 }
 0x200   :  { %1906 = vmatpush1.bf16.msra.mxu1 %v5325_v13 }
 0x201   :  { %1907 = vmatprep.subr.bf16.mxu1 %v5330_v8 }
 0x204   :  { %1908 = vmatpush1.bf16.msra.mxu1 %v5328_v14 }
 0x205   :  { %1909 = vmatprep.subr.bf16.mxu1 %v5333_v16  ;;  %v5385_v16 = vld [vmem:[%s7323_s3 + $0x580] ss:$8 sps:$4 sm:$0xff]  }
 0x208   :  { %1910 = vmatpush1.bf16.msra.mxu1 %v5331_v17 }
 0x209   :  { %1911 = vmatprep.subr.bf16.mxu1 %v5336_v18  ;;  %v5390_v18 = vld [vmem:[%s7323_s3 + $0x594] ss:$8 sps:$4 sm:$0xff]  }
 0x20c   :  { %1912 = vmatpush1.bf16.msra.mxu1 %v5334_v19  ;;  %v5388_v19 = vld [vmem:[%s7323_s3 + $0x590] ss:$8 sps:$4 sm:$0xff]  }
 0x20d   :  { %1913 = vmatprep.subr.bf16.mxu1 %v5339_v15 }
 0x210   :  { %1914 = vmatpush1.bf16.msra.mxu1 %v5337_v20  ;;  %v5393_v20 = vld [vmem:[%s7323_s3 + $0x5a4] ss:$8 sps:$4 sm:$0xff]  }
 0x211   :  { %1915 = vmatprep.subr.bf16.mxu1 %v5342_v21 }
 0x214   :  { %1916 = vmatpush1.bf16.msra.mxu1 %v5340_v22 }
 0x215   :  { %1917 = vmatprep.subr.bf16.mxu1 %v5345_v23 }
 0x218   :  { %1918 = vmatpush1.bf16.msra.mxu1 %v5343_v24 }
 0x219   :  { %1919 = vmatprep.subr.bf16.mxu1 %v5348_v25 }
 0x21c   :  { %1920 = vmatpush1.bf16.msra.mxu1 %v5346_v26  ;;  %v5391_v26 = vld [vmem:[%s7323_s3 + $0x5a0] ss:$8 sps:$4 sm:$0xff]  }
 0x21d   :  { %1921 = vmatprep.subr.bf16.mxu1 %v5351_v27  ;;  %v5396_v27 = vld [vmem:[%s7323_s3 + $0x5b4] ss:$8 sps:$4 sm:$0xff]  }
 0x220   :  { %1922 = vmatpush1.bf16.msra.mxu1 %v5349_v28  ;;  %v5394_v28 = vld [vmem:[%s7323_s3 + $0x5b0] ss:$8 sps:$4 sm:$0xff]  }
 0x221   :  { %1923 = vmatprep.subr.bf16.mxu1 %v5354_v29  ;;  %v5399_v29 = vld [vmem:[%s7323_s3 + $0x5c4] ss:$8 sps:$4 sm:$0xff]  }
 0x224   :  { %1924 = vmatpush1.bf16.msra.mxu1 %v5352_v31  ;;  %v5397_v31 = vld [vmem:[%s7323_s3 + $0x5c0] ss:$8 sps:$4 sm:$0xff]  }
 0x225   :  { %1925 = vmatprep.subr.bf16.mxu1 %v5357_v32  ;;  %v5402_v32 = vld [vmem:[%s7323_s3 + $0x5d4] ss:$8 sps:$4 sm:$0xff]  }
 0x228   :  { %1926 = vmatpush1.bf16.msra.mxu1 %v5355_v37  ;;  %v1954_v37 = vld [vmem:[#allocation2] sm:$0xf8] }
 0x229   :  { %1927 = vmatprep.subr.bf16.mxu1 %v5360_v38  ;;  %v5406_v38 = vld [vmem:[%s7323_s3 + $0x5f0] ss:$8 sps:$4 sm:$0xff]   ;;  %v1994_v40 = vrot.slane %v1954_v37, 3 }
 0x22c   :  { %1928 = vmatpush1.bf16.msra.mxu1 %v5358_v43  ;;  %v5414_v43 = vld [vmem:[%s7323_s3 + $0x614] ss:$8 sps:$4 sm:$0xff]  }
 0x22d   :  { %2164 = vmatprep.subr.bf16.mxu1 %v5363_v44  ;;  %v1996_v44 = vsel %vm1993_vm10, %v1994_v40, %v1995_v41 }
 0x22f   :  { %1930 = vmatmul.mubr.bf16.vlgmr.msra.gmra.mrb[0].mxu1 %v1715_v50 }
 0x230   :  { %1939 = vmatprep.mubr.bf16.mxu1 %v6277_v3  ;;  %2165 = vmatpush1.bf16.msra.mxu1 %v5361_v47  ;;  %v5382_v3 = vld [vmem:[%s7323_s3 + $0x570] ss:$8 sps:$4 sm:$0xff]   ;;  %v5417_v47 = vld [vmem:[%s7323_s3 + $0x624] ss:$8 sps:$4 sm:$0xff]  }
 0x231   :  { %2166 = vmatprep.subr.bf16.mxu1 %v5366_v48  ;;  %v2266_v48 = vrot.slane %v6498_v45, 4 }
 0x234   :  { %2167 = vmatpush1.bf16.msra.mxu1 %v5364_v51  ;;  %v5420_v51 = vld [vmem:[%s7323_s3 + $0x634] ss:$8 sps:$4 sm:$0xff]  }
 0x235   :  { %2168 = vmatprep.subr.bf16.mxu1 %v5369_v53  ;;  %v5418_v53 = vld [vmem:[%s7323_s3 + $0x630] ss:$8 sps:$4 sm:$0xff]  }
 0x237   :  { %1940 = vmatmul.mubr.bf16.gmra.mrb[16].mxu1 %v1714_v46  ;;  %v6500_v46 = vld [vmem:[#allocation2 + $0x18] sm:$0x7f] }
 0x238   :  { %2169 = vmatpush1.bf16.msra.mxu1 %v5367_v56  ;;  %2196 = vmatprep.mubr.bf16.mxu1 %v1999_v58  ;;  %v2267_v50 = vrot.slane %v6500_v46, 4  ;;  %v5426_v56 = vld [vmem:[%s7323_s3 + $0x654] ss:$8 sps:$4 sm:$0xff]   ;;  %v5429_v58 = vld [vmem:[%s7323_s3 + $0x664] ss:$8 sps:$4 sm:$0xff]  }
 0x239   :  { %2170 = vmatprep.subr.bf16.mxu1 %v5372_v57  ;;  %v5424_v57 = vld [vmem:[%s7323_s3 + $0x650] ss:$8 sps:$4 sm:$0xff]   ;;  %v5468_v46 = vld [vmem:[%s7323_s3 + $0x734] ss:$8 sps:$4 sm:$0xff]  }
 0x23a   :  { %v2268_v52 = vsel %vm2262_vm11, %v2266_v48, %v2267_v50 }
 0x23c   :  { %2171 = vmatpush1.bf16.msra.mxu1 %v5370_v59  ;;  %v5427_v59 = vld [vmem:[%s7323_s3 + $0x660] ss:$8 sps:$4 sm:$0xff]  }
 0x23d   :  { %2172 = vmatprep.subr.bf16.mxu1 %v5375_v60  ;;  %v5432_v60 = vld [vmem:[%s7323_s3 + $0x674] ss:$8 sps:$4 sm:$0xff]  }
 0x240   :  { %2173 = vmatpush1.bf16.msra.mxu1 %v5373_v61  ;;  %v5430_v61 = vld [vmem:[%s7323_s3 + $0x670] ss:$8 sps:$4 sm:$0xff]  }
 0x241   :  { %2174 = vmatprep.subr.bf16.mxu1 %v5378_v62  ;;  %v5435_v62 = vld [vmem:[%s7323_s3 + $0x684] ss:$8 sps:$4 sm:$0xff]  }
 0x244   :  { %2175 = vmatpush1.bf16.msra.mxu1 %v5376_v63 }
 0x245   :  { %2176 = vmatprep.subr.bf16.mxu1 %v5381_v0 }
 0x248   :  { %2177 = vmatpush1.bf16.msra.mxu1 %v5379_v1 }
 0x249   :  { %v6422_v4 = vpop.f32.mrb[4].mxu0  ;;  %2178 = vmatprep.subr.bf16.mxu1 %v5384_v2 }
 0x24a   :  { %v6427_v6 = vpop.f32.mrb[5].mxu0  ;;  %v1120_v7 = vpop.f32.mrb[4].mxu1 }
 0x24b   :  { %v6429_v11 = vpop.f32.mrb[6].mxu0  ;;  %v1122_v13 = vpop.f32.mrb[5].mxu1 }
 0x24c   :  { %2179 = vmatpush1.bf16.msra.mxu1 %v5382_v3  ;;  %v6431_v8 = vpop.f32.mrb[7].mxu0  ;;  %v1124_v14 = vpop.f32.mrb[6].mxu1 }
 0x24d   :  { %v1125_v17 = vpop.f32.mrb[7].mxu1  ;;  %2180 = vmatprep.subr.bf16.mxu1 %v5387_v5  ;;  %v5433_v5 = vld [vmem:[%s7323_s3 + $0x680] ss:$8 sps:$4 sm:$0xff]   ;;  %v5436_v14 = vld [vmem:[%s7323_s3 + $0x690] ss:$8 sps:$4 sm:$0xff]  }
 0x24e   :  { %v5439_v17 = vld [vmem:[%s7323_s3 + $0x6a0] ss:$8 sps:$4 sm:$0xff]  }
 0x250   :  { %2181 = vmatpush1.bf16.msra.mxu1 %v5385_v16  ;;  %v5441_v16 = vld [vmem:[%s7323_s3 + $0x6a4] ss:$8 sps:$4 sm:$0xff]  }
 0x251   :  { %v909_v15 = vpop.f32.mrb[8].mxu0  ;;  %2182 = vmatprep.subr.bf16.mxu1 %v5390_v18  ;;  %v5444_v18 = vld [vmem:[%s7323_s3 + $0x6b4] ss:$8 sps:$4 sm:$0xff]  }
 0x252   :  { %v6445_v21 = vadd.f32 %v1120_v7, %v909_v15  ;;  %v911_v22 = vpop.f32.mrb[9].mxu0  ;;  %v5447_v15 = vld [vmem:[%s7323_s3 + $0x6c4] ss:$8 sps:$4 sm:$0xff]  }
 0x253   :  { %v6447_v23 = vadd.f32 %v1122_v13, %v911_v22  ;;  %v913_v24 = vpop.f32.mrb[10].mxu0  ;;  %v5438_v13 = vld [vmem:[%s7323_s3 + $0x694] ss:$8 sps:$4 sm:$0xff]   ;;  %v5448_v22 = vld [vmem:[%s7323_s3 + $0x6d0] ss:$8 sps:$4 sm:$0xff]  }
 0x254   :  { %2183 = vmatpush1.bf16.msra.mxu1 %v5388_v19  ;;  %v914_v25 = vpop.f32.mrb[11].mxu0  ;;  %v5442_v19 = vld [vmem:[%s7323_s3 + $0x6b0] ss:$8 sps:$4 sm:$0xff]   ;;  %v5451_v24 = vld [vmem:[%s7323_s3 + $0x6e0] ss:$8 sps:$4 sm:$0xff]  }
 0x255   :  { %2184 = vmatprep.subr.bf16.mxu1 %v5393_v20  ;;  %v5445_v20 = vld [vmem:[%s7323_s3 + $0x6c0] ss:$8 sps:$4 sm:$0xff]   ;;  %v5456_v25 = vld [vmem:[%s7323_s3 + $0x6f4] ss:$8 sps:$4 sm:$0xff]  }
 0x258   :  { %2185 = vmatpush1.bf16.msra.mxu1 %v5391_v26  ;;  %v6594_v26 = vld [vmem:[#allocation2] sm:$0xf0] }
 0x259   :  { %2186 = vmatprep.subr.bf16.mxu1 %v5396_v27  ;;  %v2223_v27 = vld [vmem:[#allocation2 + $0x10] sm:$0x7f] }
 0x25c   :  { %2187 = vmatpush1.bf16.msra.mxu1 %v5394_v28  ;;  %v5454_v28 = vld [vmem:[%s7323_s3 + $0x6f0] ss:$8 sps:$4 sm:$0xff]  }
 0x25d   :  { %2188 = vmatprep.subr.bf16.mxu1 %v5399_v29  ;;  %v6599_v29 = vld [vmem:[#allocation2 + $0x18] sm:$0xff] }
 0x25e   :  { %v2555_v37 = vshll.u32 %v6599_v29, 16 }
 0x260   :  { %2189 = vmatpush1.bf16.msra.mxu1 %v5397_v31  ;;  %v5459_v31 = vld [vmem:[%s7323_s3 + $0x704] ss:$8 sps:$4 sm:$0xff]  }
 0x261   :  { %2190 = vmatprep.subr.bf16.mxu1 %v5402_v32  ;;  %v2263_v32 = vrot.slane %v6594_v26, 4 }
 0x264   :  { %2191 = vmatpush1.bf16.msra.mxu1 %v5400_v33  ;;  %v2264_v33 = vrot.slane %v2223_v27, 4 }
 0x265   :  { %2192 = vmatprep.subr.bf16.mxu1 %v5405_v34  ;;  %v2544_v34 = vshrl.u32 %v6498_v45, 16 }
 0x266   :  { %v2265_v40 = vsel %vm2262_vm11, %v2263_v32, %v2264_v33 }
 0x268   :  { %2193 = vmatpush1.bf16.msra.mxu1 %v5403_v35  ;;  %v2547_v35 = vshll.u32 %v6498_v45, 16  ;;  %v5465_v45 = vld [vmem:[%s7323_s3 + $0x724] ss:$8 sps:$4 sm:$0xff]  }
 0x269   :  { %2194 = vmatprep.subr.bf16.mxu1 %v5408_v36  ;;  %v2552_v36 = vshrl.u32 %v6599_v29, 16 }
 0x26c   :  { %2195 = vmatpush1.bf16.msra.mxu1 %v5406_v38  ;;  %v5457_v38 = vld [vmem:[%s7323_s3 + $0x700] ss:$8 sps:$4 sm:$0xff]  }
 0x26d   :  { %2433 = vmatprep.subr.bf16.mxu1 %v5411_v39  ;;  %v5462_v39 = vld [vmem:[%s7323_s3 + $0x714] ss:$8 sps:$4 sm:$0xff]  }
 0x26f   :  { %2197 = vmatmul.mubr.bf16.vlgmr.msra.gmra.mrb[0].mxu1 %v1996_v44  ;;  %v2557_v44 = vrot.slane %v2555_v37, 5 }
 0x270   :  { %2206 = vmatprep.mubr.bf16.mxu1 %v1998_v55  ;;  %2434 = vmatpush1.bf16.msra.mxu1 %v5409_v42  ;;  %v5421_v55 = vld [vmem:[%s7323_s3 + $0x640] ss:$8 sps:$4 sm:$0xff]   ;;  %v2549_v42 = vrot.slane %v2547_v35, 5 }
 0x271   :  { %2435 = vmatprep.subr.bf16.mxu1 %v5414_v43  ;;  %v2554_v43 = vrot.slane %v2552_v36, 4  ;;  %v5507_v36 = vld [vmem:[%s7323_s3 + $0x804] ss:$8 sps:$4 sm:$0xff]  }
 0x273   :  { %v6624_v48 = vor.u32 %v2557_v44, %v2554_v43  ;;  %v2782_v43 = vld [vmem:[#allocation2 + $0x8] sm:$0xe0] }
 0x274   :  { %2436 = vmatpush1.bf16.msra.mxu1 %v5412_v30  ;;  %v5460_v30 = vld [vmem:[%s7323_s3 + $0x710] ss:$8 sps:$4 sm:$0xff]   ;;  %v5513_v44 = vld [vmem:[%s7323_s3 + $0x824] ss:$8 sps:$4 sm:$0xff]  }
 0x275   :  { %2437 = vmatprep.subr.bf16.mxu1 %v5417_v47 }
 0x277   :  { %2207 = vmatmul.mubr.bf16.gmra.mrb[20].mxu1 %v1995_v41  ;;  %v2546_v41 = vrot.slane %v2544_v34, 4 }
 0x278   :  { %2438 = vmatpush1.bf16.msra.mxu1 %v5415_v49  ;;  %2465 = vmatprep.mubr.bf16.mxu1 %v2268_v52  ;;  %v5463_v49 = vld [vmem:[%s7323_s3 + $0x720] ss:$8 sps:$4 sm:$0xff]   ;;  %v5471_v52 = vld [vmem:[%s7323_s3 + $0x744] ss:$8 sps:$4 sm:$0xff]  }
 0x279   :  { %2439 = vmatprep.subr.bf16.mxu1 %v5420_v51  ;;  %v2550_v47 = vor.u32 %v2549_v42, %v2546_v41  ;;  %v5466_v51 = vld [vmem:[%s7323_s3 + $0x730] ss:$8 sps:$4 sm:$0xff]  }
 0x27a   :  { %v5508_v42 = vld [vmem:[%s7323_s3 + $0x810] ss:$8 sps:$4 sm:$0xff]  }
 0x27c   :  { %2440 = vmatpush1.bf16.msra.mxu1 %v5418_v53  ;;  %v5469_v53 = vld [vmem:[%s7323_s3 + $0x740] ss:$8 sps:$4 sm:$0xff]  }
 0x27d   :  { %2441 = vmatprep.subr.bf16.mxu1 %v5423_v54  ;;  %v5474_v54 = vld [vmem:[%s7323_s3 + $0x754] ss:$8 sps:$4 sm:$0xff]  }
 0x280   :  { %2442 = vmatpush1.bf16.msra.mxu1 %v5421_v55  ;;  %v5472_v55 = vld [vmem:[%s7323_s3 + $0x750] ss:$8 sps:$4 sm:$0xff]  }
 0x281   :  { %2443 = vmatprep.subr.bf16.mxu1 %v5426_v56  ;;  %v5477_v56 = vld [vmem:[%s7323_s3 + $0x764] ss:$8 sps:$4 sm:$0xff]  }
 0x284   :  { %2444 = vmatpush1.bf16.msra.mxu1 %v5424_v57  ;;  %v5475_v57 = vld [vmem:[%s7323_s3 + $0x760] ss:$8 sps:$4 sm:$0xff]  }
 0x285   :  { %2445 = vmatprep.subr.bf16.mxu1 %v5429_v58  ;;  %v5480_v58 = vld [vmem:[%s7323_s3 + $0x774] ss:$8 sps:$4 sm:$0xff]  }
 0x288   :  { %2446 = vmatpush1.bf16.msra.mxu1 %v5427_v59  ;;  %v5478_v59 = vld [vmem:[%s7323_s3 + $0x770] ss:$8 sps:$4 sm:$0xff]  }
 0x289   :  { %2447 = vmatprep.subr.bf16.mxu1 %v5432_v60  ;;  %v5483_v60 = vld [vmem:[%s7323_s3 + $0x784] ss:$8 sps:$4 sm:$0xff]  }
 0x28a   :  { %v1381_v63 = vpop.f32.mrb[8].mxu1 }
 0x28b   :  { %v6547_v0 = vadd.f32 %v1381_v63, %v6445_v21  ;;  %v1383_v1 = vpop.f32.mrb[9].mxu1  ;;  %v5450_v21 = vld [vmem:[%s7323_s3 + $0x6d4] ss:$8 sps:$4 sm:$0xff]  }
 0x28c   :  { %v6550_v2 = vadd.f32 %v1383_v1, %v6447_v23  ;;  %v1385_v3 = vpop.f32.mrb[10].mxu1  ;;  %2448 = vmatpush1.bf16.msra.mxu1 %v5430_v61  ;;  %v5453_v23 = vld [vmem:[%s7323_s3 + $0x6e4] ss:$8 sps:$4 sm:$0xff]  }
 0x28d   :  { %v1386_v7 = vpop.f32.mrb[11].mxu1  ;;  %2449 = vmatprep.subr.bf16.mxu1 %v5435_v62 }
 0x290   :  { %2450 = vmatpush1.bf16.msra.mxu1 %v5433_v5  ;;  %v5481_v5 = vld [vmem:[%s7323_s3 + $0x780] ss:$8 sps:$4 sm:$0xff]  }
 0x291   :  { %2451 = vmatprep.subr.bf16.mxu1 %v5438_v13  ;;  %v5486_v13 = vld [vmem:[%s7323_s3 + $0x794] ss:$8 sps:$4 sm:$0xff]  }
 0x294   :  { %2452 = vmatpush1.bf16.msra.mxu1 %v5436_v14  ;;  %v5487_v14 = vld [vmem:[%s7323_s3 + $0x7a0] ss:$8 sps:$4 sm:$0xff]  }
 0x295   :  { %2453 = vmatprep.subr.bf16.mxu1 %v5441_v16  ;;  %v5492_v16 = vld [vmem:[%s7323_s3 + $0x7b4] ss:$8 sps:$4 sm:$0xff]  }
 0x298   :  { %2454 = vmatpush1.bf16.msra.mxu1 %v5439_v17  ;;  %v5490_v17 = vld [vmem:[%s7323_s3 + $0x7b0] ss:$8 sps:$4 sm:$0xff]  }
 0x299   :  { %2455 = vmatprep.subr.bf16.mxu1 %v5444_v18  ;;  %v5495_v18 = vld [vmem:[%s7323_s3 + $0x7c4] ss:$8 sps:$4 sm:$0xff]  }
 0x29c   :  { %2456 = vmatpush1.bf16.msra.mxu1 %v5442_v19  ;;  %v5493_v19 = vld [vmem:[%s7323_s3 + $0x7c0] ss:$8 sps:$4 sm:$0xff]  }
 0x29d   :  { %2457 = vmatprep.subr.bf16.mxu1 %v5447_v15  ;;  %v5498_v15 = vld [vmem:[%s7323_s3 + $0x7d4] ss:$8 sps:$4 sm:$0xff]  }
 0x2a0   :  { %2458 = vmatpush1.bf16.msra.mxu1 %v5445_v20  ;;  %v6700_v20 = vld [vmem:[#allocation2 + $0x10] sm:$0xff] }
 0x2a1   :  { %2459 = vmatprep.subr.bf16.mxu1 %v5450_v21  ;;  %v5496_v21 = vld [vmem:[%s7323_s3 + $0x7d0] ss:$8 sps:$4 sm:$0xff]   ;;  %v2538_v27 = vshll.u32 %v6700_v20, 16 }
 0x2a3   :  { %v2540_v35 = vrot.slane %v2538_v27, 5  ;;  %v2822_v27 = vrot.slane %v6700_v20, 5 }
 0x2a4   :  { %2460 = vmatpush1.bf16.msra.mxu1 %v5448_v22  ;;  %v5501_v22 = vld [vmem:[%s7323_s3 + $0x7e4] ss:$8 sps:$4 sm:$0xff]  }
 0x2a5   :  { %2461 = vmatprep.subr.bf16.mxu1 %v5453_v23  ;;  %v2527_v23 = vshrl.u32 %v6594_v26, 16 }
 0x2a7   :  { %v2529_v32 = vrot.slane %v2527_v23, 4  ;;  %v2781_v23 = vld [vmem:[#allocation2] sm:$0xe0] }
 0x2a8   :  { %2462 = vmatpush1.bf16.msra.mxu1 %v5451_v24  ;;  %v2530_v24 = vshll.u32 %v6594_v26, 16  ;;  %v5502_v26 = vld [vmem:[%s7323_s3 + $0x7f0] ss:$8 sps:$4 sm:$0xff]  }
 0x2a9   :  { %2463 = vmatprep.subr.bf16.mxu1 %v5456_v25  ;;  %v2535_v25 = vshrl.u32 %v6700_v20, 16  ;;  %v3076_v20 = vld [vmem:[%s7325_s5] sm:$0xff] }
 0x2ab   :  { %v2537_v34 = vrot.slane %v2535_v25, 4  ;;  %v2821_v25 = vrot.slane %v2781_v23, 5 }
 0x2ac   :  { %2464 = vmatpush1.bf16.msra.mxu1 %v5454_v28  ;;  %v5499_v28 = vld [vmem:[%s7323_s3 + $0x7e0] ss:$8 sps:$4 sm:$0xff]  }
 0x2ad   :  { %2724 = vmatprep.subr.bf16.mxu1 %v5459_v31  ;;  %v5504_v31 = vld [vmem:[%s7323_s3 + $0x7f4] ss:$8 sps:$4 sm:$0xff]  }
 0x2af   :  { %2466 = vmatmul.mubr.bf16.vlgmr.msra.gmra.mrb[0].mxu1 %v2265_v40  ;;  %v5510_v40 = vld [vmem:[%s7323_s3 + $0x814] ss:$8 sps:$4 sm:$0xff]  }
 0x2b0   :  { %2475 = vmatprep.mubr.bf16.mxu1 %v2267_v50  ;;  %2725 = vmatpush1.bf16.msra.mxu1 %v5457_v38  ;;  %v2559_v50 = vsel %vm2525_vm12, %v2550_v47, %v6624_v48  ;;  %v2541_v38 = vor.u32 %v2540_v35, %v2537_v34  ;;  %v5511_v47 = vld [vmem:[%s7323_s3 + $0x820] ss:$8 sps:$4 sm:$0xff]  }
 0x2b1   :  { %2726 = vmatprep.subr.bf16.mxu1 %v5462_v39  ;;  %v5505_v39 = vld [vmem:[%s7323_s3 + $0x800] ss:$8 sps:$4 sm:$0xff]  }
 0x2b4   :  { %2727 = vmatpush1.bf16.msra.mxu1 %v5460_v30  ;;  %v2824_v30 = vrot.slane %v2782_v43, 5 }
 0x2b5   :  { %2728 = vmatprep.subr.bf16.mxu1 %v5465_v45  ;;  %v2825_v45 = vrot.slane %v6599_v29, 5  ;;  %v3084_v29 = vld [vmem:[%s7325_s5 + $0x40] sm:$0xff] }
 0x2b7   :  { %2476 = vmatmul.mubr.bf16.gmra.mrb[24].mxu1 %v2264_v33  ;;  %v2532_v33 = vrot.slane %v2530_v24, 5  ;;  %v5550_v24 = vld [vmem:[%s7323_s3 + $0x8f0] ss:$8 sps:$4 sm:$0xff]  }
 0x2b8   :  { %2729 = vmatpush1.bf16.msra.mxu1 %v5463_v49  ;;  %2756 = vmatprep.mubr.bf16.mxu1 %v2559_v50  ;;  %v2826_v49 = vsel %vm2820_vm13, %v2824_v30, %v2825_v45  ;;  %v5519_v50 = vld [vmem:[%s7323_s3 + $0x844] ss:$8 sps:$4 sm:$0xff]  }
 0x2b9   :  { %2730 = vmatprep.subr.bf16.mxu1 %v5468_v46  ;;  %v2533_v37 = vor.u32 %v2532_v33, %v2529_v32  ;;  %v5514_v46 = vld [vmem:[%s7323_s3 + $0x830] ss:$8 sps:$4 sm:$0xff]   ;;  %v3100_v30 = vld [vmem:[%s7325_s5 + $0xc0] sm:$0xff] }
 0x2bb   :  { %v2542_v41 = vsel %vm2525_vm12, %v2533_v37, %v2541_v38 }
 0x2bc   :  { %2731 = vmatpush1.bf16.msra.mxu1 %v5466_v51  ;;  %v5517_v51 = vld [vmem:[%s7323_s3 + $0x840] ss:$8 sps:$4 sm:$0xff]  }
 0x2bd   :  { %2732 = vmatprep.subr.bf16.mxu1 %v5471_v52  ;;  %v5522_v52 = vld [vmem:[%s7323_s3 + $0x854] ss:$8 sps:$4 sm:$0xff]  }
 0x2c0   :  { %2733 = vmatpush1.bf16.msra.mxu1 %v5469_v53  ;;  %v5520_v53 = vld [vmem:[%s7323_s3 + $0x850] ss:$8 sps:$4 sm:$0xff]  }
 0x2c1   :  { %2734 = vmatprep.subr.bf16.mxu1 %v5474_v54  ;;  %v5525_v54 = vld [vmem:[%s7323_s3 + $0x864] ss:$8 sps:$4 sm:$0xff]  }
 0x2c4   :  { %2735 = vmatpush1.bf16.msra.mxu1 %v5472_v55  ;;  %v5523_v55 = vld [vmem:[%s7323_s3 + $0x860] ss:$8 sps:$4 sm:$0xff]  }
 0x2c5   :  { %2736 = vmatprep.subr.bf16.mxu1 %v5477_v56  ;;  %v5528_v56 = vld [vmem:[%s7323_s3 + $0x874] ss:$8 sps:$4 sm:$0xff]  }
 0x2c8   :  { %2737 = vmatpush1.bf16.msra.mxu1 %v5475_v57  ;;  %v5526_v57 = vld [vmem:[%s7323_s3 + $0x870] ss:$8 sps:$4 sm:$0xff]  }
 0x2c9   :  { %2738 = vmatprep.subr.bf16.mxu1 %v5480_v58  ;;  %v5531_v58 = vld [vmem:[%s7323_s3 + $0x884] ss:$8 sps:$4 sm:$0xff]  }
 0x2ca   :  { %v1650_v61 = vpop.f32.mrb[12].mxu1 }
 0x2cb   :  { %v6665_v62 = vadd.f32 %v1650_v61, %v6547_v0  ;;  %v1652_v63 = vpop.f32.mrb[13].mxu1  ;;  %v5484_v0 = vld [vmem:[%s7323_s3 + $0x790] ss:$8 sps:$4 sm:$0xff]  }
 0x2cc   :  { %v6668_v1 = vadd.f32 %v1652_v63, %v6550_v2  ;;  %v1654_v3 = vpop.f32.mrb[14].mxu1  ;;  %2739 = vmatpush1.bf16.msra.mxu1 %v5478_v59  ;;  %v5489_v2 = vld [vmem:[%s7323_s3 + $0x7a4] ss:$8 sps:$4 sm:$0xff]  }
 0x2cd   :  { %v1655_v7 = vpop.f32.mrb[15].mxu1  ;;  %2740 = vmatprep.subr.bf16.mxu1 %v5483_v60 }
 0x2d0   :  { %2741 = vmatpush1.bf16.msra.mxu1 %v5481_v5  ;;  %v5529_v5 = vld [vmem:[%s7323_s3 + $0x880] ss:$8 sps:$4 sm:$0xff]  }
 0x2d1   :  { %2742 = vmatprep.subr.bf16.mxu1 %v5486_v13  ;;  %v5534_v13 = vld [vmem:[%s7323_s3 + $0x894] ss:$8 sps:$4 sm:$0xff]  }
 0x2d4   :  { %2743 = vmatpush1.bf16.msra.mxu1 %v5484_v0  ;;  %v5535_v0 = vld [vmem:[%s7323_s3 + $0x8a0] ss:$8 sps:$4 sm:$0xff]  }
 0x2d5   :  { %2744 = vmatprep.subr.bf16.mxu1 %v5489_v2  ;;  %v5540_v2 = vld [vmem:[%s7323_s3 + $0x8b4] ss:$8 sps:$4 sm:$0xff]  }
 0x2d8   :  { %2745 = vmatpush1.bf16.msra.mxu1 %v5487_v14  ;;  %v5538_v14 = vld [vmem:[%s7323_s3 + $0x8b0] ss:$8 sps:$4 sm:$0xff]  }
 0x2d9   :  { %2746 = vmatprep.subr.bf16.mxu1 %v5492_v16  ;;  %v5543_v16 = vld [vmem:[%s7323_s3 + $0x8c4] ss:$8 sps:$4 sm:$0xff]  }
 0x2dc   :  { %2747 = vmatpush1.bf16.msra.mxu1 %v5490_v17  ;;  %v5541_v17 = vld [vmem:[%s7323_s3 + $0x8c0] ss:$8 sps:$4 sm:$0xff]  }
 0x2dd   :  { %2748 = vmatprep.subr.bf16.mxu1 %v5495_v18  ;;  %v5546_v18 = vld [vmem:[%s7323_s3 + $0x8d4] ss:$8 sps:$4 sm:$0xff]  }
 0x2e0   :  { %2749 = vmatpush1.bf16.msra.mxu1 %v5493_v19  ;;  %v5544_v19 = vld [vmem:[%s7323_s3 + $0x8d0] ss:$8 sps:$4 sm:$0xff]  }
 0x2e1   :  { %2750 = vmatprep.subr.bf16.mxu1 %v5498_v15  ;;  %v5549_v15 = vld [vmem:[%s7323_s3 + $0x8e4] ss:$8 sps:$4 sm:$0xff]  }
 0x2e4   :  { %2751 = vmatpush1.bf16.msra.mxu1 %v5496_v21  ;;  %v5547_v21 = vld [vmem:[%s7323_s3 + $0x8e0] ss:$8 sps:$4 sm:$0xff]  }
 0x2e5   :  { %2752 = vmatprep.subr.bf16.mxu1 %v5501_v22  ;;  %v5552_v22 = vld [vmem:[%s7323_s3 + $0x8f4] ss:$8 sps:$4 sm:$0xff]  }
 0x2e8   :  { %2753 = vmatpush1.bf16.msra.mxu1 %v5499_v28  ;;  %v2823_v28 = vsel %vm2820_vm13, %v2821_v25, %v2822_v27  ;;  %v3176_v25 = vld [vmem:[%s7325_s5 + $0x320] sm:$0xff] }
 0x2e9   :  { %2754 = vmatprep.subr.bf16.mxu1 %v5504_v31 }
 0x2ec   :  { %2755 = vmatpush1.bf16.msra.mxu1 %v5502_v26 }
 0x2ed   :  { %2991 = vmatprep.subr.bf16.mxu1 %v5507_v36  ;;  %v3080_v36 = vld [vmem:[%s7325_s5 + $0x20] sm:$0xff] }
 0x2ee   :  { %v4834_v37 = vcombine.low %v3076_v20, %v3080_v36 }
 0x2ef   :  { %2757 = vmatmul.mubr.bf16.vlgmr.msra.gmra.mrb[0].mxu1 %v2542_v41  ;;  %v3092_v41 = vld [vmem:[%s7325_s5 + $0x80] sm:$0xff] }
 0x2f0   :  { %2766 = vmatprep.mubr.bf16.mxu1 %v6624_v48  ;;  %2992 = vmatpush1.bf16.msra.mxu1 %v5505_v39  ;;  %v5516_v48 = vld [vmem:[%s7323_s3 + $0x834] ss:$8 sps:$4 sm:$0xff]   ;;  %v3088_v39 = vld [vmem:[%s7325_s5 + $0x60] sm:$0xff] }
 0x2f1   :  { %2993 = vmatprep.subr.bf16.mxu1 %v5510_v40  ;;  %v4843_v40 = vcombine.high %v3084_v29, %v3088_v39  ;;  %v4842_v43 = vcombine.low %v3084_v29, %v3088_v39 }
 0x2f4   :  { %2994 = vmatpush1.bf16.msra.mxu1 %v5508_v42  ;;  %v3096_v42 = vld [vmem:[%s7325_s5 + $0xa0] sm:$0xff] }
 0x2f5   :  { %2995 = vmatprep.subr.bf16.mxu1 %v5513_v44  ;;  %v4851_v44 = vcombine.high %v3092_v41, %v3096_v42 }
 0x2f7   :  { %2767 = vmatmul.mubr.bf16.gmra.mrb[28].mxu1 %v2541_v38  ;;  %v4835_v38 = vcombine.high %v3076_v20, %v3080_v36 }
 0x2f8   :  { %2996 = vmatpush1.bf16.msra.mxu1 %v5511_v47  ;;  %3023 = vmatprep.mubr.bf16.mxu1 %v2826_v49  ;;  %v4850_v47 = vcombine.low %v3092_v41, %v3096_v42  ;;  %v3108_v49 = vld [vmem:[%s7325_s5 + $0x100] sm:$0xff] }
 0x2f9   :  { %2997 = vmatprep.subr.bf16.mxu1 %v5516_v48  ;;  %3886 = vmatprep.subr.bf16.mxu0 %v4835_v38  ;;  %v3192_v41 = vld [vmem:[%s7325_s5 + $0x3a0] sm:$0xff] }
 0x2fa   :  { %3887 = vmatpush1.bf16.msra.mxu0 %v4834_v37 }
 0x2fb   :  { %3888 = vmatprep.subr.bf16.mxu0 %v4843_v40  ;;  %v3188_v40 = vld [vmem:[%s7325_s5 + $0x380] sm:$0xff] }
 0x2fc   :  { %2998 = vmatpush1.bf16.msra.mxu1 %v5514_v46  ;;  %v3112_v46 = vld [vmem:[%s7325_s5 + $0x120] sm:$0xff] }
 0x2fd   :  { %2999 = vmatprep.subr.bf16.mxu1 %v5519_v50 }
 0x2fe   :  { %3889 = vmatpush1.bf16.msra.mxu0 %v4842_v43  ;;  %v4946_v43 = vcombine.low %v3188_v40, %v3192_v41 }
 0x2ff   :  { %3890 = vmatprep.subr.bf16.mxu0 %v4851_v44  ;;  %v4947_v44 = vcombine.high %v3188_v40, %v3192_v41 }
 0x300   :  { %3000 = vmatpush1.bf16.msra.mxu1 %v5517_v51  ;;  %v4867_v51 = vcombine.high %v3108_v49, %v3112_v46 }
 0x301   :  { %3001 = vmatprep.subr.bf16.mxu1 %v5522_v52  ;;  %v3116_v52 = vld [vmem:[%s7325_s5 + $0x140] sm:$0xff] }
 0x302   :  { %3891 = vmatpush1.bf16.msra.mxu0 %v4850_v47  ;;  %v3077_v47 = vld [vmem:[%s7325_s5 + $0x8] sm:$0xff] }
 0x304   :  { %3002 = vmatpush1.bf16.msra.mxu1 %v5520_v53  ;;  %v3120_v53 = vld [vmem:[%s7325_s5 + $0x160] sm:$0xff] }
 0x305   :  { %3003 = vmatprep.subr.bf16.mxu1 %v5525_v54  ;;  %v4866_v54 = vcombine.low %v3108_v49, %v3112_v46 }
 0x308   :  { %3004 = vmatpush1.bf16.msra.mxu1 %v5523_v55  ;;  %v4875_v55 = vcombine.high %v3116_v52, %v3120_v53 }
 0x309   :  { %3005 = vmatprep.subr.bf16.mxu1 %v5528_v56  ;;  %v3124_v56 = vld [vmem:[%s7325_s5 + $0x180] sm:$0xff] }
 0x30a   :  { %v1941_v59 = vpop.f32.mrb[16].mxu1 }
 0x30b   :  { %v1952_v60 = vadd.f32 %v1941_v59, %v6665_v62  ;;  %v1943_v61 = vpop.f32.mrb[17].mxu1  ;;  %v5532_v62 = vld [vmem:[%s7323_s3 + $0x890] ss:$8 sps:$4 sm:$0xff]  }
 0x30c   :  { %v1953_v63 = vadd.f32 %v1943_v61, %v6668_v1  ;;  %v1945_v3 = vpop.f32.mrb[18].mxu1  ;;  %3006 = vmatpush1.bf16.msra.mxu1 %v5526_v57  ;;  %v5537_v1 = vld [vmem:[%s7323_s3 + $0x8a4] ss:$8 sps:$4 sm:$0xff]  }
 0x30d   :  { %v1946_v7 = vpop.f32.mrb[19].mxu1  ;;  %3007 = vmatprep.subr.bf16.mxu1 %v5531_v58  ;;  %v3128_v57 = vld [vmem:[%s7325_s5 + $0x1a0] sm:$0xff]  ;;  %v4874_v58 = vcombine.low %v3116_v52, %v3120_v53 }
 0x30e   :  { %v4883_v59 = vcombine.high %v3124_v56, %v3128_v57  ;;  %v3136_v61 = vld [vmem:[%s7325_s5 + $0x1e0] sm:$0xff] }
 0x30f   :  { %v3144_v7 = vld [vmem:[%s7325_s5 + $0x220] sm:$0xff] }
 0x310   :  { %3008 = vmatpush1.bf16.msra.mxu1 %v5529_v5  ;;  %v3140_v5 = vld [vmem:[%s7325_s5 + $0x200] sm:$0xff] }
 0x311   :  { %3009 = vmatprep.subr.bf16.mxu1 %v5534_v13 }
 0x314   :  { %3010 = vmatpush1.bf16.msra.mxu1 %v5532_v62  ;;  %v4899_v62 = vcombine.high %v3140_v5, %v3144_v7 }
 0x315   :  { %3011 = vmatprep.subr.bf16.mxu1 %v5537_v1  ;;  %v3148_v1 = vld [vmem:[%s7325_s5 + $0x240] sm:$0xff] }
 0x318   :  { %3012 = vmatpush1.bf16.msra.mxu1 %v5535_v0  ;;  %v3152_v0 = vld [vmem:[%s7325_s5 + $0x260] sm:$0xff] }
 0x319   :  { %3013 = vmatprep.subr.bf16.mxu1 %v5540_v2  ;;  %v4898_v2 = vcombine.low %v3140_v5, %v3144_v7 }
 0x31c   :  { %3014 = vmatpush1.bf16.msra.mxu1 %v5538_v14  ;;  %v4907_v14 = vcombine.high %v3148_v1, %v3152_v0 }
 0x31d   :  { %3015 = vmatprep.subr.bf16.mxu1 %v5543_v16  ;;  %v3156_v16 = vld [vmem:[%s7325_s5 + $0x280] sm:$0xff] }
 0x320   :  { %3016 = vmatpush1.bf16.msra.mxu1 %v5541_v17  ;;  %v3160_v17 = vld [vmem:[%s7325_s5 + $0x2a0] sm:$0xff] }
 0x321   :  { %3017 = vmatprep.subr.bf16.mxu1 %v5546_v18  ;;  %v4906_v18 = vcombine.low %v3148_v1, %v3152_v0 }
 0x324   :  { %3018 = vmatpush1.bf16.msra.mxu1 %v5544_v19  ;;  %v4915_v19 = vcombine.high %v3156_v16, %v3160_v17 }
 0x325   :  { %3019 = vmatprep.subr.bf16.mxu1 %v5549_v15  ;;  %v3164_v15 = vld [vmem:[%s7325_s5 + $0x2c0] sm:$0xff] }
 0x328   :  { %3020 = vmatpush1.bf16.msra.mxu1 %v5547_v21  ;;  %v3168_v21 = vld [vmem:[%s7325_s5 + $0x2e0] sm:$0xff] }
 0x329   :  { %3021 = vmatprep.subr.bf16.mxu1 %v5552_v22  ;;  %v4914_v22 = vcombine.low %v3156_v16, %v3160_v17  ;;  %v4923_v23 = vcombine.high %v3164_v15, %v3168_v21 }
 0x32c   :  { %3022 = vmatpush1.bf16.msra.mxu1 %v5550_v24  ;;  %v3172_v24 = vld [vmem:[%s7325_s5 + $0x300] sm:$0xff] }
 0x32f   :  { %3024 = vmatmul.mubr.bf16.vlgmr.msra.gmra.mrb[0].mxu1 %v2823_v28  ;;  %v4931_v28 = vcombine.high %v3172_v24, %v3176_v25 }
 0x330   :  { %3033 = vmatprep.mubr.bf16.mxu1 %v2825_v45  ;;  %v3104_v45 = vld [vmem:[%s7325_s5 + $0xe0] sm:$0xff] }
 0x331   :  { %v4859_v48 = vcombine.high %v3100_v30, %v3104_v45  ;;  %v4858_v50 = vcombine.low %v3100_v30, %v3104_v45 }
 0x333   :  { %3892 = vmatprep.subr.bf16.mxu0 %v4859_v48  ;;  %v3081_v48 = vld [vmem:[%s7325_s5 + $0x28] sm:$0xff] }
 0x334   :  { %3893 = vmatpush1.bf16.msra.mxu0 %v4858_v50  ;;  %v4836_v49 = vcombine.low %v3077_v47, %v3081_v48  ;;  %v4837_v46 = vcombine.high %v3077_v47, %v3081_v48  ;;  %v3125_v48 = vld [vmem:[%s7325_s5 + $0x188] sm:$0xff] }
 0x335   :  { %3894 = vmatprep.subr.bf16.mxu0 %v4867_v51 }
 0x337   :  { %3034 = vmatmul.mubr.bf16.gmra.mrb[32].mxu1 %v2822_v27  ;;  %v4922_v27 = vcombine.low %v3164_v15, %v3168_v21 }
 0x338   :  { %3895 = vmatpush1.bf16.msra.mxu0 %v4866_v54 }
 0x339   :  { %3896 = vmatprep.subr.bf16.mxu0 %v4875_v55 }
 0x33c   :  { %3897 = vmatpush1.bf16.msra.mxu0 %v4874_v58 }
 0x33d   :  { %3898 = vmatprep.subr.bf16.mxu0 %v4883_v59 }
 0x34a   :  { %v2208_v31 = vpop.f32.mrb[20].mxu1 }
 0x34b   :  { %v6829_v32 = vadd.f32 %v2208_v31, %v1952_v60  ;;  %v2210_v33 = vpop.f32.mrb[21].mxu1  ;;  %v3132_v60 = vld [vmem:[%s7325_s5 + $0x1c0] sm:$0xff]  ;;  %v4930_v31 = vcombine.low %v3172_v24, %v3176_v25 }
 0x34c   :  { %v6831_v34 = vadd.f32 %v2210_v33, %v1953_v63  ;;  %v2212_v35 = vpop.f32.mrb[22].mxu1  ;;  %v4882_v63 = vcombine.low %v3124_v56, %v3128_v57  ;;  %v4891_v3 = vcombine.high %v3132_v60, %v3136_v61  ;;  %v4890_v13 = vcombine.low %v3132_v60, %v3136_v61  ;;  %v3180_v33 = vld [vmem:[%s7325_s5 + $0x340] sm:$0xff] }
 0x34d   :  { %v2213_v26 = vpop.f32.mrb[23].mxu1  ;;  %v3184_v35 = vld [vmem:[%s7325_s5 + $0x360] sm:$0xff] }
 0x34e   :  { %3899 = vmatpush1.bf16.msra.mxu0 %v4882_v63  ;;  %v4938_v26 = vcombine.low %v3180_v33, %v3184_v35  ;;  %v4939_v20 = vcombine.high %v3180_v33, %v3184_v35  ;;  %v3048_v56 = vld [vmem:[%s7326_s4] sm:$0x3]  ;;  %v3097_v33 = vld [vmem:[%s7325_s5 + $0xa8] sm:$0xff] }
 0x34f   :  { %3900 = vmatprep.subr.bf16.mxu0 %v4891_v3  ;;  %v3053_v57 = vrot.slane %v3048_v56, %v6002_v10  ;;  %v3057_v59 = vrot.slane %v3048_v56, %v6008_v12  ;;  %v3145_v56 = vld [vmem:[%s7325_s5 + $0x228] sm:$0xff] }
 0x352   :  { %3901 = vmatpush1.bf16.msra.mxu0 %v4890_v13 }
 0x353   :  { %3902 = vmatprep.subr.bf16.mxu0 %v4899_v62 }
 0x356   :  { %3903 = vmatpush1.bf16.msra.mxu0 %v4898_v2 }
 0x357   :  { %3904 = vmatprep.subr.bf16.mxu0 %v4907_v14 }
 0x35a   :  { %3905 = vmatpush1.bf16.msra.mxu0 %v4906_v18 }
 0x35b   :  { %3906 = vmatprep.subr.bf16.mxu0 %v4915_v19 }
 0x35e   :  { %3907 = vmatpush1.bf16.msra.mxu0 %v4914_v22 }
 0x35f   :  { %3908 = vmatprep.subr.bf16.mxu0 %v4923_v23 }
 0x362   :  { %3909 = vmatpush1.bf16.msra.mxu0 %v4922_v27 }
 0x363   :  { %3910 = vmatprep.subr.bf16.mxu0 %v4931_v28 }
 0x366   :  { %3911 = vmatpush1.bf16.msra.mxu0 %v4930_v31  ;;  %v3093_v31 = vld [vmem:[%s7325_s5 + $0x88] sm:$0xff] }
 0x367   :  { %3912 = vmatprep.subr.bf16.mxu0 %v4939_v20 }
 0x36a   :  { %3913 = vmatpush1.bf16.msra.mxu0 %v4938_v26 }
 0x36b   :  { %3914 = vmatprep.subr.bf16.mxu0 %v4947_v44 }
 0x36e   :  { %3915 = vmatpush1.bf16.msra.mxu0 %v4946_v43  ;;  %v3113_v43 = vld [vmem:[%s7325_s5 + $0x128] sm:$0xff] }
 0x38a   :  { %v2477_v36 = vpop.f32.mrb[24].mxu1 }
 0x38b   :  { %v2488_v29 = vadd.f32 %v2477_v36, %v6829_v32  ;;  %v2479_v37 = vpop.f32.mrb[25].mxu1  ;;  %v3196_v32 = vld [vmem:[%s7325_s5 + $0x3c0] sm:$0xff]  ;;  %v4853_v36 = vcombine.high %v3093_v31, %v3097_v33 }
 0x38c   :  { %v2489_v38 = vadd.f32 %v2479_v37, %v6831_v34  ;;  %v2481_v39 = vpop.f32.mrb[26].mxu1  ;;  %v3200_v34 = vld [vmem:[%s7325_s5 + $0x3e0] sm:$0xff]  ;;  %v3101_v37 = vld [vmem:[%s7325_s5 + $0xc8] sm:$0xff] }
 0x38d   :  { %v2482_v42 = vpop.f32.mrb[27].mxu1  ;;  %v4954_v30 = vcombine.low %v3196_v32, %v3200_v34  ;;  %v4955_v45 = vcombine.high %v3196_v32, %v3200_v34  ;;  %v4852_v39 = vcombine.low %v3093_v31, %v3097_v33  ;;  %v3117_v34 = vld [vmem:[%s7325_s5 + $0x148] sm:$0xff]  ;;  %v3078_v33 = vld [vmem:[%s7325_s5 + $0x10] sm:$0xff] }
 0x38e   :  { %v3109_v42 = vld [vmem:[%s7325_s5 + $0x108] sm:$0xff] }
 0x38f   :  { %3916 = vmatprep.subr.bf16.mxu0 %v4955_v45  ;;  %v4869_v32 = vcombine.high %v3109_v42, %v3113_v43  ;;  %v4868_v45 = vcombine.low %v3109_v42, %v3113_v43  ;;  %v3098_v42 = vld [vmem:[%s7325_s5 + $0xb0] sm:$0xff] }
 0x390   :  { %3917 = vmatpush1.bf16.msra.mxu0 %v4954_v30  ;;  %v3121_v30 = vld [vmem:[%s7325_s5 + $0x168] sm:$0xff] }
 0x391   :  { %3937 = vmatprep.subr.bf16.mxu0 %v4837_v46  ;;  %v4877_v47 = vcombine.high %v3117_v34, %v3121_v30  ;;  %v4876_v46 = vcombine.low %v3117_v34, %v3121_v30  ;;  %v3106_v34 = vld [vmem:[%s7325_s5 + $0xf0] sm:$0xff] }
 0x3ca   :  { %v2768_v50 = vpop.f32.mrb[28].mxu1 }
 0x3cb   :  { %v2779_v51 = vadd.f32 %v2768_v50, %v2488_v29  ;;  %v2770_v52 = vpop.f32.mrb[29].mxu1 }
 0x3cc   :  { %v2780_v53 = vadd.f32 %v2770_v52, %v2489_v38  ;;  %v2772_v54 = vpop.f32.mrb[30].mxu1  ;;  %v3105_v38 = vld [vmem:[%s7325_s5 + $0xe8] sm:$0xff] }
 0x3cd   :  { %v2773_v55 = vpop.f32.mrb[31].mxu1  ;;  %v4861_v41 = vcombine.high %v3101_v37, %v3105_v38  ;;  %v4860_v44 = vcombine.low %v3101_v37, %v3105_v38  ;;  %v3137_v52 = vld [vmem:[%s7325_s5 + $0x1e8] sm:$0xff]  ;;  %v3090_v37 = vld [vmem:[%s7325_s5 + $0x70] sm:$0xff] }
 0x3ce   :  { %v3141_v55 = vld [vmem:[%s7325_s5 + $0x208] sm:$0xff] }
 0x402   :  { %v3025_v58 = vpop.f32.mrb[0].mxu1 }
 0x403   :  { %v4984_v60 = vadd.f32 %v3025_v58, %v6422_v4  ;;  %v3027_v61 = vpop.f32.mrb[1].mxu1  ;;  %v3085_v4 = vld [vmem:[%s7325_s5 + $0x48] sm:$0xff]  ;;  %v4901_v58 = vcombine.high %v3141_v55, %v3145_v56 }
 0x404   :  { %v4985_v63 = vadd.f32 %v3027_v61, %v6427_v6  ;;  %v3029_v3 = vpop.f32.mrb[2].mxu1  ;;  %v3089_v6 = vld [vmem:[%s7325_s5 + $0x68] sm:$0xff]  ;;  %v4900_v61 = vcombine.low %v3141_v55, %v3145_v56  ;;  %v3130_v55 = vld [vmem:[%s7325_s5 + $0x1b0] sm:$0xff] }
 0x405   :  { %v3060_v5 = vadd.f32 %v4984_v60, %v3053_v57  ;;  %v4986_v7 = vadd.f32 %v3029_v3, %v6429_v11  ;;  %v3031_v13 = vpop.f32.mrb[3].mxu1  ;;  %v4845_v27 = vcombine.high %v3085_v4, %v3089_v6  ;;  %v4844_v26 = vcombine.low %v3085_v4, %v3089_v6  ;;  %v3153_v60 = vld [vmem:[%s7325_s5 + $0x268] sm:$0xff] }
 0x406   :  { %v3061_v62 = vadd.f32 %v4985_v63, %v3057_v59  ;;  %v4987_v1 = vadd.f32 %v3031_v13, %v6431_v8  ;;  %v3157_v3 = vld [vmem:[%s7325_s5 + $0x288] sm:$0xff] }
 0x407   :  { %v3062_v0 = vadd.f32 %v4986_v7, %v3053_v57  ;;  %v3066_v14 = vmax.f32 %v3060_v5, 0.0  ;;  %v3161_v5 = vld [vmem:[%s7325_s5 + $0x2a8] sm:$0xff] }
 0x408   :  { %v3063_v2 = vadd.f32 %v4987_v1, %v3057_v59  ;;  %v3067_v17 = vmax.f32 %v3061_v62, 0.0  ;;  %v4917_v13 = vcombine.high %v3157_v3, %v3161_v5  ;;  %v3165_v62 = vld [vmem:[%s7325_s5 + $0x2c8] sm:$0xff] }
 0x409   :  { %v3068_v16 = vmax.f32 %v3062_v0, 0.0  ;;  %v3169_v1 = vld [vmem:[%s7325_s5 + $0x2e8] sm:$0xff]  ;;  %v4916_v0 = vcombine.low %v3157_v3, %v3161_v5  ;;  %v3146_v3 = vld [vmem:[%s7325_s5 + $0x230] sm:$0xff] }
 0x40a   :  { %v3069_v18 = vmax.f32 %v3063_v2, 0.0  ;;  %v3035_v19 = vpop.f32.mrb[32].mxu1  ;;  %v4925_v2 = vcombine.high %v3165_v62, %v3169_v1  ;;  %v3185_v4 = vld [vmem:[%s7325_s5 + $0x368] sm:$0xff] }
 0x40b   :  { %v6952_v11 = vpack.c.bf16 %v3068_v16, %v3066_v14  ;;  %v3046_v15 = vadd.f32 %v3035_v19, %v2779_v51  ;;  %v3037_v21 = vpop.f32.mrb[33].mxu1  ;;  %v3133_v51 = vld [vmem:[%s7325_s5 + $0x1c8] sm:$0xff] }
 0x40c   :  { %v6954_v8 = vpack.c.bf16 %v3069_v18, %v3067_v17  ;;  %v3047_v22 = vadd.f32 %v3037_v21, %v2780_v53  ;;  %v3039_v23 = vpop.f32.mrb[34].mxu1  ;;  %v4893_v54 = vcombine.high %v3133_v51, %v3137_v52  ;;  %v3173_v14 = vld [vmem:[%s7325_s5 + $0x308] sm:$0xff]  ;;  %v4924_v17 = vcombine.low %v3165_v62, %v3169_v1  ;;  %v3154_v62 = vld [vmem:[%s7325_s5 + $0x270] sm:$0xff] }
 0x40d   :  { %v3064_v24 = vadd.f32 %v3053_v57, %v3046_v15  ;;  %v3040_v25 = vpop.f32.mrb[35].mxu1  ;;  %v4892_v57 = vcombine.low %v3133_v51, %v3137_v52  ;;  %v3177_v16 = vld [vmem:[%s7325_s5 + $0x328] sm:$0xff]  ;;  %v3122_v51 = vld [vmem:[%s7325_s5 + $0x170] sm:$0xff] }
 0x40e   :  { %v3065_v28 = vadd.f32 %v3057_v59, %v3047_v22  ;;  %3918 = vmatprep.mubr.bf16.mxu0 %v6954_v8  ;;  %v3149_v59 = vld [vmem:[%s7325_s5 + $0x248] sm:$0xff]  ;;  %v4933_v18 = vcombine.high %v3173_v14, %v3177_v16  ;;  %v4932_v6 = vcombine.low %v3173_v14, %v3177_v16  ;;  %v3162_v14 = vld [vmem:[%s7325_s5 + $0x2b0] sm:$0xff] }
 0x40f   :  { %3919 = vmatmul.mubr.bf16.vlgmr.msra.gmra.mrb[12].mxu0 %v6952_v11  ;;  %v3070_v20 = vmax.f32 %v3064_v24, 0.0  ;;  %v4909_v63 = vcombine.high %v3149_v59, %v3153_v60  ;;  %v4908_v7 = vcombine.low %v3149_v59, %v3153_v60  ;;  %v3181_v19 = vld [vmem:[%s7325_s5 + $0x348] sm:$0xff]  ;;  %v3138_v59 = vld [vmem:[%s7325_s5 + $0x1f0] sm:$0xff] }
 0x410   :  { %v3071_v35 = vmax.f32 %v3065_v28, 0.0  ;;  %3938 = vmatpush1.bf16.msra.mxu0 %v4836_v49  ;;  %v3129_v49 = vld [vmem:[%s7325_s5 + $0x1a8] sm:$0xff]  ;;  %v4941_v15 = vcombine.high %v3181_v19, %v3185_v4  ;;  %v4940_v23 = vcombine.low %v3181_v19, %v3185_v4  ;;  %v3170_v19 = vld [vmem:[%s7325_s5 + $0x2f0] sm:$0xff] }
 0x411   :  { %3939 = vmatprep.subr.bf16.mxu0 %v4845_v27  ;;  %v6973_v40 = vpack.c.bf16 %v3070_v20, %v3070_v20  ;;  %v4885_v50 = vcombine.high %v3125_v48, %v3129_v49  ;;  %v4884_v53 = vcombine.low %v3125_v48, %v3129_v49  ;;  %v3189_v21 = vld [vmem:[%s7325_s5 + $0x388] sm:$0xff]  ;;  %v3114_v48 = vld [vmem:[%s7325_s5 + $0x130] sm:$0xff] }
 0x412   :  { %v6964_v29 = vpack.c.bf16 %v3071_v35, %v3071_v35  ;;  %v3193_v22 = vld [vmem:[%s7325_s5 + $0x3a8] sm:$0xff]  ;;  %v3082_v35 = vld [vmem:[%s7325_s5 + $0x30] sm:$0xff] }
 0x413   :  { %v4949_v24 = vcombine.high %v3189_v21, %v3193_v22  ;;  %v3197_v25 = vld [vmem:[%s7325_s5 + $0x3c8] sm:$0xff]  ;;  %v4948_v28 = vcombine.low %v3189_v21, %v3193_v22  ;;  %v4839_v20 = vcombine.high %v3078_v33, %v3082_v35  ;;  %v4838_v38 = vcombine.low %v3078_v33, %v3082_v35  ;;  %v3178_v21 = vld [vmem:[%s7325_s5 + $0x330] sm:$0xff] }
 0x414   :  { %3940 = vmatpush1.bf16.msra.mxu0 %v4844_v26  ;;  %3928 = vmatprep.mubr.bf16.mxu0 %v6964_v29  ;;  %v3201_v27 = vld [vmem:[%s7325_s5 + $0x3e8] sm:$0xff]  ;;  %v3194_v33 = vld [vmem:[%s7325_s5 + $0x3b0] sm:$0xff] }
 0x415   :  { %3941 = vmatprep.subr.bf16.mxu0 %v4853_v36  ;;  %v4957_v31 = vcombine.high %v3197_v25, %v3201_v27  ;;  %v4956_v26 = vcombine.low %v3197_v25, %v3201_v27  ;;  %v3086_v36 = vld [vmem:[%s7325_s5 + $0x50] sm:$0xff] }
 0x416   :  { %v4846_v43 = vcombine.low %v3086_v36, %v3090_v37  ;;  %v3186_v25 = vld [vmem:[%s7325_s5 + $0x370] sm:$0xff] }
 0x417   :  { %3929 = vmatmul.mubr.bf16.gmra.mrb[16].mxu0 %v6973_v40 }
 0x418   :  { %3942 = vmatpush1.bf16.msra.mxu0 %v4852_v39  ;;  %3969 = vmatprep.mubr.bf16.mxu0 %v6954_v8  ;;  %v4847_v39 = vcombine.high %v3086_v36, %v3090_v37  ;;  %v3202_v36 = vld [vmem:[%s7325_s5 + $0x3f0] sm:$0xff] }
 0x419   :  { %3943 = vmatprep.subr.bf16.mxu0 %v4861_v41  ;;  %v3094_v41 = vld [vmem:[%s7325_s5 + $0x90] sm:$0xff] }
 0x41a   :  { %v4854_v30 = vcombine.low %v3094_v41, %v3098_v42 }
 0x41c   :  { %3944 = vmatpush1.bf16.msra.mxu0 %v4860_v44  ;;  %v4855_v44 = vcombine.high %v3094_v41, %v3098_v42  ;;  %v3083_v41 = vld [vmem:[%s7325_s5 + $0x38] sm:$0xff] }
 0x41d   :  { %3945 = vmatprep.subr.bf16.mxu0 %v4869_v32  ;;  %v3102_v32 = vld [vmem:[%s7325_s5 + $0xd0] sm:$0xff] }
 0x41e   :  { %v4862_v49 = vcombine.low %v3102_v32, %v3106_v34 }
 0x420   :  { %3946 = vmatpush1.bf16.msra.mxu0 %v4868_v45  ;;  %v4863_v45 = vcombine.high %v3102_v32, %v3106_v34  ;;  %v3091_v32 = vld [vmem:[%s7325_s5 + $0x78] sm:$0xff] }
 0x421   :  { %3947 = vmatprep.subr.bf16.mxu0 %v4877_v47  ;;  %v3110_v47 = vld [vmem:[%s7325_s5 + $0x110] sm:$0xff] }
 0x422   :  { %v4870_v52 = vcombine.low %v3110_v47, %v3114_v48 }
 0x424   :  { %3948 = vmatpush1.bf16.msra.mxu0 %v4876_v46  ;;  %v4871_v46 = vcombine.high %v3110_v47, %v3114_v48  ;;  %v3099_v47 = vld [vmem:[%s7325_s5 + $0xb8] sm:$0xff] }
 0x425   :  { %3949 = vmatprep.subr.bf16.mxu0 %v4885_v50  ;;  %v3118_v50 = vld [vmem:[%s7325_s5 + $0x150] sm:$0xff] }
 0x426   :  { %v4878_v56 = vcombine.low %v3118_v50, %v3122_v51 }
 0x428   :  { %3950 = vmatpush1.bf16.msra.mxu0 %v4884_v53  ;;  %v4879_v53 = vcombine.high %v3118_v50, %v3122_v51  ;;  %v3107_v50 = vld [vmem:[%s7325_s5 + $0xf8] sm:$0xff] }
 0x429   :  { %3951 = vmatprep.subr.bf16.mxu0 %v4893_v54  ;;  %v3126_v54 = vld [vmem:[%s7325_s5 + $0x190] sm:$0xff] }
 0x42a   :  { %v4886_v60 = vcombine.low %v3126_v54, %v3130_v55 }
 0x42c   :  { %3952 = vmatpush1.bf16.msra.mxu0 %v4892_v57  ;;  %v4887_v57 = vcombine.high %v3126_v54, %v3130_v55  ;;  %v3115_v54 = vld [vmem:[%s7325_s5 + $0x138] sm:$0xff] }
 0x42d   :  { %3953 = vmatprep.subr.bf16.mxu0 %v4901_v58  ;;  %v3134_v58 = vld [vmem:[%s7325_s5 + $0x1d0] sm:$0xff] }
 0x42e   :  { %v4894_v5 = vcombine.low %v3134_v58, %v3138_v59 }
 0x430   :  { %3954 = vmatpush1.bf16.msra.mxu0 %v4900_v61  ;;  %v4895_v61 = vcombine.high %v3134_v58, %v3138_v59  ;;  %v3123_v58 = vld [vmem:[%s7325_s5 + $0x178] sm:$0xff] }
 0x431   :  { %3955 = vmatprep.subr.bf16.mxu0 %v4909_v63  ;;  %v3142_v63 = vld [vmem:[%s7325_s5 + $0x210] sm:$0xff] }
 0x432   :  { %v4902_v1 = vcombine.low %v3142_v63, %v3146_v3 }
 0x434   :  { %3956 = vmatpush1.bf16.msra.mxu0 %v4908_v7  ;;  %v4903_v7 = vcombine.high %v3142_v63, %v3146_v3 }
 0x435   :  { %3957 = vmatprep.subr.bf16.mxu0 %v4917_v13  ;;  %v3150_v13 = vld [vmem:[%s7325_s5 + $0x250] sm:$0xff] }
 0x436   :  { %v4910_v16 = vcombine.low %v3150_v13, %v3154_v62 }
 0x438   :  { %3958 = vmatpush1.bf16.msra.mxu0 %v4916_v0  ;;  %v4911_v0 = vcombine.high %v3150_v13, %v3154_v62 }
 0x439   :  { %3959 = vmatprep.subr.bf16.mxu0 %v4925_v2  ;;  %v3158_v2 = vld [vmem:[%s7325_s5 + $0x290] sm:$0xff] }
 0x43a   :  { %v4918_v4 = vcombine.low %v3158_v2, %v3162_v14 }
 0x43c   :  { %3960 = vmatpush1.bf16.msra.mxu0 %v4924_v17  ;;  %v4919_v17 = vcombine.high %v3158_v2, %v3162_v14 }
 0x43d   :  { %3961 = vmatprep.subr.bf16.mxu0 %v4933_v18  ;;  %v3166_v18 = vld [vmem:[%s7325_s5 + $0x2d0] sm:$0xff] }
 0x43e   :  { %v4926_v22 = vcombine.low %v3166_v18, %v3170_v19 }
 0x440   :  { %3962 = vmatpush1.bf16.msra.mxu0 %v4932_v6  ;;  %v4927_v6 = vcombine.high %v3166_v18, %v3170_v19 }
 0x441   :  { %3963 = vmatprep.subr.bf16.mxu0 %v4941_v15  ;;  %v3174_v15 = vld [vmem:[%s7325_s5 + $0x310] sm:$0xff] }
 0x442   :  { %v4934_v27 = vcombine.low %v3174_v15, %v3178_v21 }
 0x444   :  { %3964 = vmatpush1.bf16.msra.mxu0 %v4940_v23  ;;  %v4935_v23 = vcombine.high %v3174_v15, %v3178_v21 }
 0x445   :  { %3965 = vmatprep.subr.bf16.mxu0 %v4949_v24  ;;  %v3182_v24 = vld [vmem:[%s7325_s5 + $0x350] sm:$0xff] }
 0x446   :  { %v4942_v35 = vcombine.low %v3182_v24, %v3186_v25 }
 0x448   :  { %3966 = vmatpush1.bf16.msra.mxu0 %v4948_v28  ;;  %v4943_v28 = vcombine.high %v3182_v24, %v3186_v25 }
 0x449   :  { %3967 = vmatprep.subr.bf16.mxu0 %v4957_v31  ;;  %v3190_v31 = vld [vmem:[%s7325_s5 + $0x390] sm:$0xff] }
 0x44a   :  { %v4950_v37 = vcombine.low %v3190_v31, %v3194_v33 }
 0x44c   :  { %3968 = vmatpush1.bf16.msra.mxu0 %v4956_v26  ;;  %v4951_v26 = vcombine.high %v3190_v31, %v3194_v33 }
 0x44d   :  { %3988 = vmatprep.subr.bf16.mxu0 %v4839_v20  ;;  %v3198_v20 = vld [vmem:[%s7325_s5 + $0x3d0] sm:$0xff] }
 0x44e   :  { %v4958_v42 = vcombine.low %v3198_v20, %v3202_v36 }
 0x44f   :  { %3970 = vmatmul.mubr.bf16.vlgmr.msra.gmra.mrb[20].mxu0 %v6952_v11 }
 0x450   :  { %3979 = vmatprep.mubr.bf16.mxu0 %v6964_v29  ;;  %3989 = vmatpush1.bf16.msra.mxu0 %v4838_v38  ;;  %v4959_v38 = vcombine.high %v3198_v20, %v3202_v36 }
 0x451   :  { %3990 = vmatprep.subr.bf16.mxu0 %v4847_v39  ;;  %v3079_v39 = vld [vmem:[%s7325_s5 + $0x18] sm:$0xff] }
 0x452   :  { %v4840_v34 = vcombine.low %v3079_v39, %v3083_v41 }
 0x454   :  { %3991 = vmatpush1.bf16.msra.mxu0 %v4846_v43  ;;  %v4841_v43 = vcombine.high %v3079_v39, %v3083_v41 }
 0x455   :  { %3992 = vmatprep.subr.bf16.mxu0 %v4855_v44  ;;  %v3087_v44 = vld [vmem:[%s7325_s5 + $0x58] sm:$0xff] }
 0x456   :  { %v4848_v48 = vcombine.low %v3087_v44, %v3091_v32 }
 0x457   :  { %3980 = vmatmul.mubr.bf16.gmra.mrb[24].mxu0 %v6973_v40 }
 0x458   :  { %3993 = vmatpush1.bf16.msra.mxu0 %v4854_v30  ;;  %4020 = vmatprep.mubr.bf16.mxu0 %v6954_v8  ;;  %v4849_v30 = vcombine.high %v3087_v44, %v3091_v32 }
 0x459   :  { %3994 = vmatprep.subr.bf16.mxu0 %v4863_v45  ;;  %v3095_v45 = vld [vmem:[%s7325_s5 + $0x98] sm:$0xff] }
 0x45a   :  { %v4856_v51 = vcombine.low %v3095_v45, %v3099_v47 }
 0x45c   :  { %3995 = vmatpush1.bf16.msra.mxu0 %v4862_v49  ;;  %v4857_v49 = vcombine.high %v3095_v45, %v3099_v47 }
 0x45d   :  { %3996 = vmatprep.subr.bf16.mxu0 %v4871_v46  ;;  %v3103_v46 = vld [vmem:[%s7325_s5 + $0xd8] sm:$0xff] }
 0x45e   :  { %v4864_v55 = vcombine.low %v3103_v46, %v3107_v50 }
 0x460   :  { %3997 = vmatpush1.bf16.msra.mxu0 %v4870_v52  ;;  %v4865_v52 = vcombine.high %v3103_v46, %v3107_v50 }
 0x461   :  { %3998 = vmatprep.subr.bf16.mxu0 %v4879_v53  ;;  %v3111_v53 = vld [vmem:[%s7325_s5 + $0x118] sm:$0xff] }
 0x462   :  { %v4872_v59 = vcombine.low %v3111_v53, %v3115_v54 }
 0x464   :  { %3999 = vmatpush1.bf16.msra.mxu0 %v4878_v56  ;;  %v4873_v56 = vcombine.high %v3111_v53, %v3115_v54 }
 0x465   :  { %4000 = vmatprep.subr.bf16.mxu0 %v4887_v57  ;;  %v3119_v57 = vld [vmem:[%s7325_s5 + $0x158] sm:$0xff] }
 0x466   :  { %v4880_v63 = vcombine.low %v3119_v57, %v3123_v58 }
 0x468   :  { %4001 = vmatpush1.bf16.msra.mxu0 %v4886_v60  ;;  %v4881_v60 = vcombine.high %v3119_v57, %v3123_v58 }
 0x469   :  { %4002 = vmatprep.subr.bf16.mxu0 %v4895_v61  ;;  %v3127_v61 = vld [vmem:[%s7325_s5 + $0x198] sm:$0xff] }
 0x46c   :  { %4003 = vmatpush1.bf16.msra.mxu0 %v4894_v5  ;;  %v3135_v5 = vld [vmem:[%s7325_s5 + $0x1d8] sm:$0xff] }
 0x46d   :  { %4004 = vmatprep.subr.bf16.mxu0 %v4903_v7  ;;  %v3139_v7 = vld [vmem:[%s7325_s5 + $0x1f8] sm:$0xff] }
 0x46e   :  { %v4897_v62 = vcombine.high %v3135_v5, %v3139_v7  ;;  %v4896_v2 = vcombine.low %v3135_v5, %v3139_v7 }
 0x470   :  { %4005 = vmatpush1.bf16.msra.mxu0 %v4902_v1  ;;  %v3143_v1 = vld [vmem:[%s7325_s5 + $0x218] sm:$0xff] }
 0x471   :  { %4006 = vmatprep.subr.bf16.mxu0 %v4911_v0  ;;  %v3147_v0 = vld [vmem:[%s7325_s5 + $0x238] sm:$0xff] }
 0x472   :  { %v4905_v14 = vcombine.high %v3143_v1, %v3147_v0  ;;  %v4904_v18 = vcombine.low %v3143_v1, %v3147_v0 }
 0x474   :  { %4007 = vmatpush1.bf16.msra.mxu0 %v4910_v16  ;;  %v3151_v16 = vld [vmem:[%s7325_s5 + $0x258] sm:$0xff] }
 0x475   :  { %4008 = vmatprep.subr.bf16.mxu0 %v4919_v17  ;;  %v3155_v17 = vld [vmem:[%s7325_s5 + $0x278] sm:$0xff] }
 0x476   :  { %v4913_v19 = vcombine.high %v3151_v16, %v3155_v17  ;;  %v4912_v15 = vcombine.low %v3151_v16, %v3155_v17 }
 0x478   :  { %4009 = vmatpush1.bf16.msra.mxu0 %v4918_v4  ;;  %v3159_v4 = vld [vmem:[%s7325_s5 + $0x298] sm:$0xff] }
 0x479   :  { %4010 = vmatprep.subr.bf16.mxu0 %v4927_v6  ;;  %v3163_v6 = vld [vmem:[%s7325_s5 + $0x2b8] sm:$0xff] }
 0x47a   :  { %v4921_v21 = vcombine.high %v3159_v4, %v3163_v6  ;;  %v4920_v24 = vcombine.low %v3159_v4, %v3163_v6 }
 0x47c   :  { %4011 = vmatpush1.bf16.msra.mxu0 %v4926_v22  ;;  %v3167_v22 = vld [vmem:[%s7325_s5 + $0x2d8] sm:$0xff] }
 0x47d   :  { %4012 = vmatprep.subr.bf16.mxu0 %v4935_v23  ;;  %v3171_v23 = vld [vmem:[%s7325_s5 + $0x2f8] sm:$0xff] }
 0x47e   :  { %v4929_v25 = vcombine.high %v3167_v22, %v3171_v23  ;;  %v4928_v31 = vcombine.low %v3167_v22, %v3171_v23 }
 0x480   :  { %4013 = vmatpush1.bf16.msra.mxu0 %v4934_v27  ;;  %v3175_v27 = vld [vmem:[%s7325_s5 + $0x318] sm:$0xff] }
 0x481   :  { %4014 = vmatprep.subr.bf16.mxu0 %v4943_v28  ;;  %v3179_v28 = vld [vmem:[%s7325_s5 + $0x338] sm:$0xff] }
 0x482   :  { %v4937_v33 = vcombine.high %v3175_v27, %v3179_v28  ;;  %v4936_v20 = vcombine.low %v3175_v27, %v3179_v28 }
 0x484   :  { %4015 = vmatpush1.bf16.msra.mxu0 %v4942_v35  ;;  %v3183_v35 = vld [vmem:[%s7325_s5 + $0x358] sm:$0xff] }
 0x485   :  { %4016 = vmatprep.subr.bf16.mxu0 %v4951_v26  ;;  %v3187_v26 = vld [vmem:[%s7325_s5 + $0x378] sm:$0xff] }
 0x486   :  { %v4945_v36 = vcombine.high %v3183_v35, %v3187_v26  ;;  %v4944_v39 = vcombine.low %v3183_v35, %v3187_v26  ;;  %v3228_v35 = vsub.s32 5, %v5999_v9 }
 0x488   :  { %4017 = vmatpush1.bf16.msra.mxu0 %v4950_v37  ;;  %v3191_v37 = vld [vmem:[%s7325_s5 + $0x398] sm:$0xff] }
 0x489   :  { %4018 = vmatprep.subr.bf16.mxu0 %v4959_v38  ;;  %v3195_v38 = vld [vmem:[%s7325_s5 + $0x3b8] sm:$0xff] }
 0x48a   :  { %v4953_v41 = vcombine.high %v3191_v37, %v3195_v38  ;;  %v4952_v44 = vcombine.low %v3191_v37, %v3195_v38 }
 0x48c   :  { %4019 = vmatpush1.bf16.msra.mxu0 %v4958_v42  ;;  %v3199_v42 = vld [vmem:[%s7325_s5 + $0x3d8] sm:$0xff] }
 0x48d   :  { %4039 = vmatprep.subr.bf16.mxu0 %v4841_v43  ;;  %v3203_v43 = vld [vmem:[%s7325_s5 + $0x3f8] sm:$0xff] }
 0x48e   :  { %v4961_v32 = vcombine.high %v3199_v42, %v3203_v43 }
 0x48f   :  { %4021 = vmatmul.mubr.bf16.vlgmr.msra.gmra.mrb[28].mxu0 %v6952_v11 }
 0x490   :  { %4030 = vmatprep.mubr.bf16.mxu0 %v6964_v29  ;;  %4040 = vmatpush1.bf16.msra.mxu0 %v4840_v34  ;;  %v4960_v34 = vcombine.low %v3199_v42, %v3203_v43 }
 0x491   :  { %4041 = vmatprep.subr.bf16.mxu0 %v4849_v30  ;;  %v7255_v30 = vld [vmem:[%s7327_s6] sm:$0xff] }
 0x492   :  { %v3209_v45 = vrot.slane %v7255_v30, %v6002_v10  ;;  %v3213_v47 = vrot.slane %v7255_v30, %v6008_v12 }
 0x494   :  { %4042 = vmatpush1.bf16.msra.mxu0 %v4848_v48 }
 0x495   :  { %4043 = vmatprep.subr.bf16.mxu0 %v4857_v49 }
 0x497   :  { %4031 = vmatmul.mubr.bf16.gmra.mrb[32].mxu0 %v6973_v40 }
 0x498   :  { %4044 = vmatpush1.bf16.msra.mxu0 %v4856_v51  ;;  %4071 = vmatprep.mubr.bf16.mxu0 %v6954_v8  ;;  %v3131_v8 = vld [vmem:[%s7325_s5 + $0x1b8] sm:$0xff] }
 0x499   :  { %4045 = vmatprep.subr.bf16.mxu0 %v4865_v52  ;;  %v4889_v3 = vcombine.high %v3127_v61, %v3131_v8  ;;  %v4888_v13 = vcombine.low %v3127_v61, %v3131_v8 }
 0x49c   :  { %4046 = vmatpush1.bf16.msra.mxu0 %v4864_v55 }
 0x49d   :  { %4047 = vmatprep.subr.bf16.mxu0 %v4873_v56 }
 0x4a0   :  { %4048 = vmatpush1.bf16.msra.mxu0 %v4872_v59 }
 0x4a1   :  { %4049 = vmatprep.subr.bf16.mxu0 %v4881_v60 }
 0x4a4   :  { %4050 = vmatpush1.bf16.msra.mxu0 %v4880_v63  ;;  %v3216_v63 = vsub.s32 2, %v5999_v9 }
 0x4a5   :  { %4051 = vmatprep.subr.bf16.mxu0 %v4889_v3  ;;  %v3220_v3 = vsub.s32 3, %v5999_v9 }
 0x4a6   :  { %v3217_v5 = vrot.slane %v7255_v30, %v3216_v63 }
 0x4a7   :  { %v3221_v7 = vrot.slane %v7255_v30, %v3220_v3 }
 0x4a8   :  { %4052 = vmatpush1.bf16.msra.mxu0 %v4888_v13 }
 0x4a9   :  { %4053 = vmatprep.subr.bf16.mxu0 %v4897_v62 }
 0x4ac   :  { %4054 = vmatpush1.bf16.msra.mxu0 %v4896_v2 }
 0x4ad   :  { %4055 = vmatprep.subr.bf16.mxu0 %v4905_v14 }
 0x4b0   :  { %4056 = vmatpush1.bf16.msra.mxu0 %v4904_v18 }
 0x4b1   :  { %4057 = vmatprep.subr.bf16.mxu0 %v4913_v19 }
 0x4b4   :  { %4058 = vmatpush1.bf16.msra.mxu0 %v4912_v15 }
 0x4b5   :  { %4059 = vmatprep.subr.bf16.mxu0 %v4921_v21 }
 0x4b8   :  { %4060 = vmatpush1.bf16.msra.mxu0 %v4920_v24 }
 0x4b9   :  { %4061 = vmatprep.subr.bf16.mxu0 %v4929_v25 }
 0x4bc   :  { %4062 = vmatpush1.bf16.msra.mxu0 %v4928_v31 }
 0x4bd   :  { %4063 = vmatprep.subr.bf16.mxu0 %v4937_v33  ;;  %v3224_v33 = vsub.s32 4, %v5999_v9 }
 0x4bf   :  { %v3225_v26 = vrot.slane %v7255_v30, %v3224_v33 }
 0x4c0   :  { %4064 = vmatpush1.bf16.msra.mxu0 %v4936_v20  ;;  %v3229_v20 = vrot.slane %v7255_v30, %v3228_v35 }
 0x4c1   :  { %4065 = vmatprep.subr.bf16.mxu0 %v4945_v36 }
 0x4c4   :  { %4066 = vmatpush1.bf16.msra.mxu0 %v4944_v39 }
 0x4c5   :  { %4067 = vmatprep.subr.bf16.mxu0 %v4953_v41 }
 0x4c8   :  { %4068 = vmatpush1.bf16.msra.mxu0 %v4952_v44 }
 0x4c9   :  { %4069 = vmatprep.subr.bf16.mxu0 %v4961_v32 }
 0x4cc   :  { %4070 = vmatpush1.bf16.msra.mxu0 %v4960_v34 }
 0x4cf   :  { %4072 = vmatmul.mubr.bf16.vlgmr.msra.gmra.mrb[36].mxu0 %v6952_v11 }
 0x4d0   :  { %4081 = vmatprep.mubr.bf16.mxu0 %v6964_v29 }
 0x4d7   :  { %4082 = vmatmul.mubr.bf16.gmra.mrb[40].mxu0 %v6973_v40 }
 0x4e2   :  { %v3920_v48 = vpop.f32.mrb[12].mxu0 }
 0x4e3   :  { %v3921_v49 = vadd.f32 %v3920_v48, %v3209_v45  ;;  %v3922_v46 = vpop.f32.mrb[13].mxu0 }
 0x4e4   :  { %v3923_v50 = vadd.f32 %v3922_v46, %v3213_v47  ;;  %v3924_v11 = vpop.f32.mrb[14].mxu0 }
 0x4e5   :  { %v4090_v51 = vmax.f32 %v3921_v49, 0.0  ;;  %v3926_v29 = vpop.f32.mrb[15].mxu0 }
 0x4e6   :  { %v4091_v52 = vmax.f32 %v3923_v50, 0.0 }
 0x4e8   :  { %v4974_v40 = vpack.c.bf16 %v4091_v52, %v4090_v51 }
 0x4ea   :  { %4154 = vst [vmem:[%s7328_s7] sm:$0x11] %v4974_v40  ;;  %v4966_v53 = vrot.slane %v4974_v40, 9  ;;  %v3930_v54 = vpop.f32.mrb[16].mxu0 }
 0x4eb   :  { %v3931_v55 = vadd.f32 %v3930_v54, %v3209_v45  ;;  %v3932_v10 = vpop.f32.mrb[17].mxu0  ;;  %v3236_v54 = vsub.s32 7, %v5999_v9 }
 0x4ec   :  { %4170 = vst [vmem:[%s7328_s7] sm:$0x22] %v4966_v53  ;;  %v3933_v12 = vadd.f32 %v3932_v10, %v3213_v47  ;;  %v3934_v56 = vpop.f32.mrb[18].mxu0  ;;  %v3232_v53 = vsub.s32 6, %v5999_v9 }
 0x4ed   :  { %v4106_v57 = vmax.f32 %v3931_v55, 0.0  ;;  %v3935_v58 = vpop.f32.mrb[19].mxu0  ;;  %v3237_v10 = vrot.slane %v7255_v30, %v3236_v54 }
 0x4ee   :  { %v4107_v59 = vmax.f32 %v3933_v12, 0.0  ;;  %v3233_v55 = vrot.slane %v7255_v30, %v3232_v53 }
 0x4f0   :  { %v4978_v60 = vpack.c.bf16 %v4107_v59, %v4106_v57 }
 0x4f2   :  { %v4194_v61 = vrot.slane %v4978_v60, 6  ;;  %v4206_v8 = vrot.slane %v4978_v60, 7 }
 0x4f4   :  { %4202 = vst [vmem:[%s7328_s7] sm:$0x44] %v4194_v61  ;;  %4214 = vst [vmem:[%s7328_s7] sm:$0x88] %v4206_v8 }
 0x522   :  { %v3971_v13 = vpop.f32.mrb[20].mxu0 }
 0x523   :  { %v3972_v62 = vadd.f32 %v3971_v13, %v3217_v5  ;;  %v3973_v1 = vpop.f32.mrb[21].mxu0 }
 0x524   :  { %v3974_v0 = vadd.f32 %v3973_v1, %v3221_v7  ;;  %v3975_v2 = vpop.f32.mrb[22].mxu0 }
 0x525   :  { %v4092_v14 = vmax.f32 %v3972_v62, 0.0  ;;  %v3977_v16 = vpop.f32.mrb[23].mxu0 }
 0x526   :  { %v4093_v17 = vmax.f32 %v3974_v0, 0.0 }
 0x528   :  { %v4975_v18 = vpack.c.bf16 %v4093_v17, %v4092_v14 }
 0x52a   :  { %4155 = vst [vmem:[%s7328_s7 + $0x8] sm:$0x11] %v4975_v18  ;;  %v4967_v19 = vrot.slane %v4975_v18, 9  ;;  %v3981_v4 = vpop.f32.mrb[24].mxu0 }
 0x52b   :  { %v3982_v6 = vadd.f32 %v3981_v4, %v3217_v5  ;;  %v3983_v15 = vpop.f32.mrb[25].mxu0 }
 0x52c   :  { %4171 = vst [vmem:[%s7328_s7 + $0x8] sm:$0x22] %v4967_v19  ;;  %v3984_v21 = vadd.f32 %v3983_v15, %v3221_v7  ;;  %v3985_v22 = vpop.f32.mrb[26].mxu0 }
 0x52d   :  { %v4108_v23 = vmax.f32 %v3982_v6, 0.0  ;;  %v3986_v24 = vpop.f32.mrb[27].mxu0 }
 0x52e   :  { %v4109_v25 = vmax.f32 %v3984_v21, 0.0 }
 0x530   :  { %v4979_v27 = vpack.c.bf16 %v4109_v25, %v4108_v23 }
 0x532   :  { %v4195_v28 = vrot.slane %v4979_v27, 6  ;;  %v4207_v31 = vrot.slane %v4979_v27, 7 }
 0x534   :  { %4203 = vst [vmem:[%s7328_s7 + $0x8] sm:$0x44] %v4195_v28  ;;  %4215 = vst [vmem:[%s7328_s7 + $0x8] sm:$0x88] %v4207_v31 }
 0x562   :  { %v4022_v36 = vpop.f32.mrb[28].mxu0 }
 0x563   :  { %v4023_v37 = vadd.f32 %v4022_v36, %v3225_v26  ;;  %v4024_v38 = vpop.f32.mrb[29].mxu0 }
 0x564   :  { %v4025_v39 = vadd.f32 %v4024_v38, %v3229_v20  ;;  %v4026_v41 = vpop.f32.mrb[30].mxu0 }
 0x565   :  { %v4094_v42 = vmax.f32 %v4023_v37, 0.0  ;;  %v4028_v43 = vpop.f32.mrb[31].mxu0 }
 0x566   :  { %v4095_v44 = vmax.f32 %v4025_v39, 0.0 }
 0x568   :  { %v4976_v32 = vpack.c.bf16 %v4095_v44, %v4094_v42 }
 0x56a   :  { %4156 = vst [vmem:[%s7328_s7 + $0x10] sm:$0x11] %v4976_v32  ;;  %v4968_v34 = vrot.slane %v4976_v32, 9  ;;  %v4032_v45 = vpop.f32.mrb[32].mxu0 }
 0x56b   :  { %v4033_v47 = vadd.f32 %v4032_v45, %v3225_v26  ;;  %v4034_v48 = vpop.f32.mrb[33].mxu0 }
 0x56c   :  { %4172 = vst [vmem:[%s7328_s7 + $0x10] sm:$0x22] %v4968_v34  ;;  %v4035_v49 = vadd.f32 %v4034_v48, %v3229_v20  ;;  %v4036_v46 = vpop.f32.mrb[34].mxu0 }
 0x56d   :  { %v4110_v50 = vmax.f32 %v4033_v47, 0.0  ;;  %v4037_v11 = vpop.f32.mrb[35].mxu0 }
 0x56e   :  { %v4111_v51 = vmax.f32 %v4035_v49, 0.0 }
 0x570   :  { %v4980_v29 = vpack.c.bf16 %v4111_v51, %v4110_v50 }
 0x572   :  { %v4196_v52 = vrot.slane %v4980_v29, 6  ;;  %v4208_v40 = vrot.slane %v4980_v29, 7 }
 0x574   :  { %4204 = vst [vmem:[%s7328_s7 + $0x10] sm:$0x44] %v4196_v52  ;;  %4216 = vst [vmem:[%s7328_s7 + $0x10] sm:$0x88] %v4208_v40 }
 0x5a2   :  { %v4073_v12 = vpop.f32.mrb[36].mxu0 }
 0x5a3   :  { %v4074_v56 = vadd.f32 %v4073_v12, %v3233_v55  ;;  %v4075_v57 = vpop.f32.mrb[37].mxu0 }
 0x5a4   :  { %v4076_v58 = vadd.f32 %v4075_v57, %v3237_v10  ;;  %v4077_v59 = vpop.f32.mrb[38].mxu0 }
 0x5a5   :  { %v4096_v60 = vmax.f32 %v4074_v56, 0.0  ;;  %v4079_v61 = vpop.f32.mrb[39].mxu0 }
 0x5a6   :  { %v4097_v8 = vmax.f32 %v4076_v58, 0.0 }
 0x5a8   :  { %v4977_v63 = vpack.c.bf16 %v4097_v8, %v4096_v60 }
 0x5aa   :  { %4157 = vst [vmem:[%s7328_s7 + $0x18] sm:$0x11] %v4977_v63  ;;  %v4969_v3 = vrot.slane %v4977_v63, 9  ;;  %v4083_v5 = vpop.f32.mrb[40].mxu0 }
 0x5ab   :  { %v4084_v9 = vadd.f32 %v4083_v5, %v3233_v55  ;;  %v4085_v7 = vpop.f32.mrb[41].mxu0 }
 0x5ac   :  { %4173 = vst [vmem:[%s7328_s7 + $0x18] sm:$0x22] %v4969_v3  ;;  %v4086_v30 = vadd.f32 %v4085_v7, %v3237_v10  ;;  %v4087_v13 = vpop.f32.mrb[42].mxu0 }
 0x5ad   :  { %v4112_v62 = vmax.f32 %v4084_v9, 0.0  ;;  %v4088_v1 = vpop.f32.mrb[43].mxu0 }
 0x5ae   :  { %v4113_v0 = vmax.f32 %v4086_v30, 0.0 }
 0x5b0   :  { %v4981_v2 = vpack.c.bf16 %v4113_v0, %v4112_v62 }
 0x5b2   :  { %v4197_v14 = vrot.slane %v4981_v2, 6  ;;  %v4209_v16 = vrot.slane %v4981_v2, 7 }
 0x5b4   :  { %4205 = vst [vmem:[%s7328_s7 + $0x18] sm:$0x44] %v4197_v14  ;;  %4217 = vst [vmem:[%s7328_s7 + $0x18] sm:$0x88] %v4209_v16 }

</bundles_post_ra>
